<compile_context>
chip_gen: v7x
topology: tpu7x:2x2x1
jax: 0.10.0
libtpu: 0.0.40
codegen_flags: <defaults>
</compile_context>

<pallas_src>
import jax
import jax.numpy as jnp
from jax.experimental import pallas as pl
from jax.experimental.pallas import tpu as pltpu

IN_DIM = 256 * 20   # 5120
HID_DIM = 1028
OUT_DIM = 1


def _qe_kernel(x_ref, w1t_ref, b1_ref, w2_ref, b2_ref, o_ref, acc_ref):
    k = pl.program_id(0)

    @pl.when(k == 0)
    def _():
        acc_ref[...] = jnp.zeros_like(acc_ref)

    # Partial product for lin1: (N, tk) bf16 @ (tk, HID) bf16 -> f32 acc (MXU).
    acc_ref[...] += jnp.dot(
        x_ref[...], w1t_ref[...], preferred_element_type=jnp.float32
    )

    @pl.when(k == pl.num_programs(0) - 1)
    def _():
        # bias + ReLU (dropout with p=0 is the identity); all f32.
        h = jnp.maximum(acc_ref[...] + b1_ref[...], 0.0)
        # lin2 as broadcast multiply + lane reduction (avoids a 1-lane MXU pass).
        out = jnp.sum(h * w2_ref[...], axis=-1, keepdims=True)
        o_ref[...] = (out + b2_ref[0]).astype(o_ref.dtype)


def qe_forward(x, w1, b1, w2, b2, *, tk=2560):
    """x: (N, 5120); w1: (1028, 5120); b1: (1028,); w2: (1, 1028); b2: (1,)."""
    n, d = x.shape
    assert d == IN_DIM and d % tk == 0

    out_dtype = x.dtype
    # bf16 weight/activation stream halves HBM bytes; accumulate in f32.
    x_bf = x.astype(jnp.bfloat16)
    w1t = w1.T.astype(jnp.bfloat16)                   # (5120, 1028) bf16
    b1r = b1.reshape(1, HID_DIM).astype(jnp.float32)  # (1, 1028)
    w2r = w2.reshape(1, HID_DIM).astype(jnp.float32)  # (1, 1028), lin2 row
    b2r = b2.reshape(OUT_DIM).astype(jnp.float32)     # (1,), SMEM scalar

    grid = (d // tk,)

    flops = 2 * n * IN_DIM * HID_DIM + 4 * n * HID_DIM
    bytes_accessed = (
        x_bf.size * 2            # bf16 activations
        + w1t.size * 2           # bf16 weights (dominant stream)
        + b1r.size * 4 + w2r.size * 4 + b2r.size * 4
        + n * OUT_DIM * jnp.dtype(out_dtype).itemsize
    )

    # TODO(synk): on v7x, split HID_DIM across the two TensorCores (leading
    # parallel/core axis producing per-core partial (N, 1) outputs summed in
    # the wrapper) to use both HBM paths; single-TC chips gain nothing from it.
    return pl.pallas_call(
        _qe_kernel,
        out_shape=jax.ShapeDtypeStruct((n, OUT_DIM), out_dtype),
        grid_spec=pltpu.PrefetchScalarGridSpec(
            num_scalar_prefetch=0,
            grid=grid,
            in_specs=[
                pl.BlockSpec((n, tk), lambda k: (0, k)),            # x tile
                pl.BlockSpec((tk, HID_DIM), lambda k: (k, 0)),      # w1^T tile
                pl.BlockSpec((1, HID_DIM), lambda k: (0, 0)),       # b1
                pl.BlockSpec((1, HID_DIM), lambda k: (0, 0)),       # w2 row
                pl.BlockSpec(memory_space=pltpu.MemorySpace.SMEM),  # b2 scalar
            ],
            out_specs=pl.BlockSpec((n, OUT_DIM), lambda k: (0, 0)),
            scratch_shapes=[pltpu.VMEM((n, HID_DIM), jnp.float32)],
        ),
        compiler_params=pltpu.CompilerParams(
            dimension_semantics=("arbitrary",),
            vmem_limit_bytes=32 * 1024 * 1024,
        ),
        cost_estimate=pl.CostEstimate(
            flops=flops, transcendentals=0, bytes_accessed=bytes_accessed
        ),
    )(x_bf, w1t, b1r, w2r, b2r)


def init_params(key):
    """Deterministic PyTorch-style (uniform +-1/sqrt(fan_in)) initialization."""
    k1, k2, k3, k4 = jax.random.split(key, 4)
    bound1 = 1.0 / jnp.sqrt(jnp.float32(IN_DIM))
    bound2 = 1.0 / jnp.sqrt(jnp.float32(HID_DIM))
    w1 = jax.random.uniform(k1, (HID_DIM, IN_DIM), jnp.float32, -bound1, bound1)
    b1 = jax.random.uniform(k2, (HID_DIM,), jnp.float32, -bound1, bound1)
    w2 = jax.random.uniform(k3, (OUT_DIM, HID_DIM), jnp.float32, -bound2, bound2)
    b2 = jax.random.uniform(k4, (OUT_DIM,), jnp.float32, -bound2, bound2)
    return w1, b1, w2, b2


if __name__ == "__main__":
    key = jax.random.PRNGKey(0)
    kx, kp = jax.random.split(key)

    N = 8  # small batch; feature dims fixed by the module (5120 -> 1028 -> 1)
    x = jax.random.normal(kx, (N, IN_DIM), jnp.float32)
    w1, b1, w2, b2 = init_params(kp)

    out = qe_forward(x, w1, b1, w2, b2)
    out = jax.block_until_ready(out)
    assert out.shape == (N, OUT_DIM)

    # Reference matching the kernel's bf16 weight/activation stream (tight).
    h_bf = jnp.maximum(
        jnp.dot(x.astype(jnp.bfloat16), w1.T.astype(jnp.bfloat16),
                preferred_element_type=jnp.float32) + b1, 0.0)
    ref_bf = jnp.sum(h_bf * w2.reshape(1, HID_DIM), axis=-1, keepdims=True) + b2
    assert jnp.allclose(out, ref_bf, atol=1e-2, rtol=1e-2), "mismatch vs bf16 ref"

    # Pure-f32 reference (PyTorch semantics); looser tolerance for bf16 stream.
    h_f32 = jnp.maximum(x @ w1.T + b1, 0.0)
    ref_f32 = h_f32 @ w2.T + b2
    assert jnp.allclose(out, ref_f32, atol=5e-2, rtol=5e-2), "mismatch vs f32 ref"

    print("KERNEL_OK")
</pallas_src>

<mosaic_0001>
module attributes {stable_mosaic.version = 11 : i64} {
  func.func @_qe_kernel(%arg0: i32, %arg1: memref<8x2560xbf16, #tpu.memory_space<vmem>>, %arg2: memref<2560x1028xbf16, #tpu.memory_space<vmem>>, %arg3: memref<1x1028xf32, #tpu.memory_space<vmem>>, %arg4: memref<1x1028xf32, #tpu.memory_space<vmem>>, %arg5: memref<1xf32, #tpu.memory_space<smem>>, %arg6: memref<8x1xf32, #tpu.memory_space<vmem>>, %arg7: memref<8x1028xf32, #tpu.memory_space<vmem>>) attributes {dimension_semantics = [#tpu.dimension_semantics<arbitrary>], iteration_bounds = array<i64: 2>, scalar_prefetch = 0 : i64, scratch_operands = 1 : i64, tpu.core_type = #tpu.core_type<tc>, window_params = [{transform_indices = @transform_0, window_bounds = array<i64: 8, 2560>}, {transform_indices = @transform_1, window_bounds = array<i64: 2560, 1028>}, {pipeline_mode = #tpu.pipeline_mode<synchronous>, transform_indices = @transform_2, window_bounds = array<i64: 1, 1028>}, {pipeline_mode = #tpu.pipeline_mode<synchronous>, transform_indices = @transform_3, window_bounds = array<i64: 1, 1028>}, {transform_indices = @transform_4, window_bounds = array<i64: 1>}, {pipeline_mode = #tpu.pipeline_mode<synchronous>, transform_indices = @transform_5, window_bounds = array<i64: 8, 1>}]} {
    %c0_i32 = arith.constant 0 : i32
    %0 = arith.cmpi eq, %arg0, %c0_i32 : i32
    %1 = arith.extui %0 : i1 to i32
    %c0_i32_0 = arith.constant 0 : i32
    %2 = arith.cmpi ne, %1, %c0_i32_0 : i32
    scf.if %2 {
      %cst_9 = arith.constant 0.000000e+00 : f32
      %12 = vector.broadcast %cst_9 : f32 to vector<8x1028xf32>
      %c0_10 = arith.constant 0 : index
      %c0_11 = arith.constant 0 : index
      %13 = vector.load %arg7[%c0_10, %c0_11] : memref<8x1028xf32, #tpu.memory_space<vmem>>, vector<8x1028xf32>
      tpu.vector_store %arg7[%c0_10, %c0_11], %12 {strides = array<i32>} : memref<8x1028xf32, #tpu.memory_space<vmem>>, vector<8x1028xf32>,
    } else {
    }
    %c0 = arith.constant 0 : index
    %c0_1 = arith.constant 0 : index
    %3 = vector.load %arg7[%c0, %c0_1] : memref<8x1028xf32, #tpu.memory_space<vmem>>, vector<8x1028xf32>
    %c0_2 = arith.constant 0 : index
    %c0_3 = arith.constant 0 : index
    %4 = vector.load %arg1[%c0_2, %c0_3] : memref<8x2560xbf16, #tpu.memory_space<vmem>>, vector<8x2560xbf16>
    %c0_4 = arith.constant 0 : index
    %c0_5 = arith.constant 0 : index
    %5 = vector.load %arg2[%c0_4, %c0_5] : memref<2560x1028xbf16, #tpu.memory_space<vmem>>, vector<2560x1028xbf16>
    %cst = arith.constant dense<0.000000e+00> : vector<8x1028xf32>
    %6 = tpu.matmul %4, %5, %cst {dimension_numbers = #tpu.dot_dimension_numbers<[1], [0], [0], [1], [0, 0, 1, 1], [], []>} : vector<8x2560xbf16>, vector<2560x1028xbf16>, vector<8x1028xf32> -> vector<8x1028xf32>
    %7 = arith.addf %3, %6 : vector<8x1028xf32>
    %c0_6 = arith.constant 0 : index
    %c0_7 = arith.constant 0 : index
    %8 = vector.load %arg7[%c0_6, %c0_7] : memref<8x1028xf32, #tpu.memory_space<vmem>>, vector<8x1028xf32>
    tpu.vector_store %arg7[%c0_6, %c0_7], %7 {strides = array<i32>} : memref<8x1028xf32, #tpu.memory_space<vmem>>, vector<8x1028xf32>,
    %c1_i32 = arith.constant 1 : i32
    %9 = arith.cmpi eq, %arg0, %c1_i32 : i32
    %10 = arith.extui %9 : i1 to i32
    %c0_i32_8 = arith.constant 0 : i32
    %11 = arith.cmpi ne, %10, %c0_i32_8 : i32
    scf.if %11 {
      %c0_9 = arith.constant 0 : index
      %c0_10 = arith.constant 0 : index
      %12 = vector.load %arg7[%c0_9, %c0_10] : memref<8x1028xf32, #tpu.memory_space<vmem>>, vector<8x1028xf32>
      %c0_11 = arith.constant 0 : index
      %c0_12 = arith.constant 0 : index
      %13 = vector.load %arg3[%c0_11, %c0_12] : memref<1x1028xf32, #tpu.memory_space<vmem>>, vector<1x1028xf32>
      %14 = vector.broadcast %13 : vector<1x1028xf32> to vector<8x1028xf32>
      %15 = arith.addf %12, %14 : vector<8x1028xf32>
      %cst_13 = arith.constant 0.000000e+00 : f32
      %16 = vector.broadcast %cst_13 : f32 to vector<8x1028xf32>
      %17 = arith.maximumf %15, %16 : vector<8x1028xf32>
      %c0_14 = arith.constant 0 : index
      %c0_15 = arith.constant 0 : index
      %18 = vector.load %arg4[%c0_14, %c0_15] : memref<1x1028xf32, #tpu.memory_space<vmem>>, vector<1x1028xf32>
      %19 = vector.broadcast %18 : vector<1x1028xf32> to vector<8x1028xf32>
      %20 = arith.mulf %17, %19 : vector<8x1028xf32>
      %cst_16 = arith.constant dense<0.000000e+00> : vector<8xf32>
      %21 = vector.multi_reduction <add>, %20, %cst_16 [1] : vector<8x1028xf32> to vector<8xf32>
      %22 = vector.shape_cast %21 : vector<8xf32> to vector<8x1xf32>
      %c0_17 = arith.constant 0 : index
      %23 = memref.load %arg5[%c0_17] : memref<1xf32, #tpu.memory_space<smem>>
      %24 = vector.broadcast %23 : f32 to vector<8x1xf32>
      %25 = arith.addf %22, %24 : vector<8x1xf32>
      %c0_18 = arith.constant 0 : index
      %c0_19 = arith.constant 0 : index
      %26 = vector.load %arg6[%c0_18, %c0_19] : memref<8x1xf32, #tpu.memory_space<vmem>>, vector<8x1xf32>
      tpu.vector_store %arg6[%c0_18, %c0_19], %25 {strides = array<i32>} : memref<8x1xf32, #tpu.memory_space<vmem>>, vector<8x1xf32>,
    } else {
    }
    return
  }
  func.func @transform_0(%arg0: i32) -> (i32, i32) {
    %c0_i32 = arith.constant 0 : i32
    %c0_i32_0 = arith.constant 0 : i32
    return %c0_i32, %arg0 : i32, i32
  }
  func.func @transform_1(%arg0: i32) -> (i32, i32) {
    %c0_i32 = arith.constant 0 : i32
    %c0_i32_0 = arith.constant 0 : i32
    return %arg0, %c0_i32 : i32, i32
  }
  func.func @transform_2(%arg0: i32) -> (i32, i32) {
    %c0_i32 = arith.constant 0 : i32
    %c0_i32_0 = arith.constant 0 : i32
    %c0_i32_1 = arith.constant 0 : i32
    return %c0_i32, %c0_i32_0 : i32, i32
  }
  func.func @transform_3(%arg0: i32) -> (i32, i32) {
    %c0_i32 = arith.constant 0 : i32
    %c0_i32_0 = arith.constant 0 : i32
    %c0_i32_1 = arith.constant 0 : i32
    return %c0_i32, %c0_i32_0 : i32, i32
  }
  func.func @transform_4(%arg0: i32) -> i32 {
    %c0_i32 = arith.constant 0 : i32
    %c0_i32_0 = arith.constant 0 : i32
    return %c0_i32 : i32
  }
  func.func @transform_5(%arg0: i32) -> (i32, i32) {
    %c0_i32 = arith.constant 0 : i32
    %c0_i32_0 = arith.constant 0 : i32
    %c0_i32_1 = arith.constant 0 : i32
    return %c0_i32, %c0_i32_0 : i32, i32
  }
}

</mosaic_0001>

<bundles_post_ra>
// kernel: tpu_custom_call.1
= control target key start
LH: loop header
LB: loop body
LE: loop exit
PB: predicated region body
PF: predicated region fallthrough
CT: control target
= control target key end

     0   :  { %s15399_s20 = smov 0   ;;  %s17181_s0 = inlined_call_operand.vmem [shape: bf16[8,5120], index: 0, kind: input, shape index: {}]   ;;  %s17182_s1 = inlined_call_operand.vmem [shape: bf16[5120,1028], index: 1, kind: input, shape index: {}]   ;;  %s17183_s2 = inlined_call_operand.vmem [shape: f32[1,1028], index: 2, kind: input, shape index: {}]   ;;  %s17184_s3 = inlined_call_operand.vmem [shape: f32[1,1028], index: 3, kind: input, shape index: {}]   ;;  %s17185_s4 = inlined_call_operand.<no memory space> [shape: f32[1], index: 4, kind: input, shape index: {}]   ;;  %s17186_s5 = inlined_call_operand.vmem [shape: f32[8,1], index: 5, kind: output, shape index: {}]  }
   0x1   :  { %10 = sst [smem:[#allocation3]] %s17185_s4 }
   0x2 LB: > { %s15405_s21 = sadd.s32 4294967295, %s15363_s20   ;;  %p11558_p0 = scmp.ge.s32.totalorder %s15363_s20, 1  ;;  %s15363_s20 = sphi %s15399_s20, %s16_s20  }
   0x3   : > { %p196_p1 = scmp.lt.s32.totalorder %s15363_s20, 3 }
   0x5   : > { %p197_p2 = pnand %p11558_p0, %p196_p1 }
   0x6   : > { %s225_s22 = smul.u32 (!%p197_p2), 20, %s15405_s21  ;;  %p11561_p5 = scmp.ne.s32.totalorder (!%p197_p2), %s15405_s21, 0 }
   0x7   : > { %200 = sbr.rel (%p197_p2) target bundleno = 1848 (0x738), region = 40 }
   0x8   : > { %s231_s4 = smul.u32 (!%p197_p2), 320, %s15405_s21  ;;  %p226_p3 = scmp.lt.s32.totalorder (!%p197_p2), %s225_s22, 39 }
   0xa   : > { %p232_p4 = scmp.lt.s32.totalorder (!%p197_p2), %s231_s4, 639 }
   0xe   : > { %s17188_s22 = smov (!%p226_p3, %s225_s22), 39  ;;  %s17190_s4 = smov (!%p232_p4, %s231_s4), 639 }
   0xf   : > { %s11559_s23 = sshll.u32 %s17188_s22, 2  ;;  %s13247_s27 = smul.u32 36, %s17190_s4  ;;  %vm251_vm0 = vcmask (!%p11561_p5), 31744   ;;  %v15365_v0 = vmov (!%p11561_p5), 0.0  }
  0x10   : > { %s15414_s26 = scalar_lea.vmem %s17181_s0, %s11559_s23  ;;  %242 = sbr.rel (%p11561_p5) target bundleno = 23 (0x17), region = 44  ;;  %243 = vst [vmem:[#allocation2] sm:$0xff] (!%p11561_p5), %v15365_v0  ;;  %244 = vst [vmem:[#allocation2 + $0x8] sm:$0xff] (!%p11561_p5), %v15365_v0 }
  0x11   : > { %s15419_s30 = scalar_lea.vmem %s17182_s1, %s13247_s27  ;;  %245 = vst [vmem:[#allocation2 + $0x10] sm:$0xff] (!%p11561_p5), %v15365_v0  ;;  %246 = vst [vmem:[#allocation2 + $0x18] sm:$0xff] (!%p11561_p5), %v15365_v0 }
  0x12   : > { %247 = vst [vmem:[#allocation2 + $0x20] sm:$0xff] (!%p11561_p5), %v15365_v0  ;;  %248 = vst [vmem:[#allocation2 + $0x28] sm:$0xff] (!%p11561_p5), %v15365_v0 }
  0x13   : > { %249 = vst [vmem:[#allocation2 + $0x30] sm:$0xff] (!%p11561_p5), %v15365_v0  ;;  %250 = vst [vmem:[#allocation2 + $0x38] sm:$0xff] (!%p11561_p5), %v15365_v0 }
  0x14   : > { %252 = vst.msk [vmem:[#allocation2 + $0x40] sm:$0xff] (!%p11561_p5), %vm251_vm0, %v15365_v0 }
  0x17 PF: > { %v13257_v1 = vld [vmem:[%s15419_s30 + $0x4] ss:$36 sps:$4 sm:$0xff]   ;;  %v13263_v5 = vld [vmem:[%s15419_s30 + $0x4c] ss:$36 sps:$4 sm:$0xff]   ;;  %v13269_v9 = vld [vmem:[%s15419_s30 + $0x94] ss:$36 sps:$4 sm:$0xff]  }
  0x18   : > { %v13259_v2 = vld [vmem:[%s15419_s30 + $0x484] ss:$36 sps:$4 sm:$0xff]   ;;  %9302 = vmatprep.subr.bf16.mxu0 %v13257_v1  ;;  %v13265_v6 = vld [vmem:[%s15419_s30 + $0x4cc] ss:$36 sps:$4 sm:$0xff]   ;;  %v13271_v10 = vld [vmem:[%s15419_s30 + $0x514] ss:$36 sps:$4 sm:$0xff]  }
  0x19   : > { %v13261_v3 = vld [vmem:[%s15419_s30] ss:$36 sps:$4 sm:$0xff]   ;;  %9343 = vmatprep.subr.bf16.mxu1 %v13259_v2  ;;  %v13267_v7 = vld [vmem:[%s15419_s30 + $0x48] ss:$36 sps:$4 sm:$0xff]   ;;  %v13273_v11 = vld [vmem:[%s15419_s30 + $0x90] ss:$36 sps:$4 sm:$0xff]  }
  0x1a   : > { %v13262_v4 = vld [vmem:[%s15419_s30 + $0x480] ss:$36 sps:$4 sm:$0xff]   ;;  %9303 = vmatpush1.bf16.msra.mxu0 %v13261_v3  ;;  %v13268_v8 = vld [vmem:[%s15419_s30 + $0x4c8] ss:$36 sps:$4 sm:$0xff]   ;;  %v13274_v12 = vld [vmem:[%s15419_s30 + $0x510] ss:$36 sps:$4 sm:$0xff]  }
  0x1b   : > { %9344 = vmatpush1.bf16.msra.mxu1 %v13262_v4  ;;  %9304 = vmatprep.subr.bf16.mxu0 %v13263_v5  ;;  %v13275_v13 = vld [vmem:[%s15419_s30 + $0xdc] ss:$36 sps:$4 sm:$0xff]   ;;  %v13281_v17 = vld [vmem:[%s15419_s30 + $0x124] ss:$36 sps:$4 sm:$0xff]   ;;  %v13287_v21 = vld [vmem:[%s15419_s30 + $0x16c] ss:$36 sps:$4 sm:$0xff]  }
  0x1c   : > { %9345 = vmatprep.subr.bf16.mxu1 %v13265_v6  ;;  %v13277_v14 = vld [vmem:[%s15419_s30 + $0x55c] ss:$36 sps:$4 sm:$0xff]   ;;  %v13283_v18 = vld [vmem:[%s15419_s30 + $0x5a4] ss:$36 sps:$4 sm:$0xff]   ;;  %v13289_v22 = vld [vmem:[%s15419_s30 + $0x5ec] ss:$36 sps:$4 sm:$0xff]  }
  0x1d   : > { %v13279_v15 = vld [vmem:[%s15419_s30 + $0xd8] ss:$36 sps:$4 sm:$0xff]   ;;  %v13285_v19 = vld [vmem:[%s15419_s30 + $0x120] ss:$36 sps:$4 sm:$0xff]   ;;  %v13291_v23 = vld [vmem:[%s15419_s30 + $0x168] ss:$36 sps:$4 sm:$0xff]  }
  0x1e   : > { %9305 = vmatpush1.bf16.msra.mxu0 %v13267_v7  ;;  %v13280_v16 = vld [vmem:[%s15419_s30 + $0x558] ss:$36 sps:$4 sm:$0xff]   ;;  %v13286_v20 = vld [vmem:[%s15419_s30 + $0x5a0] ss:$36 sps:$4 sm:$0xff]   ;;  %v13292_v24 = vld [vmem:[%s15419_s30 + $0x5e8] ss:$36 sps:$4 sm:$0xff]  }
  0x1f   : > { %9346 = vmatpush1.bf16.msra.mxu1 %v13268_v8  ;;  %9306 = vmatprep.subr.bf16.mxu0 %v13269_v9  ;;  %v13293_v25 = vld [vmem:[%s15419_s30 + $0x1b4] ss:$36 sps:$4 sm:$0xff]   ;;  %v13299_v29 = vld [vmem:[%s15419_s30 + $0x1fc] ss:$36 sps:$4 sm:$0xff]   ;;  %v13305_v33 = vld [vmem:[%s15419_s30 + $0x244] ss:$36 sps:$4 sm:$0xff]  }
  0x20   : > { %9347 = vmatprep.subr.bf16.mxu1 %v13271_v10  ;;  %v13295_v26 = vld [vmem:[%s15419_s30 + $0x634] ss:$36 sps:$4 sm:$0xff]   ;;  %v13301_v30 = vld [vmem:[%s15419_s30 + $0x67c] ss:$36 sps:$4 sm:$0xff]   ;;  %v13307_v34 = vld [vmem:[%s15419_s30 + $0x6c4] ss:$36 sps:$4 sm:$0xff]  }
  0x21   : > { %v13297_v27 = vld [vmem:[%s15419_s30 + $0x1b0] ss:$36 sps:$4 sm:$0xff]   ;;  %v13303_v31 = vld [vmem:[%s15419_s30 + $0x1f8] ss:$36 sps:$4 sm:$0xff]   ;;  %v13309_v35 = vld [vmem:[%s15419_s30 + $0x240] ss:$36 sps:$4 sm:$0xff]  }
  0x22   : > { %9307 = vmatpush1.bf16.msra.mxu0 %v13273_v11  ;;  %v13298_v28 = vld [vmem:[%s15419_s30 + $0x630] ss:$36 sps:$4 sm:$0xff]   ;;  %v13304_v32 = vld [vmem:[%s15419_s30 + $0x678] ss:$36 sps:$4 sm:$0xff]   ;;  %v13310_v36 = vld [vmem:[%s15419_s30 + $0x6c0] ss:$36 sps:$4 sm:$0xff]  }
  0x23   : > { %9348 = vmatpush1.bf16.msra.mxu1 %v13274_v12  ;;  %9308 = vmatprep.subr.bf16.mxu0 %v13275_v13  ;;  %v13311_v37 = vld [vmem:[%s15419_s30 + $0x28c] ss:$36 sps:$4 sm:$0xff]   ;;  %v13317_v41 = vld [vmem:[%s15419_s30 + $0x2d4] ss:$36 sps:$4 sm:$0xff]   ;;  %v13323_v45 = vld [vmem:[%s15419_s30 + $0x31c] ss:$36 sps:$4 sm:$0xff]  }
  0x24   : > { %9349 = vmatprep.subr.bf16.mxu1 %v13277_v14  ;;  %v13313_v38 = vld [vmem:[%s15419_s30 + $0x70c] ss:$36 sps:$4 sm:$0xff]   ;;  %v13319_v42 = vld [vmem:[%s15419_s30 + $0x754] ss:$36 sps:$4 sm:$0xff]   ;;  %v13325_v46 = vld [vmem:[%s15419_s30 + $0x79c] ss:$36 sps:$4 sm:$0xff]  }
  0x25   : > { %v13315_v39 = vld [vmem:[%s15419_s30 + $0x288] ss:$36 sps:$4 sm:$0xff]   ;;  %v13321_v43 = vld [vmem:[%s15419_s30 + $0x2d0] ss:$36 sps:$4 sm:$0xff]   ;;  %v262_v47 = vld [vmem:[%s15414_s26] sm:$0xff]  ;;  %vm11359_vm1 = vcmask 31744  }
  0x26   : > { %9309 = vmatpush1.bf16.msra.mxu0 %v13279_v15  ;;  %v13316_v40 = vld [vmem:[%s15419_s30 + $0x708] ss:$36 sps:$4 sm:$0xff]   ;;  %v13322_v44 = vld [vmem:[%s15419_s30 + $0x750] ss:$36 sps:$4 sm:$0xff]   ;;  %v15469_v48 = vcombine.high %v262_v47, %v262_v47  ;;  %v13327_v50 = vld [vmem:[%s15419_s30 + $0x318] ss:$36 sps:$4 sm:$0xff]   ;;  %v15496_v7 = vcombine.low %v262_v47, %v262_v47 }
  0x27   : > { %9350 = vmatpush1.bf16.msra.mxu1 %v13280_v16  ;;  %9310 = vmatprep.subr.bf16.mxu0 %v13281_v17  ;;  %v263_v49 = vld [vmem:[%s15414_s26 + $0x8] sm:$0xff]  ;;  %v13328_v51 = vld [vmem:[%s15419_s30 + $0x798] ss:$36 sps:$4 sm:$0xff]   ;;  %v13333_v55 = vld [vmem:[%s15419_s30 + $0x360] ss:$36 sps:$4 sm:$0xff]   ;;  %p13022_p6 = scmp.ne.s32.totalorder %s15405_s21, 1 }
  0x28   : > { %9351 = vmatprep.subr.bf16.mxu1 %v13283_v18  ;;  %v15474_v52 = vcombine.high %v263_v49, %v263_v49  ;;  %v13329_v53 = vld [vmem:[%s15419_s30 + $0x364] ss:$36 sps:$4 sm:$0xff]   ;;  %9334 = vmatprep.mubr.bf16.mxu0 %v15469_v48  ;;  %v13335_v57 = vld [vmem:[%s15419_s30 + $0x3ac] ss:$36 sps:$4 sm:$0xff]   ;;  %v13341_v61 = vld [vmem:[%s15419_s30 + $0x3f4] ss:$36 sps:$4 sm:$0xff]   ;;  %v15498_v8 = vcombine.low %v263_v49, %v263_v49 }
  0x29   : > { %v13331_v54 = vld [vmem:[%s15419_s30 + $0x7e4] ss:$36 sps:$4 sm:$0xff]   ;;  %v13337_v58 = vld [vmem:[%s15419_s30 + $0x82c] ss:$36 sps:$4 sm:$0xff]   ;;  %v13343_v62 = vld [vmem:[%s15419_s30 + $0x874] ss:$36 sps:$4 sm:$0xff]  }
  0x2a   : > { %9311 = vmatpush1.bf16.msra.mxu0 %v13285_v19  ;;  %9375 = vmatprep.mubr.bf16.mxu1 %v15474_v52  ;;  %v13334_v56 = vld [vmem:[%s15419_s30 + $0x7e0] ss:$36 sps:$4 sm:$0xff]   ;;  %v13339_v59 = vld [vmem:[%s15419_s30 + $0x3a8] ss:$36 sps:$4 sm:$0xff]   ;;  %v13345_v63 = vld [vmem:[%s15419_s30 + $0x3f0] ss:$36 sps:$4 sm:$0xff]  }
  0x2b   : > { %9352 = vmatpush1.bf16.msra.mxu1 %v13286_v20  ;;  %9312 = vmatprep.subr.bf16.mxu0 %v13287_v21  ;;  %v13340_v60 = vld [vmem:[%s15419_s30 + $0x828] ss:$36 sps:$4 sm:$0xff]   ;;  %v13346_v0 = vld [vmem:[%s15419_s30 + $0x870] ss:$36 sps:$4 sm:$0xff]   ;;  %v13347_v1 = vld [vmem:[%s15419_s30 + $0x43c] ss:$36 sps:$4 sm:$0xff]  }
  0x2c   : > { %9353 = vmatprep.subr.bf16.mxu1 %v13289_v22  ;;  %v13349_v2 = vld [vmem:[%s15419_s30 + $0x8bc] ss:$36 sps:$4 sm:$0xff]   ;;  %v13359_v5 = vld [vmem:[%s15419_s30 + $0x904] ss:$36 sps:$4 sm:$0xff]   ;;  %v13365_v11 = vld [vmem:[%s15419_s30 + $0x94c] ss:$36 sps:$4 sm:$0xff]  }
  0x2d   : > { %v13351_v3 = vld [vmem:[%s15419_s30 + $0x438] ss:$36 sps:$4 sm:$0xff]   ;;  %v13362_v6 = vld [vmem:[%s15419_s30 + $0xd84] ss:$36 sps:$4 sm:$0xff]   ;;  %v13368_v12 = vld [vmem:[%s15419_s30 + $0xdcc] ss:$36 sps:$4 sm:$0xff]  }
  0x2e   : > { %9313 = vmatpush1.bf16.msra.mxu0 %v13291_v23  ;;  %v13352_v4 = vld [vmem:[%s15419_s30 + $0x8b8] ss:$36 sps:$4 sm:$0xff]   ;;  %v13357_v9 = vld [vmem:[%s15419_s30 + $0x900] ss:$36 sps:$4 sm:$0xff]   ;;  %v13363_v13 = vld [vmem:[%s15419_s30 + $0x948] ss:$36 sps:$4 sm:$0xff]  }
  0x2f   : > { %9354 = vmatpush1.bf16.msra.mxu1 %v13292_v24  ;;  %9314 = vmatprep.subr.bf16.mxu0 %v13293_v25  ;;  %v13360_v10 = vld [vmem:[%s15419_s30 + $0xd80] ss:$36 sps:$4 sm:$0xff]   ;;  %v13366_v14 = vld [vmem:[%s15419_s30 + $0xdc8] ss:$36 sps:$4 sm:$0xff]   ;;  %v13371_v15 = vld [vmem:[%s15419_s30 + $0x994] ss:$36 sps:$4 sm:$0xff]  }
  0x30   : > { %9355 = vmatprep.subr.bf16.mxu1 %v13295_v26  ;;  %v13374_v16 = vld [vmem:[%s15419_s30 + $0xe14] ss:$36 sps:$4 sm:$0xff]   ;;  %v13377_v19 = vld [vmem:[%s15419_s30 + $0x9dc] ss:$36 sps:$4 sm:$0xff]   ;;  %v13383_v23 = vld [vmem:[%s15419_s30 + $0xa24] ss:$36 sps:$4 sm:$0xff]  }
  0x31   : > { %v13369_v17 = vld [vmem:[%s15419_s30 + $0x990] ss:$36 sps:$4 sm:$0xff]   ;;  %v13380_v20 = vld [vmem:[%s15419_s30 + $0xe5c] ss:$36 sps:$4 sm:$0xff]   ;;  %v13386_v24 = vld [vmem:[%s15419_s30 + $0xea4] ss:$36 sps:$4 sm:$0xff]  }
  0x32   : > { %9315 = vmatpush1.bf16.msra.mxu0 %v13297_v27  ;;  %v13372_v18 = vld [vmem:[%s15419_s30 + $0xe10] ss:$36 sps:$4 sm:$0xff]   ;;  %v13375_v21 = vld [vmem:[%s15419_s30 + $0x9d8] ss:$36 sps:$4 sm:$0xff]   ;;  %v13381_v25 = vld [vmem:[%s15419_s30 + $0xa20] ss:$36 sps:$4 sm:$0xff]  }
  0x33   : > { %9356 = vmatpush1.bf16.msra.mxu1 %v13298_v28  ;;  %9316 = vmatprep.subr.bf16.mxu0 %v13299_v29  ;;  %v13378_v22 = vld [vmem:[%s15419_s30 + $0xe58] ss:$36 sps:$4 sm:$0xff]   ;;  %v13384_v26 = vld [vmem:[%s15419_s30 + $0xea0] ss:$36 sps:$4 sm:$0xff]   ;;  %v13389_v27 = vld [vmem:[%s15419_s30 + $0xa6c] ss:$36 sps:$4 sm:$0xff]  }
  0x34   : > { %9357 = vmatprep.subr.bf16.mxu1 %v13301_v30  ;;  %v13392_v28 = vld [vmem:[%s15419_s30 + $0xeec] ss:$36 sps:$4 sm:$0xff]   ;;  %s11510_s14 = sld [smem:[#allocation3]] (!%p13022_p6)  ;;  %vm11513_vm2 = vcmask (!%p13022_p6), 7168  }
  0x35   : > { %v13387_v29 = vld [vmem:[%s15419_s30 + $0xa68] ss:$36 sps:$4 sm:$0xff]  }
  0x36   : > { %9317 = vmatpush1.bf16.msra.mxu0 %v13303_v31  ;;  %v13390_v30 = vld [vmem:[%s15419_s30 + $0xee8] ss:$36 sps:$4 sm:$0xff]   ;;  %v13395_v31 = vld [vmem:[%s15419_s30 + $0xab4] ss:$36 sps:$4 sm:$0xff]  }
  0x37   : > { %9358 = vmatpush1.bf16.msra.mxu1 %v13304_v32  ;;  %9318 = vmatprep.subr.bf16.mxu0 %v13305_v33  ;;  %v13398_v32 = vld [vmem:[%s15419_s30 + $0xf34] ss:$36 sps:$4 sm:$0xff]   ;;  %v13413_v47 = vld [vmem:[%s15419_s30 + $0xb8c] ss:$36 sps:$4 sm:$0xff]  }
  0x38   : > { %9359 = vmatprep.subr.bf16.mxu1 %v13307_v34  ;;  %v15527_v33 = vld [vmem:[%s15414_s26 + $0x10] sm:$0xff]  ;;  %v15530_v34 = vld [vmem:[%s15414_s26 + $0x18] sm:$0xff] }
  0x39   : > { %v13416_v49 = vld [vmem:[%s15419_s30 + $0x100c] ss:$36 sps:$4 sm:$0xff]  }
  0x3a   : > { %9319 = vmatpush1.bf16.msra.mxu0 %v13309_v35  ;;  %v13393_v35 = vld [vmem:[%s15419_s30 + $0xab0] ss:$36 sps:$4 sm:$0xff]  }
  0x3b   : > { %9360 = vmatpush1.bf16.msra.mxu1 %v13310_v36  ;;  %9320 = vmatprep.subr.bf16.mxu0 %v13311_v37  ;;  %v13396_v36 = vld [vmem:[%s15419_s30 + $0xf30] ss:$36 sps:$4 sm:$0xff]   ;;  %v15536_v37 = vcombine.high %v15527_v33, %v15527_v33 }
  0x3c   : > { %9361 = vmatprep.subr.bf16.mxu1 %v13313_v38  ;;  %v15540_v38 = vcombine.high %v15530_v34, %v15530_v34 }
  0x3e   : > { %9321 = vmatpush1.bf16.msra.mxu0 %v13315_v39  ;;  %v13401_v39 = vld [vmem:[%s15419_s30 + $0xafc] ss:$36 sps:$4 sm:$0xff]  }
  0x3f   : > { %9362 = vmatpush1.bf16.msra.mxu1 %v13316_v40  ;;  %9322 = vmatprep.subr.bf16.mxu0 %v13317_v41  ;;  %v13404_v40 = vld [vmem:[%s15419_s30 + $0xf7c] ss:$36 sps:$4 sm:$0xff]  }
  0x40   : > { %9363 = vmatprep.subr.bf16.mxu1 %v13319_v42  ;;  %v13399_v41 = vld [vmem:[%s15419_s30 + $0xaf8] ss:$36 sps:$4 sm:$0xff]  }
  0x41   : > { %v13402_v42 = vld [vmem:[%s15419_s30 + $0xf78] ss:$36 sps:$4 sm:$0xff]  }
  0x42   : > { %9323 = vmatpush1.bf16.msra.mxu0 %v13321_v43  ;;  %v13407_v43 = vld [vmem:[%s15419_s30 + $0xb44] ss:$36 sps:$4 sm:$0xff]  }
  0x43   : > { %9364 = vmatpush1.bf16.msra.mxu1 %v13322_v44  ;;  %9324 = vmatprep.subr.bf16.mxu0 %v13323_v45  ;;  %v13410_v44 = vld [vmem:[%s15419_s30 + $0xfc4] ss:$36 sps:$4 sm:$0xff]  }
  0x44   : > { %9365 = vmatprep.subr.bf16.mxu1 %v13325_v46  ;;  %v13405_v45 = vld [vmem:[%s15419_s30 + $0xb40] ss:$36 sps:$4 sm:$0xff]  }
  0x45   : > { %v13408_v46 = vld [vmem:[%s15419_s30 + $0xfc0] ss:$36 sps:$4 sm:$0xff]  }
  0x46   : > { %9325 = vmatpush1.bf16.msra.mxu0 %v13327_v50  ;;  %v13411_v50 = vld [vmem:[%s15419_s30 + $0xb88] ss:$36 sps:$4 sm:$0xff]  }
  0x47   : > { %9366 = vmatpush1.bf16.msra.mxu1 %v13328_v51  ;;  %9326 = vmatprep.subr.bf16.mxu0 %v13329_v53  ;;  %v13414_v51 = vld [vmem:[%s15419_s30 + $0x1008] ss:$36 sps:$4 sm:$0xff]   ;;  %v13419_v53 = vld [vmem:[%s15419_s30 + $0xbd4] ss:$36 sps:$4 sm:$0xff]  }
  0x48   : > { %9367 = vmatprep.subr.bf16.mxu1 %v13331_v54  ;;  %v13422_v54 = vld [vmem:[%s15419_s30 + $0x1054] ss:$36 sps:$4 sm:$0xff]  }
  0x4a   : > { %9327 = vmatpush1.bf16.msra.mxu0 %v13333_v55  ;;  %v13417_v55 = vld [vmem:[%s15419_s30 + $0xbd0] ss:$36 sps:$4 sm:$0xff]  }
  0x4b   : > { %9368 = vmatpush1.bf16.msra.mxu1 %v13334_v56  ;;  %9328 = vmatprep.subr.bf16.mxu0 %v13335_v57  ;;  %v13420_v56 = vld [vmem:[%s15419_s30 + $0x1050] ss:$36 sps:$4 sm:$0xff]   ;;  %v13425_v57 = vld [vmem:[%s15419_s30 + $0xc1c] ss:$36 sps:$4 sm:$0xff]  }
  0x4c   : > { %9369 = vmatprep.subr.bf16.mxu1 %v13337_v58  ;;  %v13428_v58 = vld [vmem:[%s15419_s30 + $0x109c] ss:$36 sps:$4 sm:$0xff]  }
  0x4e   : > { %9329 = vmatpush1.bf16.msra.mxu0 %v13339_v59  ;;  %v13423_v59 = vld [vmem:[%s15419_s30 + $0xc18] ss:$36 sps:$4 sm:$0xff]  }
  0x4f   : > { %9370 = vmatpush1.bf16.msra.mxu1 %v13340_v60  ;;  %9330 = vmatprep.subr.bf16.mxu0 %v13341_v61  ;;  %v13426_v60 = vld [vmem:[%s15419_s30 + $0x1098] ss:$36 sps:$4 sm:$0xff]   ;;  %v13431_v61 = vld [vmem:[%s15419_s30 + $0xc64] ss:$36 sps:$4 sm:$0xff]  }
  0x50   : > { %9371 = vmatprep.subr.bf16.mxu1 %v13343_v62  ;;  %v13434_v62 = vld [vmem:[%s15419_s30 + $0x10e4] ss:$36 sps:$4 sm:$0xff]  }
  0x52   : > { %9331 = vmatpush1.bf16.msra.mxu0 %v13345_v63  ;;  %v13429_v63 = vld [vmem:[%s15419_s30 + $0xc60] ss:$36 sps:$4 sm:$0xff]  }
  0x53   : > { %9372 = vmatpush1.bf16.msra.mxu1 %v13346_v0  ;;  %9332 = vmatprep.subr.bf16.mxu0 %v13347_v1  ;;  %v13432_v0 = vld [vmem:[%s15419_s30 + $0x10e0] ss:$36 sps:$4 sm:$0xff]   ;;  %v13437_v1 = vld [vmem:[%s15419_s30 + $0xcac] ss:$36 sps:$4 sm:$0xff]  }
  0x54   : > { %9373 = vmatprep.subr.bf16.mxu1 %v13349_v2  ;;  %v13440_v2 = vld [vmem:[%s15419_s30 + $0x112c] ss:$36 sps:$4 sm:$0xff]  }
  0x56   : > { %9333 = vmatpush1.bf16.msra.mxu0 %v13351_v3  ;;  %v13435_v3 = vld [vmem:[%s15419_s30 + $0xca8] ss:$36 sps:$4 sm:$0xff]  }
  0x57   : > { %9374 = vmatpush1.bf16.msra.mxu1 %v13352_v4  ;;  %9384 = vmatprep.subr.bf16.mxu0 %v13359_v5  ;;  %v13438_v4 = vld [vmem:[%s15419_s30 + $0x1128] ss:$36 sps:$4 sm:$0xff]   ;;  %v13443_v5 = vld [vmem:[%s15419_s30 + $0xcf4] ss:$36 sps:$4 sm:$0xff]  }
  0x58   : > { %9425 = vmatprep.subr.bf16.mxu1 %v13362_v6  ;;  %v13446_v6 = vld [vmem:[%s15419_s30 + $0x1174] ss:$36 sps:$4 sm:$0xff]  }
  0x59   : > { %9335 = vmatmul.mubr.bf16.vlgmr.msra.gmra.mrb[0].mxu0 %v15496_v7 }
  0x5a   : > { %9376 = vmatmul.mubr.bf16.vlgmr.msra.gmra.mrb[0].mxu1 %v15498_v8  ;;  %9385 = vmatpush1.bf16.msra.mxu0 %v13357_v9  ;;  %v13441_v9 = vld [vmem:[%s15419_s30 + $0xcf0] ss:$36 sps:$4 sm:$0xff]  }
  0x5b   : > { %9426 = vmatpush1.bf16.msra.mxu1 %v13360_v10  ;;  %9386 = vmatprep.subr.bf16.mxu0 %v13365_v11  ;;  %v13444_v10 = vld [vmem:[%s15419_s30 + $0x1170] ss:$36 sps:$4 sm:$0xff]   ;;  %v13449_v11 = vld [vmem:[%s15419_s30 + $0xd3c] ss:$36 sps:$4 sm:$0xff]  }
  0x5c   : > { %9427 = vmatprep.subr.bf16.mxu1 %v13368_v12  ;;  %9416 = vmatprep.mubr.bf16.mxu0 %v15536_v37  ;;  %v13452_v12 = vld [vmem:[%s15419_s30 + $0x11bc] ss:$36 sps:$4 sm:$0xff]  }
  0x5d   : > { %9457 = vmatprep.mubr.bf16.mxu1 %v15540_v38 }
  0x5e   : > { %9387 = vmatpush1.bf16.msra.mxu0 %v13363_v13  ;;  %v13447_v13 = vld [vmem:[%s15419_s30 + $0xd38] ss:$36 sps:$4 sm:$0xff]  }
  0x5f   : > { %9428 = vmatpush1.bf16.msra.mxu1 %v13366_v14  ;;  %9388 = vmatprep.subr.bf16.mxu0 %v13371_v15  ;;  %v13450_v14 = vld [vmem:[%s15419_s30 + $0x11b8] ss:$36 sps:$4 sm:$0xff]   ;;  %v13459_v15 = vld [vmem:[%s15419_s30 + $0x1204] ss:$36 sps:$4 sm:$0xff]  }
  0x60   : > { %9429 = vmatprep.subr.bf16.mxu1 %v13374_v16  ;;  %v13462_v16 = vld [vmem:[%s15419_s30 + $0x1684] ss:$36 sps:$4 sm:$0xff]  }
  0x62   : > { %9389 = vmatpush1.bf16.msra.mxu0 %v13369_v17  ;;  %v15584_v17 = vcombine.low %v15527_v33, %v15527_v33  ;;  %v13477_v33 = vld [vmem:[%s15419_s30 + $0x12dc] ss:$36 sps:$4 sm:$0xff]  }
  0x63   : > { %9430 = vmatpush1.bf16.msra.mxu1 %v13372_v18  ;;  %9390 = vmatprep.subr.bf16.mxu0 %v13377_v19  ;;  %v15588_v18 = vcombine.low %v15530_v34, %v15530_v34  ;;  %v13457_v19 = vld [vmem:[%s15419_s30 + $0x1200] ss:$36 sps:$4 sm:$0xff]  }
  0x64   : > { %9431 = vmatprep.subr.bf16.mxu1 %v13380_v20  ;;  %v13460_v20 = vld [vmem:[%s15419_s30 + $0x1680] ss:$36 sps:$4 sm:$0xff]  }
  0x65   : > { %v13480_v34 = vld [vmem:[%s15419_s30 + $0x175c] ss:$36 sps:$4 sm:$0xff]  }
  0x66   : > { %9391 = vmatpush1.bf16.msra.mxu0 %v13375_v21  ;;  %v13465_v21 = vld [vmem:[%s15419_s30 + $0x124c] ss:$36 sps:$4 sm:$0xff]  }
  0x67   : > { %9432 = vmatpush1.bf16.msra.mxu1 %v13378_v22  ;;  %9392 = vmatprep.subr.bf16.mxu0 %v13383_v23  ;;  %v13468_v22 = vld [vmem:[%s15419_s30 + $0x16cc] ss:$36 sps:$4 sm:$0xff]   ;;  %v15595_v23 = vld [vmem:[%s15414_s26 + $0x20] sm:$0xff] }
  0x68   : > { %9433 = vmatprep.subr.bf16.mxu1 %v13386_v24  ;;  %v15598_v24 = vld [vmem:[%s15414_s26 + $0x28] sm:$0xff] }
  0x6a   : > { %9393 = vmatpush1.bf16.msra.mxu0 %v13381_v25  ;;  %v15602_v25 = vcombine.high %v15595_v23, %v15595_v23 }
  0x6b   : > { %9434 = vmatpush1.bf16.msra.mxu1 %v13384_v26  ;;  %9394 = vmatprep.subr.bf16.mxu0 %v13389_v27  ;;  %v15606_v26 = vcombine.high %v15598_v24, %v15598_v24  ;;  %v13463_v27 = vld [vmem:[%s15419_s30 + $0x1248] ss:$36 sps:$4 sm:$0xff]  }
  0x6c   : > { %9435 = vmatprep.subr.bf16.mxu1 %v13392_v28  ;;  %v13466_v28 = vld [vmem:[%s15419_s30 + $0x16c8] ss:$36 sps:$4 sm:$0xff]  }
  0x6e   : > { %9395 = vmatpush1.bf16.msra.mxu0 %v13387_v29  ;;  %v13471_v29 = vld [vmem:[%s15419_s30 + $0x1294] ss:$36 sps:$4 sm:$0xff]  }
  0x6f   : > { %9436 = vmatpush1.bf16.msra.mxu1 %v13390_v30  ;;  %9396 = vmatprep.subr.bf16.mxu0 %v13395_v31  ;;  %v13474_v30 = vld [vmem:[%s15419_s30 + $0x1714] ss:$36 sps:$4 sm:$0xff]  }
  0x70   : > { %9437 = vmatprep.subr.bf16.mxu1 %v13398_v32  ;;  %v13469_v31 = vld [vmem:[%s15419_s30 + $0x1290] ss:$36 sps:$4 sm:$0xff]  }
  0x71   : > { %v13472_v32 = vld [vmem:[%s15419_s30 + $0x1710] ss:$36 sps:$4 sm:$0xff]  }
  0x72   : > { %9397 = vmatpush1.bf16.msra.mxu0 %v13393_v35  ;;  %v13475_v35 = vld [vmem:[%s15419_s30 + $0x12d8] ss:$36 sps:$4 sm:$0xff]  }
  0x73   : > { %9438 = vmatpush1.bf16.msra.mxu1 %v13396_v36  ;;  %9398 = vmatprep.subr.bf16.mxu0 %v13401_v39  ;;  %v13478_v36 = vld [vmem:[%s15419_s30 + $0x1758] ss:$36 sps:$4 sm:$0xff]   ;;  %v13483_v39 = vld [vmem:[%s15419_s30 + $0x1324] ss:$36 sps:$4 sm:$0xff]  }
  0x74   : > { %9439 = vmatprep.subr.bf16.mxu1 %v13404_v40  ;;  %v13486_v40 = vld [vmem:[%s15419_s30 + $0x17a4] ss:$36 sps:$4 sm:$0xff]  }
  0x76   : > { %9399 = vmatpush1.bf16.msra.mxu0 %v13399_v41  ;;  %v13481_v41 = vld [vmem:[%s15419_s30 + $0x1320] ss:$36 sps:$4 sm:$0xff]  }
  0x77   : > { %9440 = vmatpush1.bf16.msra.mxu1 %v13402_v42  ;;  %9400 = vmatprep.subr.bf16.mxu0 %v13407_v43  ;;  %v13484_v42 = vld [vmem:[%s15419_s30 + $0x17a0] ss:$36 sps:$4 sm:$0xff]   ;;  %v13489_v43 = vld [vmem:[%s15419_s30 + $0x136c] ss:$36 sps:$4 sm:$0xff]  }
  0x78   : > { %9441 = vmatprep.subr.bf16.mxu1 %v13410_v44  ;;  %v13492_v44 = vld [vmem:[%s15419_s30 + $0x17ec] ss:$36 sps:$4 sm:$0xff]  }
  0x7a   : > { %9401 = vmatpush1.bf16.msra.mxu0 %v13405_v45  ;;  %v13487_v45 = vld [vmem:[%s15419_s30 + $0x1368] ss:$36 sps:$4 sm:$0xff]  }
  0x7b   : > { %9442 = vmatpush1.bf16.msra.mxu1 %v13408_v46  ;;  %9402 = vmatprep.subr.bf16.mxu0 %v13413_v47  ;;  %v13490_v46 = vld [vmem:[%s15419_s30 + $0x17e8] ss:$36 sps:$4 sm:$0xff]   ;;  %v13495_v47 = vld [vmem:[%s15419_s30 + $0x13b4] ss:$36 sps:$4 sm:$0xff]  }
  0x7c   : > { %9443 = vmatprep.subr.bf16.mxu1 %v13416_v49  ;;  %v13498_v49 = vld [vmem:[%s15419_s30 + $0x1834] ss:$36 sps:$4 sm:$0xff]  }
  0x7e   : > { %9403 = vmatpush1.bf16.msra.mxu0 %v13411_v50  ;;  %v13493_v50 = vld [vmem:[%s15419_s30 + $0x13b0] ss:$36 sps:$4 sm:$0xff]  }
  0x7f   : > { %9444 = vmatpush1.bf16.msra.mxu1 %v13414_v51  ;;  %9404 = vmatprep.subr.bf16.mxu0 %v13419_v53  ;;  %v13496_v51 = vld [vmem:[%s15419_s30 + $0x1830] ss:$36 sps:$4 sm:$0xff]   ;;  %v13501_v53 = vld [vmem:[%s15419_s30 + $0x13fc] ss:$36 sps:$4 sm:$0xff]  }
  0x80   : > { %9445 = vmatprep.subr.bf16.mxu1 %v13422_v54  ;;  %v13504_v54 = vld [vmem:[%s15419_s30 + $0x187c] ss:$36 sps:$4 sm:$0xff]  }
  0x82   : > { %9405 = vmatpush1.bf16.msra.mxu0 %v13417_v55  ;;  %v13499_v55 = vld [vmem:[%s15419_s30 + $0x13f8] ss:$36 sps:$4 sm:$0xff]  }
  0x83   : > { %9446 = vmatpush1.bf16.msra.mxu1 %v13420_v56  ;;  %9406 = vmatprep.subr.bf16.mxu0 %v13425_v57  ;;  %v13502_v56 = vld [vmem:[%s15419_s30 + $0x1878] ss:$36 sps:$4 sm:$0xff]   ;;  %v13507_v57 = vld [vmem:[%s15419_s30 + $0x1444] ss:$36 sps:$4 sm:$0xff]  }
  0x84   : > { %9447 = vmatprep.subr.bf16.mxu1 %v13428_v58  ;;  %v13510_v58 = vld [vmem:[%s15419_s30 + $0x18c4] ss:$36 sps:$4 sm:$0xff]  }
  0x86   : > { %9407 = vmatpush1.bf16.msra.mxu0 %v13423_v59  ;;  %v13505_v59 = vld [vmem:[%s15419_s30 + $0x1440] ss:$36 sps:$4 sm:$0xff]  }
  0x87   : > { %9448 = vmatpush1.bf16.msra.mxu1 %v13426_v60  ;;  %9408 = vmatprep.subr.bf16.mxu0 %v13431_v61  ;;  %v13508_v60 = vld [vmem:[%s15419_s30 + $0x18c0] ss:$36 sps:$4 sm:$0xff]   ;;  %v13513_v61 = vld [vmem:[%s15419_s30 + $0x148c] ss:$36 sps:$4 sm:$0xff]  }
  0x88   : > { %9449 = vmatprep.subr.bf16.mxu1 %v13434_v62  ;;  %v13516_v62 = vld [vmem:[%s15419_s30 + $0x190c] ss:$36 sps:$4 sm:$0xff]  }
  0x8a   : > { %9409 = vmatpush1.bf16.msra.mxu0 %v13429_v63  ;;  %v13511_v63 = vld [vmem:[%s15419_s30 + $0x1488] ss:$36 sps:$4 sm:$0xff]  }
  0x8b   : > { %9450 = vmatpush1.bf16.msra.mxu1 %v13432_v0  ;;  %9410 = vmatprep.subr.bf16.mxu0 %v13437_v1  ;;  %v13514_v0 = vld [vmem:[%s15419_s30 + $0x1908] ss:$36 sps:$4 sm:$0xff]   ;;  %v13519_v1 = vld [vmem:[%s15419_s30 + $0x14d4] ss:$36 sps:$4 sm:$0xff]  }
  0x8c   : > { %9451 = vmatprep.subr.bf16.mxu1 %v13440_v2  ;;  %v13522_v2 = vld [vmem:[%s15419_s30 + $0x1954] ss:$36 sps:$4 sm:$0xff]  }
  0x8e   : > { %9411 = vmatpush1.bf16.msra.mxu0 %v13435_v3  ;;  %v13517_v3 = vld [vmem:[%s15419_s30 + $0x14d0] ss:$36 sps:$4 sm:$0xff]  }
  0x8f   : > { %9452 = vmatpush1.bf16.msra.mxu1 %v13438_v4  ;;  %9412 = vmatprep.subr.bf16.mxu0 %v13443_v5  ;;  %v13520_v4 = vld [vmem:[%s15419_s30 + $0x1950] ss:$36 sps:$4 sm:$0xff]   ;;  %v13525_v5 = vld [vmem:[%s15419_s30 + $0x151c] ss:$36 sps:$4 sm:$0xff]  }
  0x90   : > { %9453 = vmatprep.subr.bf16.mxu1 %v13446_v6  ;;  %v13528_v6 = vld [vmem:[%s15419_s30 + $0x199c] ss:$36 sps:$4 sm:$0xff]  }
  0x92   : > { %9413 = vmatpush1.bf16.msra.mxu0 %v13441_v9  ;;  %v13523_v9 = vld [vmem:[%s15419_s30 + $0x1518] ss:$36 sps:$4 sm:$0xff]  }
  0x93   : > { %9454 = vmatpush1.bf16.msra.mxu1 %v13444_v10  ;;  %9414 = vmatprep.subr.bf16.mxu0 %v13449_v11  ;;  %v13526_v10 = vld [vmem:[%s15419_s30 + $0x1998] ss:$36 sps:$4 sm:$0xff]   ;;  %v13531_v11 = vld [vmem:[%s15419_s30 + $0x1564] ss:$36 sps:$4 sm:$0xff]  }
  0x94   : > { %9455 = vmatprep.subr.bf16.mxu1 %v13452_v12  ;;  %v13534_v12 = vld [vmem:[%s15419_s30 + $0x19e4] ss:$36 sps:$4 sm:$0xff]  }
  0x96   : > { %9415 = vmatpush1.bf16.msra.mxu0 %v13447_v13  ;;  %v13529_v13 = vld [vmem:[%s15419_s30 + $0x1560] ss:$36 sps:$4 sm:$0xff]  }
  0x97   : > { %9456 = vmatpush1.bf16.msra.mxu1 %v13450_v14  ;;  %9466 = vmatprep.subr.bf16.mxu0 %v13459_v15  ;;  %v13532_v14 = vld [vmem:[%s15419_s30 + $0x19e0] ss:$36 sps:$4 sm:$0xff]   ;;  %v13537_v15 = vld [vmem:[%s15419_s30 + $0x15ac] ss:$36 sps:$4 sm:$0xff]  }
  0x98   : > { %9507 = vmatprep.subr.bf16.mxu1 %v13462_v16  ;;  %v13540_v16 = vld [vmem:[%s15419_s30 + $0x1a2c] ss:$36 sps:$4 sm:$0xff]  }
  0x99   : > { %9417 = vmatmul.mubr.bf16.vlgmr.msra.gmra.mrb[4].mxu0 %v15584_v17 }
  0x9a   : > { %9458 = vmatmul.mubr.bf16.vlgmr.msra.gmra.mrb[4].mxu1 %v15588_v18  ;;  %9467 = vmatpush1.bf16.msra.mxu0 %v13457_v19  ;;  %v13535_v19 = vld [vmem:[%s15419_s30 + $0x15a8] ss:$36 sps:$4 sm:$0xff]  }
  0x9b   : > { %9508 = vmatpush1.bf16.msra.mxu1 %v13460_v20  ;;  %9468 = vmatprep.subr.bf16.mxu0 %v13465_v21  ;;  %v13538_v20 = vld [vmem:[%s15419_s30 + $0x1a28] ss:$36 sps:$4 sm:$0xff]   ;;  %v13543_v21 = vld [vmem:[%s15419_s30 + $0x15f4] ss:$36 sps:$4 sm:$0xff]  }
  0x9c   : > { %9509 = vmatprep.subr.bf16.mxu1 %v13468_v22  ;;  %9498 = vmatprep.mubr.bf16.mxu0 %v15602_v25  ;;  %v13546_v22 = vld [vmem:[%s15419_s30 + $0x1a74] ss:$36 sps:$4 sm:$0xff]  }
  0x9d   : > { %9539 = vmatprep.mubr.bf16.mxu1 %v15606_v26 }
  0x9e   : > { %9469 = vmatpush1.bf16.msra.mxu0 %v13463_v27  ;;  %v13541_v27 = vld [vmem:[%s15419_s30 + $0x15f0] ss:$36 sps:$4 sm:$0xff]  }
  0x9f   : > { %9510 = vmatpush1.bf16.msra.mxu1 %v13466_v28  ;;  %9470 = vmatprep.subr.bf16.mxu0 %v13471_v29  ;;  %v13544_v28 = vld [vmem:[%s15419_s30 + $0x1a70] ss:$36 sps:$4 sm:$0xff]   ;;  %v13549_v29 = vld [vmem:[%s15419_s30 + $0x163c] ss:$36 sps:$4 sm:$0xff]  }
  0xa0   : > { %9511 = vmatprep.subr.bf16.mxu1 %v13474_v30  ;;  %v13552_v30 = vld [vmem:[%s15419_s30 + $0x1abc] ss:$36 sps:$4 sm:$0xff]  }
  0xa2   : > { %9471 = vmatpush1.bf16.msra.mxu0 %v13469_v31  ;;  %v13547_v31 = vld [vmem:[%s15419_s30 + $0x1638] ss:$36 sps:$4 sm:$0xff]  }
  0xa3   : > { %9512 = vmatpush1.bf16.msra.mxu1 %v13472_v32  ;;  %9472 = vmatprep.subr.bf16.mxu0 %v13477_v33  ;;  %v13550_v32 = vld [vmem:[%s15419_s30 + $0x1ab8] ss:$36 sps:$4 sm:$0xff]   ;;  %v13559_v33 = vld [vmem:[%s15419_s30 + $0x1b04] ss:$36 sps:$4 sm:$0xff]  }
  0xa4   : > { %9513 = vmatprep.subr.bf16.mxu1 %v13480_v34  ;;  %v13562_v34 = vld [vmem:[%s15419_s30 + $0x1f84] ss:$36 sps:$4 sm:$0xff]  }
  0xa6   : > { %9473 = vmatpush1.bf16.msra.mxu0 %v13475_v35  ;;  %v13557_v35 = vld [vmem:[%s15419_s30 + $0x1b00] ss:$36 sps:$4 sm:$0xff]  }
  0xa7   : > { %9514 = vmatpush1.bf16.msra.mxu1 %v13478_v36  ;;  %9474 = vmatprep.subr.bf16.mxu0 %v13483_v39  ;;  %v13560_v36 = vld [vmem:[%s15419_s30 + $0x1f80] ss:$36 sps:$4 sm:$0xff]   ;;  %v15676_v39 = vcombine.low %v15595_v23, %v15595_v23 }
  0xa8   : > { %9515 = vmatprep.subr.bf16.mxu1 %v13486_v40  ;;  %v15680_v40 = vcombine.low %v15598_v24, %v15598_v24 }
  0xaa   : > { %9475 = vmatpush1.bf16.msra.mxu0 %v13481_v41  ;;  %v15683_v41 = vld [vmem:[%s15414_s26 + $0x30] sm:$0xff] }
  0xab   : > { %9516 = vmatpush1.bf16.msra.mxu1 %v13484_v42  ;;  %9476 = vmatprep.subr.bf16.mxu0 %v13489_v43  ;;  %v15686_v42 = vld [vmem:[%s15414_s26 + $0x38] sm:$0xff]  ;;  %v13565_v43 = vld [vmem:[%s15419_s30 + $0x1b4c] ss:$36 sps:$4 sm:$0xff]   ;;  %v15692_v23 = vcombine.high %v15683_v41, %v15683_v41 }
  0xac   : > { %9517 = vmatprep.subr.bf16.mxu1 %v13492_v44  ;;  %v13568_v44 = vld [vmem:[%s15419_s30 + $0x1fcc] ss:$36 sps:$4 sm:$0xff]   ;;  %v15696_v24 = vcombine.high %v15686_v42, %v15686_v42 }
  0xae   : > { %9477 = vmatpush1.bf16.msra.mxu0 %v13487_v45  ;;  %v13563_v45 = vld [vmem:[%s15419_s30 + $0x1b48] ss:$36 sps:$4 sm:$0xff]  }
  0xaf   : > { %9518 = vmatpush1.bf16.msra.mxu1 %v13490_v46  ;;  %9478 = vmatprep.subr.bf16.mxu0 %v13495_v47  ;;  %v13566_v46 = vld [vmem:[%s15419_s30 + $0x1fc8] ss:$36 sps:$4 sm:$0xff]   ;;  %v13571_v47 = vld [vmem:[%s15419_s30 + $0x1b94] ss:$36 sps:$4 sm:$0xff]  }
  0xb0   : > { %9519 = vmatprep.subr.bf16.mxu1 %v13498_v49  ;;  %v13574_v49 = vld [vmem:[%s15419_s30 + $0x2014] ss:$36 sps:$4 sm:$0xff]  }
  0xb2   : > { %9479 = vmatpush1.bf16.msra.mxu0 %v13493_v50  ;;  %v13569_v50 = vld [vmem:[%s15419_s30 + $0x1b90] ss:$36 sps:$4 sm:$0xff]  }
  0xb3   : > { %9520 = vmatpush1.bf16.msra.mxu1 %v13496_v51  ;;  %9480 = vmatprep.subr.bf16.mxu0 %v13501_v53  ;;  %v13572_v51 = vld [vmem:[%s15419_s30 + $0x2010] ss:$36 sps:$4 sm:$0xff]   ;;  %v13577_v53 = vld [vmem:[%s15419_s30 + $0x1bdc] ss:$36 sps:$4 sm:$0xff]  }
  0xb4   : > { %9521 = vmatprep.subr.bf16.mxu1 %v13504_v54  ;;  %v13580_v54 = vld [vmem:[%s15419_s30 + $0x205c] ss:$36 sps:$4 sm:$0xff]  }
  0xb6   : > { %9481 = vmatpush1.bf16.msra.mxu0 %v13499_v55  ;;  %v13575_v55 = vld [vmem:[%s15419_s30 + $0x1bd8] ss:$36 sps:$4 sm:$0xff]  }
  0xb7   : > { %9522 = vmatpush1.bf16.msra.mxu1 %v13502_v56  ;;  %9482 = vmatprep.subr.bf16.mxu0 %v13507_v57  ;;  %v13578_v56 = vld [vmem:[%s15419_s30 + $0x2058] ss:$36 sps:$4 sm:$0xff]   ;;  %v13583_v57 = vld [vmem:[%s15419_s30 + $0x1c24] ss:$36 sps:$4 sm:$0xff]  }
  0xb8   : > { %9523 = vmatprep.subr.bf16.mxu1 %v13510_v58  ;;  %v13586_v58 = vld [vmem:[%s15419_s30 + $0x20a4] ss:$36 sps:$4 sm:$0xff]  }
  0xba   : > { %9483 = vmatpush1.bf16.msra.mxu0 %v13505_v59  ;;  %v13581_v59 = vld [vmem:[%s15419_s30 + $0x1c20] ss:$36 sps:$4 sm:$0xff]  }
  0xbb   : > { %9524 = vmatpush1.bf16.msra.mxu1 %v13508_v60  ;;  %9484 = vmatprep.subr.bf16.mxu0 %v13513_v61  ;;  %v13584_v60 = vld [vmem:[%s15419_s30 + $0x20a0] ss:$36 sps:$4 sm:$0xff]   ;;  %v13589_v61 = vld [vmem:[%s15419_s30 + $0x1c6c] ss:$36 sps:$4 sm:$0xff]  }
  0xbc   : > { %9525 = vmatprep.subr.bf16.mxu1 %v13516_v62  ;;  %v13592_v62 = vld [vmem:[%s15419_s30 + $0x20ec] ss:$36 sps:$4 sm:$0xff]  }
  0xbe   : > { %9485 = vmatpush1.bf16.msra.mxu0 %v13511_v63  ;;  %v13587_v63 = vld [vmem:[%s15419_s30 + $0x1c68] ss:$36 sps:$4 sm:$0xff]  }
  0xbf   : > { %9526 = vmatpush1.bf16.msra.mxu1 %v13514_v0  ;;  %9486 = vmatprep.subr.bf16.mxu0 %v13519_v1  ;;  %v13590_v0 = vld [vmem:[%s15419_s30 + $0x20e8] ss:$36 sps:$4 sm:$0xff]   ;;  %v13595_v1 = vld [vmem:[%s15419_s30 + $0x1cb4] ss:$36 sps:$4 sm:$0xff]  }
  0xc0   : > { %9527 = vmatprep.subr.bf16.mxu1 %v13522_v2  ;;  %v13598_v2 = vld [vmem:[%s15419_s30 + $0x2134] ss:$36 sps:$4 sm:$0xff]  }
  0xc2   : > { %9487 = vmatpush1.bf16.msra.mxu0 %v13517_v3  ;;  %v13593_v3 = vld [vmem:[%s15419_s30 + $0x1cb0] ss:$36 sps:$4 sm:$0xff]  }
  0xc3   : > { %9528 = vmatpush1.bf16.msra.mxu1 %v13520_v4  ;;  %9488 = vmatprep.subr.bf16.mxu0 %v13525_v5  ;;  %v13596_v4 = vld [vmem:[%s15419_s30 + $0x2130] ss:$36 sps:$4 sm:$0xff]   ;;  %v13601_v5 = vld [vmem:[%s15419_s30 + $0x1cfc] ss:$36 sps:$4 sm:$0xff]  }
  0xc4   : > { %9529 = vmatprep.subr.bf16.mxu1 %v13528_v6  ;;  %v13604_v6 = vld [vmem:[%s15419_s30 + $0x217c] ss:$36 sps:$4 sm:$0xff]  }
  0xc6   : > { %9489 = vmatpush1.bf16.msra.mxu0 %v13523_v9  ;;  %v13599_v9 = vld [vmem:[%s15419_s30 + $0x1cf8] ss:$36 sps:$4 sm:$0xff]  }
  0xc7   : > { %9530 = vmatpush1.bf16.msra.mxu1 %v13526_v10  ;;  %9490 = vmatprep.subr.bf16.mxu0 %v13531_v11  ;;  %v13602_v10 = vld [vmem:[%s15419_s30 + $0x2178] ss:$36 sps:$4 sm:$0xff]   ;;  %v13607_v11 = vld [vmem:[%s15419_s30 + $0x1d44] ss:$36 sps:$4 sm:$0xff]  }
  0xc8   : > { %9531 = vmatprep.subr.bf16.mxu1 %v13534_v12  ;;  %v13610_v12 = vld [vmem:[%s15419_s30 + $0x21c4] ss:$36 sps:$4 sm:$0xff]  }
  0xca   : > { %9491 = vmatpush1.bf16.msra.mxu0 %v13529_v13  ;;  %v13605_v13 = vld [vmem:[%s15419_s30 + $0x1d40] ss:$36 sps:$4 sm:$0xff]  }
  0xcb   : > { %9532 = vmatpush1.bf16.msra.mxu1 %v13532_v14  ;;  %9492 = vmatprep.subr.bf16.mxu0 %v13537_v15  ;;  %v13608_v14 = vld [vmem:[%s15419_s30 + $0x21c0] ss:$36 sps:$4 sm:$0xff]   ;;  %v13613_v15 = vld [vmem:[%s15419_s30 + $0x1d8c] ss:$36 sps:$4 sm:$0xff]  }
  0xcc   : > { %9533 = vmatprep.subr.bf16.mxu1 %v13540_v16  ;;  %v13616_v16 = vld [vmem:[%s15419_s30 + $0x220c] ss:$36 sps:$4 sm:$0xff]  }
  0xce   : > { %9493 = vmatpush1.bf16.msra.mxu0 %v13535_v19  ;;  %v13611_v19 = vld [vmem:[%s15419_s30 + $0x1d88] ss:$36 sps:$4 sm:$0xff]  }
  0xcf   : > { %9534 = vmatpush1.bf16.msra.mxu1 %v13538_v20  ;;  %9494 = vmatprep.subr.bf16.mxu0 %v13543_v21  ;;  %v13614_v20 = vld [vmem:[%s15419_s30 + $0x2208] ss:$36 sps:$4 sm:$0xff]   ;;  %v13619_v21 = vld [vmem:[%s15419_s30 + $0x1dd4] ss:$36 sps:$4 sm:$0xff]  }
  0xd0   : > { %9535 = vmatprep.subr.bf16.mxu1 %v13546_v22  ;;  %v13622_v22 = vld [vmem:[%s15419_s30 + $0x2254] ss:$36 sps:$4 sm:$0xff]  }
  0xd2   : > { %9495 = vmatpush1.bf16.msra.mxu0 %v13541_v27  ;;  %v13617_v27 = vld [vmem:[%s15419_s30 + $0x1dd0] ss:$36 sps:$4 sm:$0xff]  }
  0xd3   : > { %9536 = vmatpush1.bf16.msra.mxu1 %v13544_v28  ;;  %9496 = vmatprep.subr.bf16.mxu0 %v13549_v29  ;;  %v13620_v28 = vld [vmem:[%s15419_s30 + $0x2250] ss:$36 sps:$4 sm:$0xff]   ;;  %v13625_v29 = vld [vmem:[%s15419_s30 + $0x1e1c] ss:$36 sps:$4 sm:$0xff]  }
  0xd4   : > { %9537 = vmatprep.subr.bf16.mxu1 %v13552_v30  ;;  %v13628_v30 = vld [vmem:[%s15419_s30 + $0x229c] ss:$36 sps:$4 sm:$0xff]  }
  0xd6   : > { %9497 = vmatpush1.bf16.msra.mxu0 %v13547_v31  ;;  %v13623_v31 = vld [vmem:[%s15419_s30 + $0x1e18] ss:$36 sps:$4 sm:$0xff]  }
  0xd7   : > { %9538 = vmatpush1.bf16.msra.mxu1 %v13550_v32  ;;  %9548 = vmatprep.subr.bf16.mxu0 %v13559_v33  ;;  %v13626_v32 = vld [vmem:[%s15419_s30 + $0x2298] ss:$36 sps:$4 sm:$0xff]   ;;  %v13631_v33 = vld [vmem:[%s15419_s30 + $0x1e64] ss:$36 sps:$4 sm:$0xff]  }
  0xd8   : > { %9589 = vmatprep.subr.bf16.mxu1 %v13562_v34  ;;  %v13634_v34 = vld [vmem:[%s15419_s30 + $0x22e4] ss:$36 sps:$4 sm:$0xff]  }
  0xd9   : > { %9499 = vmatmul.mubr.bf16.vlgmr.msra.gmra.mrb[8].mxu0 %v15676_v39 }
  0xda   : > { %9540 = vmatmul.mubr.bf16.vlgmr.msra.gmra.mrb[8].mxu1 %v15680_v40  ;;  %9549 = vmatpush1.bf16.msra.mxu0 %v13557_v35  ;;  %v13629_v35 = vld [vmem:[%s15419_s30 + $0x1e60] ss:$36 sps:$4 sm:$0xff]  }
  0xdb   : > { %9590 = vmatpush1.bf16.msra.mxu1 %v13560_v36  ;;  %9550 = vmatprep.subr.bf16.mxu0 %v13565_v43  ;;  %v13632_v36 = vld [vmem:[%s15419_s30 + $0x22e0] ss:$36 sps:$4 sm:$0xff]   ;;  %v13637_v43 = vld [vmem:[%s15419_s30 + $0x1eac] ss:$36 sps:$4 sm:$0xff]  }
  0xdc   : > { %9591 = vmatprep.subr.bf16.mxu1 %v13568_v44  ;;  %9580 = vmatprep.mubr.bf16.mxu0 %v15692_v23  ;;  %v13640_v44 = vld [vmem:[%s15419_s30 + $0x232c] ss:$36 sps:$4 sm:$0xff]  }
  0xdd   : > { %9621 = vmatprep.mubr.bf16.mxu1 %v15696_v24 }
  0xde   : > { %9551 = vmatpush1.bf16.msra.mxu0 %v13563_v45  ;;  %v13635_v45 = vld [vmem:[%s15419_s30 + $0x1ea8] ss:$36 sps:$4 sm:$0xff]  }
  0xdf   : > { %9592 = vmatpush1.bf16.msra.mxu1 %v13566_v46  ;;  %9552 = vmatprep.subr.bf16.mxu0 %v13571_v47  ;;  %v13638_v46 = vld [vmem:[%s15419_s30 + $0x2328] ss:$36 sps:$4 sm:$0xff]   ;;  %v13643_v47 = vld [vmem:[%s15419_s30 + $0x1ef4] ss:$36 sps:$4 sm:$0xff]  }
  0xe0   : > { %9593 = vmatprep.subr.bf16.mxu1 %v13574_v49  ;;  %v13646_v49 = vld [vmem:[%s15419_s30 + $0x2374] ss:$36 sps:$4 sm:$0xff]  }
  0xe2   : > { %9553 = vmatpush1.bf16.msra.mxu0 %v13569_v50  ;;  %v13641_v50 = vld [vmem:[%s15419_s30 + $0x1ef0] ss:$36 sps:$4 sm:$0xff]  }
  0xe3   : > { %9594 = vmatpush1.bf16.msra.mxu1 %v13572_v51  ;;  %9554 = vmatprep.subr.bf16.mxu0 %v13577_v53  ;;  %v13644_v51 = vld [vmem:[%s15419_s30 + $0x2370] ss:$36 sps:$4 sm:$0xff]   ;;  %v13649_v53 = vld [vmem:[%s15419_s30 + $0x1f3c] ss:$36 sps:$4 sm:$0xff]  }
  0xe4   : > { %9595 = vmatprep.subr.bf16.mxu1 %v13580_v54  ;;  %v13652_v54 = vld [vmem:[%s15419_s30 + $0x23bc] ss:$36 sps:$4 sm:$0xff]  }
  0xe6   : > { %9555 = vmatpush1.bf16.msra.mxu0 %v13575_v55  ;;  %v13647_v55 = vld [vmem:[%s15419_s30 + $0x1f38] ss:$36 sps:$4 sm:$0xff]  }
  0xe7   : > { %9596 = vmatpush1.bf16.msra.mxu1 %v13578_v56  ;;  %9556 = vmatprep.subr.bf16.mxu0 %v13583_v57  ;;  %v13650_v56 = vld [vmem:[%s15419_s30 + $0x23b8] ss:$36 sps:$4 sm:$0xff]   ;;  %v13659_v57 = vld [vmem:[%s15419_s30 + $0x2404] ss:$36 sps:$4 sm:$0xff]  }
  0xe8   : > { %9597 = vmatprep.subr.bf16.mxu1 %v13586_v58  ;;  %v13662_v58 = vld [vmem:[%s15419_s30 + $0x2884] ss:$36 sps:$4 sm:$0xff]  }
  0xea   : > { %9557 = vmatpush1.bf16.msra.mxu0 %v13581_v59  ;;  %v15763_v59 = vld [vmem:[%s15414_s26 + $0x40] sm:$0xff] }
  0xeb   : > { %9598 = vmatpush1.bf16.msra.mxu1 %v13584_v60  ;;  %9558 = vmatprep.subr.bf16.mxu0 %v13589_v61  ;;  %v15767_v60 = vcombine.low %v15683_v41, %v15683_v41  ;;  %v15771_v61 = vcombine.low %v15686_v42, %v15686_v42  ;;  %v15782_v41 = vcombine.high %v15763_v59, %v15763_v59 }
  0xec   : > { %9599 = vmatprep.subr.bf16.mxu1 %v13592_v62  ;;  %v15774_v62 = vld [vmem:[%s15414_s26 + $0x48] sm:$0xff] }
  0xed   : > { %v15786_v42 = vcombine.high %v15774_v62, %v15774_v62 }
  0xee   : > { %9559 = vmatpush1.bf16.msra.mxu0 %v13587_v63  ;;  %v13657_v63 = vld [vmem:[%s15419_s30 + $0x2400] ss:$36 sps:$4 sm:$0xff]  }
  0xef   : > { %9600 = vmatpush1.bf16.msra.mxu1 %v13590_v0  ;;  %9560 = vmatprep.subr.bf16.mxu0 %v13595_v1  ;;  %v13660_v0 = vld [vmem:[%s15419_s30 + $0x2880] ss:$36 sps:$4 sm:$0xff]   ;;  %v13665_v1 = vld [vmem:[%s15419_s30 + $0x244c] ss:$36 sps:$4 sm:$0xff]  }
  0xf0   : > { %9601 = vmatprep.subr.bf16.mxu1 %v13598_v2  ;;  %v13668_v2 = vld [vmem:[%s15419_s30 + $0x28cc] ss:$36 sps:$4 sm:$0xff]  }
  0xf2   : > { %9561 = vmatpush1.bf16.msra.mxu0 %v13593_v3  ;;  %v13663_v3 = vld [vmem:[%s15419_s30 + $0x2448] ss:$36 sps:$4 sm:$0xff]  }
  0xf3   : > { %9602 = vmatpush1.bf16.msra.mxu1 %v13596_v4  ;;  %9562 = vmatprep.subr.bf16.mxu0 %v13601_v5  ;;  %v13666_v4 = vld [vmem:[%s15419_s30 + $0x28c8] ss:$36 sps:$4 sm:$0xff]   ;;  %v13671_v5 = vld [vmem:[%s15419_s30 + $0x2494] ss:$36 sps:$4 sm:$0xff]  }
  0xf4   : > { %9603 = vmatprep.subr.bf16.mxu1 %v13604_v6  ;;  %v13674_v6 = vld [vmem:[%s15419_s30 + $0x2914] ss:$36 sps:$4 sm:$0xff]  }
  0xf6   : > { %9563 = vmatpush1.bf16.msra.mxu0 %v13599_v9  ;;  %v13669_v9 = vld [vmem:[%s15419_s30 + $0x2490] ss:$36 sps:$4 sm:$0xff]  }
  0xf7   : > { %9604 = vmatpush1.bf16.msra.mxu1 %v13602_v10  ;;  %9564 = vmatprep.subr.bf16.mxu0 %v13607_v11  ;;  %v13672_v10 = vld [vmem:[%s15419_s30 + $0x2910] ss:$36 sps:$4 sm:$0xff]   ;;  %v13677_v11 = vld [vmem:[%s15419_s30 + $0x24dc] ss:$36 sps:$4 sm:$0xff]  }
  0xf8   : > { %9605 = vmatprep.subr.bf16.mxu1 %v13610_v12  ;;  %v13680_v12 = vld [vmem:[%s15419_s30 + $0x295c] ss:$36 sps:$4 sm:$0xff]  }
  0xfa   : > { %9565 = vmatpush1.bf16.msra.mxu0 %v13605_v13  ;;  %v13675_v13 = vld [vmem:[%s15419_s30 + $0x24d8] ss:$36 sps:$4 sm:$0xff]  }
  0xfb   : > { %9606 = vmatpush1.bf16.msra.mxu1 %v13608_v14  ;;  %9566 = vmatprep.subr.bf16.mxu0 %v13613_v15  ;;  %v13678_v14 = vld [vmem:[%s15419_s30 + $0x2958] ss:$36 sps:$4 sm:$0xff]   ;;  %v13683_v15 = vld [vmem:[%s15419_s30 + $0x2524] ss:$36 sps:$4 sm:$0xff]  }
  0xfc   : > { %9607 = vmatprep.subr.bf16.mxu1 %v13616_v16  ;;  %v13686_v16 = vld [vmem:[%s15419_s30 + $0x29a4] ss:$36 sps:$4 sm:$0xff]  }
  0xfe   : > { %9567 = vmatpush1.bf16.msra.mxu0 %v13611_v19  ;;  %v13681_v19 = vld [vmem:[%s15419_s30 + $0x2520] ss:$36 sps:$4 sm:$0xff]  }
  0xff   : > { %9608 = vmatpush1.bf16.msra.mxu1 %v13614_v20  ;;  %9568 = vmatprep.subr.bf16.mxu0 %v13619_v21  ;;  %v13684_v20 = vld [vmem:[%s15419_s30 + $0x29a0] ss:$36 sps:$4 sm:$0xff]   ;;  %v13689_v21 = vld [vmem:[%s15419_s30 + $0x256c] ss:$36 sps:$4 sm:$0xff]  }
 0x100   : > { %9609 = vmatprep.subr.bf16.mxu1 %v13622_v22  ;;  %v13692_v22 = vld [vmem:[%s15419_s30 + $0x29ec] ss:$36 sps:$4 sm:$0xff]  }
 0x102   : > { %9569 = vmatpush1.bf16.msra.mxu0 %v13617_v27  ;;  %v13687_v27 = vld [vmem:[%s15419_s30 + $0x2568] ss:$36 sps:$4 sm:$0xff]  }
 0x103   : > { %9610 = vmatpush1.bf16.msra.mxu1 %v13620_v28  ;;  %9570 = vmatprep.subr.bf16.mxu0 %v13625_v29  ;;  %v13690_v28 = vld [vmem:[%s15419_s30 + $0x29e8] ss:$36 sps:$4 sm:$0xff]   ;;  %v13695_v29 = vld [vmem:[%s15419_s30 + $0x25b4] ss:$36 sps:$4 sm:$0xff]  }
 0x104   : > { %9611 = vmatprep.subr.bf16.mxu1 %v13628_v30  ;;  %v13698_v30 = vld [vmem:[%s15419_s30 + $0x2a34] ss:$36 sps:$4 sm:$0xff]  }
 0x106   : > { %9571 = vmatpush1.bf16.msra.mxu0 %v13623_v31 }
 0x107   : > { %9612 = vmatpush1.bf16.msra.mxu1 %v13626_v32  ;;  %9572 = vmatprep.subr.bf16.mxu0 %v13631_v33  ;;  %v13693_v33 = vld [vmem:[%s15419_s30 + $0x25b0] ss:$36 sps:$4 sm:$0xff]  }
 0x108   : > { %9613 = vmatprep.subr.bf16.mxu1 %v13634_v34  ;;  %v13696_v34 = vld [vmem:[%s15419_s30 + $0x2a30] ss:$36 sps:$4 sm:$0xff]  }
 0x10a   : > { %9573 = vmatpush1.bf16.msra.mxu0 %v13629_v35 }
 0x10b   : > { %9614 = vmatpush1.bf16.msra.mxu1 %v13632_v36  ;;  %9574 = vmatprep.subr.bf16.mxu0 %v13637_v43 }
 0x10c   : > { %9615 = vmatprep.subr.bf16.mxu1 %v13640_v44 }
 0x10e   : > { %9575 = vmatpush1.bf16.msra.mxu0 %v13635_v45 }
 0x10f   : > { %9616 = vmatpush1.bf16.msra.mxu1 %v13638_v46  ;;  %9576 = vmatprep.subr.bf16.mxu0 %v13643_v47 }
 0x110   : > { %9617 = vmatprep.subr.bf16.mxu1 %v13646_v49 }
 0x112   : > { %9577 = vmatpush1.bf16.msra.mxu0 %v13641_v50  ;;  %v13701_v50 = vld [vmem:[%s15419_s30 + $0x25fc] ss:$36 sps:$4 sm:$0xff]  }
 0x113   : > { %9618 = vmatpush1.bf16.msra.mxu1 %v13644_v51  ;;  %9578 = vmatprep.subr.bf16.mxu0 %v13649_v53  ;;  %v13704_v51 = vld [vmem:[%s15419_s30 + $0x2a7c] ss:$36 sps:$4 sm:$0xff]  }
 0x114   : > { %9619 = vmatprep.subr.bf16.mxu1 %v13652_v54  ;;  %v13699_v53 = vld [vmem:[%s15419_s30 + $0x25f8] ss:$36 sps:$4 sm:$0xff]  }
 0x115   : > { %v13702_v54 = vld [vmem:[%s15419_s30 + $0x2a78] ss:$36 sps:$4 sm:$0xff]  }
 0x116   : > { %9579 = vmatpush1.bf16.msra.mxu0 %v13647_v55  ;;  %v13707_v55 = vld [vmem:[%s15419_s30 + $0x2644] ss:$36 sps:$4 sm:$0xff]  }
 0x117   : > { %9620 = vmatpush1.bf16.msra.mxu1 %v13650_v56  ;;  %9630 = vmatprep.subr.bf16.mxu0 %v13659_v57  ;;  %v13710_v56 = vld [vmem:[%s15419_s30 + $0x2ac4] ss:$36 sps:$4 sm:$0xff]  }
 0x118   : > { %9671 = vmatprep.subr.bf16.mxu1 %v13662_v58  ;;  %v13705_v57 = vld [vmem:[%s15419_s30 + $0x2640] ss:$36 sps:$4 sm:$0xff]  }
 0x119   : > { %9581 = vmatmul.mubr.bf16.vlgmr.msra.gmra.mrb[12].mxu0 %v15767_v60  ;;  %v13708_v58 = vld [vmem:[%s15419_s30 + $0x2ac0] ss:$36 sps:$4 sm:$0xff]  }
 0x11a   : > { %9622 = vmatmul.mubr.bf16.vlgmr.msra.gmra.mrb[12].mxu1 %v15771_v61  ;;  %9631 = vmatpush1.bf16.msra.mxu0 %v13657_v63  ;;  %v13713_v63 = vld [vmem:[%s15419_s30 + $0x268c] ss:$36 sps:$4 sm:$0xff]  }
 0x11b   : > { %9672 = vmatpush1.bf16.msra.mxu1 %v13660_v0  ;;  %9632 = vmatprep.subr.bf16.mxu0 %v13665_v1  ;;  %v13716_v0 = vld [vmem:[%s15419_s30 + $0x2b0c] ss:$36 sps:$4 sm:$0xff]  }
 0x11c   : > { %9673 = vmatprep.subr.bf16.mxu1 %v13668_v2  ;;  %9662 = vmatprep.mubr.bf16.mxu0 %v15782_v41  ;;  %v13711_v1 = vld [vmem:[%s15419_s30 + $0x2688] ss:$36 sps:$4 sm:$0xff]  }
 0x11d   : > { %9703 = vmatprep.mubr.bf16.mxu1 %v15786_v42  ;;  %v13714_v2 = vld [vmem:[%s15419_s30 + $0x2b08] ss:$36 sps:$4 sm:$0xff]  }
 0x11e   : > { %9633 = vmatpush1.bf16.msra.mxu0 %v13663_v3  ;;  %v13719_v3 = vld [vmem:[%s15419_s30 + $0x26d4] ss:$36 sps:$4 sm:$0xff]  }
 0x11f   : > { %9674 = vmatpush1.bf16.msra.mxu1 %v13666_v4  ;;  %9634 = vmatprep.subr.bf16.mxu0 %v13671_v5  ;;  %v13722_v4 = vld [vmem:[%s15419_s30 + $0x2b54] ss:$36 sps:$4 sm:$0xff]  }
 0x120   : > { %9675 = vmatprep.subr.bf16.mxu1 %v13674_v6  ;;  %v13717_v5 = vld [vmem:[%s15419_s30 + $0x26d0] ss:$36 sps:$4 sm:$0xff]  }
 0x121   : > { %v13720_v6 = vld [vmem:[%s15419_s30 + $0x2b50] ss:$36 sps:$4 sm:$0xff]  }
 0x122   : > { %9635 = vmatpush1.bf16.msra.mxu0 %v13669_v9  ;;  %v13725_v9 = vld [vmem:[%s15419_s30 + $0x271c] ss:$36 sps:$4 sm:$0xff]  }
 0x123   : > { %9676 = vmatpush1.bf16.msra.mxu1 %v13672_v10  ;;  %9636 = vmatprep.subr.bf16.mxu0 %v13677_v11  ;;  %v13728_v10 = vld [vmem:[%s15419_s30 + $0x2b9c] ss:$36 sps:$4 sm:$0xff]  }
 0x124   : > { %9677 = vmatprep.subr.bf16.mxu1 %v13680_v12  ;;  %v13723_v11 = vld [vmem:[%s15419_s30 + $0x2718] ss:$36 sps:$4 sm:$0xff]  }
 0x125   : > { %v13726_v12 = vld [vmem:[%s15419_s30 + $0x2b98] ss:$36 sps:$4 sm:$0xff]  }
 0x126   : > { %9637 = vmatpush1.bf16.msra.mxu0 %v13675_v13  ;;  %v13731_v13 = vld [vmem:[%s15419_s30 + $0x2764] ss:$36 sps:$4 sm:$0xff]  }
 0x127   : > { %9678 = vmatpush1.bf16.msra.mxu1 %v13678_v14  ;;  %9638 = vmatprep.subr.bf16.mxu0 %v13683_v15  ;;  %v13734_v14 = vld [vmem:[%s15419_s30 + $0x2be4] ss:$36 sps:$4 sm:$0xff]  }
 0x128   : > { %9679 = vmatprep.subr.bf16.mxu1 %v13686_v16  ;;  %v13729_v15 = vld [vmem:[%s15419_s30 + $0x2760] ss:$36 sps:$4 sm:$0xff]  }
 0x129   : > { %v13732_v16 = vld [vmem:[%s15419_s30 + $0x2be0] ss:$36 sps:$4 sm:$0xff]  }
 0x12a   : > { %9639 = vmatpush1.bf16.msra.mxu0 %v13681_v19  ;;  %v13737_v19 = vld [vmem:[%s15419_s30 + $0x27ac] ss:$36 sps:$4 sm:$0xff]  }
 0x12b   : > { %9680 = vmatpush1.bf16.msra.mxu1 %v13684_v20  ;;  %9640 = vmatprep.subr.bf16.mxu0 %v13689_v21  ;;  %v13740_v20 = vld [vmem:[%s15419_s30 + $0x2c2c] ss:$36 sps:$4 sm:$0xff]  }
 0x12c   : > { %9681 = vmatprep.subr.bf16.mxu1 %v13692_v22  ;;  %v9336_v31 = vpop.f32.mrb[0].mxu0  ;;  %v13735_v21 = vld [vmem:[%s15419_s30 + $0x27a8] ss:$36 sps:$4 sm:$0xff]  }
 0x12d   : > { %v9377_v32 = vpop.f32.mrb[0].mxu1  ;;  %v9338_v36 = vpop.f32.mrb[1].mxu0  ;;  %v13738_v22 = vld [vmem:[%s15419_s30 + $0x2c28] ss:$36 sps:$4 sm:$0xff]  }
 0x12e   : > { %v15814_v35 = vadd.f32 %v9377_v32, %v9336_v31  ;;  %v9379_v43 = vpop.f32.mrb[1].mxu1  ;;  %v9340_v45 = vpop.f32.mrb[2].mxu0  ;;  %9641 = vmatpush1.bf16.msra.mxu0 %v13687_v27  ;;  %v13743_v27 = vld [vmem:[%s15419_s30 + $0x27f4] ss:$36 sps:$4 sm:$0xff]   ;;  %v13749_v31 = vld [vmem:[%s15419_s30 + $0x283c] ss:$36 sps:$4 sm:$0xff]  }
 0x12f   : > { %v15816_v44 = vadd.f32 %v9379_v43, %v9338_v36  ;;  %v9381_v46 = vpop.f32.mrb[2].mxu1  ;;  %9682 = vmatpush1.bf16.msra.mxu1 %v13690_v28  ;;  %v9341_v47 = vpop.f32.mrb[3].mxu0  ;;  %9642 = vmatprep.subr.bf16.mxu0 %v13695_v29  ;;  %v13746_v28 = vld [vmem:[%s15419_s30 + $0x2c74] ss:$36 sps:$4 sm:$0xff]   ;;  %v13752_v32 = vld [vmem:[%s15419_s30 + $0x2cbc] ss:$36 sps:$4 sm:$0xff]  }
 0x130   : > { %v9382_v49 = vpop.f32.mrb[3].mxu1  ;;  %9683 = vmatprep.subr.bf16.mxu1 %v13698_v30  ;;  %v13741_v29 = vld [vmem:[%s15419_s30 + $0x27f0] ss:$36 sps:$4 sm:$0xff]   ;;  %v13757_v45 = vld [vmem:[%s15419_s30 + $0x8] ss:$36 sps:$4 sm:$0xff]   ;;  %v15860_v47 = vcombine.low %v15763_v59, %v15763_v59 }
 0x131   : > { %v13744_v30 = vld [vmem:[%s15419_s30 + $0x2c70] ss:$36 sps:$4 sm:$0xff]   ;;  %v13760_v46 = vld [vmem:[%s15419_s30 + $0x488] ss:$36 sps:$4 sm:$0xff]   ;;  %v15864_v49 = vcombine.low %v15774_v62, %v15774_v62 }
 0x132   : > { %9643 = vmatpush1.bf16.msra.mxu0 %v13693_v33  ;;  %v13747_v33 = vld [vmem:[%s15419_s30 + $0x2838] ss:$36 sps:$4 sm:$0xff]   ;;  %v13759_v36 = vld [vmem:[%s15419_s30 + $0xc] ss:$36 sps:$4 sm:$0xff]  }
 0x133   : > { %9684 = vmatpush1.bf16.msra.mxu1 %v13696_v34  ;;  %9644 = vmatprep.subr.bf16.mxu0 %v13701_v50  ;;  %v13750_v34 = vld [vmem:[%s15419_s30 + $0x2cb8] ss:$36 sps:$4 sm:$0xff]   ;;  %v13762_v43 = vld [vmem:[%s15419_s30 + $0x48c] ss:$36 sps:$4 sm:$0xff]  }
 0x134   : > { %9685 = vmatprep.subr.bf16.mxu1 %v13704_v51  ;;  %v13765_v50 = vld [vmem:[%s15419_s30 + $0x54] ss:$36 sps:$4 sm:$0xff]  }
 0x135   : > { %v13768_v51 = vld [vmem:[%s15419_s30 + $0x4d4] ss:$36 sps:$4 sm:$0xff]  }
 0x136   : > { %9645 = vmatpush1.bf16.msra.mxu0 %v13699_v53  ;;  %v13763_v59 = vld [vmem:[%s15419_s30 + $0x50] ss:$36 sps:$4 sm:$0xff]   ;;  %v13771_v53 = vld [vmem:[%s15419_s30 + $0x9c] ss:$36 sps:$4 sm:$0xff]  }
 0x137   : > { %9686 = vmatpush1.bf16.msra.mxu1 %v13702_v54  ;;  %9646 = vmatprep.subr.bf16.mxu0 %v13707_v55  ;;  %v13766_v62 = vld [vmem:[%s15419_s30 + $0x4d0] ss:$36 sps:$4 sm:$0xff]   ;;  %v13774_v54 = vld [vmem:[%s15419_s30 + $0x51c] ss:$36 sps:$4 sm:$0xff]  }
 0x138   : > { %9687 = vmatprep.subr.bf16.mxu1 %v13710_v56  ;;  %v13769_v55 = vld [vmem:[%s15419_s30 + $0x98] ss:$36 sps:$4 sm:$0xff]  }
 0x139   : > { %v13772_v56 = vld [vmem:[%s15419_s30 + $0x518] ss:$36 sps:$4 sm:$0xff]  }
 0x13a   : > { %9647 = vmatpush1.bf16.msra.mxu0 %v13705_v57  ;;  %v13777_v57 = vld [vmem:[%s15419_s30 + $0xe4] ss:$36 sps:$4 sm:$0xff]  }
 0x13b   : > { %9688 = vmatpush1.bf16.msra.mxu1 %v13708_v58  ;;  %9648 = vmatprep.subr.bf16.mxu0 %v13713_v63  ;;  %v13780_v58 = vld [vmem:[%s15419_s30 + $0x564] ss:$36 sps:$4 sm:$0xff]  }
 0x13c   : > { %9689 = vmatprep.subr.bf16.mxu1 %v13716_v0  ;;  %v13775_v63 = vld [vmem:[%s15419_s30 + $0xe0] ss:$36 sps:$4 sm:$0xff]  }
 0x13d   : > { %v13778_v0 = vld [vmem:[%s15419_s30 + $0x560] ss:$36 sps:$4 sm:$0xff]  }
 0x13e   : > { %9649 = vmatpush1.bf16.msra.mxu0 %v13711_v1  ;;  %v13783_v1 = vld [vmem:[%s15419_s30 + $0x12c] ss:$36 sps:$4 sm:$0xff]  }
 0x13f   : > { %9690 = vmatpush1.bf16.msra.mxu1 %v13714_v2  ;;  %9650 = vmatprep.subr.bf16.mxu0 %v13719_v3  ;;  %v13786_v2 = vld [vmem:[%s15419_s30 + $0x5ac] ss:$36 sps:$4 sm:$0xff]  }
 0x140   : > { %9691 = vmatprep.subr.bf16.mxu1 %v13722_v4  ;;  %v13781_v3 = vld [vmem:[%s15419_s30 + $0x128] ss:$36 sps:$4 sm:$0xff]  }
 0x141   : > { %v13784_v4 = vld [vmem:[%s15419_s30 + $0x5a8] ss:$36 sps:$4 sm:$0xff]  }
 0x142   : > { %9651 = vmatpush1.bf16.msra.mxu0 %v13717_v5  ;;  %v13789_v5 = vld [vmem:[%s15419_s30 + $0x174] ss:$36 sps:$4 sm:$0xff]  }
 0x143   : > { %9692 = vmatpush1.bf16.msra.mxu1 %v13720_v6  ;;  %9652 = vmatprep.subr.bf16.mxu0 %v13725_v9  ;;  %v13792_v6 = vld [vmem:[%s15419_s30 + $0x5f4] ss:$36 sps:$4 sm:$0xff]  }
 0x144   : > { %9693 = vmatprep.subr.bf16.mxu1 %v13728_v10  ;;  %v13787_v9 = vld [vmem:[%s15419_s30 + $0x170] ss:$36 sps:$4 sm:$0xff]  }
 0x145   : > { %v13790_v10 = vld [vmem:[%s15419_s30 + $0x5f0] ss:$36 sps:$4 sm:$0xff]  }
 0x146   : > { %9653 = vmatpush1.bf16.msra.mxu0 %v13723_v11  ;;  %v13795_v11 = vld [vmem:[%s15419_s30 + $0x1bc] ss:$36 sps:$4 sm:$0xff]  }
 0x147   : > { %9694 = vmatpush1.bf16.msra.mxu1 %v13726_v12  ;;  %9654 = vmatprep.subr.bf16.mxu0 %v13731_v13  ;;  %v13798_v12 = vld [vmem:[%s15419_s30 + $0x63c] ss:$36 sps:$4 sm:$0xff]  }
 0x148   : > { %9695 = vmatprep.subr.bf16.mxu1 %v13734_v14 }
 0x14a   : > { %9655 = vmatpush1.bf16.msra.mxu0 %v13729_v15  ;;  %v13793_v15 = vld [vmem:[%s15419_s30 + $0x1b8] ss:$36 sps:$4 sm:$0xff]  }
 0x14b   : > { %9696 = vmatpush1.bf16.msra.mxu1 %v13732_v16  ;;  %9656 = vmatprep.subr.bf16.mxu0 %v13737_v19  ;;  %v13796_v16 = vld [vmem:[%s15419_s30 + $0x638] ss:$36 sps:$4 sm:$0xff]  }
 0x14c   : > { %9697 = vmatprep.subr.bf16.mxu1 %v13740_v20 }
 0x14e   : > { %9657 = vmatpush1.bf16.msra.mxu0 %v13735_v21 }
 0x14f   : > { %9698 = vmatpush1.bf16.msra.mxu1 %v13738_v22  ;;  %9658 = vmatprep.subr.bf16.mxu0 %v13743_v27 }
 0x150   : > { %9699 = vmatprep.subr.bf16.mxu1 %v13746_v28 }
 0x152   : > { %9659 = vmatpush1.bf16.msra.mxu0 %v13741_v29 }
 0x153   : > { %9700 = vmatpush1.bf16.msra.mxu1 %v13744_v30  ;;  %9660 = vmatprep.subr.bf16.mxu0 %v13749_v31 }
 0x154   : > { %9701 = vmatprep.subr.bf16.mxu1 %v13752_v32  ;;  %v13804_v32 = vld [vmem:[%s15419_s30 + $0x684] ss:$36 sps:$4 sm:$0xff]  }
 0x156   : > { %9661 = vmatpush1.bf16.msra.mxu0 %v13747_v33 }
 0x157   : > { %9702 = vmatpush1.bf16.msra.mxu1 %v13750_v34  ;;  %9712 = vmatprep.subr.bf16.mxu0 %v13759_v36  ;;  %v13802_v34 = vld [vmem:[%s15419_s30 + $0x680] ss:$36 sps:$4 sm:$0xff]   ;;  %v13807_v36 = vld [vmem:[%s15419_s30 + $0x24c] ss:$36 sps:$4 sm:$0xff]  }
 0x158   : > { %9753 = vmatprep.subr.bf16.mxu1 %v13762_v43  ;;  %v13810_v43 = vld [vmem:[%s15419_s30 + $0x6cc] ss:$36 sps:$4 sm:$0xff]  }
 0x159   : > { %9663 = vmatmul.mubr.bf16.vlgmr.msra.gmra.mrb[16].mxu0 %v15860_v47 }
 0x15a   : > { %9704 = vmatmul.mubr.bf16.vlgmr.msra.gmra.mrb[16].mxu1 %v15864_v49  ;;  %9713 = vmatpush1.bf16.msra.mxu0 %v13757_v45  ;;  %v13805_v45 = vld [vmem:[%s15419_s30 + $0x248] ss:$36 sps:$4 sm:$0xff]  }
 0x15b   : > { %9754 = vmatpush1.bf16.msra.mxu1 %v13760_v46  ;;  %9714 = vmatprep.subr.bf16.mxu0 %v13765_v50  ;;  %v13808_v46 = vld [vmem:[%s15419_s30 + $0x6c8] ss:$36 sps:$4 sm:$0xff]   ;;  %v13813_v50 = vld [vmem:[%s15419_s30 + $0x294] ss:$36 sps:$4 sm:$0xff]  }
 0x15c   : > { %9755 = vmatprep.subr.bf16.mxu1 %v13768_v51  ;;  %9744 = vmatprep.mubr.bf16.mxu0 %v15469_v48  ;;  %v13816_v51 = vld [vmem:[%s15419_s30 + $0x714] ss:$36 sps:$4 sm:$0xff]  }
 0x15d   : > { %9785 = vmatprep.mubr.bf16.mxu1 %v15474_v52 }
 0x15e   : > { %9715 = vmatpush1.bf16.msra.mxu0 %v13763_v59  ;;  %v13811_v59 = vld [vmem:[%s15419_s30 + $0x290] ss:$36 sps:$4 sm:$0xff]  }
 0x15f   : > { %9756 = vmatpush1.bf16.msra.mxu1 %v13766_v62  ;;  %9716 = vmatprep.subr.bf16.mxu0 %v13771_v53  ;;  %v13814_v62 = vld [vmem:[%s15419_s30 + $0x710] ss:$36 sps:$4 sm:$0xff]   ;;  %v13819_v53 = vld [vmem:[%s15419_s30 + $0x2dc] ss:$36 sps:$4 sm:$0xff]  }
 0x160   : > { %9757 = vmatprep.subr.bf16.mxu1 %v13774_v54  ;;  %v13822_v54 = vld [vmem:[%s15419_s30 + $0x75c] ss:$36 sps:$4 sm:$0xff]  }
 0x162   : > { %9717 = vmatpush1.bf16.msra.mxu0 %v13769_v55  ;;  %v13817_v55 = vld [vmem:[%s15419_s30 + $0x2d8] ss:$36 sps:$4 sm:$0xff]  }
 0x163   : > { %9758 = vmatpush1.bf16.msra.mxu1 %v13772_v56  ;;  %9718 = vmatprep.subr.bf16.mxu0 %v13777_v57  ;;  %v13820_v56 = vld [vmem:[%s15419_s30 + $0x758] ss:$36 sps:$4 sm:$0xff]   ;;  %v13825_v57 = vld [vmem:[%s15419_s30 + $0x324] ss:$36 sps:$4 sm:$0xff]  }
 0x164   : > { %9759 = vmatprep.subr.bf16.mxu1 %v13780_v58  ;;  %v13828_v58 = vld [vmem:[%s15419_s30 + $0x7a4] ss:$36 sps:$4 sm:$0xff]  }
 0x166   : > { %9719 = vmatpush1.bf16.msra.mxu0 %v13775_v63  ;;  %v13823_v63 = vld [vmem:[%s15419_s30 + $0x320] ss:$36 sps:$4 sm:$0xff]  }
 0x167   : > { %9760 = vmatpush1.bf16.msra.mxu1 %v13778_v0  ;;  %9720 = vmatprep.subr.bf16.mxu0 %v13783_v1  ;;  %v13826_v0 = vld [vmem:[%s15419_s30 + $0x7a0] ss:$36 sps:$4 sm:$0xff]   ;;  %v13831_v1 = vld [vmem:[%s15419_s30 + $0x36c] ss:$36 sps:$4 sm:$0xff]  }
 0x168   : > { %9761 = vmatprep.subr.bf16.mxu1 %v13786_v2  ;;  %v13834_v2 = vld [vmem:[%s15419_s30 + $0x7ec] ss:$36 sps:$4 sm:$0xff]  }
 0x16a   : > { %9721 = vmatpush1.bf16.msra.mxu0 %v13781_v3  ;;  %v13829_v3 = vld [vmem:[%s15419_s30 + $0x368] ss:$36 sps:$4 sm:$0xff]  }
 0x16b   : > { %9762 = vmatpush1.bf16.msra.mxu1 %v13784_v4  ;;  %9722 = vmatprep.subr.bf16.mxu0 %v13789_v5  ;;  %v13832_v4 = vld [vmem:[%s15419_s30 + $0x7e8] ss:$36 sps:$4 sm:$0xff]   ;;  %v13837_v5 = vld [vmem:[%s15419_s30 + $0x3b4] ss:$36 sps:$4 sm:$0xff]  }
 0x16c   : > { %9763 = vmatprep.subr.bf16.mxu1 %v13792_v6  ;;  %v9418_v13 = vpop.f32.mrb[4].mxu0  ;;  %v13840_v6 = vld [vmem:[%s15419_s30 + $0x834] ss:$36 sps:$4 sm:$0xff]  }
 0x16d   : > { %v9459_v14 = vpop.f32.mrb[4].mxu1  ;;  %v9419_v19 = vadd.f32 %v9418_v13, %v15814_v35  ;;  %v9420_v20 = vpop.f32.mrb[5].mxu0  ;;  %v13801_v35 = vld [vmem:[%s15419_s30 + $0x204] ss:$36 sps:$4 sm:$0xff]   ;;  %v13841_v13 = vld [vmem:[%s15419_s30 + $0x3f8] ss:$36 sps:$4 sm:$0xff]  }
 0x16e   : > { %v9461_v21 = vpop.f32.mrb[5].mxu1  ;;  %v9421_v22 = vadd.f32 %v9420_v20, %v15816_v44  ;;  %v9422_v27 = vpop.f32.mrb[6].mxu0  ;;  %9723 = vmatpush1.bf16.msra.mxu0 %v13787_v9  ;;  %v13799_v44 = vld [vmem:[%s15419_s30 + $0x200] ss:$36 sps:$4 sm:$0xff]   ;;  %v13835_v9 = vld [vmem:[%s15419_s30 + $0x3b0] ss:$36 sps:$4 sm:$0xff]  }
 0x16f   : > { %v9463_v28 = vpop.f32.mrb[6].mxu1  ;;  %9764 = vmatpush1.bf16.msra.mxu1 %v13790_v10  ;;  %v15896_v29 = vadd.f32 %v9459_v14, %v9419_v19  ;;  %v9423_v30 = vpop.f32.mrb[7].mxu0  ;;  %9724 = vmatprep.subr.bf16.mxu0 %v13795_v11  ;;  %v13838_v10 = vld [vmem:[%s15419_s30 + $0x830] ss:$36 sps:$4 sm:$0xff]   ;;  %v13843_v11 = vld [vmem:[%s15419_s30 + $0x3fc] ss:$36 sps:$4 sm:$0xff]  }
 0x170   : > { %v9464_v31 = vpop.f32.mrb[7].mxu1  ;;  %9765 = vmatprep.subr.bf16.mxu1 %v13798_v12  ;;  %v15900_v33 = vadd.f32 %v9461_v21, %v9421_v22  ;;  %v13846_v12 = vld [vmem:[%s15419_s30 + $0x87c] ss:$36 sps:$4 sm:$0xff]   ;;  %v13855_v21 = vld [vmem:[%s15419_s30 + $0x90c] ss:$36 sps:$4 sm:$0xff]  }
 0x171   : > { %v13844_v14 = vld [vmem:[%s15419_s30 + $0x878] ss:$36 sps:$4 sm:$0xff]   ;;  %v13847_v19 = vld [vmem:[%s15419_s30 + $0x440] ss:$36 sps:$4 sm:$0xff]   ;;  %v13858_v22 = vld [vmem:[%s15419_s30 + $0xd8c] ss:$36 sps:$4 sm:$0xff]  }
 0x172   : > { %9725 = vmatpush1.bf16.msra.mxu0 %v13793_v15  ;;  %v13849_v15 = vld [vmem:[%s15419_s30 + $0x444] ss:$36 sps:$4 sm:$0xff]   ;;  %v13861_v30 = vld [vmem:[%s15419_s30 + $0x954] ss:$36 sps:$4 sm:$0xff]  }
 0x173   : > { %9766 = vmatpush1.bf16.msra.mxu1 %v13796_v16  ;;  %9726 = vmatprep.subr.bf16.mxu0 %v13801_v35  ;;  %v13852_v16 = vld [vmem:[%s15419_s30 + $0x8c4] ss:$36 sps:$4 sm:$0xff]   ;;  %v13864_v31 = vld [vmem:[%s15419_s30 + $0xdd4] ss:$36 sps:$4 sm:$0xff]  }
 0x174   : > { %9767 = vmatprep.subr.bf16.mxu1 %v13804_v32  ;;  %v13850_v20 = vld [vmem:[%s15419_s30 + $0x8c0] ss:$36 sps:$4 sm:$0xff]   ;;  %v13853_v27 = vld [vmem:[%s15419_s30 + $0x908] ss:$36 sps:$4 sm:$0xff]   ;;  %v13859_v35 = vld [vmem:[%s15419_s30 + $0x950] ss:$36 sps:$4 sm:$0xff]  }
 0x175   : > { %v13856_v28 = vld [vmem:[%s15419_s30 + $0xd88] ss:$36 sps:$4 sm:$0xff]   ;;  %v13862_v32 = vld [vmem:[%s15419_s30 + $0xdd0] ss:$36 sps:$4 sm:$0xff]  }
 0x176   : > { %9727 = vmatpush1.bf16.msra.mxu0 %v13799_v44  ;;  %v13867_v44 = vld [vmem:[%s15419_s30 + $0x99c] ss:$36 sps:$4 sm:$0xff]  }
 0x177   : > { %9768 = vmatpush1.bf16.msra.mxu1 %v13802_v34  ;;  %9728 = vmatprep.subr.bf16.mxu0 %v13807_v36  ;;  %v13870_v34 = vld [vmem:[%s15419_s30 + $0xe1c] ss:$36 sps:$4 sm:$0xff]  }
 0x178   : > { %9769 = vmatprep.subr.bf16.mxu1 %v13810_v43  ;;  %v13865_v36 = vld [vmem:[%s15419_s30 + $0x998] ss:$36 sps:$4 sm:$0xff]  }
 0x179   : > { %v13868_v43 = vld [vmem:[%s15419_s30 + $0xe18] ss:$36 sps:$4 sm:$0xff]  }
 0x17a   : > { %9729 = vmatpush1.bf16.msra.mxu0 %v13805_v45  ;;  %v13873_v45 = vld [vmem:[%s15419_s30 + $0x9e4] ss:$36 sps:$4 sm:$0xff]  }
 0x17b   : > { %9770 = vmatpush1.bf16.msra.mxu1 %v13808_v46  ;;  %9730 = vmatprep.subr.bf16.mxu0 %v13813_v50  ;;  %v13876_v46 = vld [vmem:[%s15419_s30 + $0xe64] ss:$36 sps:$4 sm:$0xff]  }
 0x17c   : > { %9771 = vmatprep.subr.bf16.mxu1 %v13816_v51  ;;  %v13871_v50 = vld [vmem:[%s15419_s30 + $0x9e0] ss:$36 sps:$4 sm:$0xff]  }
 0x17d   : > { %v13874_v51 = vld [vmem:[%s15419_s30 + $0xe60] ss:$36 sps:$4 sm:$0xff]  }
 0x17e   : > { %9731 = vmatpush1.bf16.msra.mxu0 %v13811_v59  ;;  %v13879_v59 = vld [vmem:[%s15419_s30 + $0xa2c] ss:$36 sps:$4 sm:$0xff]  }
 0x17f   : > { %9772 = vmatpush1.bf16.msra.mxu1 %v13814_v62  ;;  %9732 = vmatprep.subr.bf16.mxu0 %v13819_v53  ;;  %v13882_v62 = vld [vmem:[%s15419_s30 + $0xeac] ss:$36 sps:$4 sm:$0xff]  }
 0x180   : > { %9773 = vmatprep.subr.bf16.mxu1 %v13822_v54  ;;  %v13877_v53 = vld [vmem:[%s15419_s30 + $0xa28] ss:$36 sps:$4 sm:$0xff]  }
 0x181   : > { %v13880_v54 = vld [vmem:[%s15419_s30 + $0xea8] ss:$36 sps:$4 sm:$0xff]  }
 0x182   : > { %9733 = vmatpush1.bf16.msra.mxu0 %v13817_v55  ;;  %v13885_v55 = vld [vmem:[%s15419_s30 + $0xa74] ss:$36 sps:$4 sm:$0xff]  }
 0x183   : > { %9774 = vmatpush1.bf16.msra.mxu1 %v13820_v56  ;;  %9734 = vmatprep.subr.bf16.mxu0 %v13825_v57  ;;  %v13888_v56 = vld [vmem:[%s15419_s30 + $0xef4] ss:$36 sps:$4 sm:$0xff]  }
 0x184   : > { %9775 = vmatprep.subr.bf16.mxu1 %v13828_v58  ;;  %v13883_v57 = vld [vmem:[%s15419_s30 + $0xa70] ss:$36 sps:$4 sm:$0xff]  }
 0x185   : > { %v13886_v58 = vld [vmem:[%s15419_s30 + $0xef0] ss:$36 sps:$4 sm:$0xff]  }
 0x186   : > { %9735 = vmatpush1.bf16.msra.mxu0 %v13823_v63  ;;  %v13891_v63 = vld [vmem:[%s15419_s30 + $0xabc] ss:$36 sps:$4 sm:$0xff]  }
 0x187   : > { %9776 = vmatpush1.bf16.msra.mxu1 %v13826_v0  ;;  %9736 = vmatprep.subr.bf16.mxu0 %v13831_v1  ;;  %v13894_v0 = vld [vmem:[%s15419_s30 + $0xf3c] ss:$36 sps:$4 sm:$0xff]  }
 0x188   : > { %9777 = vmatprep.subr.bf16.mxu1 %v13834_v2 }
 0x18a   : > { %9737 = vmatpush1.bf16.msra.mxu0 %v13829_v3  ;;  %v13889_v3 = vld [vmem:[%s15419_s30 + $0xab8] ss:$36 sps:$4 sm:$0xff]  }
 0x18b   : > { %9778 = vmatpush1.bf16.msra.mxu1 %v13832_v4  ;;  %9738 = vmatprep.subr.bf16.mxu0 %v13837_v5 }
 0x18c   : > { %9779 = vmatprep.subr.bf16.mxu1 %v13840_v6 }
 0x18e   : > { %9739 = vmatpush1.bf16.msra.mxu0 %v13835_v9  ;;  %v13892_v9 = vld [vmem:[%s15419_s30 + $0xf38] ss:$36 sps:$4 sm:$0xff]  }
 0x18f   : > { %9780 = vmatpush1.bf16.msra.mxu1 %v13838_v10  ;;  %9740 = vmatprep.subr.bf16.mxu0 %v13843_v11 }
 0x190   : > { %9781 = vmatprep.subr.bf16.mxu1 %v13846_v12 }
 0x192   : > { %9741 = vmatpush1.bf16.msra.mxu0 %v13841_v13 }
 0x193   : > { %9782 = vmatpush1.bf16.msra.mxu1 %v13844_v14  ;;  %9742 = vmatprep.subr.bf16.mxu0 %v13849_v15 }
 0x194   : > { %9783 = vmatprep.subr.bf16.mxu1 %v13852_v16  ;;  %v13900_v16 = vld [vmem:[%s15419_s30 + $0xf84] ss:$36 sps:$4 sm:$0xff]  }
 0x196   : > { %9743 = vmatpush1.bf16.msra.mxu0 %v13847_v19 }
 0x197   : > { %9784 = vmatpush1.bf16.msra.mxu1 %v13850_v20  ;;  %9794 = vmatprep.subr.bf16.mxu0 %v13855_v21  ;;  %v13898_v20 = vld [vmem:[%s15419_s30 + $0xf80] ss:$36 sps:$4 sm:$0xff]   ;;  %v13903_v21 = vld [vmem:[%s15419_s30 + $0xb4c] ss:$36 sps:$4 sm:$0xff]  }
 0x198   : > { %9835 = vmatprep.subr.bf16.mxu1 %v13858_v22  ;;  %v13906_v22 = vld [vmem:[%s15419_s30 + $0xfcc] ss:$36 sps:$4 sm:$0xff]  }
 0x199   : > { %9745 = vmatmul.mubr.bf16.vlgmr.msra.gmra.mrb[20].mxu0 %v15496_v7 }
 0x19a   : > { %9786 = vmatmul.mubr.bf16.vlgmr.msra.gmra.mrb[20].mxu1 %v15498_v8  ;;  %9795 = vmatpush1.bf16.msra.mxu0 %v13853_v27  ;;  %v13901_v27 = vld [vmem:[%s15419_s30 + $0xb48] ss:$36 sps:$4 sm:$0xff]  }
 0x19b   : > { %9836 = vmatpush1.bf16.msra.mxu1 %v13856_v28  ;;  %9796 = vmatprep.subr.bf16.mxu0 %v13861_v30  ;;  %v13904_v28 = vld [vmem:[%s15419_s30 + $0xfc8] ss:$36 sps:$4 sm:$0xff]   ;;  %v13909_v30 = vld [vmem:[%s15419_s30 + $0xb94] ss:$36 sps:$4 sm:$0xff]  }
 0x19c   : > { %9837 = vmatprep.subr.bf16.mxu1 %v13864_v31  ;;  %9826 = vmatprep.mubr.bf16.mxu0 %v15536_v37  ;;  %v13912_v31 = vld [vmem:[%s15419_s30 + $0x1014] ss:$36 sps:$4 sm:$0xff]  }
 0x19d   : > { %9867 = vmatprep.mubr.bf16.mxu1 %v15540_v38 }
 0x19e   : > { %9797 = vmatpush1.bf16.msra.mxu0 %v13859_v35  ;;  %v13907_v35 = vld [vmem:[%s15419_s30 + $0xb90] ss:$36 sps:$4 sm:$0xff]  }
 0x19f   : > { %9838 = vmatpush1.bf16.msra.mxu1 %v13862_v32  ;;  %9798 = vmatprep.subr.bf16.mxu0 %v13867_v44  ;;  %v13910_v32 = vld [vmem:[%s15419_s30 + $0x1010] ss:$36 sps:$4 sm:$0xff]   ;;  %v13915_v44 = vld [vmem:[%s15419_s30 + $0xbdc] ss:$36 sps:$4 sm:$0xff]  }
 0x1a0   : > { %9839 = vmatprep.subr.bf16.mxu1 %v13870_v34  ;;  %v13918_v34 = vld [vmem:[%s15419_s30 + $0x105c] ss:$36 sps:$4 sm:$0xff]  }
 0x1a2   : > { %9799 = vmatpush1.bf16.msra.mxu0 %v13865_v36  ;;  %v13913_v36 = vld [vmem:[%s15419_s30 + $0xbd8] ss:$36 sps:$4 sm:$0xff]  }
 0x1a3   : > { %9840 = vmatpush1.bf16.msra.mxu1 %v13868_v43  ;;  %9800 = vmatprep.subr.bf16.mxu0 %v13873_v45  ;;  %v13916_v43 = vld [vmem:[%s15419_s30 + $0x1058] ss:$36 sps:$4 sm:$0xff]   ;;  %v13921_v45 = vld [vmem:[%s15419_s30 + $0xc24] ss:$36 sps:$4 sm:$0xff]  }
 0x1a4   : > { %9841 = vmatprep.subr.bf16.mxu1 %v13876_v46  ;;  %v13924_v46 = vld [vmem:[%s15419_s30 + $0x10a4] ss:$36 sps:$4 sm:$0xff]  }
 0x1a6   : > { %9801 = vmatpush1.bf16.msra.mxu0 %v13871_v50  ;;  %v13919_v50 = vld [vmem:[%s15419_s30 + $0xc20] ss:$36 sps:$4 sm:$0xff]  }
 0x1a7   : > { %9842 = vmatpush1.bf16.msra.mxu1 %v13874_v51  ;;  %9802 = vmatprep.subr.bf16.mxu0 %v13879_v59  ;;  %v13922_v51 = vld [vmem:[%s15419_s30 + $0x10a0] ss:$36 sps:$4 sm:$0xff]   ;;  %v13927_v59 = vld [vmem:[%s15419_s30 + $0xc6c] ss:$36 sps:$4 sm:$0xff]  }
 0x1a8   : > { %9843 = vmatprep.subr.bf16.mxu1 %v13882_v62  ;;  %v13930_v62 = vld [vmem:[%s15419_s30 + $0x10ec] ss:$36 sps:$4 sm:$0xff]  }
 0x1aa   : > { %9803 = vmatpush1.bf16.msra.mxu0 %v13877_v53  ;;  %v13925_v53 = vld [vmem:[%s15419_s30 + $0xc68] ss:$36 sps:$4 sm:$0xff]  }
 0x1ab   : > { %9844 = vmatpush1.bf16.msra.mxu1 %v13880_v54  ;;  %9804 = vmatprep.subr.bf16.mxu0 %v13885_v55  ;;  %v13928_v54 = vld [vmem:[%s15419_s30 + $0x10e8] ss:$36 sps:$4 sm:$0xff]   ;;  %v13933_v55 = vld [vmem:[%s15419_s30 + $0xcb4] ss:$36 sps:$4 sm:$0xff]  }
 0x1ac   : > { %9845 = vmatprep.subr.bf16.mxu1 %v13888_v56  ;;  %v9500_v1 = vpop.f32.mrb[8].mxu0  ;;  %v13936_v56 = vld [vmem:[%s15419_s30 + $0x1134] ss:$36 sps:$4 sm:$0xff]  }
 0x1ad   : > { %v9541_v2 = vpop.f32.mrb[8].mxu1  ;;  %v9501_v4 = vadd.f32 %v9500_v1, %v15896_v29  ;;  %v9502_v5 = vpop.f32.mrb[9].mxu0  ;;  %v13897_v29 = vld [vmem:[%s15419_s30 + $0xb04] ss:$36 sps:$4 sm:$0xff]   ;;  %v13937_v1 = vld [vmem:[%s15419_s30 + $0xcf8] ss:$36 sps:$4 sm:$0xff]  }
 0x1ae   : > { %v9543_v6 = vpop.f32.mrb[9].mxu1  ;;  %v9503_v10 = vadd.f32 %v9502_v5, %v15900_v33  ;;  %v9504_v11 = vpop.f32.mrb[10].mxu0  ;;  %9805 = vmatpush1.bf16.msra.mxu0 %v13883_v57  ;;  %v13895_v33 = vld [vmem:[%s15419_s30 + $0xb00] ss:$36 sps:$4 sm:$0xff]   ;;  %v13931_v57 = vld [vmem:[%s15419_s30 + $0xcb0] ss:$36 sps:$4 sm:$0xff]  }
 0x1af   : > { %v9545_v12 = vpop.f32.mrb[10].mxu1  ;;  %9846 = vmatpush1.bf16.msra.mxu1 %v13886_v58  ;;  %v15970_v13 = vadd.f32 %v9541_v2, %v9501_v4  ;;  %v9505_v14 = vpop.f32.mrb[11].mxu0  ;;  %9806 = vmatprep.subr.bf16.mxu0 %v13891_v63  ;;  %v13934_v58 = vld [vmem:[%s15419_s30 + $0x1130] ss:$36 sps:$4 sm:$0xff]   ;;  %v13939_v63 = vld [vmem:[%s15419_s30 + $0xcfc] ss:$36 sps:$4 sm:$0xff]  }
 0x1b0   : > { %v9546_v15 = vpop.f32.mrb[11].mxu1  ;;  %9847 = vmatprep.subr.bf16.mxu1 %v13894_v0  ;;  %v15974_v19 = vadd.f32 %v9543_v6, %v9503_v10  ;;  %v13942_v0 = vld [vmem:[%s15419_s30 + $0x117c] ss:$36 sps:$4 sm:$0xff]   ;;  %v13948_v4 = vld [vmem:[%s15419_s30 + $0x11c4] ss:$36 sps:$4 sm:$0xff]  }
 0x1b1   : > { %v13940_v2 = vld [vmem:[%s15419_s30 + $0x1178] ss:$36 sps:$4 sm:$0xff]   ;;  %v13943_v5 = vld [vmem:[%s15419_s30 + $0xd40] ss:$36 sps:$4 sm:$0xff]   ;;  %v13954_v10 = vld [vmem:[%s15419_s30 + $0x168c] ss:$36 sps:$4 sm:$0xff]  }
 0x1b2   : > { %9807 = vmatpush1.bf16.msra.mxu0 %v13889_v3  ;;  %v13945_v3 = vld [vmem:[%s15419_s30 + $0xd44] ss:$36 sps:$4 sm:$0xff]   ;;  %v13957_v14 = vld [vmem:[%s15419_s30 + $0x1254] ss:$36 sps:$4 sm:$0xff]  }
 0x1b3   : > { %9848 = vmatpush1.bf16.msra.mxu1 %v13892_v9  ;;  %9808 = vmatprep.subr.bf16.mxu0 %v13897_v29  ;;  %v13946_v6 = vld [vmem:[%s15419_s30 + $0x11c0] ss:$36 sps:$4 sm:$0xff]   ;;  %v13951_v9 = vld [vmem:[%s15419_s30 + $0x120c] ss:$36 sps:$4 sm:$0xff]   ;;  %v13960_v15 = vld [vmem:[%s15419_s30 + $0x16d4] ss:$36 sps:$4 sm:$0xff]  }
 0x1b4   : > { %9849 = vmatprep.subr.bf16.mxu1 %v13900_v16  ;;  %v13949_v11 = vld [vmem:[%s15419_s30 + $0x1208] ss:$36 sps:$4 sm:$0xff]   ;;  %v13955_v29 = vld [vmem:[%s15419_s30 + $0x1250] ss:$36 sps:$4 sm:$0xff]  }
 0x1b5   : > { %v13952_v12 = vld [vmem:[%s15419_s30 + $0x1688] ss:$36 sps:$4 sm:$0xff]   ;;  %v13958_v16 = vld [vmem:[%s15419_s30 + $0x16d0] ss:$36 sps:$4 sm:$0xff]  }
 0x1b6   : > { %9809 = vmatpush1.bf16.msra.mxu0 %v13895_v33  ;;  %v13963_v33 = vld [vmem:[%s15419_s30 + $0x129c] ss:$36 sps:$4 sm:$0xff]  }
 0x1b7   : > { %9850 = vmatpush1.bf16.msra.mxu1 %v13898_v20  ;;  %9810 = vmatprep.subr.bf16.mxu0 %v13903_v21  ;;  %v13966_v20 = vld [vmem:[%s15419_s30 + $0x171c] ss:$36 sps:$4 sm:$0xff]  }
 0x1b8   : > { %9851 = vmatprep.subr.bf16.mxu1 %v13906_v22  ;;  %v13961_v21 = vld [vmem:[%s15419_s30 + $0x1298] ss:$36 sps:$4 sm:$0xff]  }
 0x1b9   : > { %v13964_v22 = vld [vmem:[%s15419_s30 + $0x1718] ss:$36 sps:$4 sm:$0xff]  }
 0x1ba   : > { %9811 = vmatpush1.bf16.msra.mxu0 %v13901_v27  ;;  %v13969_v27 = vld [vmem:[%s15419_s30 + $0x12e4] ss:$36 sps:$4 sm:$0xff]  }
 0x1bb   : > { %9852 = vmatpush1.bf16.msra.mxu1 %v13904_v28  ;;  %9812 = vmatprep.subr.bf16.mxu0 %v13909_v30  ;;  %v13972_v28 = vld [vmem:[%s15419_s30 + $0x1764] ss:$36 sps:$4 sm:$0xff]  }
 0x1bc   : > { %9853 = vmatprep.subr.bf16.mxu1 %v13912_v31  ;;  %v13967_v30 = vld [vmem:[%s15419_s30 + $0x12e0] ss:$36 sps:$4 sm:$0xff]  }
 0x1bd   : > { %v13970_v31 = vld [vmem:[%s15419_s30 + $0x1760] ss:$36 sps:$4 sm:$0xff]  }
 0x1be   : > { %9813 = vmatpush1.bf16.msra.mxu0 %v13907_v35  ;;  %v13975_v35 = vld [vmem:[%s15419_s30 + $0x132c] ss:$36 sps:$4 sm:$0xff]  }
 0x1bf   : > { %9854 = vmatpush1.bf16.msra.mxu1 %v13910_v32  ;;  %9814 = vmatprep.subr.bf16.mxu0 %v13915_v44  ;;  %v13978_v32 = vld [vmem:[%s15419_s30 + $0x17ac] ss:$36 sps:$4 sm:$0xff]  }
 0x1c0   : > { %9855 = vmatprep.subr.bf16.mxu1 %v13918_v34  ;;  %v13973_v44 = vld [vmem:[%s15419_s30 + $0x1328] ss:$36 sps:$4 sm:$0xff]  }
 0x1c1   : > { %v13976_v34 = vld [vmem:[%s15419_s30 + $0x17a8] ss:$36 sps:$4 sm:$0xff]  }
 0x1c2   : > { %9815 = vmatpush1.bf16.msra.mxu0 %v13913_v36  ;;  %v13981_v36 = vld [vmem:[%s15419_s30 + $0x1374] ss:$36 sps:$4 sm:$0xff]  }
 0x1c3   : > { %9856 = vmatpush1.bf16.msra.mxu1 %v13916_v43  ;;  %9816 = vmatprep.subr.bf16.mxu0 %v13921_v45  ;;  %v13984_v43 = vld [vmem:[%s15419_s30 + $0x17f4] ss:$36 sps:$4 sm:$0xff]  }
 0x1c4   : > { %9857 = vmatprep.subr.bf16.mxu1 %v13924_v46  ;;  %v13979_v45 = vld [vmem:[%s15419_s30 + $0x1370] ss:$36 sps:$4 sm:$0xff]  }
 0x1c5   : > { %v13982_v46 = vld [vmem:[%s15419_s30 + $0x17f0] ss:$36 sps:$4 sm:$0xff]  }
 0x1c6   : > { %9817 = vmatpush1.bf16.msra.mxu0 %v13919_v50  ;;  %v13987_v50 = vld [vmem:[%s15419_s30 + $0x13bc] ss:$36 sps:$4 sm:$0xff]  }
 0x1c7   : > { %9858 = vmatpush1.bf16.msra.mxu1 %v13922_v51  ;;  %9818 = vmatprep.subr.bf16.mxu0 %v13927_v59  ;;  %v13990_v51 = vld [vmem:[%s15419_s30 + $0x183c] ss:$36 sps:$4 sm:$0xff]  }
 0x1c8   : > { %9859 = vmatprep.subr.bf16.mxu1 %v13930_v62 }
 0x1ca   : > { %9819 = vmatpush1.bf16.msra.mxu0 %v13925_v53  ;;  %v13985_v53 = vld [vmem:[%s15419_s30 + $0x13b8] ss:$36 sps:$4 sm:$0xff]  }
 0x1cb   : > { %9860 = vmatpush1.bf16.msra.mxu1 %v13928_v54  ;;  %9820 = vmatprep.subr.bf16.mxu0 %v13933_v55  ;;  %v13988_v54 = vld [vmem:[%s15419_s30 + $0x1838] ss:$36 sps:$4 sm:$0xff]  }
 0x1cc   : > { %9861 = vmatprep.subr.bf16.mxu1 %v13936_v56 }
 0x1ce   : > { %9821 = vmatpush1.bf16.msra.mxu0 %v13931_v57 }
 0x1cf   : > { %9862 = vmatpush1.bf16.msra.mxu1 %v13934_v58  ;;  %9822 = vmatprep.subr.bf16.mxu0 %v13939_v63 }
 0x1d0   : > { %9863 = vmatprep.subr.bf16.mxu1 %v13942_v0 }
 0x1d2   : > { %9823 = vmatpush1.bf16.msra.mxu0 %v13937_v1 }
 0x1d3   : > { %9864 = vmatpush1.bf16.msra.mxu1 %v13940_v2  ;;  %9824 = vmatprep.subr.bf16.mxu0 %v13945_v3 }
 0x1d4   : > { %9865 = vmatprep.subr.bf16.mxu1 %v13948_v4  ;;  %v13996_v4 = vld [vmem:[%s15419_s30 + $0x1884] ss:$36 sps:$4 sm:$0xff]  }
 0x1d6   : > { %9825 = vmatpush1.bf16.msra.mxu0 %v13943_v5 }
 0x1d7   : > { %9866 = vmatpush1.bf16.msra.mxu1 %v13946_v6  ;;  %9876 = vmatprep.subr.bf16.mxu0 %v13951_v9  ;;  %v13994_v6 = vld [vmem:[%s15419_s30 + $0x1880] ss:$36 sps:$4 sm:$0xff]   ;;  %v13999_v9 = vld [vmem:[%s15419_s30 + $0x144c] ss:$36 sps:$4 sm:$0xff]  }
 0x1d8   : > { %9917 = vmatprep.subr.bf16.mxu1 %v13954_v10  ;;  %v14002_v10 = vld [vmem:[%s15419_s30 + $0x18cc] ss:$36 sps:$4 sm:$0xff]  }
 0x1d9   : > { %9827 = vmatmul.mubr.bf16.vlgmr.msra.gmra.mrb[24].mxu0 %v15584_v17 }
 0x1da   : > { %9868 = vmatmul.mubr.bf16.vlgmr.msra.gmra.mrb[24].mxu1 %v15588_v18  ;;  %9877 = vmatpush1.bf16.msra.mxu0 %v13949_v11  ;;  %v13997_v11 = vld [vmem:[%s15419_s30 + $0x1448] ss:$36 sps:$4 sm:$0xff]  }
 0x1db   : > { %9918 = vmatpush1.bf16.msra.mxu1 %v13952_v12  ;;  %9878 = vmatprep.subr.bf16.mxu0 %v13957_v14  ;;  %v14000_v12 = vld [vmem:[%s15419_s30 + $0x18c8] ss:$36 sps:$4 sm:$0xff]   ;;  %v14005_v14 = vld [vmem:[%s15419_s30 + $0x1494] ss:$36 sps:$4 sm:$0xff]  }
 0x1dc   : > { %9919 = vmatprep.subr.bf16.mxu1 %v13960_v15  ;;  %9908 = vmatprep.mubr.bf16.mxu0 %v15602_v25  ;;  %v14008_v15 = vld [vmem:[%s15419_s30 + $0x1914] ss:$36 sps:$4 sm:$0xff]  }
 0x1dd   : > { %9949 = vmatprep.mubr.bf16.mxu1 %v15606_v26 }
 0x1de   : > { %9879 = vmatpush1.bf16.msra.mxu0 %v13955_v29  ;;  %v14003_v29 = vld [vmem:[%s15419_s30 + $0x1490] ss:$36 sps:$4 sm:$0xff]  }
 0x1df   : > { %9920 = vmatpush1.bf16.msra.mxu1 %v13958_v16  ;;  %9880 = vmatprep.subr.bf16.mxu0 %v13963_v33  ;;  %v14006_v16 = vld [vmem:[%s15419_s30 + $0x1910] ss:$36 sps:$4 sm:$0xff]   ;;  %v14011_v33 = vld [vmem:[%s15419_s30 + $0x14dc] ss:$36 sps:$4 sm:$0xff]  }
 0x1e0   : > { %9921 = vmatprep.subr.bf16.mxu1 %v13966_v20  ;;  %v14014_v20 = vld [vmem:[%s15419_s30 + $0x195c] ss:$36 sps:$4 sm:$0xff]  }
 0x1e2   : > { %9881 = vmatpush1.bf16.msra.mxu0 %v13961_v21  ;;  %v14009_v21 = vld [vmem:[%s15419_s30 + $0x14d8] ss:$36 sps:$4 sm:$0xff]  }
 0x1e3   : > { %9922 = vmatpush1.bf16.msra.mxu1 %v13964_v22  ;;  %9882 = vmatprep.subr.bf16.mxu0 %v13969_v27  ;;  %v14012_v22 = vld [vmem:[%s15419_s30 + $0x1958] ss:$36 sps:$4 sm:$0xff]   ;;  %v14017_v27 = vld [vmem:[%s15419_s30 + $0x1524] ss:$36 sps:$4 sm:$0xff]  }
 0x1e4   : > { %9923 = vmatprep.subr.bf16.mxu1 %v13972_v28  ;;  %v14020_v28 = vld [vmem:[%s15419_s30 + $0x19a4] ss:$36 sps:$4 sm:$0xff]  }
 0x1e6   : > { %9883 = vmatpush1.bf16.msra.mxu0 %v13967_v30  ;;  %v14015_v30 = vld [vmem:[%s15419_s30 + $0x1520] ss:$36 sps:$4 sm:$0xff]  }
 0x1e7   : > { %9924 = vmatpush1.bf16.msra.mxu1 %v13970_v31  ;;  %9884 = vmatprep.subr.bf16.mxu0 %v13975_v35  ;;  %v14018_v31 = vld [vmem:[%s15419_s30 + $0x19a0] ss:$36 sps:$4 sm:$0xff]   ;;  %v14023_v35 = vld [vmem:[%s15419_s30 + $0x156c] ss:$36 sps:$4 sm:$0xff]  }
 0x1e8   : > { %9925 = vmatprep.subr.bf16.mxu1 %v13978_v32  ;;  %v14026_v32 = vld [vmem:[%s15419_s30 + $0x19ec] ss:$36 sps:$4 sm:$0xff]  }
 0x1ea   : > { %9885 = vmatpush1.bf16.msra.mxu0 %v13973_v44  ;;  %v14021_v44 = vld [vmem:[%s15419_s30 + $0x1568] ss:$36 sps:$4 sm:$0xff]  }
 0x1eb   : > { %9926 = vmatpush1.bf16.msra.mxu1 %v13976_v34  ;;  %9886 = vmatprep.subr.bf16.mxu0 %v13981_v36  ;;  %v14024_v34 = vld [vmem:[%s15419_s30 + $0x19e8] ss:$36 sps:$4 sm:$0xff]   ;;  %v14029_v36 = vld [vmem:[%s15419_s30 + $0x15b4] ss:$36 sps:$4 sm:$0xff]  }
 0x1ec   : > { %9927 = vmatprep.subr.bf16.mxu1 %v13984_v43  ;;  %v9582_v59 = vpop.f32.mrb[12].mxu0  ;;  %v14032_v43 = vld [vmem:[%s15419_s30 + $0x1a34] ss:$36 sps:$4 sm:$0xff]  }
 0x1ed   : > { %v9623_v62 = vpop.f32.mrb[12].mxu1  ;;  %v9583_v55 = vadd.f32 %v9582_v59, %v15970_v13  ;;  %v9584_v56 = vpop.f32.mrb[13].mxu0  ;;  %v13993_v13 = vld [vmem:[%s15419_s30 + $0x1404] ss:$36 sps:$4 sm:$0xff]   ;;  %v14033_v59 = vld [vmem:[%s15419_s30 + $0x15f8] ss:$36 sps:$4 sm:$0xff]  }
 0x1ee   : > { %v9625_v57 = vpop.f32.mrb[13].mxu1  ;;  %v9585_v58 = vadd.f32 %v9584_v56, %v15974_v19  ;;  %v9586_v63 = vpop.f32.mrb[14].mxu0  ;;  %9887 = vmatpush1.bf16.msra.mxu0 %v13979_v45  ;;  %v13991_v19 = vld [vmem:[%s15419_s30 + $0x1400] ss:$36 sps:$4 sm:$0xff]   ;;  %v14027_v45 = vld [vmem:[%s15419_s30 + $0x15b0] ss:$36 sps:$4 sm:$0xff]  }
 0x1ef   : > { %v9627_v0 = vpop.f32.mrb[14].mxu1  ;;  %9928 = vmatpush1.bf16.msra.mxu1 %v13982_v46  ;;  %v16044_v1 = vadd.f32 %v9623_v62, %v9583_v55  ;;  %v9587_v2 = vpop.f32.mrb[15].mxu0  ;;  %9888 = vmatprep.subr.bf16.mxu0 %v13987_v50  ;;  %v14030_v46 = vld [vmem:[%s15419_s30 + $0x1a30] ss:$36 sps:$4 sm:$0xff]   ;;  %v14035_v50 = vld [vmem:[%s15419_s30 + $0x15fc] ss:$36 sps:$4 sm:$0xff]  }
 0x1f0   : > { %v9628_v3 = vpop.f32.mrb[15].mxu1  ;;  %9929 = vmatprep.subr.bf16.mxu1 %v13990_v51  ;;  %v16048_v5 = vadd.f32 %v9625_v57, %v9585_v58  ;;  %v14038_v51 = vld [vmem:[%s15419_s30 + $0x1a7c] ss:$36 sps:$4 sm:$0xff]   ;;  %v14047_v57 = vld [vmem:[%s15419_s30 + $0x1b0c] ss:$36 sps:$4 sm:$0xff]  }
 0x1f1   : > { %v14036_v62 = vld [vmem:[%s15419_s30 + $0x1a78] ss:$36 sps:$4 sm:$0xff]   ;;  %v14039_v55 = vld [vmem:[%s15419_s30 + $0x1640] ss:$36 sps:$4 sm:$0xff]   ;;  %v14050_v58 = vld [vmem:[%s15419_s30 + $0x1f8c] ss:$36 sps:$4 sm:$0xff]  }
 0x1f2   : > { %9889 = vmatpush1.bf16.msra.mxu0 %v13985_v53  ;;  %v14041_v53 = vld [vmem:[%s15419_s30 + $0x1644] ss:$36 sps:$4 sm:$0xff]   ;;  %v14053_v2 = vld [vmem:[%s15419_s30 + $0x1b54] ss:$36 sps:$4 sm:$0xff]  }
 0x1f3   : > { %9930 = vmatpush1.bf16.msra.mxu1 %v13988_v54  ;;  %9890 = vmatprep.subr.bf16.mxu0 %v13993_v13  ;;  %v14044_v54 = vld [vmem:[%s15419_s30 + $0x1ac4] ss:$36 sps:$4 sm:$0xff]   ;;  %v14056_v3 = vld [vmem:[%s15419_s30 + $0x1fd4] ss:$36 sps:$4 sm:$0xff]  }
 0x1f4   : > { %9931 = vmatprep.subr.bf16.mxu1 %v13996_v4  ;;  %v14042_v56 = vld [vmem:[%s15419_s30 + $0x1ac0] ss:$36 sps:$4 sm:$0xff]   ;;  %v14045_v63 = vld [vmem:[%s15419_s30 + $0x1b08] ss:$36 sps:$4 sm:$0xff]   ;;  %v14051_v13 = vld [vmem:[%s15419_s30 + $0x1b50] ss:$36 sps:$4 sm:$0xff]  }
 0x1f5   : > { %v14048_v0 = vld [vmem:[%s15419_s30 + $0x1f88] ss:$36 sps:$4 sm:$0xff]   ;;  %v14054_v4 = vld [vmem:[%s15419_s30 + $0x1fd0] ss:$36 sps:$4 sm:$0xff]  }
 0x1f6   : > { %9891 = vmatpush1.bf16.msra.mxu0 %v13991_v19  ;;  %v14059_v19 = vld [vmem:[%s15419_s30 + $0x1b9c] ss:$36 sps:$4 sm:$0xff]  }
 0x1f7   : > { %9932 = vmatpush1.bf16.msra.mxu1 %v13994_v6  ;;  %9892 = vmatprep.subr.bf16.mxu0 %v13999_v9  ;;  %v14062_v6 = vld [vmem:[%s15419_s30 + $0x201c] ss:$36 sps:$4 sm:$0xff]  }
 0x1f8   : > { %9933 = vmatprep.subr.bf16.mxu1 %v14002_v10  ;;  %v14057_v9 = vld [vmem:[%s15419_s30 + $0x1b98] ss:$36 sps:$4 sm:$0xff]  }
 0x1f9   : > { %v14060_v10 = vld [vmem:[%s15419_s30 + $0x2018] ss:$36 sps:$4 sm:$0xff]  }
 0x1fa   : > { %9893 = vmatpush1.bf16.msra.mxu0 %v13997_v11  ;;  %v14065_v11 = vld [vmem:[%s15419_s30 + $0x1be4] ss:$36 sps:$4 sm:$0xff]  }
 0x1fb   : > { %9934 = vmatpush1.bf16.msra.mxu1 %v14000_v12  ;;  %9894 = vmatprep.subr.bf16.mxu0 %v14005_v14  ;;  %v14068_v12 = vld [vmem:[%s15419_s30 + $0x2064] ss:$36 sps:$4 sm:$0xff]  }
 0x1fc   : > { %9935 = vmatprep.subr.bf16.mxu1 %v14008_v15  ;;  %v14063_v14 = vld [vmem:[%s15419_s30 + $0x1be0] ss:$36 sps:$4 sm:$0xff]  }
 0x1fd   : > { %v14066_v15 = vld [vmem:[%s15419_s30 + $0x2060] ss:$36 sps:$4 sm:$0xff]  }
 0x1fe   : > { %9895 = vmatpush1.bf16.msra.mxu0 %v14003_v29  ;;  %v14071_v29 = vld [vmem:[%s15419_s30 + $0x1c2c] ss:$36 sps:$4 sm:$0xff]  }
 0x1ff   : > { %9936 = vmatpush1.bf16.msra.mxu1 %v14006_v16  ;;  %9896 = vmatprep.subr.bf16.mxu0 %v14011_v33  ;;  %v14074_v16 = vld [vmem:[%s15419_s30 + $0x20ac] ss:$36 sps:$4 sm:$0xff]  }
 0x200   : > { %9937 = vmatprep.subr.bf16.mxu1 %v14014_v20  ;;  %v14069_v33 = vld [vmem:[%s15419_s30 + $0x1c28] ss:$36 sps:$4 sm:$0xff]  }
 0x201   : > { %v14072_v20 = vld [vmem:[%s15419_s30 + $0x20a8] ss:$36 sps:$4 sm:$0xff]  }
 0x202   : > { %9897 = vmatpush1.bf16.msra.mxu0 %v14009_v21  ;;  %v14077_v21 = vld [vmem:[%s15419_s30 + $0x1c74] ss:$36 sps:$4 sm:$0xff]  }
 0x203   : > { %9938 = vmatpush1.bf16.msra.mxu1 %v14012_v22  ;;  %9898 = vmatprep.subr.bf16.mxu0 %v14017_v27  ;;  %v14080_v22 = vld [vmem:[%s15419_s30 + $0x20f4] ss:$36 sps:$4 sm:$0xff]  }
 0x204   : > { %9939 = vmatprep.subr.bf16.mxu1 %v14020_v28  ;;  %v14075_v27 = vld [vmem:[%s15419_s30 + $0x1c70] ss:$36 sps:$4 sm:$0xff]  }
 0x205   : > { %v14078_v28 = vld [vmem:[%s15419_s30 + $0x20f0] ss:$36 sps:$4 sm:$0xff]  }
 0x206   : > { %9899 = vmatpush1.bf16.msra.mxu0 %v14015_v30  ;;  %v14083_v30 = vld [vmem:[%s15419_s30 + $0x1cbc] ss:$36 sps:$4 sm:$0xff]  }
 0x207   : > { %9940 = vmatpush1.bf16.msra.mxu1 %v14018_v31  ;;  %9900 = vmatprep.subr.bf16.mxu0 %v14023_v35  ;;  %v14086_v31 = vld [vmem:[%s15419_s30 + $0x213c] ss:$36 sps:$4 sm:$0xff]  }
 0x208   : > { %9941 = vmatprep.subr.bf16.mxu1 %v14026_v32  ;;  %v253_v32 = vld [vmem:[#allocation2] sm:$0xff] }
 0x20a   : > { %9901 = vmatpush1.bf16.msra.mxu0 %v14021_v44 }
 0x20b   : > { %9942 = vmatpush1.bf16.msra.mxu1 %v14024_v34  ;;  %9902 = vmatprep.subr.bf16.mxu0 %v14029_v36  ;;  %v14081_v34 = vld [vmem:[%s15419_s30 + $0x1cb8] ss:$36 sps:$4 sm:$0xff]  }
 0x20c   : > { %9943 = vmatprep.subr.bf16.mxu1 %v14032_v43  ;;  %v14084_v36 = vld [vmem:[%s15419_s30 + $0x2138] ss:$36 sps:$4 sm:$0xff]  }
 0x20e   : > { %9903 = vmatpush1.bf16.msra.mxu0 %v14027_v45 }
 0x20f   : > { %9944 = vmatpush1.bf16.msra.mxu1 %v14030_v46  ;;  %9904 = vmatprep.subr.bf16.mxu0 %v14035_v50  ;;  %v254_v46 = vld [vmem:[#allocation2 + $0x8] sm:$0xff] }
 0x210   : > { %9945 = vmatprep.subr.bf16.mxu1 %v14038_v51 }
 0x212   : > { %9905 = vmatpush1.bf16.msra.mxu0 %v14033_v59 }
 0x213   : > { %9946 = vmatpush1.bf16.msra.mxu1 %v14036_v62  ;;  %9906 = vmatprep.subr.bf16.mxu0 %v14041_v53 }
 0x214   : > { %9947 = vmatprep.subr.bf16.mxu1 %v14044_v54 }
 0x216   : > { %9907 = vmatpush1.bf16.msra.mxu0 %v14039_v55 }
 0x217   : > { %9948 = vmatpush1.bf16.msra.mxu1 %v14042_v56  ;;  %9958 = vmatprep.subr.bf16.mxu0 %v14047_v57  ;;  %v14089_v56 = vld [vmem:[%s15419_s30 + $0x1d04] ss:$36 sps:$4 sm:$0xff]  }
 0x218   : > { %9999 = vmatprep.subr.bf16.mxu1 %v14050_v58 }
 0x219   : > { %9909 = vmatmul.mubr.bf16.vlgmr.msra.gmra.mrb[28].mxu0 %v15676_v39 }
 0x21a   : > { %9950 = vmatmul.mubr.bf16.vlgmr.msra.gmra.mrb[28].mxu1 %v15680_v40  ;;  %9959 = vmatpush1.bf16.msra.mxu0 %v14045_v63  ;;  %v14087_v63 = vld [vmem:[%s15419_s30 + $0x1d00] ss:$36 sps:$4 sm:$0xff]  }
 0x21b   : > { %10000 = vmatpush1.bf16.msra.mxu1 %v14048_v0  ;;  %9960 = vmatprep.subr.bf16.mxu0 %v14053_v2  ;;  %v14090_v0 = vld [vmem:[%s15419_s30 + $0x2180] ss:$36 sps:$4 sm:$0xff]   ;;  %v14095_v2 = vld [vmem:[%s15419_s30 + $0x1d4c] ss:$36 sps:$4 sm:$0xff]  }
 0x21c   : > { %10001 = vmatprep.subr.bf16.mxu1 %v14056_v3  ;;  %9990 = vmatprep.mubr.bf16.mxu0 %v15692_v23  ;;  %v14098_v3 = vld [vmem:[%s15419_s30 + $0x21cc] ss:$36 sps:$4 sm:$0xff]  }
 0x21d   : > { %10031 = vmatprep.mubr.bf16.mxu1 %v15696_v24 }
 0x21e   : > { %9961 = vmatpush1.bf16.msra.mxu0 %v14051_v13  ;;  %v14093_v13 = vld [vmem:[%s15419_s30 + $0x1d48] ss:$36 sps:$4 sm:$0xff]  }
 0x21f   : > { %10002 = vmatpush1.bf16.msra.mxu1 %v14054_v4  ;;  %9962 = vmatprep.subr.bf16.mxu0 %v14059_v19  ;;  %v14096_v4 = vld [vmem:[%s15419_s30 + $0x21c8] ss:$36 sps:$4 sm:$0xff]   ;;  %v14101_v19 = vld [vmem:[%s15419_s30 + $0x1d94] ss:$36 sps:$4 sm:$0xff]  }
 0x220   : > { %10003 = vmatprep.subr.bf16.mxu1 %v14062_v6  ;;  %v14104_v6 = vld [vmem:[%s15419_s30 + $0x2214] ss:$36 sps:$4 sm:$0xff]  }
 0x222   : > { %9963 = vmatpush1.bf16.msra.mxu0 %v14057_v9  ;;  %v14099_v9 = vld [vmem:[%s15419_s30 + $0x1d90] ss:$36 sps:$4 sm:$0xff]  }
 0x223   : > { %10004 = vmatpush1.bf16.msra.mxu1 %v14060_v10  ;;  %9964 = vmatprep.subr.bf16.mxu0 %v14065_v11  ;;  %v14102_v10 = vld [vmem:[%s15419_s30 + $0x2210] ss:$36 sps:$4 sm:$0xff]   ;;  %v14107_v11 = vld [vmem:[%s15419_s30 + $0x1ddc] ss:$36 sps:$4 sm:$0xff]  }
 0x224   : > { %10005 = vmatprep.subr.bf16.mxu1 %v14068_v12  ;;  %v14110_v12 = vld [vmem:[%s15419_s30 + $0x225c] ss:$36 sps:$4 sm:$0xff]  }
 0x226   : > { %9965 = vmatpush1.bf16.msra.mxu0 %v14063_v14  ;;  %v14105_v14 = vld [vmem:[%s15419_s30 + $0x1dd8] ss:$36 sps:$4 sm:$0xff]  }
 0x227   : > { %10006 = vmatpush1.bf16.msra.mxu1 %v14066_v15  ;;  %9966 = vmatprep.subr.bf16.mxu0 %v14071_v29  ;;  %v14108_v15 = vld [vmem:[%s15419_s30 + $0x2258] ss:$36 sps:$4 sm:$0xff]   ;;  %v14113_v29 = vld [vmem:[%s15419_s30 + $0x1e24] ss:$36 sps:$4 sm:$0xff]  }
 0x228   : > { %10007 = vmatprep.subr.bf16.mxu1 %v14074_v16  ;;  %v14116_v16 = vld [vmem:[%s15419_s30 + $0x22a4] ss:$36 sps:$4 sm:$0xff]  }
 0x22a   : > { %9967 = vmatpush1.bf16.msra.mxu0 %v14069_v33  ;;  %v14111_v33 = vld [vmem:[%s15419_s30 + $0x1e20] ss:$36 sps:$4 sm:$0xff]  }
 0x22b   : > { %10008 = vmatpush1.bf16.msra.mxu1 %v14072_v20  ;;  %9968 = vmatprep.subr.bf16.mxu0 %v14077_v21  ;;  %v14114_v20 = vld [vmem:[%s15419_s30 + $0x22a0] ss:$36 sps:$4 sm:$0xff]   ;;  %v14119_v21 = vld [vmem:[%s15419_s30 + $0x1e6c] ss:$36 sps:$4 sm:$0xff]  }
 0x22c   : > { %10009 = vmatprep.subr.bf16.mxu1 %v14080_v22  ;;  %v9664_v35 = vpop.f32.mrb[16].mxu0  ;;  %v14122_v22 = vld [vmem:[%s15419_s30 + $0x22ec] ss:$36 sps:$4 sm:$0xff]  }
 0x22d   : > { %v9705_v44 = vpop.f32.mrb[16].mxu1  ;;  %v9665_v43 = vadd.f32 %v9664_v35, %v16044_v1  ;;  %v9666_v45 = vpop.f32.mrb[17].mxu0  ;;  %v14092_v1 = vld [vmem:[%s15419_s30 + $0x2184] ss:$36 sps:$4 sm:$0xff]   ;;  %v14123_v35 = vld [vmem:[%s15419_s30 + $0x1eb0] ss:$36 sps:$4 sm:$0xff]  }
 0x22e   : > { %v9707_v50 = vpop.f32.mrb[17].mxu1  ;;  %v9667_v51 = vadd.f32 %v9666_v45, %v16048_v5  ;;  %v9668_v59 = vpop.f32.mrb[18].mxu0  ;;  %9969 = vmatpush1.bf16.msra.mxu0 %v14075_v27  ;;  %v14117_v27 = vld [vmem:[%s15419_s30 + $0x1e68] ss:$36 sps:$4 sm:$0xff]  }
 0x22f   : > { %v9709_v62 = vpop.f32.mrb[18].mxu1  ;;  %10010 = vmatpush1.bf16.msra.mxu1 %v14078_v28  ;;  %v9706_v53 = vadd.f32 %v9705_v44, %v9665_v43  ;;  %v9669_v54 = vpop.f32.mrb[19].mxu0  ;;  %9970 = vmatprep.subr.bf16.mxu0 %v14083_v30  ;;  %v14120_v28 = vld [vmem:[%s15419_s30 + $0x22e8] ss:$36 sps:$4 sm:$0xff]   ;;  %v14125_v30 = vld [vmem:[%s15419_s30 + $0x1eb4] ss:$36 sps:$4 sm:$0xff]  }
 0x230   : > { %v9710_v55 = vpop.f32.mrb[19].mxu1  ;;  %10011 = vmatprep.subr.bf16.mxu1 %v14086_v31  ;;  %v9708_v57 = vadd.f32 %v9707_v50, %v9667_v51  ;;  %v14128_v31 = vld [vmem:[%s15419_s30 + $0x2334] ss:$36 sps:$4 sm:$0xff]   ;;  %v14131_v44 = vld [vmem:[%s15419_s30 + $0x1efc] ss:$36 sps:$4 sm:$0xff]  }
 0x231   : > { %v11342_v58 = vadd.f32 %v9706_v53, %v253_v32  ;;  %v14126_v32 = vld [vmem:[%s15419_s30 + $0x2330] ss:$36 sps:$4 sm:$0xff]   ;;  %v14132_v43 = vld [vmem:[%s15419_s30 + $0x2378] ss:$36 sps:$4 sm:$0xff]   ;;  %v14137_v45 = vld [vmem:[%s15419_s30 + $0x1f44] ss:$36 sps:$4 sm:$0xff]  }
 0x232   : > { %v11343_v5 = vadd.f32 %v9708_v57, %v254_v46  ;;  %9971 = vmatpush1.bf16.msra.mxu0 %v14081_v34  ;;  %v14134_v34 = vld [vmem:[%s15419_s30 + $0x237c] ss:$36 sps:$4 sm:$0xff]   ;;  %v14140_v46 = vld [vmem:[%s15419_s30 + $0x23c4] ss:$36 sps:$4 sm:$0xff]   ;;  %v14143_v59 = vld [vmem:[%s15419_s30 + $0x240c] ss:$36 sps:$4 sm:$0xff]  }
 0x233   : > { %10012 = vmatpush1.bf16.msra.mxu1 %v14084_v36  ;;  %11351 = vst [vmem:[#allocation2] sm:$0xff] %v11342_v58  ;;  %9972 = vmatprep.subr.bf16.mxu0 %v14089_v56  ;;  %v14129_v36 = vld [vmem:[%s15419_s30 + $0x1ef8] ss:$36 sps:$4 sm:$0xff]   ;;  %v14135_v50 = vld [vmem:[%s15419_s30 + $0x1f40] ss:$36 sps:$4 sm:$0xff]  }
 0x234   : > { %10013 = vmatprep.subr.bf16.mxu1 %v14092_v1  ;;  %11352 = vst [vmem:[#allocation2 + $0x8] sm:$0xff] %v11343_v5  ;;  %v14138_v51 = vld [vmem:[%s15419_s30 + $0x23c0] ss:$36 sps:$4 sm:$0xff]   ;;  %v14146_v62 = vld [vmem:[%s15419_s30 + $0x288c] ss:$36 sps:$4 sm:$0xff]  }
 0x235   : > { %v14141_v53 = vld [vmem:[%s15419_s30 + $0x2408] ss:$36 sps:$4 sm:$0xff]   ;;  %v14149_v55 = vld [vmem:[%s15419_s30 + $0x2454] ss:$36 sps:$4 sm:$0xff]   ;;  %v14155_v58 = vld [vmem:[%s15419_s30 + $0x249c] ss:$36 sps:$4 sm:$0xff]  }
 0x236   : > { %9973 = vmatpush1.bf16.msra.mxu0 %v14087_v63  ;;  %v14144_v54 = vld [vmem:[%s15419_s30 + $0x2888] ss:$36 sps:$4 sm:$0xff]   ;;  %v14152_v56 = vld [vmem:[%s15419_s30 + $0x28d4] ss:$36 sps:$4 sm:$0xff]   ;;  %v14158_v5 = vld [vmem:[%s15419_s30 + $0x291c] ss:$36 sps:$4 sm:$0xff]  }
 0x237   : > { %10014 = vmatpush1.bf16.msra.mxu1 %v14090_v0  ;;  %9974 = vmatprep.subr.bf16.mxu0 %v14095_v2  ;;  %v14147_v1 = vld [vmem:[%s15419_s30 + $0x2450] ss:$36 sps:$4 sm:$0xff]   ;;  %v14153_v63 = vld [vmem:[%s15419_s30 + $0x2498] ss:$36 sps:$4 sm:$0xff]   ;;  %v14161_v2 = vld [vmem:[%s15419_s30 + $0x24e4] ss:$36 sps:$4 sm:$0xff]  }
 0x238   : > { %10015 = vmatprep.subr.bf16.mxu1 %v14098_v3  ;;  %v14150_v57 = vld [vmem:[%s15419_s30 + $0x28d0] ss:$36 sps:$4 sm:$0xff]   ;;  %v14156_v0 = vld [vmem:[%s15419_s30 + $0x2918] ss:$36 sps:$4 sm:$0xff]   ;;  %v14164_v3 = vld [vmem:[%s15419_s30 + $0x2964] ss:$36 sps:$4 sm:$0xff]  }
 0x23a   : > { %9975 = vmatpush1.bf16.msra.mxu0 %v14093_v13  ;;  %v14159_v13 = vld [vmem:[%s15419_s30 + $0x24e0] ss:$36 sps:$4 sm:$0xff]  }
 0x23b   : > { %10016 = vmatpush1.bf16.msra.mxu1 %v14096_v4  ;;  %9976 = vmatprep.subr.bf16.mxu0 %v14101_v19  ;;  %v14162_v4 = vld [vmem:[%s15419_s30 + $0x2960] ss:$36 sps:$4 sm:$0xff]   ;;  %v14167_v19 = vld [vmem:[%s15419_s30 + $0x252c] ss:$36 sps:$4 sm:$0xff]  }
 0x23c   : > { %10017 = vmatprep.subr.bf16.mxu1 %v14104_v6  ;;  %v14170_v6 = vld [vmem:[%s15419_s30 + $0x29ac] ss:$36 sps:$4 sm:$0xff]  }
 0x23e   : > { %9977 = vmatpush1.bf16.msra.mxu0 %v14099_v9  ;;  %v14165_v9 = vld [vmem:[%s15419_s30 + $0x2528] ss:$36 sps:$4 sm:$0xff]  }
 0x23f   : > { %10018 = vmatpush1.bf16.msra.mxu1 %v14102_v10  ;;  %9978 = vmatprep.subr.bf16.mxu0 %v14107_v11  ;;  %v14168_v10 = vld [vmem:[%s15419_s30 + $0x29a8] ss:$36 sps:$4 sm:$0xff]   ;;  %v14173_v11 = vld [vmem:[%s15419_s30 + $0x2574] ss:$36 sps:$4 sm:$0xff]  }
 0x240   : > { %10019 = vmatprep.subr.bf16.mxu1 %v14110_v12  ;;  %v14176_v12 = vld [vmem:[%s15419_s30 + $0x29f4] ss:$36 sps:$4 sm:$0xff]  }
 0x242   : > { %9979 = vmatpush1.bf16.msra.mxu0 %v14105_v14  ;;  %v14171_v14 = vld [vmem:[%s15419_s30 + $0x2570] ss:$36 sps:$4 sm:$0xff]  }
 0x243   : > { %10020 = vmatpush1.bf16.msra.mxu1 %v14108_v15  ;;  %9980 = vmatprep.subr.bf16.mxu0 %v14113_v29  ;;  %v14174_v15 = vld [vmem:[%s15419_s30 + $0x29f0] ss:$36 sps:$4 sm:$0xff]   ;;  %v14179_v29 = vld [vmem:[%s15419_s30 + $0x25bc] ss:$36 sps:$4 sm:$0xff]  }
 0x244   : > { %10021 = vmatprep.subr.bf16.mxu1 %v14116_v16  ;;  %v14182_v16 = vld [vmem:[%s15419_s30 + $0x2a3c] ss:$36 sps:$4 sm:$0xff]  }
 0x246   : > { %9981 = vmatpush1.bf16.msra.mxu0 %v14111_v33 }
 0x247   : > { %10022 = vmatpush1.bf16.msra.mxu1 %v14114_v20  ;;  %9982 = vmatprep.subr.bf16.mxu0 %v14119_v21  ;;  %v14177_v21 = vld [vmem:[%s15419_s30 + $0x25b8] ss:$36 sps:$4 sm:$0xff]  }
 0x248   : > { %10023 = vmatprep.subr.bf16.mxu1 %v14122_v22  ;;  %v14180_v22 = vld [vmem:[%s15419_s30 + $0x2a38] ss:$36 sps:$4 sm:$0xff]  }
 0x24a   : > { %9983 = vmatpush1.bf16.msra.mxu0 %v14117_v27 }
 0x24b   : > { %10024 = vmatpush1.bf16.msra.mxu1 %v14120_v28  ;;  %9984 = vmatprep.subr.bf16.mxu0 %v14125_v30 }
 0x24c   : > { %10025 = vmatprep.subr.bf16.mxu1 %v14128_v31 }
 0x24e   : > { %9985 = vmatpush1.bf16.msra.mxu0 %v14123_v35 }
 0x24f   : > { %10026 = vmatpush1.bf16.msra.mxu1 %v14126_v32  ;;  %9986 = vmatprep.subr.bf16.mxu0 %v14131_v44 }
 0x250   : > { %10027 = vmatprep.subr.bf16.mxu1 %v14134_v34 }
 0x252   : > { %9987 = vmatpush1.bf16.msra.mxu0 %v14129_v36  ;;  %v14185_v36 = vld [vmem:[%s15419_s30 + $0x2604] ss:$36 sps:$4 sm:$0xff]  }
 0x253   : > { %10028 = vmatpush1.bf16.msra.mxu1 %v14132_v43  ;;  %9988 = vmatprep.subr.bf16.mxu0 %v14137_v45  ;;  %v14188_v43 = vld [vmem:[%s15419_s30 + $0x2a84] ss:$36 sps:$4 sm:$0xff]  }
 0x254   : > { %10029 = vmatprep.subr.bf16.mxu1 %v14140_v46  ;;  %v14183_v45 = vld [vmem:[%s15419_s30 + $0x2600] ss:$36 sps:$4 sm:$0xff]  }
 0x255   : > { %v14186_v46 = vld [vmem:[%s15419_s30 + $0x2a80] ss:$36 sps:$4 sm:$0xff]  }
 0x256   : > { %9989 = vmatpush1.bf16.msra.mxu0 %v14135_v50  ;;  %v14191_v50 = vld [vmem:[%s15419_s30 + $0x264c] ss:$36 sps:$4 sm:$0xff]  }
 0x257   : > { %10030 = vmatpush1.bf16.msra.mxu1 %v14138_v51  ;;  %10040 = vmatprep.subr.bf16.mxu0 %v14143_v59  ;;  %v14194_v51 = vld [vmem:[%s15419_s30 + $0x2acc] ss:$36 sps:$4 sm:$0xff]  }
 0x258   : > { %10081 = vmatprep.subr.bf16.mxu1 %v14146_v62  ;;  %v14189_v59 = vld [vmem:[%s15419_s30 + $0x2648] ss:$36 sps:$4 sm:$0xff]  }
 0x259   : > { %9991 = vmatmul.mubr.bf16.vlgmr.msra.gmra.mrb[32].mxu0 %v15767_v60  ;;  %v14192_v62 = vld [vmem:[%s15419_s30 + $0x2ac8] ss:$36 sps:$4 sm:$0xff]  }
 0x25a   : > { %10032 = vmatmul.mubr.bf16.vlgmr.msra.gmra.mrb[32].mxu1 %v15771_v61  ;;  %10041 = vmatpush1.bf16.msra.mxu0 %v14141_v53  ;;  %v14197_v53 = vld [vmem:[%s15419_s30 + $0x2694] ss:$36 sps:$4 sm:$0xff]  }
 0x25b   : > { %10082 = vmatpush1.bf16.msra.mxu1 %v14144_v54  ;;  %10042 = vmatprep.subr.bf16.mxu0 %v14149_v55  ;;  %v14200_v54 = vld [vmem:[%s15419_s30 + $0x2b14] ss:$36 sps:$4 sm:$0xff]  }
 0x25c   : > { %10083 = vmatprep.subr.bf16.mxu1 %v14152_v56  ;;  %10072 = vmatprep.mubr.bf16.mxu0 %v15782_v41  ;;  %v14195_v55 = vld [vmem:[%s15419_s30 + $0x2690] ss:$36 sps:$4 sm:$0xff]  }
 0x25d   : > { %10113 = vmatprep.mubr.bf16.mxu1 %v15786_v42  ;;  %v14198_v56 = vld [vmem:[%s15419_s30 + $0x2b10] ss:$36 sps:$4 sm:$0xff]  }
 0x25e   : > { %10043 = vmatpush1.bf16.msra.mxu0 %v14147_v1  ;;  %v14203_v1 = vld [vmem:[%s15419_s30 + $0x26dc] ss:$36 sps:$4 sm:$0xff]  }
 0x25f   : > { %10084 = vmatpush1.bf16.msra.mxu1 %v14150_v57  ;;  %10044 = vmatprep.subr.bf16.mxu0 %v14155_v58  ;;  %v14206_v57 = vld [vmem:[%s15419_s30 + $0x2b5c] ss:$36 sps:$4 sm:$0xff]  }
 0x260   : > { %10085 = vmatprep.subr.bf16.mxu1 %v14158_v5  ;;  %v14201_v58 = vld [vmem:[%s15419_s30 + $0x26d8] ss:$36 sps:$4 sm:$0xff]  }
 0x261   : > { %v14204_v5 = vld [vmem:[%s15419_s30 + $0x2b58] ss:$36 sps:$4 sm:$0xff]  }
 0x262   : > { %10045 = vmatpush1.bf16.msra.mxu0 %v14153_v63  ;;  %v14209_v63 = vld [vmem:[%s15419_s30 + $0x2724] ss:$36 sps:$4 sm:$0xff]  }
 0x263   : > { %10086 = vmatpush1.bf16.msra.mxu1 %v14156_v0  ;;  %10046 = vmatprep.subr.bf16.mxu0 %v14161_v2  ;;  %v14212_v0 = vld [vmem:[%s15419_s30 + $0x2ba4] ss:$36 sps:$4 sm:$0xff]  }
 0x264   : > { %10087 = vmatprep.subr.bf16.mxu1 %v14164_v3  ;;  %v14207_v2 = vld [vmem:[%s15419_s30 + $0x2720] ss:$36 sps:$4 sm:$0xff]  }
 0x265   : > { %v14210_v3 = vld [vmem:[%s15419_s30 + $0x2ba0] ss:$36 sps:$4 sm:$0xff]  }
 0x266   : > { %10047 = vmatpush1.bf16.msra.mxu0 %v14159_v13  ;;  %v14215_v13 = vld [vmem:[%s15419_s30 + $0x276c] ss:$36 sps:$4 sm:$0xff]  }
 0x267   : > { %10088 = vmatpush1.bf16.msra.mxu1 %v14162_v4  ;;  %10048 = vmatprep.subr.bf16.mxu0 %v14167_v19  ;;  %v14218_v4 = vld [vmem:[%s15419_s30 + $0x2bec] ss:$36 sps:$4 sm:$0xff]  }
 0x268   : > { %10089 = vmatprep.subr.bf16.mxu1 %v14170_v6  ;;  %v14213_v19 = vld [vmem:[%s15419_s30 + $0x2768] ss:$36 sps:$4 sm:$0xff]  }
 0x269   : > { %v14216_v6 = vld [vmem:[%s15419_s30 + $0x2be8] ss:$36 sps:$4 sm:$0xff]  }
 0x26a   : > { %10049 = vmatpush1.bf16.msra.mxu0 %v14165_v9  ;;  %v14221_v9 = vld [vmem:[%s15419_s30 + $0x27b4] ss:$36 sps:$4 sm:$0xff]  }
 0x26b   : > { %10090 = vmatpush1.bf16.msra.mxu1 %v14168_v10  ;;  %10050 = vmatprep.subr.bf16.mxu0 %v14173_v11  ;;  %v14224_v10 = vld [vmem:[%s15419_s30 + $0x2c34] ss:$36 sps:$4 sm:$0xff]  }
 0x26c   : > { %10091 = vmatprep.subr.bf16.mxu1 %v14176_v12  ;;  %v9746_v33 = vpop.f32.mrb[20].mxu0  ;;  %v14219_v11 = vld [vmem:[%s15419_s30 + $0x27b0] ss:$36 sps:$4 sm:$0xff]  }
 0x26d   : > { %v9787_v20 = vpop.f32.mrb[20].mxu1  ;;  %v9748_v28 = vpop.f32.mrb[21].mxu0  ;;  %v14222_v12 = vld [vmem:[%s15419_s30 + $0x2c30] ss:$36 sps:$4 sm:$0xff]  }
 0x26e   : > { %v16186_v27 = vadd.f32 %v9787_v20, %v9746_v33  ;;  %v9789_v30 = vpop.f32.mrb[21].mxu1  ;;  %v9750_v35 = vpop.f32.mrb[22].mxu0  ;;  %10051 = vmatpush1.bf16.msra.mxu0 %v14171_v14  ;;  %v14227_v14 = vld [vmem:[%s15419_s30 + $0x27fc] ss:$36 sps:$4 sm:$0xff]   ;;  %v14233_v33 = vld [vmem:[%s15419_s30 + $0x2844] ss:$36 sps:$4 sm:$0xff]  }
 0x26f   : > { %v16188_v31 = vadd.f32 %v9789_v30, %v9748_v28  ;;  %v9791_v32 = vpop.f32.mrb[22].mxu1  ;;  %10092 = vmatpush1.bf16.msra.mxu1 %v14174_v15  ;;  %v9751_v44 = vpop.f32.mrb[23].mxu0  ;;  %10052 = vmatprep.subr.bf16.mxu0 %v14179_v29  ;;  %v14230_v15 = vld [vmem:[%s15419_s30 + $0x2c7c] ss:$36 sps:$4 sm:$0xff]   ;;  %v14236_v20 = vld [vmem:[%s15419_s30 + $0x2cc4] ss:$36 sps:$4 sm:$0xff]  }
 0x270   : > { %v9792_v34 = vpop.f32.mrb[23].mxu1  ;;  %10093 = vmatprep.subr.bf16.mxu1 %v14182_v16  ;;  %v14225_v29 = vld [vmem:[%s15419_s30 + $0x27f8] ss:$36 sps:$4 sm:$0xff]   ;;  %v14237_v35 = vld [vmem:[%s15419_s30 + $0x10] ss:$36 sps:$4 sm:$0xff]  }
 0x271   : > { %v14228_v16 = vld [vmem:[%s15419_s30 + $0x2c78] ss:$36 sps:$4 sm:$0xff]   ;;  %v14240_v32 = vld [vmem:[%s15419_s30 + $0x490] ss:$36 sps:$4 sm:$0xff]  }
 0x272   : > { %10053 = vmatpush1.bf16.msra.mxu0 %v14177_v21  ;;  %v14231_v21 = vld [vmem:[%s15419_s30 + $0x2840] ss:$36 sps:$4 sm:$0xff]   ;;  %v14239_v28 = vld [vmem:[%s15419_s30 + $0x14] ss:$36 sps:$4 sm:$0xff]  }
 0x273   : > { %10094 = vmatpush1.bf16.msra.mxu1 %v14180_v22  ;;  %10054 = vmatprep.subr.bf16.mxu0 %v14185_v36  ;;  %v14234_v22 = vld [vmem:[%s15419_s30 + $0x2cc0] ss:$36 sps:$4 sm:$0xff]   ;;  %v14242_v30 = vld [vmem:[%s15419_s30 + $0x494] ss:$36 sps:$4 sm:$0xff]  }
 0x274   : > { %10095 = vmatprep.subr.bf16.mxu1 %v14188_v43  ;;  %v14245_v44 = vld [vmem:[%s15419_s30 + $0x5c] ss:$36 sps:$4 sm:$0xff]  }
 0x275   : > { %v14248_v34 = vld [vmem:[%s15419_s30 + $0x4dc] ss:$36 sps:$4 sm:$0xff]  }
 0x276   : > { %10055 = vmatpush1.bf16.msra.mxu0 %v14183_v45  ;;  %v14243_v36 = vld [vmem:[%s15419_s30 + $0x58] ss:$36 sps:$4 sm:$0xff]   ;;  %v14251_v45 = vld [vmem:[%s15419_s30 + $0xa4] ss:$36 sps:$4 sm:$0xff]  }
 0x277   : > { %10096 = vmatpush1.bf16.msra.mxu1 %v14186_v46  ;;  %10056 = vmatprep.subr.bf16.mxu0 %v14191_v50  ;;  %v14246_v43 = vld [vmem:[%s15419_s30 + $0x4d8] ss:$36 sps:$4 sm:$0xff]   ;;  %v14254_v46 = vld [vmem:[%s15419_s30 + $0x524] ss:$36 sps:$4 sm:$0xff]  }
 0x278   : > { %10097 = vmatprep.subr.bf16.mxu1 %v14194_v51  ;;  %v14249_v50 = vld [vmem:[%s15419_s30 + $0xa0] ss:$36 sps:$4 sm:$0xff]  }
 0x279   : > { %v14252_v51 = vld [vmem:[%s15419_s30 + $0x520] ss:$36 sps:$4 sm:$0xff]  }
 0x27a   : > { %10057 = vmatpush1.bf16.msra.mxu0 %v14189_v59  ;;  %v14257_v59 = vld [vmem:[%s15419_s30 + $0xec] ss:$36 sps:$4 sm:$0xff]  }
 0x27b   : > { %10098 = vmatpush1.bf16.msra.mxu1 %v14192_v62  ;;  %10058 = vmatprep.subr.bf16.mxu0 %v14197_v53  ;;  %v14260_v62 = vld [vmem:[%s15419_s30 + $0x56c] ss:$36 sps:$4 sm:$0xff]  }
 0x27c   : > { %10099 = vmatprep.subr.bf16.mxu1 %v14200_v54  ;;  %v14255_v53 = vld [vmem:[%s15419_s30 + $0xe8] ss:$36 sps:$4 sm:$0xff]  }
 0x27d   : > { %v14258_v54 = vld [vmem:[%s15419_s30 + $0x568] ss:$36 sps:$4 sm:$0xff]  }
 0x27e   : > { %10059 = vmatpush1.bf16.msra.mxu0 %v14195_v55  ;;  %v14263_v55 = vld [vmem:[%s15419_s30 + $0x134] ss:$36 sps:$4 sm:$0xff]  }
 0x27f   : > { %10100 = vmatpush1.bf16.msra.mxu1 %v14198_v56  ;;  %10060 = vmatprep.subr.bf16.mxu0 %v14203_v1  ;;  %v14266_v56 = vld [vmem:[%s15419_s30 + $0x5b4] ss:$36 sps:$4 sm:$0xff]  }
 0x280   : > { %10101 = vmatprep.subr.bf16.mxu1 %v14206_v57  ;;  %v14261_v1 = vld [vmem:[%s15419_s30 + $0x130] ss:$36 sps:$4 sm:$0xff]  }
 0x281   : > { %v14264_v57 = vld [vmem:[%s15419_s30 + $0x5b0] ss:$36 sps:$4 sm:$0xff]  }
 0x282   : > { %10061 = vmatpush1.bf16.msra.mxu0 %v14201_v58  ;;  %v14269_v58 = vld [vmem:[%s15419_s30 + $0x17c] ss:$36 sps:$4 sm:$0xff]  }
 0x283   : > { %10102 = vmatpush1.bf16.msra.mxu1 %v14204_v5  ;;  %10062 = vmatprep.subr.bf16.mxu0 %v14209_v63  ;;  %v14272_v5 = vld [vmem:[%s15419_s30 + $0x5fc] ss:$36 sps:$4 sm:$0xff]  }
 0x284   : > { %10103 = vmatprep.subr.bf16.mxu1 %v14212_v0  ;;  %v14267_v63 = vld [vmem:[%s15419_s30 + $0x178] ss:$36 sps:$4 sm:$0xff]  }
 0x285   : > { %v14270_v0 = vld [vmem:[%s15419_s30 + $0x5f8] ss:$36 sps:$4 sm:$0xff]  }
 0x286   : > { %10063 = vmatpush1.bf16.msra.mxu0 %v14207_v2  ;;  %v14275_v2 = vld [vmem:[%s15419_s30 + $0x1c4] ss:$36 sps:$4 sm:$0xff]  }
 0x287   : > { %10104 = vmatpush1.bf16.msra.mxu1 %v14210_v3  ;;  %10064 = vmatprep.subr.bf16.mxu0 %v14215_v13  ;;  %v14278_v3 = vld [vmem:[%s15419_s30 + $0x644] ss:$36 sps:$4 sm:$0xff]  }
 0x288   : > { %10105 = vmatprep.subr.bf16.mxu1 %v14218_v4 }
 0x28a   : > { %10065 = vmatpush1.bf16.msra.mxu0 %v14213_v19  ;;  %v14273_v19 = vld [vmem:[%s15419_s30 + $0x1c0] ss:$36 sps:$4 sm:$0xff]  }
 0x28b   : > { %10106 = vmatpush1.bf16.msra.mxu1 %v14216_v6  ;;  %10066 = vmatprep.subr.bf16.mxu0 %v14221_v9  ;;  %v14276_v6 = vld [vmem:[%s15419_s30 + $0x640] ss:$36 sps:$4 sm:$0xff]  }
 0x28c   : > { %10107 = vmatprep.subr.bf16.mxu1 %v14224_v10 }
 0x28e   : > { %10067 = vmatpush1.bf16.msra.mxu0 %v14219_v11 }
 0x28f   : > { %10108 = vmatpush1.bf16.msra.mxu1 %v14222_v12  ;;  %10068 = vmatprep.subr.bf16.mxu0 %v14227_v14 }
 0x290   : > { %10109 = vmatprep.subr.bf16.mxu1 %v14230_v15 }
 0x292   : > { %10069 = vmatpush1.bf16.msra.mxu0 %v14225_v29 }
 0x293   : > { %10110 = vmatpush1.bf16.msra.mxu1 %v14228_v16  ;;  %10070 = vmatprep.subr.bf16.mxu0 %v14233_v33 }
 0x294   : > { %10111 = vmatprep.subr.bf16.mxu1 %v14236_v20  ;;  %v14284_v20 = vld [vmem:[%s15419_s30 + $0x68c] ss:$36 sps:$4 sm:$0xff]  }
 0x296   : > { %10071 = vmatpush1.bf16.msra.mxu0 %v14231_v21 }
 0x297   : > { %10112 = vmatpush1.bf16.msra.mxu1 %v14234_v22  ;;  %10122 = vmatprep.subr.bf16.mxu0 %v14239_v28  ;;  %v14282_v22 = vld [vmem:[%s15419_s30 + $0x688] ss:$36 sps:$4 sm:$0xff]   ;;  %v14287_v28 = vld [vmem:[%s15419_s30 + $0x254] ss:$36 sps:$4 sm:$0xff]  }
 0x298   : > { %10163 = vmatprep.subr.bf16.mxu1 %v14242_v30  ;;  %v14290_v30 = vld [vmem:[%s15419_s30 + $0x6d4] ss:$36 sps:$4 sm:$0xff]  }
 0x299   : > { %10073 = vmatmul.mubr.bf16.vlgmr.msra.gmra.mrb[36].mxu0 %v15860_v47 }
 0x29a   : > { %10114 = vmatmul.mubr.bf16.vlgmr.msra.gmra.mrb[36].mxu1 %v15864_v49  ;;  %10123 = vmatpush1.bf16.msra.mxu0 %v14237_v35  ;;  %v14285_v35 = vld [vmem:[%s15419_s30 + $0x250] ss:$36 sps:$4 sm:$0xff]  }
 0x29b   : > { %10164 = vmatpush1.bf16.msra.mxu1 %v14240_v32  ;;  %10124 = vmatprep.subr.bf16.mxu0 %v14245_v44  ;;  %v14288_v32 = vld [vmem:[%s15419_s30 + $0x6d0] ss:$36 sps:$4 sm:$0xff]   ;;  %v14293_v44 = vld [vmem:[%s15419_s30 + $0x29c] ss:$36 sps:$4 sm:$0xff]  }
 0x29c   : > { %10165 = vmatprep.subr.bf16.mxu1 %v14248_v34  ;;  %10154 = vmatprep.mubr.bf16.mxu0 %v15469_v48  ;;  %v14296_v34 = vld [vmem:[%s15419_s30 + $0x71c] ss:$36 sps:$4 sm:$0xff]  }
 0x29d   : > { %10195 = vmatprep.mubr.bf16.mxu1 %v15474_v52 }
 0x29e   : > { %10125 = vmatpush1.bf16.msra.mxu0 %v14243_v36  ;;  %v14291_v36 = vld [vmem:[%s15419_s30 + $0x298] ss:$36 sps:$4 sm:$0xff]  }
 0x29f   : > { %10166 = vmatpush1.bf16.msra.mxu1 %v14246_v43  ;;  %10126 = vmatprep.subr.bf16.mxu0 %v14251_v45  ;;  %v14294_v43 = vld [vmem:[%s15419_s30 + $0x718] ss:$36 sps:$4 sm:$0xff]   ;;  %v14299_v45 = vld [vmem:[%s15419_s30 + $0x2e4] ss:$36 sps:$4 sm:$0xff]  }
 0x2a0   : > { %10167 = vmatprep.subr.bf16.mxu1 %v14254_v46  ;;  %v14302_v46 = vld [vmem:[%s15419_s30 + $0x764] ss:$36 sps:$4 sm:$0xff]  }
 0x2a2   : > { %10127 = vmatpush1.bf16.msra.mxu0 %v14249_v50  ;;  %v14297_v50 = vld [vmem:[%s15419_s30 + $0x2e0] ss:$36 sps:$4 sm:$0xff]  }
 0x2a3   : > { %10168 = vmatpush1.bf16.msra.mxu1 %v14252_v51  ;;  %10128 = vmatprep.subr.bf16.mxu0 %v14257_v59  ;;  %v14300_v51 = vld [vmem:[%s15419_s30 + $0x760] ss:$36 sps:$4 sm:$0xff]   ;;  %v14305_v59 = vld [vmem:[%s15419_s30 + $0x32c] ss:$36 sps:$4 sm:$0xff]  }
 0x2a4   : > { %10169 = vmatprep.subr.bf16.mxu1 %v14260_v62  ;;  %v14308_v62 = vld [vmem:[%s15419_s30 + $0x7ac] ss:$36 sps:$4 sm:$0xff]  }
 0x2a6   : > { %10129 = vmatpush1.bf16.msra.mxu0 %v14255_v53  ;;  %v14303_v53 = vld [vmem:[%s15419_s30 + $0x328] ss:$36 sps:$4 sm:$0xff]  }
 0x2a7   : > { %10170 = vmatpush1.bf16.msra.mxu1 %v14258_v54  ;;  %10130 = vmatprep.subr.bf16.mxu0 %v14263_v55  ;;  %v14306_v54 = vld [vmem:[%s15419_s30 + $0x7a8] ss:$36 sps:$4 sm:$0xff]   ;;  %v14311_v55 = vld [vmem:[%s15419_s30 + $0x374] ss:$36 sps:$4 sm:$0xff]  }
 0x2a8   : > { %10171 = vmatprep.subr.bf16.mxu1 %v14266_v56  ;;  %v14314_v56 = vld [vmem:[%s15419_s30 + $0x7f4] ss:$36 sps:$4 sm:$0xff]  }
 0x2aa   : > { %10131 = vmatpush1.bf16.msra.mxu0 %v14261_v1  ;;  %v14309_v1 = vld [vmem:[%s15419_s30 + $0x370] ss:$36 sps:$4 sm:$0xff]  }
 0x2ab   : > { %10172 = vmatpush1.bf16.msra.mxu1 %v14264_v57  ;;  %10132 = vmatprep.subr.bf16.mxu0 %v14269_v58  ;;  %v14312_v57 = vld [vmem:[%s15419_s30 + $0x7f0] ss:$36 sps:$4 sm:$0xff]   ;;  %v14317_v58 = vld [vmem:[%s15419_s30 + $0x3bc] ss:$36 sps:$4 sm:$0xff]  }
 0x2ac   : > { %10173 = vmatprep.subr.bf16.mxu1 %v14272_v5  ;;  %v9828_v13 = vpop.f32.mrb[24].mxu0  ;;  %v14320_v5 = vld [vmem:[%s15419_s30 + $0x83c] ss:$36 sps:$4 sm:$0xff]  }
 0x2ad   : > { %v9869_v4 = vpop.f32.mrb[24].mxu1  ;;  %v9829_v9 = vadd.f32 %v9828_v13, %v16186_v27  ;;  %v9830_v10 = vpop.f32.mrb[25].mxu0  ;;  %v14281_v27 = vld [vmem:[%s15419_s30 + $0x20c] ss:$36 sps:$4 sm:$0xff]   ;;  %v14321_v13 = vld [vmem:[%s15419_s30 + $0x400] ss:$36 sps:$4 sm:$0xff]  }
 0x2ae   : > { %v9871_v11 = vpop.f32.mrb[25].mxu1  ;;  %v9831_v12 = vadd.f32 %v9830_v10, %v16188_v31  ;;  %v9832_v14 = vpop.f32.mrb[26].mxu0  ;;  %10133 = vmatpush1.bf16.msra.mxu0 %v14267_v63  ;;  %v14279_v31 = vld [vmem:[%s15419_s30 + $0x208] ss:$36 sps:$4 sm:$0xff]   ;;  %v14315_v63 = vld [vmem:[%s15419_s30 + $0x3b8] ss:$36 sps:$4 sm:$0xff]  }
 0x2af   : > { %v9873_v15 = vpop.f32.mrb[26].mxu1  ;;  %10174 = vmatpush1.bf16.msra.mxu1 %v14270_v0  ;;  %v16260_v29 = vadd.f32 %v9869_v4, %v9829_v9  ;;  %v9833_v16 = vpop.f32.mrb[27].mxu0  ;;  %10134 = vmatprep.subr.bf16.mxu0 %v14275_v2  ;;  %v14318_v0 = vld [vmem:[%s15419_s30 + $0x838] ss:$36 sps:$4 sm:$0xff]   ;;  %v14323_v2 = vld [vmem:[%s15419_s30 + $0x404] ss:$36 sps:$4 sm:$0xff]  }
 0x2b0   : > { %v9874_v33 = vpop.f32.mrb[27].mxu1  ;;  %10175 = vmatprep.subr.bf16.mxu1 %v14278_v3  ;;  %v16264_v21 = vadd.f32 %v9871_v11, %v9831_v12  ;;  %v14326_v3 = vld [vmem:[%s15419_s30 + $0x884] ss:$36 sps:$4 sm:$0xff]   ;;  %v14335_v11 = vld [vmem:[%s15419_s30 + $0x914] ss:$36 sps:$4 sm:$0xff]  }
 0x2b1   : > { %v14324_v4 = vld [vmem:[%s15419_s30 + $0x880] ss:$36 sps:$4 sm:$0xff]   ;;  %v14327_v9 = vld [vmem:[%s15419_s30 + $0x448] ss:$36 sps:$4 sm:$0xff]   ;;  %v14338_v12 = vld [vmem:[%s15419_s30 + $0xd94] ss:$36 sps:$4 sm:$0xff]  }
 0x2b2   : > { %10135 = vmatpush1.bf16.msra.mxu0 %v14273_v19  ;;  %v14329_v19 = vld [vmem:[%s15419_s30 + $0x44c] ss:$36 sps:$4 sm:$0xff]   ;;  %v14341_v16 = vld [vmem:[%s15419_s30 + $0x95c] ss:$36 sps:$4 sm:$0xff]  }
 0x2b3   : > { %10176 = vmatpush1.bf16.msra.mxu1 %v14276_v6  ;;  %10136 = vmatprep.subr.bf16.mxu0 %v14281_v27  ;;  %v14332_v6 = vld [vmem:[%s15419_s30 + $0x8cc] ss:$36 sps:$4 sm:$0xff]   ;;  %v14344_v33 = vld [vmem:[%s15419_s30 + $0xddc] ss:$36 sps:$4 sm:$0xff]  }
 0x2b4   : > { %10177 = vmatprep.subr.bf16.mxu1 %v14284_v20  ;;  %v14330_v10 = vld [vmem:[%s15419_s30 + $0x8c8] ss:$36 sps:$4 sm:$0xff]   ;;  %v14333_v14 = vld [vmem:[%s15419_s30 + $0x910] ss:$36 sps:$4 sm:$0xff]   ;;  %v14339_v27 = vld [vmem:[%s15419_s30 + $0x958] ss:$36 sps:$4 sm:$0xff]  }
 0x2b5   : > { %v14336_v15 = vld [vmem:[%s15419_s30 + $0xd90] ss:$36 sps:$4 sm:$0xff]   ;;  %v14342_v20 = vld [vmem:[%s15419_s30 + $0xdd8] ss:$36 sps:$4 sm:$0xff]  }
 0x2b6   : > { %10137 = vmatpush1.bf16.msra.mxu0 %v14279_v31  ;;  %v14347_v31 = vld [vmem:[%s15419_s30 + $0x9a4] ss:$36 sps:$4 sm:$0xff]  }
 0x2b7   : > { %10178 = vmatpush1.bf16.msra.mxu1 %v14282_v22  ;;  %10138 = vmatprep.subr.bf16.mxu0 %v14287_v28  ;;  %v14350_v22 = vld [vmem:[%s15419_s30 + $0xe24] ss:$36 sps:$4 sm:$0xff]  }
 0x2b8   : > { %10179 = vmatprep.subr.bf16.mxu1 %v14290_v30  ;;  %v14345_v28 = vld [vmem:[%s15419_s30 + $0x9a0] ss:$36 sps:$4 sm:$0xff]  }
 0x2b9   : > { %v14348_v30 = vld [vmem:[%s15419_s30 + $0xe20] ss:$36 sps:$4 sm:$0xff]  }
 0x2ba   : > { %10139 = vmatpush1.bf16.msra.mxu0 %v14285_v35  ;;  %v14353_v35 = vld [vmem:[%s15419_s30 + $0x9ec] ss:$36 sps:$4 sm:$0xff]  }
 0x2bb   : > { %10180 = vmatpush1.bf16.msra.mxu1 %v14288_v32  ;;  %10140 = vmatprep.subr.bf16.mxu0 %v14293_v44  ;;  %v14356_v32 = vld [vmem:[%s15419_s30 + $0xe6c] ss:$36 sps:$4 sm:$0xff]  }
 0x2bc   : > { %10181 = vmatprep.subr.bf16.mxu1 %v14296_v34  ;;  %v14351_v44 = vld [vmem:[%s15419_s30 + $0x9e8] ss:$36 sps:$4 sm:$0xff]  }
 0x2bd   : > { %v14354_v34 = vld [vmem:[%s15419_s30 + $0xe68] ss:$36 sps:$4 sm:$0xff]  }
 0x2be   : > { %10141 = vmatpush1.bf16.msra.mxu0 %v14291_v36  ;;  %v14359_v36 = vld [vmem:[%s15419_s30 + $0xa34] ss:$36 sps:$4 sm:$0xff]  }
 0x2bf   : > { %10182 = vmatpush1.bf16.msra.mxu1 %v14294_v43  ;;  %10142 = vmatprep.subr.bf16.mxu0 %v14299_v45  ;;  %v14362_v43 = vld [vmem:[%s15419_s30 + $0xeb4] ss:$36 sps:$4 sm:$0xff]  }
 0x2c0   : > { %10183 = vmatprep.subr.bf16.mxu1 %v14302_v46  ;;  %v14357_v45 = vld [vmem:[%s15419_s30 + $0xa30] ss:$36 sps:$4 sm:$0xff]  }
 0x2c1   : > { %v14360_v46 = vld [vmem:[%s15419_s30 + $0xeb0] ss:$36 sps:$4 sm:$0xff]  }
 0x2c2   : > { %10143 = vmatpush1.bf16.msra.mxu0 %v14297_v50  ;;  %v14365_v50 = vld [vmem:[%s15419_s30 + $0xa7c] ss:$36 sps:$4 sm:$0xff]  }
 0x2c3   : > { %10184 = vmatpush1.bf16.msra.mxu1 %v14300_v51  ;;  %10144 = vmatprep.subr.bf16.mxu0 %v14305_v59  ;;  %v14368_v51 = vld [vmem:[%s15419_s30 + $0xefc] ss:$36 sps:$4 sm:$0xff]  }
 0x2c4   : > { %10185 = vmatprep.subr.bf16.mxu1 %v14308_v62  ;;  %v14363_v59 = vld [vmem:[%s15419_s30 + $0xa78] ss:$36 sps:$4 sm:$0xff]  }
 0x2c5   : > { %v14366_v62 = vld [vmem:[%s15419_s30 + $0xef8] ss:$36 sps:$4 sm:$0xff]  }
 0x2c6   : > { %10145 = vmatpush1.bf16.msra.mxu0 %v14303_v53  ;;  %v14371_v53 = vld [vmem:[%s15419_s30 + $0xac4] ss:$36 sps:$4 sm:$0xff]  }
 0x2c7   : > { %10186 = vmatpush1.bf16.msra.mxu1 %v14306_v54  ;;  %10146 = vmatprep.subr.bf16.mxu0 %v14311_v55  ;;  %v14374_v54 = vld [vmem:[%s15419_s30 + $0xf44] ss:$36 sps:$4 sm:$0xff]  }
 0x2c8   : > { %10187 = vmatprep.subr.bf16.mxu1 %v14314_v56 }
 0x2ca   : > { %10147 = vmatpush1.bf16.msra.mxu0 %v14309_v1  ;;  %v14369_v1 = vld [vmem:[%s15419_s30 + $0xac0] ss:$36 sps:$4 sm:$0xff]  }
 0x2cb   : > { %10188 = vmatpush1.bf16.msra.mxu1 %v14312_v57  ;;  %10148 = vmatprep.subr.bf16.mxu0 %v14317_v58 }
 0x2cc   : > { %10189 = vmatprep.subr.bf16.mxu1 %v14320_v5 }
 0x2ce   : > { %10149 = vmatpush1.bf16.msra.mxu0 %v14315_v63  ;;  %v14372_v63 = vld [vmem:[%s15419_s30 + $0xf40] ss:$36 sps:$4 sm:$0xff]  }
 0x2cf   : > { %10190 = vmatpush1.bf16.msra.mxu1 %v14318_v0  ;;  %10150 = vmatprep.subr.bf16.mxu0 %v14323_v2 }
 0x2d0   : > { %10191 = vmatprep.subr.bf16.mxu1 %v14326_v3 }
 0x2d2   : > { %10151 = vmatpush1.bf16.msra.mxu0 %v14321_v13 }
 0x2d3   : > { %10192 = vmatpush1.bf16.msra.mxu1 %v14324_v4  ;;  %10152 = vmatprep.subr.bf16.mxu0 %v14329_v19 }
 0x2d4   : > { %10193 = vmatprep.subr.bf16.mxu1 %v14332_v6  ;;  %v14380_v6 = vld [vmem:[%s15419_s30 + $0xf8c] ss:$36 sps:$4 sm:$0xff]  }
 0x2d6   : > { %10153 = vmatpush1.bf16.msra.mxu0 %v14327_v9 }
 0x2d7   : > { %10194 = vmatpush1.bf16.msra.mxu1 %v14330_v10  ;;  %10204 = vmatprep.subr.bf16.mxu0 %v14335_v11  ;;  %v14378_v10 = vld [vmem:[%s15419_s30 + $0xf88] ss:$36 sps:$4 sm:$0xff]   ;;  %v14383_v11 = vld [vmem:[%s15419_s30 + $0xb54] ss:$36 sps:$4 sm:$0xff]  }
 0x2d8   : > { %10245 = vmatprep.subr.bf16.mxu1 %v14338_v12  ;;  %v14386_v12 = vld [vmem:[%s15419_s30 + $0xfd4] ss:$36 sps:$4 sm:$0xff]  }
 0x2d9   : > { %10155 = vmatmul.mubr.bf16.vlgmr.msra.gmra.mrb[40].mxu0 %v15496_v7 }
 0x2da   : > { %10196 = vmatmul.mubr.bf16.vlgmr.msra.gmra.mrb[40].mxu1 %v15498_v8  ;;  %10205 = vmatpush1.bf16.msra.mxu0 %v14333_v14  ;;  %v14381_v14 = vld [vmem:[%s15419_s30 + $0xb50] ss:$36 sps:$4 sm:$0xff]  }
 0x2db   : > { %10246 = vmatpush1.bf16.msra.mxu1 %v14336_v15  ;;  %10206 = vmatprep.subr.bf16.mxu0 %v14341_v16  ;;  %v14384_v15 = vld [vmem:[%s15419_s30 + $0xfd0] ss:$36 sps:$4 sm:$0xff]   ;;  %v14389_v16 = vld [vmem:[%s15419_s30 + $0xb9c] ss:$36 sps:$4 sm:$0xff]  }
 0x2dc   : > { %10247 = vmatprep.subr.bf16.mxu1 %v14344_v33  ;;  %10236 = vmatprep.mubr.bf16.mxu0 %v15536_v37  ;;  %v14392_v33 = vld [vmem:[%s15419_s30 + $0x101c] ss:$36 sps:$4 sm:$0xff]  }
 0x2dd   : > { %10277 = vmatprep.mubr.bf16.mxu1 %v15540_v38 }
 0x2de   : > { %10207 = vmatpush1.bf16.msra.mxu0 %v14339_v27  ;;  %v14387_v27 = vld [vmem:[%s15419_s30 + $0xb98] ss:$36 sps:$4 sm:$0xff]  }
 0x2df   : > { %10248 = vmatpush1.bf16.msra.mxu1 %v14342_v20  ;;  %10208 = vmatprep.subr.bf16.mxu0 %v14347_v31  ;;  %v14390_v20 = vld [vmem:[%s15419_s30 + $0x1018] ss:$36 sps:$4 sm:$0xff]   ;;  %v14395_v31 = vld [vmem:[%s15419_s30 + $0xbe4] ss:$36 sps:$4 sm:$0xff]  }
 0x2e0   : > { %10249 = vmatprep.subr.bf16.mxu1 %v14350_v22  ;;  %v14398_v22 = vld [vmem:[%s15419_s30 + $0x1064] ss:$36 sps:$4 sm:$0xff]  }
 0x2e2   : > { %10209 = vmatpush1.bf16.msra.mxu0 %v14345_v28  ;;  %v14393_v28 = vld [vmem:[%s15419_s30 + $0xbe0] ss:$36 sps:$4 sm:$0xff]  }
 0x2e3   : > { %10250 = vmatpush1.bf16.msra.mxu1 %v14348_v30  ;;  %10210 = vmatprep.subr.bf16.mxu0 %v14353_v35  ;;  %v14396_v30 = vld [vmem:[%s15419_s30 + $0x1060] ss:$36 sps:$4 sm:$0xff]   ;;  %v14401_v35 = vld [vmem:[%s15419_s30 + $0xc2c] ss:$36 sps:$4 sm:$0xff]  }
 0x2e4   : > { %10251 = vmatprep.subr.bf16.mxu1 %v14356_v32  ;;  %v14404_v32 = vld [vmem:[%s15419_s30 + $0x10ac] ss:$36 sps:$4 sm:$0xff]  }
 0x2e6   : > { %10211 = vmatpush1.bf16.msra.mxu0 %v14351_v44  ;;  %v14399_v44 = vld [vmem:[%s15419_s30 + $0xc28] ss:$36 sps:$4 sm:$0xff]  }
 0x2e7   : > { %10252 = vmatpush1.bf16.msra.mxu1 %v14354_v34  ;;  %10212 = vmatprep.subr.bf16.mxu0 %v14359_v36  ;;  %v14402_v34 = vld [vmem:[%s15419_s30 + $0x10a8] ss:$36 sps:$4 sm:$0xff]   ;;  %v14407_v36 = vld [vmem:[%s15419_s30 + $0xc74] ss:$36 sps:$4 sm:$0xff]  }
 0x2e8   : > { %10253 = vmatprep.subr.bf16.mxu1 %v14362_v43  ;;  %v14410_v43 = vld [vmem:[%s15419_s30 + $0x10f4] ss:$36 sps:$4 sm:$0xff]  }
 0x2ea   : > { %10213 = vmatpush1.bf16.msra.mxu0 %v14357_v45  ;;  %v14405_v45 = vld [vmem:[%s15419_s30 + $0xc70] ss:$36 sps:$4 sm:$0xff]  }
 0x2eb   : > { %10254 = vmatpush1.bf16.msra.mxu1 %v14360_v46  ;;  %10214 = vmatprep.subr.bf16.mxu0 %v14365_v50  ;;  %v14408_v46 = vld [vmem:[%s15419_s30 + $0x10f0] ss:$36 sps:$4 sm:$0xff]   ;;  %v14413_v50 = vld [vmem:[%s15419_s30 + $0xcbc] ss:$36 sps:$4 sm:$0xff]  }
 0x2ec   : > { %10255 = vmatprep.subr.bf16.mxu1 %v14368_v51  ;;  %v9910_v55 = vpop.f32.mrb[28].mxu0  ;;  %v14416_v51 = vld [vmem:[%s15419_s30 + $0x113c] ss:$36 sps:$4 sm:$0xff]  }
 0x2ed   : > { %v9951_v56 = vpop.f32.mrb[28].mxu1  ;;  %v9911_v57 = vadd.f32 %v9910_v55, %v16260_v29  ;;  %v9912_v58 = vpop.f32.mrb[29].mxu0  ;;  %v14377_v29 = vld [vmem:[%s15419_s30 + $0xb0c] ss:$36 sps:$4 sm:$0xff]   ;;  %v14417_v55 = vld [vmem:[%s15419_s30 + $0xd00] ss:$36 sps:$4 sm:$0xff]  }
 0x2ee   : > { %v9953_v5 = vpop.f32.mrb[29].mxu1  ;;  %v9913_v0 = vadd.f32 %v9912_v58, %v16264_v21  ;;  %v9914_v2 = vpop.f32.mrb[30].mxu0  ;;  %10215 = vmatpush1.bf16.msra.mxu0 %v14363_v59  ;;  %v14375_v21 = vld [vmem:[%s15419_s30 + $0xb08] ss:$36 sps:$4 sm:$0xff]   ;;  %v14411_v59 = vld [vmem:[%s15419_s30 + $0xcb8] ss:$36 sps:$4 sm:$0xff]  }
 0x2ef   : > { %v9955_v3 = vpop.f32.mrb[30].mxu1  ;;  %10256 = vmatpush1.bf16.msra.mxu1 %v14366_v62  ;;  %v16334_v13 = vadd.f32 %v9951_v56, %v9911_v57  ;;  %v9915_v4 = vpop.f32.mrb[31].mxu0  ;;  %10216 = vmatprep.subr.bf16.mxu0 %v14371_v53  ;;  %v14414_v62 = vld [vmem:[%s15419_s30 + $0x1138] ss:$36 sps:$4 sm:$0xff]   ;;  %v14419_v53 = vld [vmem:[%s15419_s30 + $0xd04] ss:$36 sps:$4 sm:$0xff]  }
 0x2f0   : > { %v9956_v19 = vpop.f32.mrb[31].mxu1  ;;  %10257 = vmatprep.subr.bf16.mxu1 %v14374_v54  ;;  %v16338_v9 = vadd.f32 %v9953_v5, %v9913_v0  ;;  %v14422_v54 = vld [vmem:[%s15419_s30 + $0x1184] ss:$36 sps:$4 sm:$0xff]   ;;  %v14428_v57 = vld [vmem:[%s15419_s30 + $0x11cc] ss:$36 sps:$4 sm:$0xff]  }
 0x2f1   : > { %v14420_v56 = vld [vmem:[%s15419_s30 + $0x1180] ss:$36 sps:$4 sm:$0xff]   ;;  %v14423_v58 = vld [vmem:[%s15419_s30 + $0xd48] ss:$36 sps:$4 sm:$0xff]   ;;  %v14434_v0 = vld [vmem:[%s15419_s30 + $0x1694] ss:$36 sps:$4 sm:$0xff]  }
 0x2f2   : > { %10217 = vmatpush1.bf16.msra.mxu0 %v14369_v1  ;;  %v14425_v1 = vld [vmem:[%s15419_s30 + $0xd4c] ss:$36 sps:$4 sm:$0xff]   ;;  %v14437_v4 = vld [vmem:[%s15419_s30 + $0x125c] ss:$36 sps:$4 sm:$0xff]  }
 0x2f3   : > { %10258 = vmatpush1.bf16.msra.mxu1 %v14372_v63  ;;  %10218 = vmatprep.subr.bf16.mxu0 %v14377_v29  ;;  %v14426_v5 = vld [vmem:[%s15419_s30 + $0x11c8] ss:$36 sps:$4 sm:$0xff]   ;;  %v14431_v63 = vld [vmem:[%s15419_s30 + $0x1214] ss:$36 sps:$4 sm:$0xff]   ;;  %v14440_v19 = vld [vmem:[%s15419_s30 + $0x16dc] ss:$36 sps:$4 sm:$0xff]  }
 0x2f4   : > { %10259 = vmatprep.subr.bf16.mxu1 %v14380_v6  ;;  %v14429_v2 = vld [vmem:[%s15419_s30 + $0x1210] ss:$36 sps:$4 sm:$0xff]   ;;  %v14435_v29 = vld [vmem:[%s15419_s30 + $0x1258] ss:$36 sps:$4 sm:$0xff]  }
 0x2f5   : > { %v14432_v3 = vld [vmem:[%s15419_s30 + $0x1690] ss:$36 sps:$4 sm:$0xff]   ;;  %v14438_v6 = vld [vmem:[%s15419_s30 + $0x16d8] ss:$36 sps:$4 sm:$0xff]  }
 0x2f6   : > { %10219 = vmatpush1.bf16.msra.mxu0 %v14375_v21  ;;  %v14443_v21 = vld [vmem:[%s15419_s30 + $0x12a4] ss:$36 sps:$4 sm:$0xff]  }
 0x2f7   : > { %10260 = vmatpush1.bf16.msra.mxu1 %v14378_v10  ;;  %10220 = vmatprep.subr.bf16.mxu0 %v14383_v11  ;;  %v14446_v10 = vld [vmem:[%s15419_s30 + $0x1724] ss:$36 sps:$4 sm:$0xff]  }
 0x2f8   : > { %10261 = vmatprep.subr.bf16.mxu1 %v14386_v12  ;;  %v14441_v11 = vld [vmem:[%s15419_s30 + $0x12a0] ss:$36 sps:$4 sm:$0xff]  }
 0x2f9   : > { %v14444_v12 = vld [vmem:[%s15419_s30 + $0x1720] ss:$36 sps:$4 sm:$0xff]  }
 0x2fa   : > { %10221 = vmatpush1.bf16.msra.mxu0 %v14381_v14  ;;  %v14449_v14 = vld [vmem:[%s15419_s30 + $0x12ec] ss:$36 sps:$4 sm:$0xff]  }
 0x2fb   : > { %10262 = vmatpush1.bf16.msra.mxu1 %v14384_v15  ;;  %10222 = vmatprep.subr.bf16.mxu0 %v14389_v16  ;;  %v14452_v15 = vld [vmem:[%s15419_s30 + $0x176c] ss:$36 sps:$4 sm:$0xff]  }
 0x2fc   : > { %10263 = vmatprep.subr.bf16.mxu1 %v14392_v33  ;;  %v14447_v16 = vld [vmem:[%s15419_s30 + $0x12e8] ss:$36 sps:$4 sm:$0xff]  }
 0x2fd   : > { %v14450_v33 = vld [vmem:[%s15419_s30 + $0x1768] ss:$36 sps:$4 sm:$0xff]  }
 0x2fe   : > { %10223 = vmatpush1.bf16.msra.mxu0 %v14387_v27  ;;  %v14455_v27 = vld [vmem:[%s15419_s30 + $0x1334] ss:$36 sps:$4 sm:$0xff]  }
 0x2ff   : > { %10264 = vmatpush1.bf16.msra.mxu1 %v14390_v20  ;;  %10224 = vmatprep.subr.bf16.mxu0 %v14395_v31  ;;  %v14458_v20 = vld [vmem:[%s15419_s30 + $0x17b4] ss:$36 sps:$4 sm:$0xff]  }
 0x300   : > { %10265 = vmatprep.subr.bf16.mxu1 %v14398_v22  ;;  %v14453_v31 = vld [vmem:[%s15419_s30 + $0x1330] ss:$36 sps:$4 sm:$0xff]  }
 0x301   : > { %v14456_v22 = vld [vmem:[%s15419_s30 + $0x17b0] ss:$36 sps:$4 sm:$0xff]  }
 0x302   : > { %10225 = vmatpush1.bf16.msra.mxu0 %v14393_v28  ;;  %v14461_v28 = vld [vmem:[%s15419_s30 + $0x137c] ss:$36 sps:$4 sm:$0xff]  }
 0x303   : > { %10266 = vmatpush1.bf16.msra.mxu1 %v14396_v30  ;;  %10226 = vmatprep.subr.bf16.mxu0 %v14401_v35  ;;  %v14464_v30 = vld [vmem:[%s15419_s30 + $0x17fc] ss:$36 sps:$4 sm:$0xff]  }
 0x304   : > { %10267 = vmatprep.subr.bf16.mxu1 %v14404_v32  ;;  %v14459_v35 = vld [vmem:[%s15419_s30 + $0x1378] ss:$36 sps:$4 sm:$0xff]  }
 0x305   : > { %v14462_v32 = vld [vmem:[%s15419_s30 + $0x17f8] ss:$36 sps:$4 sm:$0xff]  }
 0x306   : > { %10227 = vmatpush1.bf16.msra.mxu0 %v14399_v44  ;;  %v14467_v44 = vld [vmem:[%s15419_s30 + $0x13c4] ss:$36 sps:$4 sm:$0xff]  }
 0x307   : > { %10268 = vmatpush1.bf16.msra.mxu1 %v14402_v34  ;;  %10228 = vmatprep.subr.bf16.mxu0 %v14407_v36  ;;  %v14470_v34 = vld [vmem:[%s15419_s30 + $0x1844] ss:$36 sps:$4 sm:$0xff]  }
 0x308   : > { %10269 = vmatprep.subr.bf16.mxu1 %v14410_v43 }
 0x30a   : > { %10229 = vmatpush1.bf16.msra.mxu0 %v14405_v45  ;;  %v14465_v45 = vld [vmem:[%s15419_s30 + $0x13c0] ss:$36 sps:$4 sm:$0xff]  }
 0x30b   : > { %10270 = vmatpush1.bf16.msra.mxu1 %v14408_v46  ;;  %10230 = vmatprep.subr.bf16.mxu0 %v14413_v50  ;;  %v14468_v46 = vld [vmem:[%s15419_s30 + $0x1840] ss:$36 sps:$4 sm:$0xff]  }
 0x30c   : > { %10271 = vmatprep.subr.bf16.mxu1 %v14416_v51 }
 0x30e   : > { %10231 = vmatpush1.bf16.msra.mxu0 %v14411_v59 }
 0x30f   : > { %10272 = vmatpush1.bf16.msra.mxu1 %v14414_v62  ;;  %10232 = vmatprep.subr.bf16.mxu0 %v14419_v53 }
 0x310   : > { %10273 = vmatprep.subr.bf16.mxu1 %v14422_v54 }
 0x312   : > { %10233 = vmatpush1.bf16.msra.mxu0 %v14417_v55 }
 0x313   : > { %10274 = vmatpush1.bf16.msra.mxu1 %v14420_v56  ;;  %10234 = vmatprep.subr.bf16.mxu0 %v14425_v1 }
 0x314   : > { %10275 = vmatprep.subr.bf16.mxu1 %v14428_v57  ;;  %v14476_v57 = vld [vmem:[%s15419_s30 + $0x188c] ss:$36 sps:$4 sm:$0xff]  }
 0x316   : > { %10235 = vmatpush1.bf16.msra.mxu0 %v14423_v58 }
 0x317   : > { %10276 = vmatpush1.bf16.msra.mxu1 %v14426_v5  ;;  %10286 = vmatprep.subr.bf16.mxu0 %v14431_v63  ;;  %v14474_v5 = vld [vmem:[%s15419_s30 + $0x1888] ss:$36 sps:$4 sm:$0xff]   ;;  %v14479_v63 = vld [vmem:[%s15419_s30 + $0x1454] ss:$36 sps:$4 sm:$0xff]  }
 0x318   : > { %10327 = vmatprep.subr.bf16.mxu1 %v14434_v0  ;;  %v14482_v0 = vld [vmem:[%s15419_s30 + $0x18d4] ss:$36 sps:$4 sm:$0xff]  }
 0x319   : > { %10237 = vmatmul.mubr.bf16.vlgmr.msra.gmra.mrb[44].mxu0 %v15584_v17 }
 0x31a   : > { %10278 = vmatmul.mubr.bf16.vlgmr.msra.gmra.mrb[44].mxu1 %v15588_v18  ;;  %10287 = vmatpush1.bf16.msra.mxu0 %v14429_v2  ;;  %v14477_v2 = vld [vmem:[%s15419_s30 + $0x1450] ss:$36 sps:$4 sm:$0xff]  }
 0x31b   : > { %10328 = vmatpush1.bf16.msra.mxu1 %v14432_v3  ;;  %10288 = vmatprep.subr.bf16.mxu0 %v14437_v4  ;;  %v14480_v3 = vld [vmem:[%s15419_s30 + $0x18d0] ss:$36 sps:$4 sm:$0xff]   ;;  %v14485_v4 = vld [vmem:[%s15419_s30 + $0x149c] ss:$36 sps:$4 sm:$0xff]  }
 0x31c   : > { %10329 = vmatprep.subr.bf16.mxu1 %v14440_v19  ;;  %10318 = vmatprep.mubr.bf16.mxu0 %v15602_v25  ;;  %v14488_v19 = vld [vmem:[%s15419_s30 + $0x191c] ss:$36 sps:$4 sm:$0xff]  }
 0x31d   : > { %10359 = vmatprep.mubr.bf16.mxu1 %v15606_v26 }
 0x31e   : > { %10289 = vmatpush1.bf16.msra.mxu0 %v14435_v29  ;;  %v14483_v29 = vld [vmem:[%s15419_s30 + $0x1498] ss:$36 sps:$4 sm:$0xff]  }
 0x31f   : > { %10330 = vmatpush1.bf16.msra.mxu1 %v14438_v6  ;;  %10290 = vmatprep.subr.bf16.mxu0 %v14443_v21  ;;  %v14486_v6 = vld [vmem:[%s15419_s30 + $0x1918] ss:$36 sps:$4 sm:$0xff]   ;;  %v14491_v21 = vld [vmem:[%s15419_s30 + $0x14e4] ss:$36 sps:$4 sm:$0xff]  }
 0x320   : > { %10331 = vmatprep.subr.bf16.mxu1 %v14446_v10  ;;  %v14494_v10 = vld [vmem:[%s15419_s30 + $0x1964] ss:$36 sps:$4 sm:$0xff]  }
 0x322   : > { %10291 = vmatpush1.bf16.msra.mxu0 %v14441_v11  ;;  %v14489_v11 = vld [vmem:[%s15419_s30 + $0x14e0] ss:$36 sps:$4 sm:$0xff]  }
 0x323   : > { %10332 = vmatpush1.bf16.msra.mxu1 %v14444_v12  ;;  %10292 = vmatprep.subr.bf16.mxu0 %v14449_v14  ;;  %v14492_v12 = vld [vmem:[%s15419_s30 + $0x1960] ss:$36 sps:$4 sm:$0xff]   ;;  %v14497_v14 = vld [vmem:[%s15419_s30 + $0x152c] ss:$36 sps:$4 sm:$0xff]  }
 0x324   : > { %10333 = vmatprep.subr.bf16.mxu1 %v14452_v15  ;;  %v14500_v15 = vld [vmem:[%s15419_s30 + $0x19ac] ss:$36 sps:$4 sm:$0xff]  }
 0x326   : > { %10293 = vmatpush1.bf16.msra.mxu0 %v14447_v16  ;;  %v14495_v16 = vld [vmem:[%s15419_s30 + $0x1528] ss:$36 sps:$4 sm:$0xff]  }
 0x327   : > { %10334 = vmatpush1.bf16.msra.mxu1 %v14450_v33  ;;  %10294 = vmatprep.subr.bf16.mxu0 %v14455_v27  ;;  %v14498_v33 = vld [vmem:[%s15419_s30 + $0x19a8] ss:$36 sps:$4 sm:$0xff]   ;;  %v14503_v27 = vld [vmem:[%s15419_s30 + $0x1574] ss:$36 sps:$4 sm:$0xff]  }
 0x328   : > { %10335 = vmatprep.subr.bf16.mxu1 %v14458_v20  ;;  %v14506_v20 = vld [vmem:[%s15419_s30 + $0x19f4] ss:$36 sps:$4 sm:$0xff]  }
 0x32a   : > { %10295 = vmatpush1.bf16.msra.mxu0 %v14453_v31  ;;  %v14501_v31 = vld [vmem:[%s15419_s30 + $0x1570] ss:$36 sps:$4 sm:$0xff]  }
 0x32b   : > { %10336 = vmatpush1.bf16.msra.mxu1 %v14456_v22  ;;  %10296 = vmatprep.subr.bf16.mxu0 %v14461_v28  ;;  %v14504_v22 = vld [vmem:[%s15419_s30 + $0x19f0] ss:$36 sps:$4 sm:$0xff]   ;;  %v14509_v28 = vld [vmem:[%s15419_s30 + $0x15bc] ss:$36 sps:$4 sm:$0xff]  }
 0x32c   : > { %10337 = vmatprep.subr.bf16.mxu1 %v14464_v30  ;;  %v9992_v36 = vpop.f32.mrb[32].mxu0  ;;  %v14512_v30 = vld [vmem:[%s15419_s30 + $0x1a3c] ss:$36 sps:$4 sm:$0xff]  }
 0x32d   : > { %v10033_v43 = vpop.f32.mrb[32].mxu1  ;;  %v9993_v50 = vadd.f32 %v9992_v36, %v16334_v13  ;;  %v9994_v51 = vpop.f32.mrb[33].mxu0  ;;  %v14473_v13 = vld [vmem:[%s15419_s30 + $0x140c] ss:$36 sps:$4 sm:$0xff]   ;;  %v14513_v36 = vld [vmem:[%s15419_s30 + $0x1600] ss:$36 sps:$4 sm:$0xff]  }
 0x32e   : > { %v10035_v59 = vpop.f32.mrb[33].mxu1  ;;  %v9995_v62 = vadd.f32 %v9994_v51, %v16338_v9  ;;  %v9996_v53 = vpop.f32.mrb[34].mxu0  ;;  %10297 = vmatpush1.bf16.msra.mxu0 %v14459_v35  ;;  %v14471_v9 = vld [vmem:[%s15419_s30 + $0x1408] ss:$36 sps:$4 sm:$0xff]   ;;  %v14507_v35 = vld [vmem:[%s15419_s30 + $0x15b8] ss:$36 sps:$4 sm:$0xff]  }
 0x32f   : > { %v10037_v54 = vpop.f32.mrb[34].mxu1  ;;  %10338 = vmatpush1.bf16.msra.mxu1 %v14462_v32  ;;  %v16408_v55 = vadd.f32 %v10033_v43, %v9993_v50  ;;  %v9997_v56 = vpop.f32.mrb[35].mxu0  ;;  %10298 = vmatprep.subr.bf16.mxu0 %v14467_v44  ;;  %v14510_v32 = vld [vmem:[%s15419_s30 + $0x1a38] ss:$36 sps:$4 sm:$0xff]   ;;  %v14515_v44 = vld [vmem:[%s15419_s30 + $0x1604] ss:$36 sps:$4 sm:$0xff]  }
 0x330   : > { %v10038_v1 = vpop.f32.mrb[35].mxu1  ;;  %10339 = vmatprep.subr.bf16.mxu1 %v14470_v34  ;;  %v16412_v58 = vadd.f32 %v10035_v59, %v9995_v62  ;;  %v14518_v34 = vld [vmem:[%s15419_s30 + $0x1a84] ss:$36 sps:$4 sm:$0xff]   ;;  %v14527_v59 = vld [vmem:[%s15419_s30 + $0x1b14] ss:$36 sps:$4 sm:$0xff]  }
 0x331   : > { %v14516_v43 = vld [vmem:[%s15419_s30 + $0x1a80] ss:$36 sps:$4 sm:$0xff]   ;;  %v14519_v50 = vld [vmem:[%s15419_s30 + $0x1648] ss:$36 sps:$4 sm:$0xff]   ;;  %v14530_v62 = vld [vmem:[%s15419_s30 + $0x1f94] ss:$36 sps:$4 sm:$0xff]  }
 0x332   : > { %10299 = vmatpush1.bf16.msra.mxu0 %v14465_v45  ;;  %v14521_v45 = vld [vmem:[%s15419_s30 + $0x164c] ss:$36 sps:$4 sm:$0xff]   ;;  %v14533_v56 = vld [vmem:[%s15419_s30 + $0x1b5c] ss:$36 sps:$4 sm:$0xff]  }
 0x333   : > { %10340 = vmatpush1.bf16.msra.mxu1 %v14468_v46  ;;  %10300 = vmatprep.subr.bf16.mxu0 %v14473_v13  ;;  %v14524_v46 = vld [vmem:[%s15419_s30 + $0x1acc] ss:$36 sps:$4 sm:$0xff]   ;;  %v14536_v1 = vld [vmem:[%s15419_s30 + $0x1fdc] ss:$36 sps:$4 sm:$0xff]  }
 0x334   : > { %10341 = vmatprep.subr.bf16.mxu1 %v14476_v57  ;;  %v14522_v51 = vld [vmem:[%s15419_s30 + $0x1ac8] ss:$36 sps:$4 sm:$0xff]   ;;  %v14525_v53 = vld [vmem:[%s15419_s30 + $0x1b10] ss:$36 sps:$4 sm:$0xff]   ;;  %v14531_v13 = vld [vmem:[%s15419_s30 + $0x1b58] ss:$36 sps:$4 sm:$0xff]  }
 0x335   : > { %v14528_v54 = vld [vmem:[%s15419_s30 + $0x1f90] ss:$36 sps:$4 sm:$0xff]   ;;  %v14534_v57 = vld [vmem:[%s15419_s30 + $0x1fd8] ss:$36 sps:$4 sm:$0xff]  }
 0x336   : > { %10301 = vmatpush1.bf16.msra.mxu0 %v14471_v9  ;;  %v14539_v9 = vld [vmem:[%s15419_s30 + $0x1ba4] ss:$36 sps:$4 sm:$0xff]  }
 0x337   : > { %10342 = vmatpush1.bf16.msra.mxu1 %v14474_v5  ;;  %10302 = vmatprep.subr.bf16.mxu0 %v14479_v63  ;;  %v14542_v5 = vld [vmem:[%s15419_s30 + $0x2024] ss:$36 sps:$4 sm:$0xff]  }
 0x338   : > { %10343 = vmatprep.subr.bf16.mxu1 %v14482_v0  ;;  %v14537_v63 = vld [vmem:[%s15419_s30 + $0x1ba0] ss:$36 sps:$4 sm:$0xff]  }
 0x339   : > { %v14540_v0 = vld [vmem:[%s15419_s30 + $0x2020] ss:$36 sps:$4 sm:$0xff]  }
 0x33a   : > { %10303 = vmatpush1.bf16.msra.mxu0 %v14477_v2  ;;  %v14545_v2 = vld [vmem:[%s15419_s30 + $0x1bec] ss:$36 sps:$4 sm:$0xff]  }
 0x33b   : > { %10344 = vmatpush1.bf16.msra.mxu1 %v14480_v3  ;;  %10304 = vmatprep.subr.bf16.mxu0 %v14485_v4  ;;  %v14548_v3 = vld [vmem:[%s15419_s30 + $0x206c] ss:$36 sps:$4 sm:$0xff]  }
 0x33c   : > { %10345 = vmatprep.subr.bf16.mxu1 %v14488_v19  ;;  %v14543_v4 = vld [vmem:[%s15419_s30 + $0x1be8] ss:$36 sps:$4 sm:$0xff]  }
 0x33d   : > { %v14546_v19 = vld [vmem:[%s15419_s30 + $0x2068] ss:$36 sps:$4 sm:$0xff]  }
 0x33e   : > { %10305 = vmatpush1.bf16.msra.mxu0 %v14483_v29  ;;  %v14551_v29 = vld [vmem:[%s15419_s30 + $0x1c34] ss:$36 sps:$4 sm:$0xff]  }
 0x33f   : > { %10346 = vmatpush1.bf16.msra.mxu1 %v14486_v6  ;;  %10306 = vmatprep.subr.bf16.mxu0 %v14491_v21  ;;  %v14554_v6 = vld [vmem:[%s15419_s30 + $0x20b4] ss:$36 sps:$4 sm:$0xff]  }
 0x340   : > { %10347 = vmatprep.subr.bf16.mxu1 %v14494_v10  ;;  %v14549_v21 = vld [vmem:[%s15419_s30 + $0x1c30] ss:$36 sps:$4 sm:$0xff]  }
 0x341   : > { %v14552_v10 = vld [vmem:[%s15419_s30 + $0x20b0] ss:$36 sps:$4 sm:$0xff]  }
 0x342   : > { %10307 = vmatpush1.bf16.msra.mxu0 %v14489_v11  ;;  %v14557_v11 = vld [vmem:[%s15419_s30 + $0x1c7c] ss:$36 sps:$4 sm:$0xff]  }
 0x343   : > { %10348 = vmatpush1.bf16.msra.mxu1 %v14492_v12  ;;  %10308 = vmatprep.subr.bf16.mxu0 %v14497_v14  ;;  %v14560_v12 = vld [vmem:[%s15419_s30 + $0x20fc] ss:$36 sps:$4 sm:$0xff]  }
 0x344   : > { %10349 = vmatprep.subr.bf16.mxu1 %v14500_v15  ;;  %v14555_v14 = vld [vmem:[%s15419_s30 + $0x1c78] ss:$36 sps:$4 sm:$0xff]  }
 0x345   : > { %v14558_v15 = vld [vmem:[%s15419_s30 + $0x20f8] ss:$36 sps:$4 sm:$0xff]  }
 0x346   : > { %10309 = vmatpush1.bf16.msra.mxu0 %v14495_v16  ;;  %v14563_v16 = vld [vmem:[%s15419_s30 + $0x1cc4] ss:$36 sps:$4 sm:$0xff]  }
 0x347   : > { %10350 = vmatpush1.bf16.msra.mxu1 %v14498_v33  ;;  %10310 = vmatprep.subr.bf16.mxu0 %v14503_v27  ;;  %v14566_v33 = vld [vmem:[%s15419_s30 + $0x2144] ss:$36 sps:$4 sm:$0xff]  }
 0x348   : > { %10351 = vmatprep.subr.bf16.mxu1 %v14506_v20  ;;  %v255_v20 = vld [vmem:[#allocation2 + $0x10] sm:$0xff] }
 0x34a   : > { %10311 = vmatpush1.bf16.msra.mxu0 %v14501_v31 }
 0x34b   : > { %10352 = vmatpush1.bf16.msra.mxu1 %v14504_v22  ;;  %10312 = vmatprep.subr.bf16.mxu0 %v14509_v28  ;;  %v14561_v22 = vld [vmem:[%s15419_s30 + $0x1cc0] ss:$36 sps:$4 sm:$0xff]  }
 0x34c   : > { %10353 = vmatprep.subr.bf16.mxu1 %v14512_v30  ;;  %v14564_v28 = vld [vmem:[%s15419_s30 + $0x2140] ss:$36 sps:$4 sm:$0xff]  }
 0x34e   : > { %10313 = vmatpush1.bf16.msra.mxu0 %v14507_v35 }
 0x34f   : > { %10354 = vmatpush1.bf16.msra.mxu1 %v14510_v32  ;;  %10314 = vmatprep.subr.bf16.mxu0 %v14515_v44  ;;  %v256_v32 = vld [vmem:[#allocation2 + $0x18] sm:$0xff] }
 0x350   : > { %10355 = vmatprep.subr.bf16.mxu1 %v14518_v34 }
 0x352   : > { %10315 = vmatpush1.bf16.msra.mxu0 %v14513_v36 }
 0x353   : > { %10356 = vmatpush1.bf16.msra.mxu1 %v14516_v43  ;;  %10316 = vmatprep.subr.bf16.mxu0 %v14521_v45 }
 0x354   : > { %10357 = vmatprep.subr.bf16.mxu1 %v14524_v46 }
 0x356   : > { %10317 = vmatpush1.bf16.msra.mxu0 %v14519_v50 }
 0x357   : > { %10358 = vmatpush1.bf16.msra.mxu1 %v14522_v51  ;;  %10368 = vmatprep.subr.bf16.mxu0 %v14527_v59  ;;  %v14569_v51 = vld [vmem:[%s15419_s30 + $0x1d0c] ss:$36 sps:$4 sm:$0xff]  }
 0x358   : > { %10409 = vmatprep.subr.bf16.mxu1 %v14530_v62 }
 0x359   : > { %10319 = vmatmul.mubr.bf16.vlgmr.msra.gmra.mrb[48].mxu0 %v15676_v39 }
 0x35a   : > { %10360 = vmatmul.mubr.bf16.vlgmr.msra.gmra.mrb[48].mxu1 %v15680_v40  ;;  %10369 = vmatpush1.bf16.msra.mxu0 %v14525_v53  ;;  %v14567_v53 = vld [vmem:[%s15419_s30 + $0x1d08] ss:$36 sps:$4 sm:$0xff]  }
 0x35b   : > { %10410 = vmatpush1.bf16.msra.mxu1 %v14528_v54  ;;  %10370 = vmatprep.subr.bf16.mxu0 %v14533_v56  ;;  %v14570_v54 = vld [vmem:[%s15419_s30 + $0x2188] ss:$36 sps:$4 sm:$0xff]   ;;  %v14575_v56 = vld [vmem:[%s15419_s30 + $0x1d54] ss:$36 sps:$4 sm:$0xff]  }
 0x35c   : > { %10411 = vmatprep.subr.bf16.mxu1 %v14536_v1  ;;  %10400 = vmatprep.mubr.bf16.mxu0 %v15692_v23  ;;  %v14578_v1 = vld [vmem:[%s15419_s30 + $0x21d4] ss:$36 sps:$4 sm:$0xff]  }
 0x35d   : > { %10441 = vmatprep.mubr.bf16.mxu1 %v15696_v24 }
 0x35e   : > { %10371 = vmatpush1.bf16.msra.mxu0 %v14531_v13  ;;  %v14573_v13 = vld [vmem:[%s15419_s30 + $0x1d50] ss:$36 sps:$4 sm:$0xff]  }
 0x35f   : > { %10412 = vmatpush1.bf16.msra.mxu1 %v14534_v57  ;;  %10372 = vmatprep.subr.bf16.mxu0 %v14539_v9  ;;  %v14576_v57 = vld [vmem:[%s15419_s30 + $0x21d0] ss:$36 sps:$4 sm:$0xff]   ;;  %v14581_v9 = vld [vmem:[%s15419_s30 + $0x1d9c] ss:$36 sps:$4 sm:$0xff]  }
 0x360   : > { %10413 = vmatprep.subr.bf16.mxu1 %v14542_v5  ;;  %v14584_v5 = vld [vmem:[%s15419_s30 + $0x221c] ss:$36 sps:$4 sm:$0xff]  }
 0x362   : > { %10373 = vmatpush1.bf16.msra.mxu0 %v14537_v63  ;;  %v14579_v63 = vld [vmem:[%s15419_s30 + $0x1d98] ss:$36 sps:$4 sm:$0xff]  }
 0x363   : > { %10414 = vmatpush1.bf16.msra.mxu1 %v14540_v0  ;;  %10374 = vmatprep.subr.bf16.mxu0 %v14545_v2  ;;  %v14582_v0 = vld [vmem:[%s15419_s30 + $0x2218] ss:$36 sps:$4 sm:$0xff]   ;;  %v14587_v2 = vld [vmem:[%s15419_s30 + $0x1de4] ss:$36 sps:$4 sm:$0xff]  }
 0x364   : > { %10415 = vmatprep.subr.bf16.mxu1 %v14548_v3  ;;  %v14590_v3 = vld [vmem:[%s15419_s30 + $0x2264] ss:$36 sps:$4 sm:$0xff]  }
 0x366   : > { %10375 = vmatpush1.bf16.msra.mxu0 %v14543_v4  ;;  %v14585_v4 = vld [vmem:[%s15419_s30 + $0x1de0] ss:$36 sps:$4 sm:$0xff]  }
 0x367   : > { %10416 = vmatpush1.bf16.msra.mxu1 %v14546_v19  ;;  %10376 = vmatprep.subr.bf16.mxu0 %v14551_v29  ;;  %v14588_v19 = vld [vmem:[%s15419_s30 + $0x2260] ss:$36 sps:$4 sm:$0xff]   ;;  %v14593_v29 = vld [vmem:[%s15419_s30 + $0x1e2c] ss:$36 sps:$4 sm:$0xff]  }
 0x368   : > { %10417 = vmatprep.subr.bf16.mxu1 %v14554_v6  ;;  %v14596_v6 = vld [vmem:[%s15419_s30 + $0x22ac] ss:$36 sps:$4 sm:$0xff]  }
 0x36a   : > { %10377 = vmatpush1.bf16.msra.mxu0 %v14549_v21  ;;  %v14591_v21 = vld [vmem:[%s15419_s30 + $0x1e28] ss:$36 sps:$4 sm:$0xff]  }
 0x36b   : > { %10418 = vmatpush1.bf16.msra.mxu1 %v14552_v10  ;;  %10378 = vmatprep.subr.bf16.mxu0 %v14557_v11  ;;  %v14594_v10 = vld [vmem:[%s15419_s30 + $0x22a8] ss:$36 sps:$4 sm:$0xff]   ;;  %v14599_v11 = vld [vmem:[%s15419_s30 + $0x1e74] ss:$36 sps:$4 sm:$0xff]  }
 0x36c   : > { %10419 = vmatprep.subr.bf16.mxu1 %v14560_v12  ;;  %v10074_v27 = vpop.f32.mrb[36].mxu0  ;;  %v14602_v12 = vld [vmem:[%s15419_s30 + $0x22f4] ss:$36 sps:$4 sm:$0xff]  }
 0x36d   : > { %v10115_v31 = vpop.f32.mrb[36].mxu1  ;;  %v10075_v30 = vadd.f32 %v10074_v27, %v16408_v55  ;;  %v10076_v35 = vpop.f32.mrb[37].mxu0  ;;  %v14572_v55 = vld [vmem:[%s15419_s30 + $0x218c] ss:$36 sps:$4 sm:$0xff]   ;;  %v14603_v27 = vld [vmem:[%s15419_s30 + $0x1eb8] ss:$36 sps:$4 sm:$0xff]  }
 0x36e   : > { %v10117_v44 = vpop.f32.mrb[37].mxu1  ;;  %v10077_v34 = vadd.f32 %v10076_v35, %v16412_v58  ;;  %v10078_v36 = vpop.f32.mrb[38].mxu0  ;;  %10379 = vmatpush1.bf16.msra.mxu0 %v14555_v14  ;;  %v14597_v14 = vld [vmem:[%s15419_s30 + $0x1e70] ss:$36 sps:$4 sm:$0xff]  }
 0x36f   : > { %v10119_v43 = vpop.f32.mrb[38].mxu1  ;;  %10420 = vmatpush1.bf16.msra.mxu1 %v14558_v15  ;;  %v10116_v45 = vadd.f32 %v10115_v31, %v10075_v30  ;;  %v10079_v46 = vpop.f32.mrb[39].mxu0  ;;  %10380 = vmatprep.subr.bf16.mxu0 %v14563_v16  ;;  %v14600_v15 = vld [vmem:[%s15419_s30 + $0x22f0] ss:$36 sps:$4 sm:$0xff]   ;;  %v14605_v16 = vld [vmem:[%s15419_s30 + $0x1ebc] ss:$36 sps:$4 sm:$0xff]  }
 0x370   : > { %v10120_v50 = vpop.f32.mrb[39].mxu1  ;;  %10421 = vmatprep.subr.bf16.mxu1 %v14566_v33  ;;  %v10118_v59 = vadd.f32 %v10117_v44, %v10077_v34  ;;  %v14608_v33 = vld [vmem:[%s15419_s30 + $0x233c] ss:$36 sps:$4 sm:$0xff]   ;;  %v14611_v31 = vld [vmem:[%s15419_s30 + $0x1f04] ss:$36 sps:$4 sm:$0xff]  }
 0x371   : > { %v11344_v62 = vadd.f32 %v10116_v45, %v255_v20  ;;  %v14606_v20 = vld [vmem:[%s15419_s30 + $0x2338] ss:$36 sps:$4 sm:$0xff]   ;;  %v14612_v30 = vld [vmem:[%s15419_s30 + $0x2380] ss:$36 sps:$4 sm:$0xff]   ;;  %v14617_v35 = vld [vmem:[%s15419_s30 + $0x1f4c] ss:$36 sps:$4 sm:$0xff]  }
 0x372   : > { %v11345_v58 = vadd.f32 %v10118_v59, %v256_v32  ;;  %10381 = vmatpush1.bf16.msra.mxu0 %v14561_v22  ;;  %v14614_v22 = vld [vmem:[%s15419_s30 + $0x2384] ss:$36 sps:$4 sm:$0xff]   ;;  %v14620_v32 = vld [vmem:[%s15419_s30 + $0x23cc] ss:$36 sps:$4 sm:$0xff]   ;;  %v14623_v36 = vld [vmem:[%s15419_s30 + $0x2414] ss:$36 sps:$4 sm:$0xff]  }
 0x373   : > { %10422 = vmatpush1.bf16.msra.mxu1 %v14564_v28  ;;  %11353 = vst [vmem:[#allocation2 + $0x10] sm:$0xff] %v11344_v62  ;;  %10382 = vmatprep.subr.bf16.mxu0 %v14569_v51  ;;  %v14609_v28 = vld [vmem:[%s15419_s30 + $0x1f00] ss:$36 sps:$4 sm:$0xff]   ;;  %v14615_v44 = vld [vmem:[%s15419_s30 + $0x1f48] ss:$36 sps:$4 sm:$0xff]  }
 0x374   : > { %10423 = vmatprep.subr.bf16.mxu1 %v14572_v55  ;;  %11354 = vst [vmem:[#allocation2 + $0x18] sm:$0xff] %v11345_v58  ;;  %v14618_v34 = vld [vmem:[%s15419_s30 + $0x23c8] ss:$36 sps:$4 sm:$0xff]   ;;  %v14626_v43 = vld [vmem:[%s15419_s30 + $0x2894] ss:$36 sps:$4 sm:$0xff]  }
 0x375   : > { %v14621_v45 = vld [vmem:[%s15419_s30 + $0x2410] ss:$36 sps:$4 sm:$0xff]   ;;  %v14629_v50 = vld [vmem:[%s15419_s30 + $0x245c] ss:$36 sps:$4 sm:$0xff]   ;;  %v14635_v62 = vld [vmem:[%s15419_s30 + $0x24a4] ss:$36 sps:$4 sm:$0xff]  }
 0x376   : > { %10383 = vmatpush1.bf16.msra.mxu0 %v14567_v53  ;;  %v14624_v46 = vld [vmem:[%s15419_s30 + $0x2890] ss:$36 sps:$4 sm:$0xff]   ;;  %v14632_v51 = vld [vmem:[%s15419_s30 + $0x28dc] ss:$36 sps:$4 sm:$0xff]   ;;  %v14638_v58 = vld [vmem:[%s15419_s30 + $0x2924] ss:$36 sps:$4 sm:$0xff]  }
 0x377   : > { %10424 = vmatpush1.bf16.msra.mxu1 %v14570_v54  ;;  %10384 = vmatprep.subr.bf16.mxu0 %v14575_v56  ;;  %v14627_v55 = vld [vmem:[%s15419_s30 + $0x2458] ss:$36 sps:$4 sm:$0xff]   ;;  %v14633_v53 = vld [vmem:[%s15419_s30 + $0x24a0] ss:$36 sps:$4 sm:$0xff]   ;;  %v14641_v56 = vld [vmem:[%s15419_s30 + $0x24ec] ss:$36 sps:$4 sm:$0xff]  }
 0x378   : > { %10425 = vmatprep.subr.bf16.mxu1 %v14578_v1  ;;  %v14630_v59 = vld [vmem:[%s15419_s30 + $0x28d8] ss:$36 sps:$4 sm:$0xff]   ;;  %v14636_v54 = vld [vmem:[%s15419_s30 + $0x2920] ss:$36 sps:$4 sm:$0xff]   ;;  %v14644_v1 = vld [vmem:[%s15419_s30 + $0x296c] ss:$36 sps:$4 sm:$0xff]  }
 0x37a   : > { %10385 = vmatpush1.bf16.msra.mxu0 %v14573_v13  ;;  %v14639_v13 = vld [vmem:[%s15419_s30 + $0x24e8] ss:$36 sps:$4 sm:$0xff]  }
 0x37b   : > { %10426 = vmatpush1.bf16.msra.mxu1 %v14576_v57  ;;  %10386 = vmatprep.subr.bf16.mxu0 %v14581_v9  ;;  %v14642_v57 = vld [vmem:[%s15419_s30 + $0x2968] ss:$36 sps:$4 sm:$0xff]   ;;  %v14647_v9 = vld [vmem:[%s15419_s30 + $0x2534] ss:$36 sps:$4 sm:$0xff]  }
 0x37c   : > { %10427 = vmatprep.subr.bf16.mxu1 %v14584_v5  ;;  %v14650_v5 = vld [vmem:[%s15419_s30 + $0x29b4] ss:$36 sps:$4 sm:$0xff]  }
 0x37e   : > { %10387 = vmatpush1.bf16.msra.mxu0 %v14579_v63  ;;  %v14645_v63 = vld [vmem:[%s15419_s30 + $0x2530] ss:$36 sps:$4 sm:$0xff]  }
 0x37f   : > { %10428 = vmatpush1.bf16.msra.mxu1 %v14582_v0  ;;  %10388 = vmatprep.subr.bf16.mxu0 %v14587_v2  ;;  %v14648_v0 = vld [vmem:[%s15419_s30 + $0x29b0] ss:$36 sps:$4 sm:$0xff]   ;;  %v14653_v2 = vld [vmem:[%s15419_s30 + $0x257c] ss:$36 sps:$4 sm:$0xff]  }
 0x380   : > { %10429 = vmatprep.subr.bf16.mxu1 %v14590_v3  ;;  %v14656_v3 = vld [vmem:[%s15419_s30 + $0x29fc] ss:$36 sps:$4 sm:$0xff]  }
 0x382   : > { %10389 = vmatpush1.bf16.msra.mxu0 %v14585_v4  ;;  %v14651_v4 = vld [vmem:[%s15419_s30 + $0x2578] ss:$36 sps:$4 sm:$0xff]  }
 0x383   : > { %10430 = vmatpush1.bf16.msra.mxu1 %v14588_v19  ;;  %10390 = vmatprep.subr.bf16.mxu0 %v14593_v29  ;;  %v14654_v19 = vld [vmem:[%s15419_s30 + $0x29f8] ss:$36 sps:$4 sm:$0xff]   ;;  %v14659_v29 = vld [vmem:[%s15419_s30 + $0x25c4] ss:$36 sps:$4 sm:$0xff]  }
 0x384   : > { %10431 = vmatprep.subr.bf16.mxu1 %v14596_v6  ;;  %v14662_v6 = vld [vmem:[%s15419_s30 + $0x2a44] ss:$36 sps:$4 sm:$0xff]  }
 0x386   : > { %10391 = vmatpush1.bf16.msra.mxu0 %v14591_v21 }
 0x387   : > { %10432 = vmatpush1.bf16.msra.mxu1 %v14594_v10  ;;  %10392 = vmatprep.subr.bf16.mxu0 %v14599_v11 }
 0x388   : > { %10433 = vmatprep.subr.bf16.mxu1 %v14602_v12 }
 0x38a   : > { %10393 = vmatpush1.bf16.msra.mxu0 %v14597_v14 }
 0x38b   : > { %10434 = vmatpush1.bf16.msra.mxu1 %v14600_v15  ;;  %10394 = vmatprep.subr.bf16.mxu0 %v14605_v16 }
 0x38c   : > { %10435 = vmatprep.subr.bf16.mxu1 %v14608_v33 }
 0x38e   : > { %10395 = vmatpush1.bf16.msra.mxu0 %v14603_v27  ;;  %v14657_v27 = vld [vmem:[%s15419_s30 + $0x25c0] ss:$36 sps:$4 sm:$0xff]  }
 0x38f   : > { %10436 = vmatpush1.bf16.msra.mxu1 %v14606_v20  ;;  %10396 = vmatprep.subr.bf16.mxu0 %v14611_v31  ;;  %v14660_v20 = vld [vmem:[%s15419_s30 + $0x2a40] ss:$36 sps:$4 sm:$0xff]  }
 0x390   : > { %10437 = vmatprep.subr.bf16.mxu1 %v14614_v22 }
 0x392   : > { %10397 = vmatpush1.bf16.msra.mxu0 %v14609_v28  ;;  %v14665_v28 = vld [vmem:[%s15419_s30 + $0x260c] ss:$36 sps:$4 sm:$0xff]  }
 0x393   : > { %10438 = vmatpush1.bf16.msra.mxu1 %v14612_v30  ;;  %10398 = vmatprep.subr.bf16.mxu0 %v14617_v35  ;;  %v14668_v30 = vld [vmem:[%s15419_s30 + $0x2a8c] ss:$36 sps:$4 sm:$0xff]  }
 0x394   : > { %10439 = vmatprep.subr.bf16.mxu1 %v14620_v32  ;;  %v14663_v35 = vld [vmem:[%s15419_s30 + $0x2608] ss:$36 sps:$4 sm:$0xff]  }
 0x395   : > { %v14666_v32 = vld [vmem:[%s15419_s30 + $0x2a88] ss:$36 sps:$4 sm:$0xff]  }
 0x396   : > { %10399 = vmatpush1.bf16.msra.mxu0 %v14615_v44  ;;  %v14671_v44 = vld [vmem:[%s15419_s30 + $0x2654] ss:$36 sps:$4 sm:$0xff]  }
 0x397   : > { %10440 = vmatpush1.bf16.msra.mxu1 %v14618_v34  ;;  %10450 = vmatprep.subr.bf16.mxu0 %v14623_v36  ;;  %v14674_v34 = vld [vmem:[%s15419_s30 + $0x2ad4] ss:$36 sps:$4 sm:$0xff]  }
 0x398   : > { %10491 = vmatprep.subr.bf16.mxu1 %v14626_v43  ;;  %v14669_v36 = vld [vmem:[%s15419_s30 + $0x2650] ss:$36 sps:$4 sm:$0xff]  }
 0x399   : > { %10401 = vmatmul.mubr.bf16.vlgmr.msra.gmra.mrb[52].mxu0 %v15767_v60  ;;  %v14672_v43 = vld [vmem:[%s15419_s30 + $0x2ad0] ss:$36 sps:$4 sm:$0xff]  }
 0x39a   : > { %10442 = vmatmul.mubr.bf16.vlgmr.msra.gmra.mrb[52].mxu1 %v15771_v61  ;;  %10451 = vmatpush1.bf16.msra.mxu0 %v14621_v45  ;;  %v14677_v45 = vld [vmem:[%s15419_s30 + $0x269c] ss:$36 sps:$4 sm:$0xff]  }
 0x39b   : > { %10492 = vmatpush1.bf16.msra.mxu1 %v14624_v46  ;;  %10452 = vmatprep.subr.bf16.mxu0 %v14629_v50  ;;  %v14680_v46 = vld [vmem:[%s15419_s30 + $0x2b1c] ss:$36 sps:$4 sm:$0xff]  }
 0x39c   : > { %10493 = vmatprep.subr.bf16.mxu1 %v14632_v51  ;;  %10482 = vmatprep.mubr.bf16.mxu0 %v15782_v41  ;;  %v14675_v50 = vld [vmem:[%s15419_s30 + $0x2698] ss:$36 sps:$4 sm:$0xff]  }
 0x39d   : > { %10523 = vmatprep.mubr.bf16.mxu1 %v15786_v42  ;;  %v14678_v51 = vld [vmem:[%s15419_s30 + $0x2b18] ss:$36 sps:$4 sm:$0xff]  }
 0x39e   : > { %10453 = vmatpush1.bf16.msra.mxu0 %v14627_v55  ;;  %v14683_v55 = vld [vmem:[%s15419_s30 + $0x26e4] ss:$36 sps:$4 sm:$0xff]  }
 0x39f   : > { %10494 = vmatpush1.bf16.msra.mxu1 %v14630_v59  ;;  %10454 = vmatprep.subr.bf16.mxu0 %v14635_v62  ;;  %v14686_v59 = vld [vmem:[%s15419_s30 + $0x2b64] ss:$36 sps:$4 sm:$0xff]  }
 0x3a0   : > { %10495 = vmatprep.subr.bf16.mxu1 %v14638_v58  ;;  %v14681_v62 = vld [vmem:[%s15419_s30 + $0x26e0] ss:$36 sps:$4 sm:$0xff]  }
 0x3a1   : > { %v14684_v58 = vld [vmem:[%s15419_s30 + $0x2b60] ss:$36 sps:$4 sm:$0xff]  }
 0x3a2   : > { %10455 = vmatpush1.bf16.msra.mxu0 %v14633_v53  ;;  %v14689_v53 = vld [vmem:[%s15419_s30 + $0x272c] ss:$36 sps:$4 sm:$0xff]  }
 0x3a3   : > { %10496 = vmatpush1.bf16.msra.mxu1 %v14636_v54  ;;  %10456 = vmatprep.subr.bf16.mxu0 %v14641_v56  ;;  %v14692_v54 = vld [vmem:[%s15419_s30 + $0x2bac] ss:$36 sps:$4 sm:$0xff]  }
 0x3a4   : > { %10497 = vmatprep.subr.bf16.mxu1 %v14644_v1  ;;  %v14687_v56 = vld [vmem:[%s15419_s30 + $0x2728] ss:$36 sps:$4 sm:$0xff]  }
 0x3a5   : > { %v14690_v1 = vld [vmem:[%s15419_s30 + $0x2ba8] ss:$36 sps:$4 sm:$0xff]  }
 0x3a6   : > { %10457 = vmatpush1.bf16.msra.mxu0 %v14639_v13  ;;  %v14695_v13 = vld [vmem:[%s15419_s30 + $0x2774] ss:$36 sps:$4 sm:$0xff]  }
 0x3a7   : > { %10498 = vmatpush1.bf16.msra.mxu1 %v14642_v57  ;;  %10458 = vmatprep.subr.bf16.mxu0 %v14647_v9  ;;  %v14698_v57 = vld [vmem:[%s15419_s30 + $0x2bf4] ss:$36 sps:$4 sm:$0xff]  }
 0x3a8   : > { %10499 = vmatprep.subr.bf16.mxu1 %v14650_v5  ;;  %v14693_v9 = vld [vmem:[%s15419_s30 + $0x2770] ss:$36 sps:$4 sm:$0xff]  }
 0x3a9   : > { %v14696_v5 = vld [vmem:[%s15419_s30 + $0x2bf0] ss:$36 sps:$4 sm:$0xff]  }
 0x3aa   : > { %10459 = vmatpush1.bf16.msra.mxu0 %v14645_v63  ;;  %v14701_v63 = vld [vmem:[%s15419_s30 + $0x27bc] ss:$36 sps:$4 sm:$0xff]  }
 0x3ab   : > { %10500 = vmatpush1.bf16.msra.mxu1 %v14648_v0  ;;  %10460 = vmatprep.subr.bf16.mxu0 %v14653_v2  ;;  %v14704_v0 = vld [vmem:[%s15419_s30 + $0x2c3c] ss:$36 sps:$4 sm:$0xff]  }
 0x3ac   : > { %10501 = vmatprep.subr.bf16.mxu1 %v14656_v3  ;;  %v10156_v21 = vpop.f32.mrb[40].mxu0  ;;  %v14699_v2 = vld [vmem:[%s15419_s30 + $0x27b8] ss:$36 sps:$4 sm:$0xff]  }
 0x3ad   : > { %v10197_v10 = vpop.f32.mrb[40].mxu1  ;;  %v10158_v12 = vpop.f32.mrb[41].mxu0  ;;  %v14702_v3 = vld [vmem:[%s15419_s30 + $0x2c38] ss:$36 sps:$4 sm:$0xff]  }
 0x3ae   : > { %v16548_v11 = vadd.f32 %v10197_v10, %v10156_v21  ;;  %v10199_v14 = vpop.f32.mrb[41].mxu1  ;;  %v10160_v16 = vpop.f32.mrb[42].mxu0  ;;  %10461 = vmatpush1.bf16.msra.mxu0 %v14651_v4  ;;  %v14707_v4 = vld [vmem:[%s15419_s30 + $0x2804] ss:$36 sps:$4 sm:$0xff]   ;;  %v14713_v21 = vld [vmem:[%s15419_s30 + $0x284c] ss:$36 sps:$4 sm:$0xff]  }
 0x3af   : > { %v16550_v15 = vadd.f32 %v10199_v14, %v10158_v12  ;;  %v10201_v33 = vpop.f32.mrb[42].mxu1  ;;  %10502 = vmatpush1.bf16.msra.mxu1 %v14654_v19  ;;  %v10161_v31 = vpop.f32.mrb[43].mxu0  ;;  %10462 = vmatprep.subr.bf16.mxu0 %v14659_v29  ;;  %v14710_v19 = vld [vmem:[%s15419_s30 + $0x2c84] ss:$36 sps:$4 sm:$0xff]   ;;  %v14716_v10 = vld [vmem:[%s15419_s30 + $0x2ccc] ss:$36 sps:$4 sm:$0xff]  }
 0x3b0   : > { %v10202_v22 = vpop.f32.mrb[43].mxu1  ;;  %10503 = vmatprep.subr.bf16.mxu1 %v14662_v6  ;;  %v14705_v29 = vld [vmem:[%s15419_s30 + $0x2800] ss:$36 sps:$4 sm:$0xff]   ;;  %v14711_v12 = vld [vmem:[%s15419_s30 + $0x2848] ss:$36 sps:$4 sm:$0xff]  }
 0x3b1   : > { %v14708_v6 = vld [vmem:[%s15419_s30 + $0x2c80] ss:$36 sps:$4 sm:$0xff]   ;;  %v14714_v14 = vld [vmem:[%s15419_s30 + $0x2cc8] ss:$36 sps:$4 sm:$0xff]  }
 0x3b2   : > { %10463 = vmatpush1.bf16.msra.mxu0 %v14657_v27  ;;  %v14719_v16 = vld [vmem:[%s15419_s30 + $0x1c] ss:$36 sps:$4 sm:$0xff]   ;;  %v14725_v31 = vld [vmem:[%s15419_s30 + $0x64] ss:$36 sps:$4 sm:$0xff]  }
 0x3b3   : > { %10504 = vmatpush1.bf16.msra.mxu1 %v14660_v20  ;;  %10464 = vmatprep.subr.bf16.mxu0 %v14665_v28  ;;  %v14722_v33 = vld [vmem:[%s15419_s30 + $0x49c] ss:$36 sps:$4 sm:$0xff]   ;;  %v14728_v22 = vld [vmem:[%s15419_s30 + $0x4e4] ss:$36 sps:$4 sm:$0xff]  }
 0x3b4   : > { %10505 = vmatprep.subr.bf16.mxu1 %v14668_v30  ;;  %v14717_v27 = vld [vmem:[%s15419_s30 + $0x18] ss:$36 sps:$4 sm:$0xff]   ;;  %v14723_v28 = vld [vmem:[%s15419_s30 + $0x60] ss:$36 sps:$4 sm:$0xff]  }
 0x3b5   : > { %v14720_v20 = vld [vmem:[%s15419_s30 + $0x498] ss:$36 sps:$4 sm:$0xff]   ;;  %v14726_v30 = vld [vmem:[%s15419_s30 + $0x4e0] ss:$36 sps:$4 sm:$0xff]  }
 0x3b6   : > { %10465 = vmatpush1.bf16.msra.mxu0 %v14663_v35  ;;  %v14731_v35 = vld [vmem:[%s15419_s30 + $0xac] ss:$36 sps:$4 sm:$0xff]  }
 0x3b7   : > { %10506 = vmatpush1.bf16.msra.mxu1 %v14666_v32  ;;  %10466 = vmatprep.subr.bf16.mxu0 %v14671_v44  ;;  %v14734_v32 = vld [vmem:[%s15419_s30 + $0x52c] ss:$36 sps:$4 sm:$0xff]  }
 0x3b8   : > { %10507 = vmatprep.subr.bf16.mxu1 %v14674_v34  ;;  %v14729_v44 = vld [vmem:[%s15419_s30 + $0xa8] ss:$36 sps:$4 sm:$0xff]  }
 0x3b9   : > { %v14732_v34 = vld [vmem:[%s15419_s30 + $0x528] ss:$36 sps:$4 sm:$0xff]  }
 0x3ba   : > { %10467 = vmatpush1.bf16.msra.mxu0 %v14669_v36  ;;  %v14737_v36 = vld [vmem:[%s15419_s30 + $0xf4] ss:$36 sps:$4 sm:$0xff]  }
 0x3bb   : > { %10508 = vmatpush1.bf16.msra.mxu1 %v14672_v43  ;;  %10468 = vmatprep.subr.bf16.mxu0 %v14677_v45  ;;  %v14740_v43 = vld [vmem:[%s15419_s30 + $0x574] ss:$36 sps:$4 sm:$0xff]  }
 0x3bc   : > { %10509 = vmatprep.subr.bf16.mxu1 %v14680_v46  ;;  %v14735_v45 = vld [vmem:[%s15419_s30 + $0xf0] ss:$36 sps:$4 sm:$0xff]  }
 0x3bd   : > { %v14738_v46 = vld [vmem:[%s15419_s30 + $0x570] ss:$36 sps:$4 sm:$0xff]  }
 0x3be   : > { %10469 = vmatpush1.bf16.msra.mxu0 %v14675_v50  ;;  %v14743_v50 = vld [vmem:[%s15419_s30 + $0x13c] ss:$36 sps:$4 sm:$0xff]  }
 0x3bf   : > { %10510 = vmatpush1.bf16.msra.mxu1 %v14678_v51  ;;  %10470 = vmatprep.subr.bf16.mxu0 %v14683_v55  ;;  %v14746_v51 = vld [vmem:[%s15419_s30 + $0x5bc] ss:$36 sps:$4 sm:$0xff]  }
 0x3c0   : > { %10511 = vmatprep.subr.bf16.mxu1 %v14686_v59  ;;  %v14741_v55 = vld [vmem:[%s15419_s30 + $0x138] ss:$36 sps:$4 sm:$0xff]  }
 0x3c1   : > { %v14744_v59 = vld [vmem:[%s15419_s30 + $0x5b8] ss:$36 sps:$4 sm:$0xff]  }
 0x3c2   : > { %10471 = vmatpush1.bf16.msra.mxu0 %v14681_v62  ;;  %v14749_v62 = vld [vmem:[%s15419_s30 + $0x184] ss:$36 sps:$4 sm:$0xff]  }
 0x3c3   : > { %10512 = vmatpush1.bf16.msra.mxu1 %v14684_v58  ;;  %10472 = vmatprep.subr.bf16.mxu0 %v14689_v53  ;;  %v14752_v58 = vld [vmem:[%s15419_s30 + $0x604] ss:$36 sps:$4 sm:$0xff]  }
 0x3c4   : > { %10513 = vmatprep.subr.bf16.mxu1 %v14692_v54  ;;  %v14747_v53 = vld [vmem:[%s15419_s30 + $0x180] ss:$36 sps:$4 sm:$0xff]  }
 0x3c5   : > { %v14750_v54 = vld [vmem:[%s15419_s30 + $0x600] ss:$36 sps:$4 sm:$0xff]  }
 0x3c6   : > { %10473 = vmatpush1.bf16.msra.mxu0 %v14687_v56  ;;  %v14755_v56 = vld [vmem:[%s15419_s30 + $0x1cc] ss:$36 sps:$4 sm:$0xff]  }
 0x3c7   : > { %10514 = vmatpush1.bf16.msra.mxu1 %v14690_v1  ;;  %10474 = vmatprep.subr.bf16.mxu0 %v14695_v13  ;;  %v14758_v1 = vld [vmem:[%s15419_s30 + $0x64c] ss:$36 sps:$4 sm:$0xff]  }
 0x3c8   : > { %10515 = vmatprep.subr.bf16.mxu1 %v14698_v57 }
 0x3ca   : > { %10475 = vmatpush1.bf16.msra.mxu0 %v14693_v9 }
 0x3cb   : > { %10516 = vmatpush1.bf16.msra.mxu1 %v14696_v5  ;;  %10476 = vmatprep.subr.bf16.mxu0 %v14701_v63 }
 0x3cc   : > { %10517 = vmatprep.subr.bf16.mxu1 %v14704_v0 }
 0x3ce   : > { %10477 = vmatpush1.bf16.msra.mxu0 %v14699_v2 }
 0x3cf   : > { %10518 = vmatpush1.bf16.msra.mxu1 %v14702_v3  ;;  %10478 = vmatprep.subr.bf16.mxu0 %v14707_v4  ;;  %v14753_v4 = vld [vmem:[%s15419_s30 + $0x1c8] ss:$36 sps:$4 sm:$0xff]  }
 0x3d0   : > { %10519 = vmatprep.subr.bf16.mxu1 %v14710_v19  ;;  %v14756_v19 = vld [vmem:[%s15419_s30 + $0x648] ss:$36 sps:$4 sm:$0xff]  }
 0x3d2   : > { %10479 = vmatpush1.bf16.msra.mxu0 %v14705_v29 }
 0x3d3   : > { %10520 = vmatpush1.bf16.msra.mxu1 %v14708_v6  ;;  %10480 = vmatprep.subr.bf16.mxu0 %v14713_v21 }
 0x3d4   : > { %10521 = vmatprep.subr.bf16.mxu1 %v14716_v10 }
 0x3d6   : > { %10481 = vmatpush1.bf16.msra.mxu0 %v14711_v12  ;;  %v14759_v12 = vld [vmem:[%s15419_s30 + $0x210] ss:$36 sps:$4 sm:$0xff]  }
 0x3d7   : > { %10522 = vmatpush1.bf16.msra.mxu1 %v14714_v14  ;;  %10532 = vmatprep.subr.bf16.mxu0 %v14719_v16  ;;  %v14762_v14 = vld [vmem:[%s15419_s30 + $0x690] ss:$36 sps:$4 sm:$0xff]   ;;  %v14767_v16 = vld [vmem:[%s15419_s30 + $0x25c] ss:$36 sps:$4 sm:$0xff]  }
 0x3d8   : > { %10573 = vmatprep.subr.bf16.mxu1 %v14722_v33  ;;  %v14770_v33 = vld [vmem:[%s15419_s30 + $0x6dc] ss:$36 sps:$4 sm:$0xff]  }
 0x3d9   : > { %10483 = vmatmul.mubr.bf16.vlgmr.msra.gmra.mrb[56].mxu0 %v15860_v47 }
 0x3da   : > { %10524 = vmatmul.mubr.bf16.vlgmr.msra.gmra.mrb[56].mxu1 %v15864_v49  ;;  %10533 = vmatpush1.bf16.msra.mxu0 %v14717_v27  ;;  %v14765_v27 = vld [vmem:[%s15419_s30 + $0x258] ss:$36 sps:$4 sm:$0xff]  }
 0x3db   : > { %10574 = vmatpush1.bf16.msra.mxu1 %v14720_v20  ;;  %10534 = vmatprep.subr.bf16.mxu0 %v14725_v31  ;;  %v14768_v20 = vld [vmem:[%s15419_s30 + $0x6d8] ss:$36 sps:$4 sm:$0xff]   ;;  %v14773_v31 = vld [vmem:[%s15419_s30 + $0x2a4] ss:$36 sps:$4 sm:$0xff]  }
 0x3dc   : > { %10575 = vmatprep.subr.bf16.mxu1 %v14728_v22  ;;  %10564 = vmatprep.mubr.bf16.mxu0 %v15469_v48  ;;  %v14776_v22 = vld [vmem:[%s15419_s30 + $0x724] ss:$36 sps:$4 sm:$0xff]  }
 0x3dd   : > { %10605 = vmatprep.mubr.bf16.mxu1 %v15474_v52 }
 0x3de   : > { %10535 = vmatpush1.bf16.msra.mxu0 %v14723_v28  ;;  %v14771_v28 = vld [vmem:[%s15419_s30 + $0x2a0] ss:$36 sps:$4 sm:$0xff]  }
 0x3df   : > { %10576 = vmatpush1.bf16.msra.mxu1 %v14726_v30  ;;  %10536 = vmatprep.subr.bf16.mxu0 %v14731_v35  ;;  %v14774_v30 = vld [vmem:[%s15419_s30 + $0x720] ss:$36 sps:$4 sm:$0xff]   ;;  %v14779_v35 = vld [vmem:[%s15419_s30 + $0x2ec] ss:$36 sps:$4 sm:$0xff]  }
 0x3e0   : > { %10577 = vmatprep.subr.bf16.mxu1 %v14734_v32  ;;  %v14782_v32 = vld [vmem:[%s15419_s30 + $0x76c] ss:$36 sps:$4 sm:$0xff]  }
 0x3e2   : > { %10537 = vmatpush1.bf16.msra.mxu0 %v14729_v44  ;;  %v14777_v44 = vld [vmem:[%s15419_s30 + $0x2e8] ss:$36 sps:$4 sm:$0xff]  }
 0x3e3   : > { %10578 = vmatpush1.bf16.msra.mxu1 %v14732_v34  ;;  %10538 = vmatprep.subr.bf16.mxu0 %v14737_v36  ;;  %v14780_v34 = vld [vmem:[%s15419_s30 + $0x768] ss:$36 sps:$4 sm:$0xff]   ;;  %v14785_v36 = vld [vmem:[%s15419_s30 + $0x334] ss:$36 sps:$4 sm:$0xff]  }
 0x3e4   : > { %10579 = vmatprep.subr.bf16.mxu1 %v14740_v43  ;;  %v14788_v43 = vld [vmem:[%s15419_s30 + $0x7b4] ss:$36 sps:$4 sm:$0xff]  }
 0x3e6   : > { %10539 = vmatpush1.bf16.msra.mxu0 %v14735_v45  ;;  %v14783_v45 = vld [vmem:[%s15419_s30 + $0x330] ss:$36 sps:$4 sm:$0xff]  }
 0x3e7   : > { %10580 = vmatpush1.bf16.msra.mxu1 %v14738_v46  ;;  %10540 = vmatprep.subr.bf16.mxu0 %v14743_v50  ;;  %v14786_v46 = vld [vmem:[%s15419_s30 + $0x7b0] ss:$36 sps:$4 sm:$0xff]   ;;  %v14791_v50 = vld [vmem:[%s15419_s30 + $0x37c] ss:$36 sps:$4 sm:$0xff]  }
 0x3e8   : > { %10581 = vmatprep.subr.bf16.mxu1 %v14746_v51  ;;  %v14794_v51 = vld [vmem:[%s15419_s30 + $0x7fc] ss:$36 sps:$4 sm:$0xff]  }
 0x3ea   : > { %10541 = vmatpush1.bf16.msra.mxu0 %v14741_v55  ;;  %v14789_v55 = vld [vmem:[%s15419_s30 + $0x378] ss:$36 sps:$4 sm:$0xff]  }
 0x3eb   : > { %10582 = vmatpush1.bf16.msra.mxu1 %v14744_v59  ;;  %10542 = vmatprep.subr.bf16.mxu0 %v14749_v62  ;;  %v14792_v59 = vld [vmem:[%s15419_s30 + $0x7f8] ss:$36 sps:$4 sm:$0xff]   ;;  %v14797_v62 = vld [vmem:[%s15419_s30 + $0x3c4] ss:$36 sps:$4 sm:$0xff]  }
 0x3ec   : > { %10583 = vmatprep.subr.bf16.mxu1 %v14752_v58  ;;  %v10238_v13 = vpop.f32.mrb[44].mxu0  ;;  %v14800_v58 = vld [vmem:[%s15419_s30 + $0x844] ss:$36 sps:$4 sm:$0xff]  }
 0x3ed   : > { %v10279_v57 = vpop.f32.mrb[44].mxu1  ;;  %v10239_v9 = vadd.f32 %v10238_v13, %v16548_v11  ;;  %v10240_v5 = vpop.f32.mrb[45].mxu0  ;;  %v14761_v11 = vld [vmem:[%s15419_s30 + $0x214] ss:$36 sps:$4 sm:$0xff]   ;;  %v14801_v13 = vld [vmem:[%s15419_s30 + $0x408] ss:$36 sps:$4 sm:$0xff]  }
 0x3ee   : > { %v10281_v63 = vpop.f32.mrb[45].mxu1  ;;  %v10241_v0 = vadd.f32 %v10240_v5, %v16550_v15  ;;  %v10242_v2 = vpop.f32.mrb[46].mxu0  ;;  %10543 = vmatpush1.bf16.msra.mxu0 %v14747_v53  ;;  %v14764_v15 = vld [vmem:[%s15419_s30 + $0x694] ss:$36 sps:$4 sm:$0xff]   ;;  %v14795_v53 = vld [vmem:[%s15419_s30 + $0x3c0] ss:$36 sps:$4 sm:$0xff]  }
 0x3ef   : > { %v10283_v3 = vpop.f32.mrb[46].mxu1  ;;  %10584 = vmatpush1.bf16.msra.mxu1 %v14750_v54  ;;  %v16624_v29 = vadd.f32 %v10279_v57, %v10239_v9  ;;  %v10243_v6 = vpop.f32.mrb[47].mxu0  ;;  %10544 = vmatprep.subr.bf16.mxu0 %v14755_v56  ;;  %v14798_v54 = vld [vmem:[%s15419_s30 + $0x840] ss:$36 sps:$4 sm:$0xff]   ;;  %v14803_v56 = vld [vmem:[%s15419_s30 + $0x40c] ss:$36 sps:$4 sm:$0xff]  }
 0x3f0   : > { %v10284_v21 = vpop.f32.mrb[47].mxu1  ;;  %10585 = vmatprep.subr.bf16.mxu1 %v14758_v1  ;;  %v16628_v10 = vadd.f32 %v10281_v63, %v10241_v0  ;;  %v14806_v1 = vld [vmem:[%s15419_s30 + $0x88c] ss:$36 sps:$4 sm:$0xff]   ;;  %v14809_v9 = vld [vmem:[%s15419_s30 + $0x454] ss:$36 sps:$4 sm:$0xff]  }
 0x3f1   : > { %v14804_v57 = vld [vmem:[%s15419_s30 + $0x888] ss:$36 sps:$4 sm:$0xff]   ;;  %v14812_v5 = vld [vmem:[%s15419_s30 + $0x8d4] ss:$36 sps:$4 sm:$0xff]   ;;  %v14815_v2 = vld [vmem:[%s15419_s30 + $0x91c] ss:$36 sps:$4 sm:$0xff]  }
 0x3f2   : > { %10545 = vmatpush1.bf16.msra.mxu0 %v14753_v4  ;;  %v14807_v63 = vld [vmem:[%s15419_s30 + $0x450] ss:$36 sps:$4 sm:$0xff]   ;;  %v14818_v3 = vld [vmem:[%s15419_s30 + $0xd9c] ss:$36 sps:$4 sm:$0xff]   ;;  %v14821_v6 = vld [vmem:[%s15419_s30 + $0x964] ss:$36 sps:$4 sm:$0xff]  }
 0x3f3   : > { %10586 = vmatpush1.bf16.msra.mxu1 %v14756_v19  ;;  %10546 = vmatprep.subr.bf16.mxu0 %v14761_v11  ;;  %v14810_v0 = vld [vmem:[%s15419_s30 + $0x8d0] ss:$36 sps:$4 sm:$0xff]   ;;  %v14813_v4 = vld [vmem:[%s15419_s30 + $0x918] ss:$36 sps:$4 sm:$0xff]   ;;  %v14824_v21 = vld [vmem:[%s15419_s30 + $0xde4] ss:$36 sps:$4 sm:$0xff]  }
 0x3f4   : > { %10587 = vmatprep.subr.bf16.mxu1 %v14764_v15  ;;  %v14816_v19 = vld [vmem:[%s15419_s30 + $0xd98] ss:$36 sps:$4 sm:$0xff]   ;;  %v14819_v11 = vld [vmem:[%s15419_s30 + $0x960] ss:$36 sps:$4 sm:$0xff]  }
 0x3f5   : > { %v14822_v15 = vld [vmem:[%s15419_s30 + $0xde0] ss:$36 sps:$4 sm:$0xff]  }
 0x3f6   : > { %10547 = vmatpush1.bf16.msra.mxu0 %v14759_v12  ;;  %v14827_v12 = vld [vmem:[%s15419_s30 + $0x9ac] ss:$36 sps:$4 sm:$0xff]  }
 0x3f7   : > { %10588 = vmatpush1.bf16.msra.mxu1 %v14762_v14  ;;  %10548 = vmatprep.subr.bf16.mxu0 %v14767_v16  ;;  %v14830_v14 = vld [vmem:[%s15419_s30 + $0xe2c] ss:$36 sps:$4 sm:$0xff]  }
 0x3f8   : > { %10589 = vmatprep.subr.bf16.mxu1 %v14770_v33  ;;  %v14825_v16 = vld [vmem:[%s15419_s30 + $0x9a8] ss:$36 sps:$4 sm:$0xff]  }
 0x3f9   : > { %v14828_v33 = vld [vmem:[%s15419_s30 + $0xe28] ss:$36 sps:$4 sm:$0xff]  }
 0x3fa   : > { %10549 = vmatpush1.bf16.msra.mxu0 %v14765_v27  ;;  %v14833_v27 = vld [vmem:[%s15419_s30 + $0x9f4] ss:$36 sps:$4 sm:$0xff]  }
 0x3fb   : > { %10590 = vmatpush1.bf16.msra.mxu1 %v14768_v20  ;;  %10550 = vmatprep.subr.bf16.mxu0 %v14773_v31  ;;  %v14836_v20 = vld [vmem:[%s15419_s30 + $0xe74] ss:$36 sps:$4 sm:$0xff]  }
 0x3fc   : > { %10591 = vmatprep.subr.bf16.mxu1 %v14776_v22  ;;  %v14831_v31 = vld [vmem:[%s15419_s30 + $0x9f0] ss:$36 sps:$4 sm:$0xff]  }
 0x3fd   : > { %v14834_v22 = vld [vmem:[%s15419_s30 + $0xe70] ss:$36 sps:$4 sm:$0xff]  }
 0x3fe   : > { %10551 = vmatpush1.bf16.msra.mxu0 %v14771_v28  ;;  %v14839_v28 = vld [vmem:[%s15419_s30 + $0xa3c] ss:$36 sps:$4 sm:$0xff]  }
 0x3ff   : > { %10592 = vmatpush1.bf16.msra.mxu1 %v14774_v30  ;;  %10552 = vmatprep.subr.bf16.mxu0 %v14779_v35  ;;  %v14842_v30 = vld [vmem:[%s15419_s30 + $0xebc] ss:$36 sps:$4 sm:$0xff]  }
 0x400   : > { %10593 = vmatprep.subr.bf16.mxu1 %v14782_v32  ;;  %v14837_v35 = vld [vmem:[%s15419_s30 + $0xa38] ss:$36 sps:$4 sm:$0xff]  }
 0x401   : > { %v14840_v32 = vld [vmem:[%s15419_s30 + $0xeb8] ss:$36 sps:$4 sm:$0xff]  }
 0x402   : > { %10553 = vmatpush1.bf16.msra.mxu0 %v14777_v44  ;;  %v14845_v44 = vld [vmem:[%s15419_s30 + $0xa84] ss:$36 sps:$4 sm:$0xff]  }
 0x403   : > { %10594 = vmatpush1.bf16.msra.mxu1 %v14780_v34  ;;  %10554 = vmatprep.subr.bf16.mxu0 %v14785_v36  ;;  %v14848_v34 = vld [vmem:[%s15419_s30 + $0xf04] ss:$36 sps:$4 sm:$0xff]  }
 0x404   : > { %10595 = vmatprep.subr.bf16.mxu1 %v14788_v43  ;;  %v14843_v36 = vld [vmem:[%s15419_s30 + $0xa80] ss:$36 sps:$4 sm:$0xff]  }
 0x405   : > { %v14846_v43 = vld [vmem:[%s15419_s30 + $0xf00] ss:$36 sps:$4 sm:$0xff]  }
 0x406   : > { %10555 = vmatpush1.bf16.msra.mxu0 %v14783_v45  ;;  %v14851_v45 = vld [vmem:[%s15419_s30 + $0xacc] ss:$36 sps:$4 sm:$0xff]  }
 0x407   : > { %10596 = vmatpush1.bf16.msra.mxu1 %v14786_v46  ;;  %10556 = vmatprep.subr.bf16.mxu0 %v14791_v50  ;;  %v14854_v46 = vld [vmem:[%s15419_s30 + $0xf4c] ss:$36 sps:$4 sm:$0xff]  }
 0x408   : > { %10597 = vmatprep.subr.bf16.mxu1 %v14794_v51 }
 0x40a   : > { %10557 = vmatpush1.bf16.msra.mxu0 %v14789_v55 }
 0x40b   : > { %10598 = vmatpush1.bf16.msra.mxu1 %v14792_v59  ;;  %10558 = vmatprep.subr.bf16.mxu0 %v14797_v62 }
 0x40c   : > { %10599 = vmatprep.subr.bf16.mxu1 %v14800_v58 }
 0x40e   : > { %10559 = vmatpush1.bf16.msra.mxu0 %v14795_v53 }
 0x40f   : > { %10600 = vmatpush1.bf16.msra.mxu1 %v14798_v54  ;;  %10560 = vmatprep.subr.bf16.mxu0 %v14803_v56  ;;  %v14849_v56 = vld [vmem:[%s15419_s30 + $0xac8] ss:$36 sps:$4 sm:$0xff]  }
 0x410   : > { %10601 = vmatprep.subr.bf16.mxu1 %v14806_v1  ;;  %v14852_v1 = vld [vmem:[%s15419_s30 + $0xf48] ss:$36 sps:$4 sm:$0xff]  }
 0x412   : > { %10561 = vmatpush1.bf16.msra.mxu0 %v14801_v13 }
 0x413   : > { %10602 = vmatpush1.bf16.msra.mxu1 %v14804_v57  ;;  %10562 = vmatprep.subr.bf16.mxu0 %v14809_v9 }
 0x414   : > { %10603 = vmatprep.subr.bf16.mxu1 %v14812_v5 }
 0x416   : > { %10563 = vmatpush1.bf16.msra.mxu0 %v14807_v63  ;;  %v14855_v63 = vld [vmem:[%s15419_s30 + $0xb10] ss:$36 sps:$4 sm:$0xff]  }
 0x417   : > { %10604 = vmatpush1.bf16.msra.mxu1 %v14810_v0  ;;  %10614 = vmatprep.subr.bf16.mxu0 %v14815_v2  ;;  %v14858_v0 = vld [vmem:[%s15419_s30 + $0xf90] ss:$36 sps:$4 sm:$0xff]   ;;  %v14863_v2 = vld [vmem:[%s15419_s30 + $0xb5c] ss:$36 sps:$4 sm:$0xff]  }
 0x418   : > { %10655 = vmatprep.subr.bf16.mxu1 %v14818_v3  ;;  %v14866_v3 = vld [vmem:[%s15419_s30 + $0xfdc] ss:$36 sps:$4 sm:$0xff]  }
 0x419   : > { %10565 = vmatmul.mubr.bf16.vlgmr.msra.gmra.mrb[60].mxu0 %v15496_v7 }
 0x41a   : > { %10606 = vmatmul.mubr.bf16.vlgmr.msra.gmra.mrb[60].mxu1 %v15498_v8  ;;  %10615 = vmatpush1.bf16.msra.mxu0 %v14813_v4  ;;  %v14861_v4 = vld [vmem:[%s15419_s30 + $0xb58] ss:$36 sps:$4 sm:$0xff]  }
 0x41b   : > { %10656 = vmatpush1.bf16.msra.mxu1 %v14816_v19  ;;  %10616 = vmatprep.subr.bf16.mxu0 %v14821_v6  ;;  %v14864_v19 = vld [vmem:[%s15419_s30 + $0xfd8] ss:$36 sps:$4 sm:$0xff]   ;;  %v14869_v6 = vld [vmem:[%s15419_s30 + $0xba4] ss:$36 sps:$4 sm:$0xff]  }
 0x41c   : > { %10657 = vmatprep.subr.bf16.mxu1 %v14824_v21  ;;  %10646 = vmatprep.mubr.bf16.mxu0 %v15536_v37  ;;  %v14872_v21 = vld [vmem:[%s15419_s30 + $0x1024] ss:$36 sps:$4 sm:$0xff]  }
 0x41d   : > { %10687 = vmatprep.mubr.bf16.mxu1 %v15540_v38 }
 0x41e   : > { %10617 = vmatpush1.bf16.msra.mxu0 %v14819_v11  ;;  %v14867_v11 = vld [vmem:[%s15419_s30 + $0xba0] ss:$36 sps:$4 sm:$0xff]  }
 0x41f   : > { %10658 = vmatpush1.bf16.msra.mxu1 %v14822_v15  ;;  %10618 = vmatprep.subr.bf16.mxu0 %v14827_v12  ;;  %v14870_v15 = vld [vmem:[%s15419_s30 + $0x1020] ss:$36 sps:$4 sm:$0xff]   ;;  %v14875_v12 = vld [vmem:[%s15419_s30 + $0xbec] ss:$36 sps:$4 sm:$0xff]  }
 0x420   : > { %10659 = vmatprep.subr.bf16.mxu1 %v14830_v14  ;;  %v14878_v14 = vld [vmem:[%s15419_s30 + $0x106c] ss:$36 sps:$4 sm:$0xff]  }
 0x422   : > { %10619 = vmatpush1.bf16.msra.mxu0 %v14825_v16  ;;  %v14873_v16 = vld [vmem:[%s15419_s30 + $0xbe8] ss:$36 sps:$4 sm:$0xff]  }
 0x423   : > { %10660 = vmatpush1.bf16.msra.mxu1 %v14828_v33  ;;  %10620 = vmatprep.subr.bf16.mxu0 %v14833_v27  ;;  %v14876_v33 = vld [vmem:[%s15419_s30 + $0x1068] ss:$36 sps:$4 sm:$0xff]   ;;  %v14881_v27 = vld [vmem:[%s15419_s30 + $0xc34] ss:$36 sps:$4 sm:$0xff]  }
 0x424   : > { %10661 = vmatprep.subr.bf16.mxu1 %v14836_v20  ;;  %v14884_v20 = vld [vmem:[%s15419_s30 + $0x10b4] ss:$36 sps:$4 sm:$0xff]  }
 0x426   : > { %10621 = vmatpush1.bf16.msra.mxu0 %v14831_v31  ;;  %v14879_v31 = vld [vmem:[%s15419_s30 + $0xc30] ss:$36 sps:$4 sm:$0xff]  }
 0x427   : > { %10662 = vmatpush1.bf16.msra.mxu1 %v14834_v22  ;;  %10622 = vmatprep.subr.bf16.mxu0 %v14839_v28  ;;  %v14882_v22 = vld [vmem:[%s15419_s30 + $0x10b0] ss:$36 sps:$4 sm:$0xff]   ;;  %v14887_v28 = vld [vmem:[%s15419_s30 + $0xc7c] ss:$36 sps:$4 sm:$0xff]  }
 0x428   : > { %10663 = vmatprep.subr.bf16.mxu1 %v14842_v30  ;;  %v14890_v30 = vld [vmem:[%s15419_s30 + $0x10fc] ss:$36 sps:$4 sm:$0xff]  }
 0x42a   : > { %10623 = vmatpush1.bf16.msra.mxu0 %v14837_v35  ;;  %v14885_v35 = vld [vmem:[%s15419_s30 + $0xc78] ss:$36 sps:$4 sm:$0xff]  }
 0x42b   : > { %10664 = vmatpush1.bf16.msra.mxu1 %v14840_v32  ;;  %10624 = vmatprep.subr.bf16.mxu0 %v14845_v44  ;;  %v14888_v32 = vld [vmem:[%s15419_s30 + $0x10f8] ss:$36 sps:$4 sm:$0xff]   ;;  %v14893_v44 = vld [vmem:[%s15419_s30 + $0xcc4] ss:$36 sps:$4 sm:$0xff]  }
 0x42c   : > { %10665 = vmatprep.subr.bf16.mxu1 %v14848_v34  ;;  %v10320_v50 = vpop.f32.mrb[48].mxu0  ;;  %v14896_v34 = vld [vmem:[%s15419_s30 + $0x1144] ss:$36 sps:$4 sm:$0xff]  }
 0x42d   : > { %v10361_v51 = vpop.f32.mrb[48].mxu1  ;;  %v10321_v55 = vadd.f32 %v10320_v50, %v16624_v29  ;;  %v10322_v59 = vpop.f32.mrb[49].mxu0  ;;  %v14857_v29 = vld [vmem:[%s15419_s30 + $0xb14] ss:$36 sps:$4 sm:$0xff]   ;;  %v14897_v50 = vld [vmem:[%s15419_s30 + $0xd08] ss:$36 sps:$4 sm:$0xff]  }
 0x42e   : > { %v10363_v62 = vpop.f32.mrb[49].mxu1  ;;  %v10323_v58 = vadd.f32 %v10322_v59, %v16628_v10  ;;  %v10324_v53 = vpop.f32.mrb[50].mxu0  ;;  %10625 = vmatpush1.bf16.msra.mxu0 %v14843_v36  ;;  %v14860_v10 = vld [vmem:[%s15419_s30 + $0xf94] ss:$36 sps:$4 sm:$0xff]   ;;  %v14891_v36 = vld [vmem:[%s15419_s30 + $0xcc0] ss:$36 sps:$4 sm:$0xff]  }
 0x42f   : > { %v10365_v54 = vpop.f32.mrb[50].mxu1  ;;  %10666 = vmatpush1.bf16.msra.mxu1 %v14846_v43  ;;  %v16698_v13 = vadd.f32 %v10361_v51, %v10321_v55  ;;  %v10325_v57 = vpop.f32.mrb[51].mxu0  ;;  %10626 = vmatprep.subr.bf16.mxu0 %v14851_v45  ;;  %v14894_v43 = vld [vmem:[%s15419_s30 + $0x1140] ss:$36 sps:$4 sm:$0xff]   ;;  %v14899_v45 = vld [vmem:[%s15419_s30 + $0xd0c] ss:$36 sps:$4 sm:$0xff]  }
 0x430   : > { %v10366_v9 = vpop.f32.mrb[51].mxu1  ;;  %10667 = vmatprep.subr.bf16.mxu1 %v14854_v46  ;;  %v16702_v5 = vadd.f32 %v10363_v62, %v10323_v58  ;;  %v14902_v46 = vld [vmem:[%s15419_s30 + $0x118c] ss:$36 sps:$4 sm:$0xff]   ;;  %v14905_v55 = vld [vmem:[%s15419_s30 + $0xd54] ss:$36 sps:$4 sm:$0xff]  }
 0x431   : > { %v14900_v51 = vld [vmem:[%s15419_s30 + $0x1188] ss:$36 sps:$4 sm:$0xff]   ;;  %v14908_v59 = vld [vmem:[%s15419_s30 + $0x11d4] ss:$36 sps:$4 sm:$0xff]   ;;  %v14911_v53 = vld [vmem:[%s15419_s30 + $0x121c] ss:$36 sps:$4 sm:$0xff]  }
 0x432   : > { %10627 = vmatpush1.bf16.msra.mxu0 %v14849_v56  ;;  %v14903_v62 = vld [vmem:[%s15419_s30 + $0xd50] ss:$36 sps:$4 sm:$0xff]   ;;  %v14914_v54 = vld [vmem:[%s15419_s30 + $0x169c] ss:$36 sps:$4 sm:$0xff]   ;;  %v14917_v57 = vld [vmem:[%s15419_s30 + $0x1264] ss:$36 sps:$4 sm:$0xff]  }
 0x433   : > { %10668 = vmatpush1.bf16.msra.mxu1 %v14852_v1  ;;  %10628 = vmatprep.subr.bf16.mxu0 %v14857_v29  ;;  %v14906_v58 = vld [vmem:[%s15419_s30 + $0x11d0] ss:$36 sps:$4 sm:$0xff]   ;;  %v14909_v56 = vld [vmem:[%s15419_s30 + $0x1218] ss:$36 sps:$4 sm:$0xff]   ;;  %v14920_v9 = vld [vmem:[%s15419_s30 + $0x16e4] ss:$36 sps:$4 sm:$0xff]  }
 0x434   : > { %10669 = vmatprep.subr.bf16.mxu1 %v14860_v10  ;;  %v14912_v1 = vld [vmem:[%s15419_s30 + $0x1698] ss:$36 sps:$4 sm:$0xff]   ;;  %v14915_v29 = vld [vmem:[%s15419_s30 + $0x1260] ss:$36 sps:$4 sm:$0xff]  }
 0x435   : > { %v14918_v10 = vld [vmem:[%s15419_s30 + $0x16e0] ss:$36 sps:$4 sm:$0xff]  }
 0x436   : > { %10629 = vmatpush1.bf16.msra.mxu0 %v14855_v63  ;;  %v14923_v63 = vld [vmem:[%s15419_s30 + $0x12ac] ss:$36 sps:$4 sm:$0xff]  }
 0x437   : > { %10670 = vmatpush1.bf16.msra.mxu1 %v14858_v0  ;;  %10630 = vmatprep.subr.bf16.mxu0 %v14863_v2  ;;  %v14926_v0 = vld [vmem:[%s15419_s30 + $0x172c] ss:$36 sps:$4 sm:$0xff]  }
 0x438   : > { %10671 = vmatprep.subr.bf16.mxu1 %v14866_v3  ;;  %v14921_v2 = vld [vmem:[%s15419_s30 + $0x12a8] ss:$36 sps:$4 sm:$0xff]  }
 0x439   : > { %v14924_v3 = vld [vmem:[%s15419_s30 + $0x1728] ss:$36 sps:$4 sm:$0xff]  }
 0x43a   : > { %10631 = vmatpush1.bf16.msra.mxu0 %v14861_v4  ;;  %v14929_v4 = vld [vmem:[%s15419_s30 + $0x12f4] ss:$36 sps:$4 sm:$0xff]  }
 0x43b   : > { %10672 = vmatpush1.bf16.msra.mxu1 %v14864_v19  ;;  %10632 = vmatprep.subr.bf16.mxu0 %v14869_v6  ;;  %v14932_v19 = vld [vmem:[%s15419_s30 + $0x1774] ss:$36 sps:$4 sm:$0xff]  }
 0x43c   : > { %10673 = vmatprep.subr.bf16.mxu1 %v14872_v21  ;;  %v14927_v6 = vld [vmem:[%s15419_s30 + $0x12f0] ss:$36 sps:$4 sm:$0xff]  }
 0x43d   : > { %v14930_v21 = vld [vmem:[%s15419_s30 + $0x1770] ss:$36 sps:$4 sm:$0xff]  }
 0x43e   : > { %10633 = vmatpush1.bf16.msra.mxu0 %v14867_v11  ;;  %v14935_v11 = vld [vmem:[%s15419_s30 + $0x133c] ss:$36 sps:$4 sm:$0xff]  }
 0x43f   : > { %10674 = vmatpush1.bf16.msra.mxu1 %v14870_v15  ;;  %10634 = vmatprep.subr.bf16.mxu0 %v14875_v12  ;;  %v14938_v15 = vld [vmem:[%s15419_s30 + $0x17bc] ss:$36 sps:$4 sm:$0xff]  }
 0x440   : > { %10675 = vmatprep.subr.bf16.mxu1 %v14878_v14  ;;  %v14933_v12 = vld [vmem:[%s15419_s30 + $0x1338] ss:$36 sps:$4 sm:$0xff]  }
 0x441   : > { %v14936_v14 = vld [vmem:[%s15419_s30 + $0x17b8] ss:$36 sps:$4 sm:$0xff]  }
 0x442   : > { %10635 = vmatpush1.bf16.msra.mxu0 %v14873_v16  ;;  %v14941_v16 = vld [vmem:[%s15419_s30 + $0x1384] ss:$36 sps:$4 sm:$0xff]  }
 0x443   : > { %10676 = vmatpush1.bf16.msra.mxu1 %v14876_v33  ;;  %10636 = vmatprep.subr.bf16.mxu0 %v14881_v27  ;;  %v14944_v33 = vld [vmem:[%s15419_s30 + $0x1804] ss:$36 sps:$4 sm:$0xff]  }
 0x444   : > { %10677 = vmatprep.subr.bf16.mxu1 %v14884_v20  ;;  %v14939_v27 = vld [vmem:[%s15419_s30 + $0x1380] ss:$36 sps:$4 sm:$0xff]  }
 0x445   : > { %v14942_v20 = vld [vmem:[%s15419_s30 + $0x1800] ss:$36 sps:$4 sm:$0xff]  }
 0x446   : > { %10637 = vmatpush1.bf16.msra.mxu0 %v14879_v31  ;;  %v14947_v31 = vld [vmem:[%s15419_s30 + $0x13cc] ss:$36 sps:$4 sm:$0xff]  }
 0x447   : > { %10678 = vmatpush1.bf16.msra.mxu1 %v14882_v22  ;;  %10638 = vmatprep.subr.bf16.mxu0 %v14887_v28  ;;  %v14950_v22 = vld [vmem:[%s15419_s30 + $0x184c] ss:$36 sps:$4 sm:$0xff]  }
 0x448   : > { %10679 = vmatprep.subr.bf16.mxu1 %v14890_v30 }
 0x44a   : > { %10639 = vmatpush1.bf16.msra.mxu0 %v14885_v35 }
 0x44b   : > { %10680 = vmatpush1.bf16.msra.mxu1 %v14888_v32  ;;  %10640 = vmatprep.subr.bf16.mxu0 %v14893_v44 }
 0x44c   : > { %10681 = vmatprep.subr.bf16.mxu1 %v14896_v34 }
 0x44e   : > { %10641 = vmatpush1.bf16.msra.mxu0 %v14891_v36 }
 0x44f   : > { %10682 = vmatpush1.bf16.msra.mxu1 %v14894_v43  ;;  %10642 = vmatprep.subr.bf16.mxu0 %v14899_v45  ;;  %v14945_v45 = vld [vmem:[%s15419_s30 + $0x13c8] ss:$36 sps:$4 sm:$0xff]  }
 0x450   : > { %10683 = vmatprep.subr.bf16.mxu1 %v14902_v46  ;;  %v14948_v46 = vld [vmem:[%s15419_s30 + $0x1848] ss:$36 sps:$4 sm:$0xff]  }
 0x452   : > { %10643 = vmatpush1.bf16.msra.mxu0 %v14897_v50 }
 0x453   : > { %10684 = vmatpush1.bf16.msra.mxu1 %v14900_v51  ;;  %10644 = vmatprep.subr.bf16.mxu0 %v14905_v55 }
 0x454   : > { %10685 = vmatprep.subr.bf16.mxu1 %v14908_v59 }
 0x456   : > { %10645 = vmatpush1.bf16.msra.mxu0 %v14903_v62  ;;  %v14951_v62 = vld [vmem:[%s15419_s30 + $0x1410] ss:$36 sps:$4 sm:$0xff]  }
 0x457   : > { %10686 = vmatpush1.bf16.msra.mxu1 %v14906_v58  ;;  %10696 = vmatprep.subr.bf16.mxu0 %v14911_v53  ;;  %v14954_v58 = vld [vmem:[%s15419_s30 + $0x1890] ss:$36 sps:$4 sm:$0xff]   ;;  %v14959_v53 = vld [vmem:[%s15419_s30 + $0x145c] ss:$36 sps:$4 sm:$0xff]  }
 0x458   : > { %10737 = vmatprep.subr.bf16.mxu1 %v14914_v54  ;;  %v14962_v54 = vld [vmem:[%s15419_s30 + $0x18dc] ss:$36 sps:$4 sm:$0xff]  }
 0x459   : > { %10647 = vmatmul.mubr.bf16.vlgmr.msra.gmra.mrb[64].mxu0 %v15584_v17 }
 0x45a   : > { %10688 = vmatmul.mubr.bf16.vlgmr.msra.gmra.mrb[64].mxu1 %v15588_v18  ;;  %10697 = vmatpush1.bf16.msra.mxu0 %v14909_v56  ;;  %v14957_v56 = vld [vmem:[%s15419_s30 + $0x1458] ss:$36 sps:$4 sm:$0xff]  }
 0x45b   : > { %10738 = vmatpush1.bf16.msra.mxu1 %v14912_v1  ;;  %10698 = vmatprep.subr.bf16.mxu0 %v14917_v57  ;;  %v14960_v1 = vld [vmem:[%s15419_s30 + $0x18d8] ss:$36 sps:$4 sm:$0xff]   ;;  %v14965_v57 = vld [vmem:[%s15419_s30 + $0x14a4] ss:$36 sps:$4 sm:$0xff]  }
 0x45c   : > { %10739 = vmatprep.subr.bf16.mxu1 %v14920_v9  ;;  %10728 = vmatprep.mubr.bf16.mxu0 %v15602_v25  ;;  %v14968_v9 = vld [vmem:[%s15419_s30 + $0x1924] ss:$36 sps:$4 sm:$0xff]  }
 0x45d   : > { %10769 = vmatprep.mubr.bf16.mxu1 %v15606_v26 }
 0x45e   : > { %10699 = vmatpush1.bf16.msra.mxu0 %v14915_v29  ;;  %v14963_v29 = vld [vmem:[%s15419_s30 + $0x14a0] ss:$36 sps:$4 sm:$0xff]  }
 0x45f   : > { %10740 = vmatpush1.bf16.msra.mxu1 %v14918_v10  ;;  %10700 = vmatprep.subr.bf16.mxu0 %v14923_v63  ;;  %v14966_v10 = vld [vmem:[%s15419_s30 + $0x1920] ss:$36 sps:$4 sm:$0xff]   ;;  %v14971_v63 = vld [vmem:[%s15419_s30 + $0x14ec] ss:$36 sps:$4 sm:$0xff]  }
 0x460   : > { %10741 = vmatprep.subr.bf16.mxu1 %v14926_v0  ;;  %v14974_v0 = vld [vmem:[%s15419_s30 + $0x196c] ss:$36 sps:$4 sm:$0xff]  }
 0x462   : > { %10701 = vmatpush1.bf16.msra.mxu0 %v14921_v2  ;;  %v14969_v2 = vld [vmem:[%s15419_s30 + $0x14e8] ss:$36 sps:$4 sm:$0xff]  }
 0x463   : > { %10742 = vmatpush1.bf16.msra.mxu1 %v14924_v3  ;;  %10702 = vmatprep.subr.bf16.mxu0 %v14929_v4  ;;  %v14972_v3 = vld [vmem:[%s15419_s30 + $0x1968] ss:$36 sps:$4 sm:$0xff]   ;;  %v14977_v4 = vld [vmem:[%s15419_s30 + $0x1534] ss:$36 sps:$4 sm:$0xff]  }
 0x464   : > { %10743 = vmatprep.subr.bf16.mxu1 %v14932_v19  ;;  %v14980_v19 = vld [vmem:[%s15419_s30 + $0x19b4] ss:$36 sps:$4 sm:$0xff]  }
 0x466   : > { %10703 = vmatpush1.bf16.msra.mxu0 %v14927_v6  ;;  %v14975_v6 = vld [vmem:[%s15419_s30 + $0x1530] ss:$36 sps:$4 sm:$0xff]  }
 0x467   : > { %10744 = vmatpush1.bf16.msra.mxu1 %v14930_v21  ;;  %10704 = vmatprep.subr.bf16.mxu0 %v14935_v11  ;;  %v14978_v21 = vld [vmem:[%s15419_s30 + $0x19b0] ss:$36 sps:$4 sm:$0xff]   ;;  %v14983_v11 = vld [vmem:[%s15419_s30 + $0x157c] ss:$36 sps:$4 sm:$0xff]  }
 0x468   : > { %10745 = vmatprep.subr.bf16.mxu1 %v14938_v15  ;;  %v14986_v15 = vld [vmem:[%s15419_s30 + $0x19fc] ss:$36 sps:$4 sm:$0xff]  }
 0x46a   : > { %10705 = vmatpush1.bf16.msra.mxu0 %v14933_v12  ;;  %v14981_v12 = vld [vmem:[%s15419_s30 + $0x1578] ss:$36 sps:$4 sm:$0xff]  }
 0x46b   : > { %10746 = vmatpush1.bf16.msra.mxu1 %v14936_v14  ;;  %10706 = vmatprep.subr.bf16.mxu0 %v14941_v16  ;;  %v14984_v14 = vld [vmem:[%s15419_s30 + $0x19f8] ss:$36 sps:$4 sm:$0xff]   ;;  %v14989_v16 = vld [vmem:[%s15419_s30 + $0x15c4] ss:$36 sps:$4 sm:$0xff]  }
 0x46c   : > { %10747 = vmatprep.subr.bf16.mxu1 %v14944_v33  ;;  %v10402_v28 = vpop.f32.mrb[52].mxu0  ;;  %v14992_v33 = vld [vmem:[%s15419_s30 + $0x1a44] ss:$36 sps:$4 sm:$0xff]  }
 0x46d   : > { %v10443_v30 = vpop.f32.mrb[52].mxu1  ;;  %v10403_v35 = vadd.f32 %v10402_v28, %v16698_v13  ;;  %v10404_v32 = vpop.f32.mrb[53].mxu0  ;;  %v14953_v13 = vld [vmem:[%s15419_s30 + $0x1414] ss:$36 sps:$4 sm:$0xff]   ;;  %v14993_v28 = vld [vmem:[%s15419_s30 + $0x1608] ss:$36 sps:$4 sm:$0xff]  }
 0x46e   : > { %v10445_v44 = vpop.f32.mrb[53].mxu1  ;;  %v10405_v34 = vadd.f32 %v10404_v32, %v16702_v5  ;;  %v10406_v36 = vpop.f32.mrb[54].mxu0  ;;  %10707 = vmatpush1.bf16.msra.mxu0 %v14939_v27  ;;  %v14956_v5 = vld [vmem:[%s15419_s30 + $0x1894] ss:$36 sps:$4 sm:$0xff]   ;;  %v14987_v27 = vld [vmem:[%s15419_s30 + $0x15c0] ss:$36 sps:$4 sm:$0xff]  }
 0x46f   : > { %v10447_v43 = vpop.f32.mrb[54].mxu1  ;;  %10748 = vmatpush1.bf16.msra.mxu1 %v14942_v20  ;;  %v16772_v50 = vadd.f32 %v10443_v30, %v10403_v35  ;;  %v10407_v51 = vpop.f32.mrb[55].mxu0  ;;  %10708 = vmatprep.subr.bf16.mxu0 %v14947_v31  ;;  %v14990_v20 = vld [vmem:[%s15419_s30 + $0x1a40] ss:$36 sps:$4 sm:$0xff]   ;;  %v14995_v31 = vld [vmem:[%s15419_s30 + $0x160c] ss:$36 sps:$4 sm:$0xff]  }
 0x470   : > { %v10448_v55 = vpop.f32.mrb[55].mxu1  ;;  %10749 = vmatprep.subr.bf16.mxu1 %v14950_v22  ;;  %v16776_v59 = vadd.f32 %v10445_v44, %v10405_v34  ;;  %v14998_v22 = vld [vmem:[%s15419_s30 + $0x1a8c] ss:$36 sps:$4 sm:$0xff]   ;;  %v15001_v35 = vld [vmem:[%s15419_s30 + $0x1654] ss:$36 sps:$4 sm:$0xff]  }
 0x471   : > { %v14996_v30 = vld [vmem:[%s15419_s30 + $0x1a88] ss:$36 sps:$4 sm:$0xff]   ;;  %v15004_v32 = vld [vmem:[%s15419_s30 + $0x1ad4] ss:$36 sps:$4 sm:$0xff]   ;;  %v15007_v36 = vld [vmem:[%s15419_s30 + $0x1b1c] ss:$36 sps:$4 sm:$0xff]  }
 0x472   : > { %10709 = vmatpush1.bf16.msra.mxu0 %v14945_v45  ;;  %v14999_v44 = vld [vmem:[%s15419_s30 + $0x1650] ss:$36 sps:$4 sm:$0xff]   ;;  %v15010_v43 = vld [vmem:[%s15419_s30 + $0x1f9c] ss:$36 sps:$4 sm:$0xff]   ;;  %v15013_v51 = vld [vmem:[%s15419_s30 + $0x1b64] ss:$36 sps:$4 sm:$0xff]  }
 0x473   : > { %10750 = vmatpush1.bf16.msra.mxu1 %v14948_v46  ;;  %10710 = vmatprep.subr.bf16.mxu0 %v14953_v13  ;;  %v15002_v34 = vld [vmem:[%s15419_s30 + $0x1ad0] ss:$36 sps:$4 sm:$0xff]   ;;  %v15005_v45 = vld [vmem:[%s15419_s30 + $0x1b18] ss:$36 sps:$4 sm:$0xff]   ;;  %v15016_v55 = vld [vmem:[%s15419_s30 + $0x1fe4] ss:$36 sps:$4 sm:$0xff]  }
 0x474   : > { %10751 = vmatprep.subr.bf16.mxu1 %v14956_v5  ;;  %v15008_v46 = vld [vmem:[%s15419_s30 + $0x1f98] ss:$36 sps:$4 sm:$0xff]   ;;  %v15011_v13 = vld [vmem:[%s15419_s30 + $0x1b60] ss:$36 sps:$4 sm:$0xff]  }
 0x475   : > { %v15014_v5 = vld [vmem:[%s15419_s30 + $0x1fe0] ss:$36 sps:$4 sm:$0xff]  }
 0x476   : > { %10711 = vmatpush1.bf16.msra.mxu0 %v14951_v62  ;;  %v15019_v62 = vld [vmem:[%s15419_s30 + $0x1bac] ss:$36 sps:$4 sm:$0xff]  }
 0x477   : > { %10752 = vmatpush1.bf16.msra.mxu1 %v14954_v58  ;;  %10712 = vmatprep.subr.bf16.mxu0 %v14959_v53  ;;  %v15022_v58 = vld [vmem:[%s15419_s30 + $0x202c] ss:$36 sps:$4 sm:$0xff]  }
 0x478   : > { %10753 = vmatprep.subr.bf16.mxu1 %v14962_v54  ;;  %v15017_v53 = vld [vmem:[%s15419_s30 + $0x1ba8] ss:$36 sps:$4 sm:$0xff]  }
 0x479   : > { %v15020_v54 = vld [vmem:[%s15419_s30 + $0x2028] ss:$36 sps:$4 sm:$0xff]  }
 0x47a   : > { %10713 = vmatpush1.bf16.msra.mxu0 %v14957_v56  ;;  %v15025_v56 = vld [vmem:[%s15419_s30 + $0x1bf4] ss:$36 sps:$4 sm:$0xff]  }
 0x47b   : > { %10754 = vmatpush1.bf16.msra.mxu1 %v14960_v1  ;;  %10714 = vmatprep.subr.bf16.mxu0 %v14965_v57  ;;  %v15028_v1 = vld [vmem:[%s15419_s30 + $0x2074] ss:$36 sps:$4 sm:$0xff]  }
 0x47c   : > { %10755 = vmatprep.subr.bf16.mxu1 %v14968_v9  ;;  %v15023_v57 = vld [vmem:[%s15419_s30 + $0x1bf0] ss:$36 sps:$4 sm:$0xff]  }
 0x47d   : > { %v15026_v9 = vld [vmem:[%s15419_s30 + $0x2070] ss:$36 sps:$4 sm:$0xff]  }
 0x47e   : > { %10715 = vmatpush1.bf16.msra.mxu0 %v14963_v29  ;;  %v15031_v29 = vld [vmem:[%s15419_s30 + $0x1c3c] ss:$36 sps:$4 sm:$0xff]  }
 0x47f   : > { %10756 = vmatpush1.bf16.msra.mxu1 %v14966_v10  ;;  %10716 = vmatprep.subr.bf16.mxu0 %v14971_v63  ;;  %v15034_v10 = vld [vmem:[%s15419_s30 + $0x20bc] ss:$36 sps:$4 sm:$0xff]  }
 0x480   : > { %10757 = vmatprep.subr.bf16.mxu1 %v14974_v0  ;;  %v15029_v63 = vld [vmem:[%s15419_s30 + $0x1c38] ss:$36 sps:$4 sm:$0xff]  }
 0x481   : > { %v15032_v0 = vld [vmem:[%s15419_s30 + $0x20b8] ss:$36 sps:$4 sm:$0xff]  }
 0x482   : > { %10717 = vmatpush1.bf16.msra.mxu0 %v14969_v2  ;;  %v15037_v2 = vld [vmem:[%s15419_s30 + $0x1c84] ss:$36 sps:$4 sm:$0xff]  }
 0x483   : > { %10758 = vmatpush1.bf16.msra.mxu1 %v14972_v3  ;;  %10718 = vmatprep.subr.bf16.mxu0 %v14977_v4  ;;  %v15040_v3 = vld [vmem:[%s15419_s30 + $0x2104] ss:$36 sps:$4 sm:$0xff]  }
 0x484   : > { %10759 = vmatprep.subr.bf16.mxu1 %v14980_v19  ;;  %v15035_v4 = vld [vmem:[%s15419_s30 + $0x1c80] ss:$36 sps:$4 sm:$0xff]  }
 0x485   : > { %v15038_v19 = vld [vmem:[%s15419_s30 + $0x2100] ss:$36 sps:$4 sm:$0xff]  }
 0x486   : > { %10719 = vmatpush1.bf16.msra.mxu0 %v14975_v6  ;;  %v15043_v6 = vld [vmem:[%s15419_s30 + $0x1ccc] ss:$36 sps:$4 sm:$0xff]  }
 0x487   : > { %10760 = vmatpush1.bf16.msra.mxu1 %v14978_v21  ;;  %10720 = vmatprep.subr.bf16.mxu0 %v14983_v11  ;;  %v15046_v21 = vld [vmem:[%s15419_s30 + $0x214c] ss:$36 sps:$4 sm:$0xff]  }
 0x488   : > { %10761 = vmatprep.subr.bf16.mxu1 %v14986_v15 }
 0x48a   : > { %10721 = vmatpush1.bf16.msra.mxu0 %v14981_v12 }
 0x48b   : > { %10762 = vmatpush1.bf16.msra.mxu1 %v14984_v14  ;;  %10722 = vmatprep.subr.bf16.mxu0 %v14989_v16 }
 0x48c   : > { %10763 = vmatprep.subr.bf16.mxu1 %v14992_v33  ;;  %v15041_v33 = vld [vmem:[%s15419_s30 + $0x1cc8] ss:$36 sps:$4 sm:$0xff]  }
 0x48e   : > { %10723 = vmatpush1.bf16.msra.mxu0 %v14987_v27  ;;  %v257_v27 = vld [vmem:[#allocation2 + $0x20] sm:$0xff] }
 0x48f   : > { %10764 = vmatpush1.bf16.msra.mxu1 %v14990_v20  ;;  %10724 = vmatprep.subr.bf16.mxu0 %v14995_v31  ;;  %v258_v31 = vld [vmem:[#allocation2 + $0x28] sm:$0xff] }
 0x490   : > { %10765 = vmatprep.subr.bf16.mxu1 %v14998_v22 }
 0x492   : > { %10725 = vmatpush1.bf16.msra.mxu0 %v14993_v28 }
 0x493   : > { %10766 = vmatpush1.bf16.msra.mxu1 %v14996_v30  ;;  %10726 = vmatprep.subr.bf16.mxu0 %v15001_v35  ;;  %v15044_v30 = vld [vmem:[%s15419_s30 + $0x2148] ss:$36 sps:$4 sm:$0xff]  }
 0x494   : > { %10767 = vmatprep.subr.bf16.mxu1 %v15004_v32 }
 0x496   : > { %10727 = vmatpush1.bf16.msra.mxu0 %v14999_v44  ;;  %v15049_v44 = vld [vmem:[%s15419_s30 + $0x1d14] ss:$36 sps:$4 sm:$0xff]  }
 0x497   : > { %10768 = vmatpush1.bf16.msra.mxu1 %v15002_v34  ;;  %10778 = vmatprep.subr.bf16.mxu0 %v15007_v36  ;;  %v15052_v34 = vld [vmem:[%s15419_s30 + $0x2194] ss:$36 sps:$4 sm:$0xff]  }
 0x498   : > { %10819 = vmatprep.subr.bf16.mxu1 %v15010_v43 }
 0x499   : > { %10729 = vmatmul.mubr.bf16.vlgmr.msra.gmra.mrb[68].mxu0 %v15676_v39 }
 0x49a   : > { %10770 = vmatmul.mubr.bf16.vlgmr.msra.gmra.mrb[68].mxu1 %v15680_v40  ;;  %10779 = vmatpush1.bf16.msra.mxu0 %v15005_v45  ;;  %v15047_v45 = vld [vmem:[%s15419_s30 + $0x1d10] ss:$36 sps:$4 sm:$0xff]  }
 0x49b   : > { %10820 = vmatpush1.bf16.msra.mxu1 %v15008_v46  ;;  %10780 = vmatprep.subr.bf16.mxu0 %v15013_v51  ;;  %v15050_v46 = vld [vmem:[%s15419_s30 + $0x2190] ss:$36 sps:$4 sm:$0xff]   ;;  %v15055_v51 = vld [vmem:[%s15419_s30 + $0x1d5c] ss:$36 sps:$4 sm:$0xff]  }
 0x49c   : > { %10821 = vmatprep.subr.bf16.mxu1 %v15016_v55  ;;  %10810 = vmatprep.mubr.bf16.mxu0 %v15692_v23  ;;  %v15058_v55 = vld [vmem:[%s15419_s30 + $0x21dc] ss:$36 sps:$4 sm:$0xff]  }
 0x49d   : > { %10851 = vmatprep.mubr.bf16.mxu1 %v15696_v24 }
 0x49e   : > { %10781 = vmatpush1.bf16.msra.mxu0 %v15011_v13  ;;  %v15053_v13 = vld [vmem:[%s15419_s30 + $0x1d58] ss:$36 sps:$4 sm:$0xff]  }
 0x49f   : > { %10822 = vmatpush1.bf16.msra.mxu1 %v15014_v5  ;;  %10782 = vmatprep.subr.bf16.mxu0 %v15019_v62  ;;  %v15056_v5 = vld [vmem:[%s15419_s30 + $0x21d8] ss:$36 sps:$4 sm:$0xff]   ;;  %v15061_v62 = vld [vmem:[%s15419_s30 + $0x1da4] ss:$36 sps:$4 sm:$0xff]  }
 0x4a0   : > { %10823 = vmatprep.subr.bf16.mxu1 %v15022_v58  ;;  %v15064_v58 = vld [vmem:[%s15419_s30 + $0x2224] ss:$36 sps:$4 sm:$0xff]  }
 0x4a2   : > { %10783 = vmatpush1.bf16.msra.mxu0 %v15017_v53  ;;  %v15059_v53 = vld [vmem:[%s15419_s30 + $0x1da0] ss:$36 sps:$4 sm:$0xff]  }
 0x4a3   : > { %10824 = vmatpush1.bf16.msra.mxu1 %v15020_v54  ;;  %10784 = vmatprep.subr.bf16.mxu0 %v15025_v56  ;;  %v15062_v54 = vld [vmem:[%s15419_s30 + $0x2220] ss:$36 sps:$4 sm:$0xff]   ;;  %v15067_v56 = vld [vmem:[%s15419_s30 + $0x1dec] ss:$36 sps:$4 sm:$0xff]  }
 0x4a4   : > { %10825 = vmatprep.subr.bf16.mxu1 %v15028_v1  ;;  %v15070_v1 = vld [vmem:[%s15419_s30 + $0x226c] ss:$36 sps:$4 sm:$0xff]  }
 0x4a6   : > { %10785 = vmatpush1.bf16.msra.mxu0 %v15023_v57  ;;  %v15065_v57 = vld [vmem:[%s15419_s30 + $0x1de8] ss:$36 sps:$4 sm:$0xff]  }
 0x4a7   : > { %10826 = vmatpush1.bf16.msra.mxu1 %v15026_v9  ;;  %10786 = vmatprep.subr.bf16.mxu0 %v15031_v29  ;;  %v15068_v9 = vld [vmem:[%s15419_s30 + $0x2268] ss:$36 sps:$4 sm:$0xff]   ;;  %v15073_v29 = vld [vmem:[%s15419_s30 + $0x1e34] ss:$36 sps:$4 sm:$0xff]  }
 0x4a8   : > { %10827 = vmatprep.subr.bf16.mxu1 %v15034_v10  ;;  %v15076_v10 = vld [vmem:[%s15419_s30 + $0x22b4] ss:$36 sps:$4 sm:$0xff]  }
 0x4aa   : > { %10787 = vmatpush1.bf16.msra.mxu0 %v15029_v63  ;;  %v15071_v63 = vld [vmem:[%s15419_s30 + $0x1e30] ss:$36 sps:$4 sm:$0xff]  }
 0x4ab   : > { %10828 = vmatpush1.bf16.msra.mxu1 %v15032_v0  ;;  %10788 = vmatprep.subr.bf16.mxu0 %v15037_v2  ;;  %v15074_v0 = vld [vmem:[%s15419_s30 + $0x22b0] ss:$36 sps:$4 sm:$0xff]   ;;  %v15079_v2 = vld [vmem:[%s15419_s30 + $0x1e7c] ss:$36 sps:$4 sm:$0xff]  }
 0x4ac   : > { %10829 = vmatprep.subr.bf16.mxu1 %v15040_v3  ;;  %v10484_v11 = vpop.f32.mrb[56].mxu0  ;;  %v15082_v3 = vld [vmem:[%s15419_s30 + $0x22fc] ss:$36 sps:$4 sm:$0xff]  }
 0x4ad   : > { %v10525_v15 = vpop.f32.mrb[56].mxu1  ;;  %v10485_v12 = vadd.f32 %v10484_v11, %v16772_v50  ;;  %v10486_v14 = vpop.f32.mrb[57].mxu0  ;;  %v15083_v11 = vld [vmem:[%s15419_s30 + $0x1ec0] ss:$36 sps:$4 sm:$0xff]  }
 0x4ae   : > { %v10527_v16 = vpop.f32.mrb[57].mxu1  ;;  %v10487_v20 = vadd.f32 %v10486_v14, %v16776_v59  ;;  %v10488_v22 = vpop.f32.mrb[58].mxu0  ;;  %10789 = vmatpush1.bf16.msra.mxu0 %v15035_v4  ;;  %v15077_v4 = vld [vmem:[%s15419_s30 + $0x1e78] ss:$36 sps:$4 sm:$0xff]   ;;  %v15094_v14 = vld [vmem:[%s15419_s30 + $0x238c] ss:$36 sps:$4 sm:$0xff]  }
 0x4af   : > { %v10529_v28 = vpop.f32.mrb[58].mxu1  ;;  %10830 = vmatpush1.bf16.msra.mxu1 %v15038_v19  ;;  %v10526_v35 = vadd.f32 %v10525_v15, %v10485_v12  ;;  %v10489_v32 = vpop.f32.mrb[59].mxu0  ;;  %10790 = vmatprep.subr.bf16.mxu0 %v15043_v6  ;;  %v15080_v19 = vld [vmem:[%s15419_s30 + $0x22f8] ss:$36 sps:$4 sm:$0xff]   ;;  %v15085_v6 = vld [vmem:[%s15419_s30 + $0x1ec4] ss:$36 sps:$4 sm:$0xff]  }
 0x4b0   : > { %v10530_v50 = vpop.f32.mrb[59].mxu1  ;;  %10831 = vmatprep.subr.bf16.mxu1 %v15046_v21  ;;  %v10528_v36 = vadd.f32 %v10527_v16, %v10487_v20  ;;  %v15088_v21 = vld [vmem:[%s15419_s30 + $0x2344] ss:$36 sps:$4 sm:$0xff]   ;;  %v15091_v12 = vld [vmem:[%s15419_s30 + $0x1f0c] ss:$36 sps:$4 sm:$0xff]  }
 0x4b1   : > { %v11346_v59 = vadd.f32 %v10526_v35, %v257_v27  ;;  %v15086_v15 = vld [vmem:[%s15419_s30 + $0x2340] ss:$36 sps:$4 sm:$0xff]   ;;  %v15089_v16 = vld [vmem:[%s15419_s30 + $0x1f08] ss:$36 sps:$4 sm:$0xff]   ;;  %v15097_v27 = vld [vmem:[%s15419_s30 + $0x1f54] ss:$36 sps:$4 sm:$0xff]  }
 0x4b2   : > { %v11347_v43 = vadd.f32 %v10528_v36, %v258_v31  ;;  %10791 = vmatpush1.bf16.msra.mxu0 %v15041_v33  ;;  %v15092_v33 = vld [vmem:[%s15419_s30 + $0x2388] ss:$36 sps:$4 sm:$0xff]   ;;  %v15100_v20 = vld [vmem:[%s15419_s30 + $0x23d4] ss:$36 sps:$4 sm:$0xff]   ;;  %v15103_v28 = vld [vmem:[%s15419_s30 + $0x241c] ss:$36 sps:$4 sm:$0xff]  }
 0x4b3   : > { %10832 = vmatpush1.bf16.msra.mxu1 %v15044_v30  ;;  %11355 = vst [vmem:[#allocation2 + $0x20] sm:$0xff] %v11346_v59  ;;  %10792 = vmatprep.subr.bf16.mxu0 %v15049_v44  ;;  %v15095_v31 = vld [vmem:[%s15419_s30 + $0x1f50] ss:$36 sps:$4 sm:$0xff]   ;;  %v15106_v30 = vld [vmem:[%s15419_s30 + $0x289c] ss:$36 sps:$4 sm:$0xff]  }
 0x4b4   : > { %10833 = vmatprep.subr.bf16.mxu1 %v15052_v34  ;;  %11356 = vst [vmem:[#allocation2 + $0x28] sm:$0xff] %v11347_v43  ;;  %v15098_v22 = vld [vmem:[%s15419_s30 + $0x23d0] ss:$36 sps:$4 sm:$0xff]   ;;  %v15101_v35 = vld [vmem:[%s15419_s30 + $0x2418] ss:$36 sps:$4 sm:$0xff]  }
 0x4b5   : > { %v15104_v32 = vld [vmem:[%s15419_s30 + $0x2898] ss:$36 sps:$4 sm:$0xff]   ;;  %v15109_v50 = vld [vmem:[%s15419_s30 + $0x2464] ss:$36 sps:$4 sm:$0xff]   ;;  %v15115_v59 = vld [vmem:[%s15419_s30 + $0x24ac] ss:$36 sps:$4 sm:$0xff]  }
 0x4b6   : > { %10793 = vmatpush1.bf16.msra.mxu0 %v15047_v45  ;;  %v15112_v44 = vld [vmem:[%s15419_s30 + $0x28e4] ss:$36 sps:$4 sm:$0xff]   ;;  %v15118_v43 = vld [vmem:[%s15419_s30 + $0x292c] ss:$36 sps:$4 sm:$0xff]  }
 0x4b7   : > { %10834 = vmatpush1.bf16.msra.mxu1 %v15050_v46  ;;  %10794 = vmatprep.subr.bf16.mxu0 %v15055_v51  ;;  %v15107_v34 = vld [vmem:[%s15419_s30 + $0x2460] ss:$36 sps:$4 sm:$0xff]   ;;  %v15113_v45 = vld [vmem:[%s15419_s30 + $0x24a8] ss:$36 sps:$4 sm:$0xff]   ;;  %v15121_v51 = vld [vmem:[%s15419_s30 + $0x24f4] ss:$36 sps:$4 sm:$0xff]  }
 0x4b8   : > { %10835 = vmatprep.subr.bf16.mxu1 %v15058_v55  ;;  %v15110_v36 = vld [vmem:[%s15419_s30 + $0x28e0] ss:$36 sps:$4 sm:$0xff]   ;;  %v15116_v46 = vld [vmem:[%s15419_s30 + $0x2928] ss:$36 sps:$4 sm:$0xff]   ;;  %v15124_v55 = vld [vmem:[%s15419_s30 + $0x2974] ss:$36 sps:$4 sm:$0xff]  }
 0x4ba   : > { %10795 = vmatpush1.bf16.msra.mxu0 %v15053_v13  ;;  %v15119_v13 = vld [vmem:[%s15419_s30 + $0x24f0] ss:$36 sps:$4 sm:$0xff]  }
 0x4bb   : > { %10836 = vmatpush1.bf16.msra.mxu1 %v15056_v5  ;;  %10796 = vmatprep.subr.bf16.mxu0 %v15061_v62  ;;  %v15122_v5 = vld [vmem:[%s15419_s30 + $0x2970] ss:$36 sps:$4 sm:$0xff]   ;;  %v15127_v62 = vld [vmem:[%s15419_s30 + $0x253c] ss:$36 sps:$4 sm:$0xff]  }
 0x4bc   : > { %10837 = vmatprep.subr.bf16.mxu1 %v15064_v58  ;;  %v15130_v58 = vld [vmem:[%s15419_s30 + $0x29bc] ss:$36 sps:$4 sm:$0xff]  }
 0x4be   : > { %10797 = vmatpush1.bf16.msra.mxu0 %v15059_v53  ;;  %v15125_v53 = vld [vmem:[%s15419_s30 + $0x2538] ss:$36 sps:$4 sm:$0xff]  }
 0x4bf   : > { %10838 = vmatpush1.bf16.msra.mxu1 %v15062_v54  ;;  %10798 = vmatprep.subr.bf16.mxu0 %v15067_v56  ;;  %v15128_v54 = vld [vmem:[%s15419_s30 + $0x29b8] ss:$36 sps:$4 sm:$0xff]   ;;  %v15133_v56 = vld [vmem:[%s15419_s30 + $0x2584] ss:$36 sps:$4 sm:$0xff]  }
 0x4c0   : > { %10839 = vmatprep.subr.bf16.mxu1 %v15070_v1  ;;  %v15136_v1 = vld [vmem:[%s15419_s30 + $0x2a04] ss:$36 sps:$4 sm:$0xff]  }
 0x4c2   : > { %10799 = vmatpush1.bf16.msra.mxu0 %v15065_v57  ;;  %v15131_v57 = vld [vmem:[%s15419_s30 + $0x2580] ss:$36 sps:$4 sm:$0xff]  }
 0x4c3   : > { %10840 = vmatpush1.bf16.msra.mxu1 %v15068_v9  ;;  %10800 = vmatprep.subr.bf16.mxu0 %v15073_v29  ;;  %v15134_v9 = vld [vmem:[%s15419_s30 + $0x2a00] ss:$36 sps:$4 sm:$0xff]   ;;  %v15139_v29 = vld [vmem:[%s15419_s30 + $0x25cc] ss:$36 sps:$4 sm:$0xff]  }
 0x4c4   : > { %10841 = vmatprep.subr.bf16.mxu1 %v15076_v10  ;;  %v15142_v10 = vld [vmem:[%s15419_s30 + $0x2a4c] ss:$36 sps:$4 sm:$0xff]  }
 0x4c6   : > { %10801 = vmatpush1.bf16.msra.mxu0 %v15071_v63 }
 0x4c7   : > { %10842 = vmatpush1.bf16.msra.mxu1 %v15074_v0  ;;  %10802 = vmatprep.subr.bf16.mxu0 %v15079_v2 }
 0x4c8   : > { %10843 = vmatprep.subr.bf16.mxu1 %v15082_v3 }
 0x4ca   : > { %10803 = vmatpush1.bf16.msra.mxu0 %v15077_v4 }
 0x4cb   : > { %10844 = vmatpush1.bf16.msra.mxu1 %v15080_v19  ;;  %10804 = vmatprep.subr.bf16.mxu0 %v15085_v6 }
 0x4cc   : > { %10845 = vmatprep.subr.bf16.mxu1 %v15088_v21 }
 0x4ce   : > { %10805 = vmatpush1.bf16.msra.mxu0 %v15083_v11  ;;  %v15137_v11 = vld [vmem:[%s15419_s30 + $0x25c8] ss:$36 sps:$4 sm:$0xff]  }
 0x4cf   : > { %10846 = vmatpush1.bf16.msra.mxu1 %v15086_v15  ;;  %10806 = vmatprep.subr.bf16.mxu0 %v15091_v12  ;;  %v15140_v15 = vld [vmem:[%s15419_s30 + $0x2a48] ss:$36 sps:$4 sm:$0xff]  }
 0x4d0   : > { %10847 = vmatprep.subr.bf16.mxu1 %v15094_v14 }
 0x4d2   : > { %10807 = vmatpush1.bf16.msra.mxu0 %v15089_v16  ;;  %v15145_v16 = vld [vmem:[%s15419_s30 + $0x2614] ss:$36 sps:$4 sm:$0xff]  }
 0x4d3   : > { %10848 = vmatpush1.bf16.msra.mxu1 %v15092_v33  ;;  %10808 = vmatprep.subr.bf16.mxu0 %v15097_v27  ;;  %v15148_v33 = vld [vmem:[%s15419_s30 + $0x2a94] ss:$36 sps:$4 sm:$0xff]  }
 0x4d4   : > { %10849 = vmatprep.subr.bf16.mxu1 %v15100_v20  ;;  %v15143_v27 = vld [vmem:[%s15419_s30 + $0x2610] ss:$36 sps:$4 sm:$0xff]  }
 0x4d5   : > { %v15146_v20 = vld [vmem:[%s15419_s30 + $0x2a90] ss:$36 sps:$4 sm:$0xff]  }
 0x4d6   : > { %10809 = vmatpush1.bf16.msra.mxu0 %v15095_v31  ;;  %v15151_v31 = vld [vmem:[%s15419_s30 + $0x265c] ss:$36 sps:$4 sm:$0xff]  }
 0x4d7   : > { %10850 = vmatpush1.bf16.msra.mxu1 %v15098_v22  ;;  %10860 = vmatprep.subr.bf16.mxu0 %v15103_v28  ;;  %v15154_v22 = vld [vmem:[%s15419_s30 + $0x2adc] ss:$36 sps:$4 sm:$0xff]  }
 0x4d8   : > { %10901 = vmatprep.subr.bf16.mxu1 %v15106_v30  ;;  %v15149_v28 = vld [vmem:[%s15419_s30 + $0x2658] ss:$36 sps:$4 sm:$0xff]  }
 0x4d9   : > { %10811 = vmatmul.mubr.bf16.vlgmr.msra.gmra.mrb[72].mxu0 %v15767_v60  ;;  %v15152_v30 = vld [vmem:[%s15419_s30 + $0x2ad8] ss:$36 sps:$4 sm:$0xff]  }
 0x4da   : > { %10852 = vmatmul.mubr.bf16.vlgmr.msra.gmra.mrb[72].mxu1 %v15771_v61  ;;  %10861 = vmatpush1.bf16.msra.mxu0 %v15101_v35  ;;  %v15157_v35 = vld [vmem:[%s15419_s30 + $0x26a4] ss:$36 sps:$4 sm:$0xff]  }
 0x4db   : > { %10902 = vmatpush1.bf16.msra.mxu1 %v15104_v32  ;;  %10862 = vmatprep.subr.bf16.mxu0 %v15109_v50  ;;  %v15160_v32 = vld [vmem:[%s15419_s30 + $0x2b24] ss:$36 sps:$4 sm:$0xff]  }
 0x4dc   : > { %10903 = vmatprep.subr.bf16.mxu1 %v15112_v44  ;;  %10892 = vmatprep.mubr.bf16.mxu0 %v15782_v41  ;;  %v15155_v50 = vld [vmem:[%s15419_s30 + $0x26a0] ss:$36 sps:$4 sm:$0xff]  }
 0x4dd   : > { %10933 = vmatprep.mubr.bf16.mxu1 %v15786_v42  ;;  %v15158_v44 = vld [vmem:[%s15419_s30 + $0x2b20] ss:$36 sps:$4 sm:$0xff]  }
 0x4de   : > { %10863 = vmatpush1.bf16.msra.mxu0 %v15107_v34  ;;  %v15163_v34 = vld [vmem:[%s15419_s30 + $0x26ec] ss:$36 sps:$4 sm:$0xff]  }
 0x4df   : > { %10904 = vmatpush1.bf16.msra.mxu1 %v15110_v36  ;;  %10864 = vmatprep.subr.bf16.mxu0 %v15115_v59  ;;  %v15166_v36 = vld [vmem:[%s15419_s30 + $0x2b6c] ss:$36 sps:$4 sm:$0xff]  }
 0x4e0   : > { %10905 = vmatprep.subr.bf16.mxu1 %v15118_v43  ;;  %v15161_v59 = vld [vmem:[%s15419_s30 + $0x26e8] ss:$36 sps:$4 sm:$0xff]  }
 0x4e1   : > { %v15164_v43 = vld [vmem:[%s15419_s30 + $0x2b68] ss:$36 sps:$4 sm:$0xff]  }
 0x4e2   : > { %10865 = vmatpush1.bf16.msra.mxu0 %v15113_v45  ;;  %v15169_v45 = vld [vmem:[%s15419_s30 + $0x2734] ss:$36 sps:$4 sm:$0xff]  }
 0x4e3   : > { %10906 = vmatpush1.bf16.msra.mxu1 %v15116_v46  ;;  %10866 = vmatprep.subr.bf16.mxu0 %v15121_v51  ;;  %v15172_v46 = vld [vmem:[%s15419_s30 + $0x2bb4] ss:$36 sps:$4 sm:$0xff]  }
 0x4e4   : > { %10907 = vmatprep.subr.bf16.mxu1 %v15124_v55  ;;  %v15167_v51 = vld [vmem:[%s15419_s30 + $0x2730] ss:$36 sps:$4 sm:$0xff]  }
 0x4e5   : > { %v15170_v55 = vld [vmem:[%s15419_s30 + $0x2bb0] ss:$36 sps:$4 sm:$0xff]  }
 0x4e6   : > { %10867 = vmatpush1.bf16.msra.mxu0 %v15119_v13  ;;  %v15175_v13 = vld [vmem:[%s15419_s30 + $0x277c] ss:$36 sps:$4 sm:$0xff]  }
 0x4e7   : > { %10908 = vmatpush1.bf16.msra.mxu1 %v15122_v5  ;;  %10868 = vmatprep.subr.bf16.mxu0 %v15127_v62  ;;  %v15178_v5 = vld [vmem:[%s15419_s30 + $0x2bfc] ss:$36 sps:$4 sm:$0xff]  }
 0x4e8   : > { %10909 = vmatprep.subr.bf16.mxu1 %v15130_v58  ;;  %v15173_v62 = vld [vmem:[%s15419_s30 + $0x2778] ss:$36 sps:$4 sm:$0xff]  }
 0x4e9   : > { %v15176_v58 = vld [vmem:[%s15419_s30 + $0x2bf8] ss:$36 sps:$4 sm:$0xff]  }
 0x4ea   : > { %10869 = vmatpush1.bf16.msra.mxu0 %v15125_v53  ;;  %v15181_v53 = vld [vmem:[%s15419_s30 + $0x27c4] ss:$36 sps:$4 sm:$0xff]  }
 0x4eb   : > { %10910 = vmatpush1.bf16.msra.mxu1 %v15128_v54  ;;  %10870 = vmatprep.subr.bf16.mxu0 %v15133_v56  ;;  %v15184_v54 = vld [vmem:[%s15419_s30 + $0x2c44] ss:$36 sps:$4 sm:$0xff]  }
 0x4ec   : > { %10911 = vmatprep.subr.bf16.mxu1 %v15136_v1  ;;  %v10566_v63 = vpop.f32.mrb[60].mxu0  ;;  %v15179_v56 = vld [vmem:[%s15419_s30 + $0x27c0] ss:$36 sps:$4 sm:$0xff]  }
 0x4ed   : > { %v10607_v0 = vpop.f32.mrb[60].mxu1  ;;  %v10568_v3 = vpop.f32.mrb[61].mxu0  ;;  %v15182_v1 = vld [vmem:[%s15419_s30 + $0x2c40] ss:$36 sps:$4 sm:$0xff]  }
 0x4ee   : > { %v16912_v2 = vadd.f32 %v10607_v0, %v10566_v63  ;;  %v10609_v4 = vpop.f32.mrb[61].mxu1  ;;  %v10570_v6 = vpop.f32.mrb[62].mxu0  ;;  %10871 = vmatpush1.bf16.msra.mxu0 %v15131_v57  ;;  %v15187_v57 = vld [vmem:[%s15419_s30 + $0x280c] ss:$36 sps:$4 sm:$0xff]   ;;  %v15193_v63 = vld [vmem:[%s15419_s30 + $0x2854] ss:$36 sps:$4 sm:$0xff]  }
 0x4ef   : > { %v16914_v19 = vadd.f32 %v10609_v4, %v10568_v3  ;;  %v10611_v21 = vpop.f32.mrb[62].mxu1  ;;  %10912 = vmatpush1.bf16.msra.mxu1 %v15134_v9  ;;  %v10571_v12 = vpop.f32.mrb[63].mxu0  ;;  %10872 = vmatprep.subr.bf16.mxu0 %v15139_v29  ;;  %v15190_v9 = vld [vmem:[%s15419_s30 + $0x2c8c] ss:$36 sps:$4 sm:$0xff]   ;;  %v15196_v0 = vld [vmem:[%s15419_s30 + $0x2cd4] ss:$36 sps:$4 sm:$0xff]  }
 0x4f0   : > { %v10612_v14 = vpop.f32.mrb[63].mxu1  ;;  %10913 = vmatprep.subr.bf16.mxu1 %v15142_v10  ;;  %v15185_v29 = vld [vmem:[%s15419_s30 + $0x2808] ss:$36 sps:$4 sm:$0xff]   ;;  %v15191_v3 = vld [vmem:[%s15419_s30 + $0x2850] ss:$36 sps:$4 sm:$0xff]  }
 0x4f1   : > { %v15188_v10 = vld [vmem:[%s15419_s30 + $0x2c88] ss:$36 sps:$4 sm:$0xff]   ;;  %v15194_v4 = vld [vmem:[%s15419_s30 + $0x2cd0] ss:$36 sps:$4 sm:$0xff]   ;;  %v15197_v6 = vld [vmem:[%s15419_s30 + $0x260] ss:$36 sps:$4 sm:$0xff]  }
 0x4f2   : > { %10873 = vmatpush1.bf16.msra.mxu0 %v15137_v11  ;;  %v15198_v21 = vld [vmem:[%s15419_s30 + $0x6e0] ss:$36 sps:$4 sm:$0xff]   ;;  %v15201_v12 = vld [vmem:[%s15419_s30 + $0x2a8] ss:$36 sps:$4 sm:$0xff]  }
 0x4f3   : > { %10914 = vmatpush1.bf16.msra.mxu1 %v15140_v15  ;;  %10874 = vmatprep.subr.bf16.mxu0 %v15145_v16  ;;  %v15199_v11 = vld [vmem:[%s15419_s30 + $0x20] ss:$36 sps:$4 sm:$0xff]   ;;  %v15202_v14 = vld [vmem:[%s15419_s30 + $0x728] ss:$36 sps:$4 sm:$0xff]  }
 0x4f4   : > { %10915 = vmatprep.subr.bf16.mxu1 %v15148_v33  ;;  %v15200_v15 = vld [vmem:[%s15419_s30 + $0x4a0] ss:$36 sps:$4 sm:$0xff]   ;;  %v15203_v16 = vld [vmem:[%s15419_s30 + $0x68] ss:$36 sps:$4 sm:$0xff]  }
 0x4f5   : > { %v15204_v33 = vld [vmem:[%s15419_s30 + $0x4e8] ss:$36 sps:$4 sm:$0xff]  }
 0x4f6   : > { %10875 = vmatpush1.bf16.msra.mxu0 %v15143_v27  ;;  %v15205_v27 = vld [vmem:[%s15419_s30 + $0x2f0] ss:$36 sps:$4 sm:$0xff]  }
 0x4f7   : > { %10916 = vmatpush1.bf16.msra.mxu1 %v15146_v20  ;;  %10876 = vmatprep.subr.bf16.mxu0 %v15151_v31  ;;  %v15206_v20 = vld [vmem:[%s15419_s30 + $0x770] ss:$36 sps:$4 sm:$0xff]  }
 0x4f8   : > { %10917 = vmatprep.subr.bf16.mxu1 %v15154_v22  ;;  %v15207_v31 = vld [vmem:[%s15419_s30 + $0xb0] ss:$36 sps:$4 sm:$0xff]  }
 0x4f9   : > { %v15208_v22 = vld [vmem:[%s15419_s30 + $0x530] ss:$36 sps:$4 sm:$0xff]  }
 0x4fa   : > { %10877 = vmatpush1.bf16.msra.mxu0 %v15149_v28  ;;  %v15209_v28 = vld [vmem:[%s15419_s30 + $0x338] ss:$36 sps:$4 sm:$0xff]  }
 0x4fb   : > { %10918 = vmatpush1.bf16.msra.mxu1 %v15152_v30  ;;  %10878 = vmatprep.subr.bf16.mxu0 %v15157_v35  ;;  %v15210_v30 = vld [vmem:[%s15419_s30 + $0x7b8] ss:$36 sps:$4 sm:$0xff]  }
 0x4fc   : > { %10919 = vmatprep.subr.bf16.mxu1 %v15160_v32  ;;  %v15211_v35 = vld [vmem:[%s15419_s30 + $0xf8] ss:$36 sps:$4 sm:$0xff]   ;;  %v15214_v32 = vld [vmem:[%s15419_s30 + $0x800] ss:$36 sps:$4 sm:$0xff]  }
 0x4fe   : > { %10879 = vmatpush1.bf16.msra.mxu0 %v15155_v50  ;;  %v15215_v50 = vld [vmem:[%s15419_s30 + $0x140] ss:$36 sps:$4 sm:$0xff]  }
 0x4ff   : > { %10920 = vmatpush1.bf16.msra.mxu1 %v15158_v44  ;;  %10880 = vmatprep.subr.bf16.mxu0 %v15163_v34  ;;  %v15216_v44 = vld [vmem:[%s15419_s30 + $0x5c0] ss:$36 sps:$4 sm:$0xff]   ;;  %v15217_v34 = vld [vmem:[%s15419_s30 + $0x3c8] ss:$36 sps:$4 sm:$0xff]  }
 0x500   : > { %10921 = vmatprep.subr.bf16.mxu1 %v15166_v36  ;;  %v15218_v36 = vld [vmem:[%s15419_s30 + $0x848] ss:$36 sps:$4 sm:$0xff]  }
 0x502   : > { %10881 = vmatpush1.bf16.msra.mxu0 %v15161_v59  ;;  %v15219_v59 = vld [vmem:[%s15419_s30 + $0x188] ss:$36 sps:$4 sm:$0xff]  }
 0x503   : > { %10922 = vmatpush1.bf16.msra.mxu1 %v15164_v43  ;;  %10882 = vmatprep.subr.bf16.mxu0 %v15169_v45  ;;  %v15220_v43 = vld [vmem:[%s15419_s30 + $0x608] ss:$36 sps:$4 sm:$0xff]   ;;  %v15221_v45 = vld [vmem:[%s15419_s30 + $0x410] ss:$36 sps:$4 sm:$0xff]  }
 0x504   : > { %10923 = vmatprep.subr.bf16.mxu1 %v15172_v46  ;;  %v15222_v46 = vld [vmem:[%s15419_s30 + $0x890] ss:$36 sps:$4 sm:$0xff]  }
 0x506   : > { %10883 = vmatpush1.bf16.msra.mxu0 %v15167_v51 }
 0x507   : > { %10924 = vmatpush1.bf16.msra.mxu1 %v15170_v55  ;;  %10884 = vmatprep.subr.bf16.mxu0 %v15175_v13 }
 0x508   : > { %10925 = vmatprep.subr.bf16.mxu1 %v15178_v5 }
 0x50a   : > { %10885 = vmatpush1.bf16.msra.mxu0 %v15173_v62 }
 0x50b   : > { %10926 = vmatpush1.bf16.msra.mxu1 %v15176_v58  ;;  %10886 = vmatprep.subr.bf16.mxu0 %v15181_v53 }
 0x50c   : > { %10927 = vmatprep.subr.bf16.mxu1 %v15184_v54 }
 0x50e   : > { %10887 = vmatpush1.bf16.msra.mxu0 %v15179_v56  ;;  %v15223_v56 = vld [vmem:[%s15419_s30 + $0x1d0] ss:$36 sps:$4 sm:$0xff]  }
 0x50f   : > { %10928 = vmatpush1.bf16.msra.mxu1 %v15182_v1  ;;  %10888 = vmatprep.subr.bf16.mxu0 %v15187_v57  ;;  %v15224_v1 = vld [vmem:[%s15419_s30 + $0x650] ss:$36 sps:$4 sm:$0xff]  }
 0x510   : > { %10929 = vmatprep.subr.bf16.mxu1 %v15190_v9 }
 0x512   : > { %10889 = vmatpush1.bf16.msra.mxu0 %v15185_v29 }
 0x513   : > { %10930 = vmatpush1.bf16.msra.mxu1 %v15188_v10  ;;  %10890 = vmatprep.subr.bf16.mxu0 %v15193_v63  ;;  %v15227_v63 = vld [vmem:[%s15419_s30 + $0x218] ss:$36 sps:$4 sm:$0xff]  }
 0x514   : > { %10931 = vmatprep.subr.bf16.mxu1 %v15196_v0  ;;  %v15228_v0 = vld [vmem:[%s15419_s30 + $0x698] ss:$36 sps:$4 sm:$0xff]  }
 0x516   : > { %10891 = vmatpush1.bf16.msra.mxu0 %v15191_v3  ;;  %v15229_v3 = vld [vmem:[%s15419_s30 + $0xb60] ss:$36 sps:$4 sm:$0xff]  }
 0x517   : > { %10932 = vmatpush1.bf16.msra.mxu1 %v15194_v4  ;;  %13027 = vmatprep.subr.bf16.mxu0 %v15197_v6  ;;  %v15230_v4 = vld [vmem:[%s15419_s30 + $0xfe0] ss:$36 sps:$4 sm:$0xff]  }
 0x518   : > { %13049 = vmatprep.subr.bf16.mxu1 %v15198_v21  ;;  %v15231_v6 = vld [vmem:[%s15419_s30 + $0x920] ss:$36 sps:$4 sm:$0xff]  }
 0x519   : > { %10893 = vmatmul.mubr.bf16.vlgmr.msra.gmra.mrb[76].mxu0 %v15860_v47  ;;  %v15232_v21 = vld [vmem:[%s15419_s30 + $0xda0] ss:$36 sps:$4 sm:$0xff]  }
 0x51a   : > { %10934 = vmatmul.mubr.bf16.vlgmr.msra.gmra.mrb[76].mxu1 %v15864_v49  ;;  %13028 = vmatpush3.bf16.msra.mxu0 %v15199_v11  ;;  %v15233_v11 = vld [vmem:[%s15419_s30 + $0xba8] ss:$36 sps:$4 sm:$0xff]  }
 0x51b   : > { %13050 = vmatpush3.bf16.msra.mxu1 %v15200_v15  ;;  %13029 = vmatprep.subr.bf16.mxu0 %v15201_v12  ;;  %v15234_v15 = vld [vmem:[%s15419_s30 + $0x1028] ss:$36 sps:$4 sm:$0xff]  }
 0x51c   : > { %13051 = vmatprep.subr.bf16.mxu1 %v15202_v14  ;;  %10974 = vmatprep.mubr.bf16.mxu0 %v15469_v48  ;;  %v15212_v48 = vld [vmem:[%s15419_s30 + $0x578] ss:$36 sps:$4 sm:$0xff]   ;;  %v15235_v12 = vld [vmem:[%s15419_s30 + $0x968] ss:$36 sps:$4 sm:$0xff]  }
 0x51d   : > { %11014 = vmatprep.mubr.bf16.mxu1 %v15474_v52  ;;  %v15213_v52 = vld [vmem:[%s15419_s30 + $0x380] ss:$36 sps:$4 sm:$0xff]   ;;  %v15236_v14 = vld [vmem:[%s15419_s30 + $0xde8] ss:$36 sps:$4 sm:$0xff]  }
 0x51e   : > { %13030 = vmatpush3.bf16.msra.mxu0 %v15203_v16  ;;  %v15237_v16 = vld [vmem:[%s15419_s30 + $0xbf0] ss:$36 sps:$4 sm:$0xff]  }
 0x51f   : > { %13052 = vmatpush3.bf16.msra.mxu1 %v15204_v33  ;;  %13031 = vmatprep.subr.bf16.mxu0 %v15205_v27  ;;  %v15238_v33 = vld [vmem:[%s15419_s30 + $0x1070] ss:$36 sps:$4 sm:$0xff]   ;;  %v15241_v27 = vld [vmem:[%s15419_s30 + $0xc38] ss:$36 sps:$4 sm:$0xff]  }
 0x520   : > { %13053 = vmatprep.subr.bf16.mxu1 %v15206_v20  ;;  %v15242_v20 = vld [vmem:[%s15419_s30 + $0x10b8] ss:$36 sps:$4 sm:$0xff]  }
 0x522   : > { %13032 = vmatpush3.bf16.msra.mxu0 %v15207_v31  ;;  %v15243_v31 = vld [vmem:[%s15419_s30 + $0x9f8] ss:$36 sps:$4 sm:$0xff]  }
 0x523   : > { %13054 = vmatpush3.bf16.msra.mxu1 %v15208_v22  ;;  %13033 = vmatprep.subr.bf16.mxu0 %v15209_v28  ;;  %v15246_v22 = vld [vmem:[%s15419_s30 + $0x1100] ss:$36 sps:$4 sm:$0xff]  }
 0x524   : > { %13055 = vmatprep.subr.bf16.mxu1 %v15210_v30  ;;  %v15247_v28 = vld [vmem:[%s15419_s30 + $0xa40] ss:$36 sps:$4 sm:$0xff]  }
 0x525   : > { %v15248_v30 = vld [vmem:[%s15419_s30 + $0xec0] ss:$36 sps:$4 sm:$0xff]  }
 0x526   : > { %13034 = vmatpush3.bf16.msra.mxu0 %v15211_v35  ;;  %v15249_v35 = vld [vmem:[%s15419_s30 + $0xcc8] ss:$36 sps:$4 sm:$0xff]  }
 0x527   : > { %13056 = vmatpush3.bf16.msra.mxu1 %v15212_v48  ;;  %13035 = vmatprep.subr.bf16.mxu0 %v15213_v52  ;;  %v15250_v48 = vld [vmem:[%s15419_s30 + $0x1148] ss:$36 sps:$4 sm:$0xff]  }
 0x528   : > { %13057 = vmatprep.subr.bf16.mxu1 %v15214_v32  ;;  %v15251_v52 = vld [vmem:[%s15419_s30 + $0xa88] ss:$36 sps:$4 sm:$0xff]  }
 0x529   : > { %v15252_v32 = vld [vmem:[%s15419_s30 + $0xf08] ss:$36 sps:$4 sm:$0xff]  }
 0x52a   : > { %13036 = vmatpush3.bf16.msra.mxu0 %v15215_v50  ;;  %v15253_v50 = vld [vmem:[%s15419_s30 + $0xd10] ss:$36 sps:$4 sm:$0xff]  }
 0x52b   : > { %13058 = vmatpush3.bf16.msra.mxu1 %v15216_v44  ;;  %13037 = vmatprep.subr.bf16.mxu0 %v15217_v34  ;;  %v15254_v44 = vld [vmem:[%s15419_s30 + $0x1190] ss:$36 sps:$4 sm:$0xff]  }
 0x52c   : > { %13059 = vmatprep.subr.bf16.mxu1 %v15218_v36  ;;  %v10648_v51 = vpop.f32.mrb[64].mxu0  ;;  %v15255_v34 = vld [vmem:[%s15419_s30 + $0xad0] ss:$36 sps:$4 sm:$0xff]  }
 0x52d   : > { %v10689_v55 = vpop.f32.mrb[64].mxu1  ;;  %v10649_v13 = vadd.f32 %v10648_v51, %v16912_v2  ;;  %v10650_v5 = vpop.f32.mrb[65].mxu0  ;;  %v15225_v2 = vld [vmem:[%s15419_s30 + $0x458] ss:$36 sps:$4 sm:$0xff]   ;;  %v15256_v36 = vld [vmem:[%s15419_s30 + $0xf50] ss:$36 sps:$4 sm:$0xff]  }
 0x52e   : > { %v10691_v62 = vpop.f32.mrb[65].mxu1  ;;  %v10651_v58 = vadd.f32 %v10650_v5, %v16914_v19  ;;  %v10652_v53 = vpop.f32.mrb[66].mxu0  ;;  %13038 = vmatpush3.bf16.msra.mxu0 %v15219_v59  ;;  %v15226_v19 = vld [vmem:[%s15419_s30 + $0x8d8] ss:$36 sps:$4 sm:$0xff]   ;;  %v15261_v51 = vld [vmem:[%s15419_s30 + $0x1460] ss:$36 sps:$4 sm:$0xff]  }
 0x52f   : > { %v10693_v54 = vpop.f32.mrb[66].mxu1  ;;  %13060 = vmatpush3.bf16.msra.mxu1 %v15220_v43  ;;  %v16988_v57 = vadd.f32 %v10689_v55, %v10649_v13  ;;  %v10653_v9 = vpop.f32.mrb[67].mxu0  ;;  %13039 = vmatprep.subr.bf16.mxu0 %v15221_v45  ;;  %v15257_v59 = vld [vmem:[%s15419_s30 + $0xd58] ss:$36 sps:$4 sm:$0xff]   ;;  %v15262_v55 = vld [vmem:[%s15419_s30 + $0x18e0] ss:$36 sps:$4 sm:$0xff]  }
 0x530   : > { %v10694_v29 = vpop.f32.mrb[67].mxu1  ;;  %13061 = vmatprep.subr.bf16.mxu1 %v15222_v46  ;;  %v16992_v10 = vadd.f32 %v10691_v62, %v10651_v58  ;;  %v15258_v43 = vld [vmem:[%s15419_s30 + $0x11d8] ss:$36 sps:$4 sm:$0xff]   ;;  %v15263_v13 = vld [vmem:[%s15419_s30 + $0x1220] ss:$36 sps:$4 sm:$0xff]  }
 0x531   : > { %v15259_v45 = vld [vmem:[%s15419_s30 + $0xb18] ss:$36 sps:$4 sm:$0xff]   ;;  %v15264_v5 = vld [vmem:[%s15419_s30 + $0x16a0] ss:$36 sps:$4 sm:$0xff]   ;;  %v15265_v62 = vld [vmem:[%s15419_s30 + $0x14a8] ss:$36 sps:$4 sm:$0xff]  }
 0x532   : > { %13040 = vmatpush3.bf16.msra.mxu0 %v15223_v56  ;;  %v15260_v46 = vld [vmem:[%s15419_s30 + $0xf98] ss:$36 sps:$4 sm:$0xff]   ;;  %v15266_v58 = vld [vmem:[%s15419_s30 + $0x1928] ss:$36 sps:$4 sm:$0xff]   ;;  %v15269_v56 = vld [vmem:[%s15419_s30 + $0x14f0] ss:$36 sps:$4 sm:$0xff]  }
 0x533   : > { %13062 = vmatpush3.bf16.msra.mxu1 %v15224_v1  ;;  %13041 = vmatprep.subr.bf16.mxu0 %v15225_v2  ;;  %v15267_v53 = vld [vmem:[%s15419_s30 + $0x1268] ss:$36 sps:$4 sm:$0xff]   ;;  %v15270_v1 = vld [vmem:[%s15419_s30 + $0x1970] ss:$36 sps:$4 sm:$0xff]   ;;  %v15273_v9 = vld [vmem:[%s15419_s30 + $0x1538] ss:$36 sps:$4 sm:$0xff]  }
 0x534   : > { %13063 = vmatprep.subr.bf16.mxu1 %v15226_v19  ;;  %v15268_v54 = vld [vmem:[%s15419_s30 + $0x16e8] ss:$36 sps:$4 sm:$0xff]   ;;  %v15274_v29 = vld [vmem:[%s15419_s30 + $0x19b8] ss:$36 sps:$4 sm:$0xff]   ;;  %v15278_v19 = vld [vmem:[%s15419_s30 + $0x1a00] ss:$36 sps:$4 sm:$0xff]  }
 0x535   : > { %v15275_v2 = vld [vmem:[%s15419_s30 + $0x12f8] ss:$36 sps:$4 sm:$0xff]  }
 0x536   : > { %13042 = vmatpush3.bf16.msra.mxu0 %v15227_v63  ;;  %v15279_v63 = vld [vmem:[%s15419_s30 + $0x1340] ss:$36 sps:$4 sm:$0xff]  }
 0x537   : > { %13064 = vmatpush3.bf16.msra.mxu1 %v15228_v0  ;;  %13071 = vmatprep.subr.bf16.mxu0 %v15229_v3  ;;  %v15280_v0 = vld [vmem:[%s15419_s30 + $0x17c0] ss:$36 sps:$4 sm:$0xff]   ;;  %v15281_v3 = vld [vmem:[%s15419_s30 + $0x15c8] ss:$36 sps:$4 sm:$0xff]  }
 0x538   : > { %13093 = vmatprep.subr.bf16.mxu1 %v15230_v4  ;;  %v15282_v4 = vld [vmem:[%s15419_s30 + $0x1a48] ss:$36 sps:$4 sm:$0xff]  }
 0x539   : > { %10975 = vmatmul.mubr.bf16.vlgmr.msra.gmra.mrb[80].mxu0 %v15496_v7  ;;  %v15239_v7 = vld [vmem:[%s15419_s30 + $0x9b0] ss:$36 sps:$4 sm:$0xff]  }
 0x53a   : > { %11015 = vmatmul.mubr.bf16.vlgmr.msra.gmra.mrb[80].mxu1 %v15498_v8  ;;  %13072 = vmatpush3.bf16.msra.mxu0 %v15231_v6  ;;  %v15240_v8 = vld [vmem:[%s15419_s30 + $0xe30] ss:$36 sps:$4 sm:$0xff]   ;;  %v15283_v6 = vld [vmem:[%s15419_s30 + $0x1388] ss:$36 sps:$4 sm:$0xff]  }
 0x53b   : > { %13094 = vmatpush3.bf16.msra.mxu1 %v15232_v21  ;;  %13073 = vmatprep.subr.bf16.mxu0 %v15233_v11  ;;  %v15284_v21 = vld [vmem:[%s15419_s30 + $0x1808] ss:$36 sps:$4 sm:$0xff]   ;;  %v15285_v11 = vld [vmem:[%s15419_s30 + $0x1610] ss:$36 sps:$4 sm:$0xff]  }
 0x53c   : > { %13095 = vmatprep.subr.bf16.mxu1 %v15234_v15  ;;  %11054 = vmatprep.mubr.bf16.mxu0 %v15536_v37  ;;  %v15244_v37 = vld [vmem:[%s15419_s30 + $0xe78] ss:$36 sps:$4 sm:$0xff]   ;;  %v15286_v15 = vld [vmem:[%s15419_s30 + $0x1a90] ss:$36 sps:$4 sm:$0xff]  }
 0x53d   : > { %11094 = vmatprep.mubr.bf16.mxu1 %v15540_v38  ;;  %v15245_v38 = vld [vmem:[%s15419_s30 + $0xc80] ss:$36 sps:$4 sm:$0xff]  }
 0x53e   : > { %13074 = vmatpush3.bf16.msra.mxu0 %v15235_v12 }
 0x53f   : > { %13096 = vmatpush3.bf16.msra.mxu1 %v15236_v14  ;;  %13075 = vmatprep.subr.bf16.mxu0 %v15237_v16 }
 0x540   : > { %13097 = vmatprep.subr.bf16.mxu1 %v15238_v33 }
 0x542   : > { %13076 = vmatpush3.bf16.msra.mxu0 %v15239_v7 }
 0x543   : > { %13098 = vmatpush3.bf16.msra.mxu1 %v15240_v8  ;;  %13077 = vmatprep.subr.bf16.mxu0 %v15241_v27 }
 0x544   : > { %13099 = vmatprep.subr.bf16.mxu1 %v15242_v20 }
 0x546   : > { %13078 = vmatpush3.bf16.msra.mxu0 %v15243_v31  ;;  %v15287_v31 = vld [vmem:[%s15419_s30 + $0x13d0] ss:$36 sps:$4 sm:$0xff]  }
 0x547   : > { %13100 = vmatpush3.bf16.msra.mxu1 %v15244_v37  ;;  %13079 = vmatprep.subr.bf16.mxu0 %v15245_v38  ;;  %v15288_v37 = vld [vmem:[%s15419_s30 + $0x1850] ss:$36 sps:$4 sm:$0xff]  }
 0x548   : > { %13101 = vmatprep.subr.bf16.mxu1 %v15246_v22 }
 0x54a   : > { %13080 = vmatpush3.bf16.msra.mxu0 %v15247_v28 }
 0x54b   : > { %13102 = vmatpush3.bf16.msra.mxu1 %v15248_v30  ;;  %13081 = vmatprep.subr.bf16.mxu0 %v15249_v35  ;;  %v15291_v35 = vld [vmem:[%s15419_s30 + $0x1418] ss:$36 sps:$4 sm:$0xff]  }
 0x54c   : > { %13103 = vmatprep.subr.bf16.mxu1 %v15250_v48  ;;  %v15292_v48 = vld [vmem:[%s15419_s30 + $0x1898] ss:$36 sps:$4 sm:$0xff]  }
 0x54e   : > { %13082 = vmatpush3.bf16.msra.mxu0 %v15251_v52  ;;  %v15293_v52 = vld [vmem:[%s15419_s30 + $0x1d60] ss:$36 sps:$4 sm:$0xff]  }
 0x54f   : > { %13104 = vmatpush3.bf16.msra.mxu1 %v15252_v32  ;;  %13083 = vmatprep.subr.bf16.mxu0 %v15253_v50  ;;  %v15294_v32 = vld [vmem:[%s15419_s30 + $0x21e0] ss:$36 sps:$4 sm:$0xff]  }
 0x550   : > { %13105 = vmatprep.subr.bf16.mxu1 %v15254_v44  ;;  %v15295_v50 = vld [vmem:[%s15419_s30 + $0x1b20] ss:$36 sps:$4 sm:$0xff]  }
 0x551   : > { %v15296_v44 = vld [vmem:[%s15419_s30 + $0x1fa0] ss:$36 sps:$4 sm:$0xff]  }
 0x552   : > { %13084 = vmatpush3.bf16.msra.mxu0 %v15255_v34  ;;  %v15297_v34 = vld [vmem:[%s15419_s30 + $0x1da8] ss:$36 sps:$4 sm:$0xff]  }
 0x553   : > { %13106 = vmatpush3.bf16.msra.mxu1 %v15256_v36  ;;  %13085 = vmatprep.subr.bf16.mxu0 %v15257_v59  ;;  %v15298_v36 = vld [vmem:[%s15419_s30 + $0x2228] ss:$36 sps:$4 sm:$0xff]  }
 0x554   : > { %13107 = vmatprep.subr.bf16.mxu1 %v15258_v43  ;;  %v15299_v59 = vld [vmem:[%s15419_s30 + $0x1b68] ss:$36 sps:$4 sm:$0xff]  }
 0x555   : > { %v15300_v43 = vld [vmem:[%s15419_s30 + $0x1fe8] ss:$36 sps:$4 sm:$0xff]  }
 0x556   : > { %13086 = vmatpush3.bf16.msra.mxu0 %v15259_v45  ;;  %v15301_v45 = vld [vmem:[%s15419_s30 + $0x1df0] ss:$36 sps:$4 sm:$0xff]  }
 0x557   : > { %13108 = vmatpush3.bf16.msra.mxu1 %v15260_v46  ;;  %13115 = vmatprep.subr.bf16.mxu0 %v15261_v51  ;;  %v15302_v46 = vld [vmem:[%s15419_s30 + $0x2270] ss:$36 sps:$4 sm:$0xff]   ;;  %v15305_v51 = vld [vmem:[%s15419_s30 + $0x1e38] ss:$36 sps:$4 sm:$0xff]  }
 0x558   : > { %13137 = vmatprep.subr.bf16.mxu1 %v15262_v55  ;;  %v15306_v55 = vld [vmem:[%s15419_s30 + $0x22b8] ss:$36 sps:$4 sm:$0xff]  }
 0x559   : > { %11055 = vmatmul.mubr.bf16.vlgmr.msra.gmra.mrb[84].mxu0 %v15584_v17  ;;  %v15271_v17 = vld [vmem:[%s15419_s30 + $0x12b0] ss:$36 sps:$4 sm:$0xff]  }
 0x55a   : > { %11095 = vmatmul.mubr.bf16.vlgmr.msra.gmra.mrb[84].mxu1 %v15588_v18  ;;  %13116 = vmatpush3.bf16.msra.mxu0 %v15263_v13  ;;  %v15272_v18 = vld [vmem:[%s15419_s30 + $0x1730] ss:$36 sps:$4 sm:$0xff]   ;;  %v15307_v13 = vld [vmem:[%s15419_s30 + $0x1bf8] ss:$36 sps:$4 sm:$0xff]  }
 0x55b   : > { %13138 = vmatpush3.bf16.msra.mxu1 %v15264_v5  ;;  %13117 = vmatprep.subr.bf16.mxu0 %v15265_v62  ;;  %v15310_v5 = vld [vmem:[%s15419_s30 + $0x2300] ss:$36 sps:$4 sm:$0xff]  }
 0x55c   : > { %13139 = vmatprep.subr.bf16.mxu1 %v15266_v58  ;;  %11134 = vmatprep.mubr.bf16.mxu0 %v15602_v25  ;;  %v15276_v25 = vld [vmem:[%s15419_s30 + $0x1778] ss:$36 sps:$4 sm:$0xff]   ;;  %v15311_v62 = vld [vmem:[%s15419_s30 + $0x1c40] ss:$36 sps:$4 sm:$0xff]  }
 0x55d   : > { %11174 = vmatprep.mubr.bf16.mxu1 %v15606_v26  ;;  %v15277_v26 = vld [vmem:[%s15419_s30 + $0x1580] ss:$36 sps:$4 sm:$0xff]  }
 0x55e   : > { %13118 = vmatpush3.bf16.msra.mxu0 %v15267_v53  ;;  %v15312_v58 = vld [vmem:[%s15419_s30 + $0x20c0] ss:$36 sps:$4 sm:$0xff]   ;;  %v15313_v53 = vld [vmem:[%s15419_s30 + $0x1ec8] ss:$36 sps:$4 sm:$0xff]  }
 0x55f   : > { %13140 = vmatpush3.bf16.msra.mxu1 %v15268_v54  ;;  %13119 = vmatprep.subr.bf16.mxu0 %v15269_v56  ;;  %v15314_v54 = vld [vmem:[%s15419_s30 + $0x2348] ss:$36 sps:$4 sm:$0xff]  }
 0x560   : > { %13141 = vmatprep.subr.bf16.mxu1 %v15270_v1  ;;  %v15315_v56 = vld [vmem:[%s15419_s30 + $0x1c88] ss:$36 sps:$4 sm:$0xff]  }
 0x561   : > { %v15316_v1 = vld [vmem:[%s15419_s30 + $0x2108] ss:$36 sps:$4 sm:$0xff]  }
 0x562   : > { %13120 = vmatpush3.bf16.msra.mxu0 %v15271_v17  ;;  %v15317_v17 = vld [vmem:[%s15419_s30 + $0x1f10] ss:$36 sps:$4 sm:$0xff]  }
 0x563   : > { %13142 = vmatpush3.bf16.msra.mxu1 %v15272_v18  ;;  %13121 = vmatprep.subr.bf16.mxu0 %v15273_v9  ;;  %v15318_v18 = vld [vmem:[%s15419_s30 + $0x2390] ss:$36 sps:$4 sm:$0xff]  }
 0x564   : > { %13143 = vmatprep.subr.bf16.mxu1 %v15274_v29  ;;  %v15319_v9 = vld [vmem:[%s15419_s30 + $0x1cd0] ss:$36 sps:$4 sm:$0xff]  }
 0x565   : > { %v15320_v29 = vld [vmem:[%s15419_s30 + $0x2150] ss:$36 sps:$4 sm:$0xff]  }
 0x566   : > { %13122 = vmatpush3.bf16.msra.mxu0 %v15275_v2  ;;  %v15321_v2 = vld [vmem:[%s15419_s30 + $0x1f58] ss:$36 sps:$4 sm:$0xff]  }
 0x567   : > { %13144 = vmatpush3.bf16.msra.mxu1 %v15276_v25  ;;  %13123 = vmatprep.subr.bf16.mxu0 %v15277_v26  ;;  %v15322_v25 = vld [vmem:[%s15419_s30 + $0x23d8] ss:$36 sps:$4 sm:$0xff]  }
 0x568   : > { %13145 = vmatprep.subr.bf16.mxu1 %v15278_v19  ;;  %v15323_v26 = vld [vmem:[%s15419_s30 + $0x1d18] ss:$36 sps:$4 sm:$0xff]  }
 0x569   : > { %v15324_v19 = vld [vmem:[%s15419_s30 + $0x2198] ss:$36 sps:$4 sm:$0xff]  }
 0x56a   : > { %13124 = vmatpush3.bf16.msra.mxu0 %v15279_v63  ;;  %v15325_v63 = vld [vmem:[%s15419_s30 + $0x2660] ss:$36 sps:$4 sm:$0xff]  }
 0x56b   : > { %13146 = vmatpush3.bf16.msra.mxu1 %v15280_v0  ;;  %13125 = vmatprep.subr.bf16.mxu0 %v15281_v3  ;;  %v15326_v0 = vld [vmem:[%s15419_s30 + $0x2ae0] ss:$36 sps:$4 sm:$0xff]  }
 0x56c   : > { %13147 = vmatprep.subr.bf16.mxu1 %v15282_v4  ;;  %v10730_v12 = vpop.f32.mrb[68].mxu0  ;;  %v15327_v3 = vld [vmem:[%s15419_s30 + $0x2420] ss:$36 sps:$4 sm:$0xff]  }
 0x56d   : > { %v10771_v14 = vpop.f32.mrb[68].mxu1  ;;  %v10731_v16 = vadd.f32 %v10730_v12, %v16988_v57  ;;  %v10732_v33 = vpop.f32.mrb[69].mxu0  ;;  %v15289_v57 = vld [vmem:[%s15419_s30 + $0x1658] ss:$36 sps:$4 sm:$0xff]   ;;  %v15328_v4 = vld [vmem:[%s15419_s30 + $0x28a0] ss:$36 sps:$4 sm:$0xff]  }
 0x56e   : > { %v10773_v7 = vpop.f32.mrb[69].mxu1  ;;  %v10733_v8 = vadd.f32 %v10732_v33, %v16992_v10  ;;  %v10734_v27 = vpop.f32.mrb[70].mxu0  ;;  %13126 = vmatpush3.bf16.msra.mxu0 %v15283_v6  ;;  %v15290_v10 = vld [vmem:[%s15419_s30 + $0x1ad8] ss:$36 sps:$4 sm:$0xff]   ;;  %v15329_v6 = vld [vmem:[%s15419_s30 + $0x26a8] ss:$36 sps:$4 sm:$0xff]  }
 0x56f   : > { %v10775_v20 = vpop.f32.mrb[70].mxu1  ;;  %13148 = vmatpush3.bf16.msra.mxu1 %v15284_v21  ;;  %v17066_v38 = vadd.f32 %v10771_v14, %v10731_v16  ;;  %v10735_v22 = vpop.f32.mrb[71].mxu0  ;;  %13127 = vmatprep.subr.bf16.mxu0 %v15285_v11  ;;  %v15330_v21 = vld [vmem:[%s15419_s30 + $0x2b28] ss:$36 sps:$4 sm:$0xff]   ;;  %v15333_v12 = vld [vmem:[%s15419_s30 + $0x26f0] ss:$36 sps:$4 sm:$0xff]  }
 0x570   : > { %v10776_v28 = vpop.f32.mrb[71].mxu1  ;;  %13149 = vmatprep.subr.bf16.mxu1 %v15286_v15  ;;  %v17070_v30 = vadd.f32 %v10773_v7, %v10733_v8  ;;  %v15331_v11 = vld [vmem:[%s15419_s30 + $0x2468] ss:$36 sps:$4 sm:$0xff]   ;;  %v15334_v14 = vld [vmem:[%s15419_s30 + $0x2b70] ss:$36 sps:$4 sm:$0xff]  }
 0x571   : > { %v15332_v15 = vld [vmem:[%s15419_s30 + $0x28e8] ss:$36 sps:$4 sm:$0xff]   ;;  %v15337_v16 = vld [vmem:[%s15419_s30 + $0x2738] ss:$36 sps:$4 sm:$0xff]   ;;  %v15342_v8 = vld [vmem:[%s15419_s30 + $0x2c00] ss:$36 sps:$4 sm:$0xff]  }
 0x572   : > { %13128 = vmatpush3.bf16.msra.mxu0 %v15287_v31  ;;  %v15338_v33 = vld [vmem:[%s15419_s30 + $0x2bb8] ss:$36 sps:$4 sm:$0xff]   ;;  %v15343_v27 = vld [vmem:[%s15419_s30 + $0x2540] ss:$36 sps:$4 sm:$0xff]   ;;  %v15345_v31 = vld [vmem:[%s15419_s30 + $0x27c8] ss:$36 sps:$4 sm:$0xff]  }
 0x573   : > { %13150 = vmatpush3.bf16.msra.mxu1 %v15288_v37  ;;  %13129 = vmatprep.subr.bf16.mxu0 %v15289_v57  ;;  %v15339_v7 = vld [vmem:[%s15419_s30 + $0x24f8] ss:$36 sps:$4 sm:$0xff]   ;;  %v15344_v20 = vld [vmem:[%s15419_s30 + $0x29c0] ss:$36 sps:$4 sm:$0xff]   ;;  %v15346_v37 = vld [vmem:[%s15419_s30 + $0x2c48] ss:$36 sps:$4 sm:$0xff]  }
 0x574   : > { %13151 = vmatprep.subr.bf16.mxu1 %v15290_v10  ;;  %v15347_v22 = vld [vmem:[%s15419_s30 + $0x2588] ss:$36 sps:$4 sm:$0xff]   ;;  %v15349_v57 = vld [vmem:[%s15419_s30 + $0x2810] ss:$36 sps:$4 sm:$0xff]  }
 0x575   : > { %v15348_v28 = vld [vmem:[%s15419_s30 + $0x2a08] ss:$36 sps:$4 sm:$0xff]   ;;  %v15350_v10 = vld [vmem:[%s15419_s30 + $0x2c90] ss:$36 sps:$4 sm:$0xff]  }
 0x576   : > { %13130 = vmatpush3.bf16.msra.mxu0 %v15291_v35 }
 0x577   : > { %13152 = vmatpush3.bf16.msra.mxu1 %v15292_v48  ;;  %13159 = vmatprep.subr.bf16.mxu0 %v15293_v52 }
 0x578   : > { %13181 = vmatprep.subr.bf16.mxu1 %v15294_v32 }
 0x579   : > { %11135 = vmatmul.mubr.bf16.vlgmr.msra.gmra.mrb[88].mxu0 %v15676_v39  ;;  %v15303_v39 = vld [vmem:[%s15419_s30 + $0x1bb0] ss:$36 sps:$4 sm:$0xff]  }
 0x57a   : > { %11175 = vmatmul.mubr.bf16.vlgmr.msra.gmra.mrb[88].mxu1 %v15680_v40  ;;  %13160 = vmatpush3.bf16.msra.mxu0 %v15295_v50  ;;  %v15304_v40 = vld [vmem:[%s15419_s30 + $0x2030] ss:$36 sps:$4 sm:$0xff]  }
 0x57b   : > { %13182 = vmatpush3.bf16.msra.mxu1 %v15296_v44  ;;  %13161 = vmatprep.subr.bf16.mxu0 %v15297_v34 }
 0x57c   : > { %13183 = vmatprep.subr.bf16.mxu1 %v15298_v36  ;;  %11214 = vmatprep.mubr.bf16.mxu0 %v15692_v23  ;;  %v15308_v23 = vld [vmem:[%s15419_s30 + $0x2078] ss:$36 sps:$4 sm:$0xff]  }
 0x57d   : > { %11254 = vmatprep.mubr.bf16.mxu1 %v15696_v24  ;;  %v15309_v24 = vld [vmem:[%s15419_s30 + $0x1e80] ss:$36 sps:$4 sm:$0xff]  }
 0x57e   : > { %13162 = vmatpush3.bf16.msra.mxu0 %v15299_v59  ;;  %v15351_v59 = vld [vmem:[%s15419_s30 + $0x25d0] ss:$36 sps:$4 sm:$0xff]  }
 0x57f   : > { %13184 = vmatpush3.bf16.msra.mxu1 %v15300_v43  ;;  %13163 = vmatprep.subr.bf16.mxu0 %v15301_v45  ;;  %v15352_v43 = vld [vmem:[%s15419_s30 + $0x2a50] ss:$36 sps:$4 sm:$0xff]  }
 0x580   : > { %13185 = vmatprep.subr.bf16.mxu1 %v15302_v46 }
 0x582   : > { %13164 = vmatpush3.bf16.msra.mxu0 %v15303_v39 }
 0x583   : > { %13186 = vmatpush3.bf16.msra.mxu1 %v15304_v40  ;;  %13165 = vmatprep.subr.bf16.mxu0 %v15305_v51  ;;  %v15353_v40 = vld [vmem:[%s15419_s30 + $0x2858] ss:$36 sps:$4 sm:$0xff]  }
 0x584   : > { %13187 = vmatprep.subr.bf16.mxu1 %v15306_v55  ;;  %v15355_v55 = vld [vmem:[%s15419_s30 + $0x2618] ss:$36 sps:$4 sm:$0xff]  }
 0x586   : > { %13166 = vmatpush3.bf16.msra.mxu0 %v15307_v13 }
 0x587   : > { %13188 = vmatpush3.bf16.msra.mxu1 %v15308_v23  ;;  %13167 = vmatprep.subr.bf16.mxu0 %v15309_v24 }
 0x588   : > { %13189 = vmatprep.subr.bf16.mxu1 %v15310_v5 }
 0x58a   : > { %13168 = vmatpush3.bf16.msra.mxu0 %v15311_v62 }
 0x58b   : > { %13190 = vmatpush3.bf16.msra.mxu1 %v15312_v58  ;;  %13169 = vmatprep.subr.bf16.mxu0 %v15313_v53  ;;  %v259_v58 = vld [vmem:[#allocation2 + $0x30] sm:$0xff] }
 0x58c   : > { %13191 = vmatprep.subr.bf16.mxu1 %v15314_v54 }
 0x58e   : > { %13170 = vmatpush3.bf16.msra.mxu0 %v15315_v56 }
 0x58f   : > { %13192 = vmatpush3.bf16.msra.mxu1 %v15316_v1  ;;  %13171 = vmatprep.subr.bf16.mxu0 %v15317_v17  ;;  %v260_v17 = vld [vmem:[#allocation2 + $0x38] sm:$0xff] }
 0x590   : > { %13193 = vmatprep.subr.bf16.mxu1 %v15318_v18 }
 0x592   : > { %13172 = vmatpush3.bf16.msra.mxu0 %v15319_v9 }
 0x593   : > { %13194 = vmatpush3.bf16.msra.mxu1 %v15320_v29  ;;  %13173 = vmatprep.subr.bf16.mxu0 %v15321_v2 }
 0x594   : > { %13195 = vmatprep.subr.bf16.mxu1 %v15322_v25 }
 0x596   : > { %13174 = vmatpush3.bf16.msra.mxu0 %v15323_v26 }
 0x597   : > { %13196 = vmatpush3.bf16.msra.mxu1 %v15324_v19  ;;  %13203 = vmatprep.subr.bf16.mxu0 %v15325_v63 }
 0x598   : > { %13225 = vmatprep.subr.bf16.mxu1 %v15326_v0 }
 0x599   : > { %11215 = vmatmul.mubr.bf16.vlgmr.msra.gmra.mrb[92].mxu0 %v15767_v60  ;;  %v15335_v60 = vld [vmem:[%s15419_s30 + $0x24b0] ss:$36 sps:$4 sm:$0xff]  }
 0x59a   : > { %11255 = vmatmul.mubr.bf16.vlgmr.msra.gmra.mrb[92].mxu1 %v15771_v61  ;;  %13204 = vmatpush3.bf16.msra.mxu0 %v15327_v3  ;;  %v15336_v61 = vld [vmem:[%s15419_s30 + $0x2930] ss:$36 sps:$4 sm:$0xff]  }
 0x59b   : > { %13226 = vmatpush3.bf16.msra.mxu1 %v15328_v4  ;;  %13205 = vmatprep.subr.bf16.mxu0 %v15329_v6 }
 0x59c   : > { %13227 = vmatprep.subr.bf16.mxu1 %v15330_v21  ;;  %11294 = vmatprep.mubr.bf16.mxu0 %v15782_v41  ;;  %v15340_v41 = vld [vmem:[%s15419_s30 + $0x2978] ss:$36 sps:$4 sm:$0xff]  }
 0x59d   : > { %11334 = vmatprep.mubr.bf16.mxu1 %v15786_v42  ;;  %v15341_v42 = vld [vmem:[%s15419_s30 + $0x2780] ss:$36 sps:$4 sm:$0xff]  }
 0x59e   : > { %13206 = vmatpush3.bf16.msra.mxu0 %v15331_v11 }
 0x59f   : > { %13228 = vmatpush3.bf16.msra.mxu1 %v15332_v15  ;;  %13207 = vmatprep.subr.bf16.mxu0 %v15333_v12 }
 0x5a0   : > { %13229 = vmatprep.subr.bf16.mxu1 %v15334_v14 }
 0x5a2   : > { %13208 = vmatpush3.bf16.msra.mxu0 %v15335_v60 }
 0x5a3   : > { %13230 = vmatpush3.bf16.msra.mxu1 %v15336_v61  ;;  %13209 = vmatprep.subr.bf16.mxu0 %v15337_v16 }
 0x5a4   : > { %13231 = vmatprep.subr.bf16.mxu1 %v15338_v33 }
 0x5a6   : > { %13210 = vmatpush3.bf16.msra.mxu0 %v15339_v7 }
 0x5a7   : > { %13232 = vmatpush3.bf16.msra.mxu1 %v15340_v41  ;;  %13211 = vmatprep.subr.bf16.mxu0 %v15341_v42 }
 0x5a8   : > { %13233 = vmatprep.subr.bf16.mxu1 %v15342_v8 }
 0x5aa   : > { %13212 = vmatpush3.bf16.msra.mxu0 %v15343_v27 }
 0x5ab   : > { %13234 = vmatpush3.bf16.msra.mxu1 %v15344_v20  ;;  %13213 = vmatprep.subr.bf16.mxu0 %v15345_v31 }
 0x5ac   : > { %13235 = vmatprep.subr.bf16.mxu1 %v15346_v37  ;;  %v10812_v35 = vpop.f32.mrb[72].mxu0 }
 0x5ad   : > { %v10853_v48 = vpop.f32.mrb[72].mxu1  ;;  %v10813_v52 = vadd.f32 %v10812_v35, %v17066_v38  ;;  %v10814_v32 = vpop.f32.mrb[73].mxu0  ;;  %v15354_v38 = vld [vmem:[%s15419_s30 + $0x2cd8] ss:$36 sps:$4 sm:$0xff]  }
 0x5ae   : > { %v10855_v50 = vpop.f32.mrb[73].mxu1  ;;  %v10815_v44 = vadd.f32 %v10814_v32, %v17070_v30  ;;  %v10816_v34 = vpop.f32.mrb[74].mxu0  ;;  %13214 = vmatpush3.bf16.msra.mxu0 %v15347_v22  ;;  %v15356_v30 = vld [vmem:[%s15419_s30 + $0x2a98] ss:$36 sps:$4 sm:$0xff]  }
 0x5af   : > { %v10857_v36 = vpop.f32.mrb[74].mxu1  ;;  %13236 = vmatpush3.bf16.msra.mxu1 %v15348_v28  ;;  %v10854_v45 = vadd.f32 %v10853_v48, %v10813_v52  ;;  %v10817_v46 = vpop.f32.mrb[75].mxu0  ;;  %13215 = vmatprep.subr.bf16.mxu0 %v15349_v57 }
 0x5b0   : > { %v10858_v39 = vpop.f32.mrb[75].mxu1  ;;  %13237 = vmatprep.subr.bf16.mxu1 %v15350_v10  ;;  %v10856_v51 = vadd.f32 %v10855_v50, %v10815_v44 }
 0x5b2   : > { %13216 = vmatpush3.bf16.msra.mxu0 %v15351_v59 }
 0x5b3   : > { %13238 = vmatpush3.bf16.msra.mxu1 %v15352_v43  ;;  %13217 = vmatprep.subr.bf16.mxu0 %v15353_v40 }
 0x5b4   : > { %13239 = vmatprep.subr.bf16.mxu1 %v15354_v38 }
 0x5b6   : > { %13218 = vmatpush3.bf16.msra.mxu0 %v15355_v55 }
 0x5b7   : > { %13240 = vmatpush3.bf16.msra.mxu1 %v15356_v30 }
 0x5b9   : > { %11295 = vmatmul.mubr.bf16.vlgmr.msra.gmra.mrb[96].mxu0 %v15860_v47 }
 0x5ba   : > { %11335 = vmatmul.mubr.bf16.vlgmr.msra.gmra.mrb[96].mxu1 %v15864_v49 }
 0x5ec   : > { %v10894_v13 = vpop.f32.mrb[76].mxu0 }
 0x5ed   : > { %v10935_v23 = vpop.f32.mrb[76].mxu1  ;;  %v10895_v24 = vadd.f32 %v10894_v13, %v10854_v45  ;;  %v10896_v5 = vpop.f32.mrb[77].mxu0 }
 0x5ee   : > { %v10937_v62 = vpop.f32.mrb[77].mxu1  ;;  %v10897_v53 = vadd.f32 %v10896_v5, %v10856_v51  ;;  %v10898_v54 = vpop.f32.mrb[78].mxu0 }
 0x5ef   : > { %v10939_v56 = vpop.f32.mrb[78].mxu1  ;;  %v10936_v1 = vadd.f32 %v10935_v23, %v10895_v24  ;;  %v10899_v18 = vpop.f32.mrb[79].mxu0 }
 0x5f0   : > { %v10940_v9 = vpop.f32.mrb[79].mxu1  ;;  %v10938_v29 = vadd.f32 %v10937_v62, %v10897_v53 }
 0x5f1   : > { %v11348_v2 = vadd.f32 %v10936_v1, %v259_v58 }
 0x5f2   : > { %v11349_v25 = vadd.f32 %v10938_v29, %v260_v17  ;;  %v261_v17 = vld [vmem:[#allocation2 + $0x40] sm:$0xff]  ;;  %v11378_v29 = vlaneseq (!%p13022_p6) }
 0x5f3   : > { %11357 = vst [vmem:[#allocation2 + $0x30] sm:$0xff] %v11348_v2 }
 0x5f4   : > { %11358 = vst [vmem:[#allocation2 + $0x38] sm:$0xff] %v11349_v25  ;;  %v17152_v2 = vshrl.u32 (!%p13022_p6), %v11378_v29, 7  ;;  %v11374_v25 = vld [vmem:[%s17183_s2] sm:$0xff] (!%p13022_p6) }
 0x60c   : > { %v13043_v47 = vpop.f32.mrb[80].mxu0 }
 0x60d   : > { %v13065_v49 = vpop.f32.mrb[80].mxu1  ;;  %v13044_v26 = vpop.f32.mrb[81].mxu0 }
 0x60e   : > { %v13066_v19 = vpop.f32.mrb[81].mxu1  ;;  %v13045_v63 = vadd.f32 %v13044_v26, %v13043_v47  ;;  %v13046_v3 = vpop.f32.mrb[82].mxu0  ;;  %v11365_v47 = vld [vmem:[#allocation2] sm:$0xff] (!%p13022_p6)  ;;  %v11384_v26 = vsub.s32 (!%p13022_p6), 1, %v17152_v2 }
 0x60f   : > { %v13067_v0 = vadd.f32 %v13066_v19, %v13065_v49  ;;  %v13068_v4 = vpop.f32.mrb[82].mxu1  ;;  %v13047_v6 = vpop.f32.mrb[83].mxu0  ;;  %v11380_v49 = vsub.s32 (!%p13022_p6), 0, %v17152_v2  ;;  %v11388_v19 = vsub.s32 (!%p13022_p6), 2, %v17152_v2  ;;  %v11367_v3 = vld [vmem:[#allocation2 + $0x10] sm:$0xff] (!%p13022_p6) }
 0x610   : > { %v13069_v21 = vpop.f32.mrb[83].mxu1  ;;  %v11368_v4 = vld [vmem:[#allocation2 + $0x18] sm:$0xff] (!%p13022_p6)  ;;  %v11396_v6 = vsub.s32 (!%p13022_p6), 4, %v17152_v2 }
 0x611   : > { %v11017_v11 = vadd.f32 %v13067_v0, %v13045_v63  ;;  %v11392_v63 = vsub.s32 (!%p13022_p6), 3, %v17152_v2  ;;  %v11366_v0 = vld [vmem:[#allocation2 + $0x8] sm:$0xff] (!%p13022_p6)  ;;  %v11400_v21 = vsub.s32 (!%p13022_p6), 5, %v17152_v2 }
 0x62c   : > { %v13087_v15 = vpop.f32.mrb[84].mxu0 }
 0x62d   : > { %v13109_v12 = vpop.f32.mrb[84].mxu1  ;;  %v13088_v14 = vpop.f32.mrb[85].mxu0 }
 0x62e   : > { %v13110_v60 = vpop.f32.mrb[85].mxu1  ;;  %v13089_v61 = vadd.f32 %v13088_v14, %v13087_v15  ;;  %v13090_v33 = vpop.f32.mrb[86].mxu0  ;;  %v11381_v15 = vrot.slane (!%p13022_p6), %v11374_v25, %v11380_v49  ;;  %v11389_v14 = vrot.slane (!%p13022_p6), %v11374_v25, %v11388_v19 }
 0x62f   : > { %v13111_v16 = vadd.f32 %v13110_v60, %v13109_v12  ;;  %v13112_v7 = vpop.f32.mrb[86].mxu1  ;;  %v13091_v41 = vpop.f32.mrb[87].mxu0  ;;  %v11385_v12 = vrot.slane (!%p13022_p6), %v11374_v25, %v11384_v26  ;;  %v11393_v60 = vrot.slane (!%p13022_p6), %v11374_v25, %v11392_v63  ;;  %v11401_v33 = vrot.slane (!%p13022_p6), %v11374_v25, %v11400_v21 }
 0x630   : > { %v13113_v42 = vpop.f32.mrb[87].mxu1  ;;  %v11057_v8 = vadd.f32 %v13089_v61, %v11017_v11  ;;  %v11404_v11 = vsub.s32 (!%p13022_p6), 6, %v17152_v2  ;;  %v11369_v61 = vld [vmem:[#allocation2 + $0x20] sm:$0xff] (!%p13022_p6)  ;;  %v11408_v7 = vsub.s32 (!%p13022_p6), 7, %v17152_v2  ;;  %v11423_v41 = vadd.f32 (!%p13022_p6), %v11381_v15, %v11365_v47 }
 0x631   : > { %v11424_v42 = vadd.f32 (!%p13022_p6), %v11385_v12, %v11366_v0 }
 0x632   : > { %v11097_v27 = vadd.f32 %v13111_v16, %v11057_v8  ;;  %v11397_v16 = vrot.slane (!%p13022_p6), %v11374_v25, %v11396_v6  ;;  %v11425_v8 = vadd.f32 (!%p13022_p6), %v11389_v14, %v11367_v3 }
 0x64c   : > { %v13131_v20 = vpop.f32.mrb[88].mxu0 }
 0x64d   : > { %v13153_v31 = vpop.f32.mrb[88].mxu1  ;;  %v13132_v37 = vpop.f32.mrb[89].mxu0 }
 0x64e   : > { %v13154_v22 = vpop.f32.mrb[89].mxu1  ;;  %v13133_v28 = vadd.f32 %v13132_v37, %v13131_v20  ;;  %v13134_v10 = vpop.f32.mrb[90].mxu0  ;;  %v11370_v20 = vld [vmem:[#allocation2 + $0x28] sm:$0xff] (!%p13022_p6)  ;;  %v11441_v37 = vld [vmem:[%s17184_s3] sm:$0xff] (!%p13022_p6) }
 0x64f   : > { %v13155_v57 = vadd.f32 %v13154_v22, %v13153_v31  ;;  %v13156_v35 = vpop.f32.mrb[90].mxu1  ;;  %v13135_v48 = vpop.f32.mrb[91].mxu0  ;;  %v11405_v31 = vrot.slane (!%p13022_p6), %v11374_v25, %v11404_v11  ;;  %v11371_v22 = vld [vmem:[#allocation2 + $0x30] sm:$0xff] (!%p13022_p6)  ;;  %v11433_v10 = vmax.f32 (!%p13022_p6), %v11424_v42, 0.0 }
 0x650   : > { %v13157_v52 = vpop.f32.mrb[91].mxu1  ;;  %v11137_v32 = vadd.f32 %v13133_v28, %v11097_v27  ;;  %v11426_v27 = vadd.f32 (!%p13022_p6), %v11393_v60, %v11368_v4  ;;  %v11427_v28 = vadd.f32 (!%p13022_p6), %v11397_v16, %v11369_v61  ;;  %v11409_v35 = vrot.slane (!%p13022_p6), %v11374_v25, %v11408_v7 }
 0x651   : > { %v11434_v48 = vmax.f32 (!%p13022_p6), %v11425_v8, 0.0  ;;  %v11372_v52 = vld [vmem:[#allocation2 + $0x38] sm:$0xff] (!%p13022_p6) }
 0x652   : > { %v11177_v50 = vadd.f32 %v13155_v57, %v11137_v32  ;;  %v11432_v57 = vmax.f32 (!%p13022_p6), %v11423_v41, 0.0 }
 0x66c   : > { %v13175_v44 = vpop.f32.mrb[92].mxu0 }
 0x66d   : > { %v13197_v34 = vpop.f32.mrb[92].mxu1  ;;  %v13176_v36 = vpop.f32.mrb[93].mxu0 }
 0x66e   : > { %v13198_v59 = vpop.f32.mrb[93].mxu1  ;;  %v13177_v43 = vadd.f32 %v13176_v36, %v13175_v44  ;;  %v13178_v46 = vpop.f32.mrb[94].mxu0  ;;  %v11428_v44 = vadd.f32 (!%p13022_p6), %v11401_v33, %v11370_v20  ;;  %v11448_v36 = vrot.slane (!%p13022_p6), %v11441_v37, %v11380_v49 }
 0x66f   : > { %v13199_v45 = vadd.f32 %v13198_v59, %v13197_v34  ;;  %v13200_v39 = vpop.f32.mrb[94].mxu1  ;;  %v13179_v40 = vpop.f32.mrb[95].mxu0  ;;  %v11435_v34 = vmax.f32 (!%p13022_p6), %v11426_v27, 0.0  ;;  %v11452_v59 = vrot.slane (!%p13022_p6), %v11441_v37, %v11384_v26  ;;  %v11460_v46 = vrot.slane (!%p13022_p6), %v11441_v37, %v11392_v63 }
 0x670   : > { %v13201_v38 = vpop.f32.mrb[95].mxu1  ;;  %v11217_v51 = vadd.f32 %v13177_v43, %v11177_v50  ;;  %v13023_v50 = vld [vmem:[%s17183_s2 + $0x8] ss:$0 sm:$0xff] (!%p13022_p6)  ;;  %v11429_v43 = vadd.f32 (!%p13022_p6), %v11405_v31, %v11371_v22  ;;  %v11436_v39 = vmax.f32 (!%p13022_p6), %v11427_v28, 0.0  ;;  %v11464_v40 = vrot.slane (!%p13022_p6), %v11441_v37, %v11396_v6 }
 0x671   : > { %v11490_v38 = vmul.f32 (!%p13022_p6), %v11448_v36, %v11432_v57  ;;  %v11511_v6 = vstv (!%p13022_p6), %s11510_s14 }
 0x672   : > { %v11257_v55 = vadd.f32 %v13199_v45, %v11217_v51  ;;  %v11456_v45 = vrot.slane (!%p13022_p6), %v11441_v37, %v11388_v19  ;;  %v11491_v51 = vmul.f32 (!%p13022_p6), %v11452_v59, %v11433_v10 }
 0x68c   : > { %v13219_v30 = vpop.f32.mrb[96].mxu0 }
 0x68d   : > { %v13241_v13 = vpop.f32.mrb[96].mxu1  ;;  %v13220_v23 = vpop.f32.mrb[97].mxu0 }
 0x68e   : > { %v13242_v24 = vpop.f32.mrb[97].mxu1  ;;  %v13221_v5 = vadd.f32 %v13220_v23, %v13219_v30  ;;  %v13222_v58 = vpop.f32.mrb[98].mxu0  ;;  %v11437_v23 = vmax.f32 (!%p13022_p6), %v11428_v44, 0.0 }
 0x68f   : > { %v13243_v62 = vadd.f32 %v13242_v24, %v13241_v13  ;;  %v13244_v53 = vpop.f32.mrb[98].mxu1  ;;  %v13223_v54 = vpop.f32.mrb[99].mxu0  ;;  %v11492_v13 = vmul.f32 (!%p13022_p6), %v11456_v45, %v11434_v48  ;;  %v11468_v24 = vrot.slane (!%p13022_p6), %v11441_v37, %v11400_v21  ;;  %v11438_v58 = vmax.f32 (!%p13022_p6), %v11429_v43, 0.0 }
 0x690   : > { %v13245_v56 = vpop.f32.mrb[99].mxu1  ;;  %v11297_v1 = vadd.f32 %v13221_v5, %v11257_v55  ;;  %11364 = sbr.rel (%p13022_p6) target bundleno = 1848 (0x738), region = 48  ;;  %v11430_v55 = vadd.f32 (!%p13022_p6), %v11409_v35, %v11372_v52  ;;  %v11493_v5 = vmul.f32 (!%p13022_p6), %v11460_v46, %v11435_v34  ;;  %v11472_v53 = vrot.slane (!%p13022_p6), %v11441_v37, %v11404_v11 }
 0x691   : > { %v11494_v54 = vmul.f32 (!%p13022_p6), %v11464_v40, %v11436_v39  ;;  %v11495_v29 = vmul.f32 (!%p13022_p6), %v11468_v24, %v11437_v23 }
 0x692   : > { %v11337_v18 = vadd.f32 %v13243_v62, %v11297_v1  ;;  %v11499_v62 = vadd.f32 (!%p13022_p6), %v11491_v51, %v11490_v38  ;;  %v11496_v25 = vmul.f32 (!%p13022_p6), %v11472_v53, %v11438_v58 }
 0x694   : > { %v11350_v9 = vadd.f32 %v11337_v18, %v261_v17  ;;  %v11500_v56 = vadd.f32 (!%p13022_p6), %v11499_v62, %v11492_v13  ;;  %v11439_v17 = vmax.f32 (!%p13022_p6), %v11430_v55, 0.0  ;;  %v13024_v18 = vld [vmem:[%s17184_s3 + $0x8] ss:$0 sm:$0xff] (!%p13022_p6) }
 0x696   : > { %11360 = vst.msk [vmem:[#allocation2 + $0x40] sm:$0xff] %vm11359_vm1, %v11350_v9  ;;  %v11476_v9 = vrot.slane (!%p13022_p6), %v11441_v37, %v11408_v7  ;;  %v11501_v2 = vadd.f32 (!%p13022_p6), %v11500_v56, %v11493_v5 }
 0x698   : > { %v11502_v47 = vadd.f32 %v11501_v2, %v11494_v54  ;;  %v11497_v26 = vmul.f32 %v11476_v9, %v11439_v17 }
 0x69a   : > { %v11503_v19 = vadd.f32 %v11502_v47, %v11495_v29 }
 0x69c   : > { %v11504_v63 = vadd.f32 %v11503_v19, %v11496_v25 }
 0x69d   : > { %v11373_v32 = vld [vmem:[#allocation2 + $0x40] sm:$0xff] }
 0x69e   : > { %v11431_v30 = vadd.f32 %v13023_v50, %v11373_v32  ;;  %v11505_v3 = vadd.f32 %v11504_v63, %v11497_v26 }
 0x6a0   : > { %v11440_v1 = vmax.f32 %v11431_v30, 0.0 }
 0x6a2   : > { %v11498_v49 = vmul.f32 %v13024_v18, %v11440_v1 }
 0x6a4   : > { %v11506_v0 = vsel %vm11359_vm1, %v11498_v49, 0.0 }
 0x6a5   : > { %v11507_v4 = vadd.f32 %v11506_v0, %v11505_v3 }
 0x6a7   : > { %11508 = vadd.xlane.f32.xlu0 %v11507_v4 }
 0x734   : > { %v11509_v21 = vpop.xlane.xlu0 %11508 }
 0x735   : > { %v11512_v11 = vadd.f32 %v11511_v6, %v11509_v21 }
 0x737   : > { %11514 = vst.msk [vmem:[%s17186_s5] sm:$0xff] %vm11513_vm2, %v11512_v11 }
 0x738 PF: > { %s16_s20 = sadd.s32 1, %s15363_s20  }
 0x739   : > { %p13_p7 = scmp.ge.s32.totalorder %s16_s20, 4  }
 0x73b   :  { %15 = sbr.rel (!%p13_p7) target bundleno = 2 (0x2), region = 77 }

</bundles_post_ra>
